<compile_context>
chip_gen: v5e
topology: v5e:2x2
jax: 0.10.0
libtpu: 0.0.40
codegen_flags: <defaults>
</compile_context>

<pallas_src>
import functools

import jax
import jax.numpy as jnp
from jax.experimental import pallas as pl
from jax.experimental.pallas import tpu as pltpu


# ----------------------------------------------------------------------------
# In-kernel helpers (f32 elementwise math)
# ----------------------------------------------------------------------------
def _silu(x):
    return x * jax.nn.sigmoid(x)


def _ln(x, g, b, eps=1e-6):
    mu = jnp.mean(x, axis=-1, keepdims=True)
    var = jnp.mean((x - mu) ** 2, axis=-1, keepdims=True)
    return (x - mu) * jax.lax.rsqrt(var + eps) * g + b


def _vmem_limit_bytes():
    # Parameterize by generation (v7x: 64 MiB physical vs 128 MiB on v5e/v6e).
    try:
        cap = int(pltpu.get_tpu_info().vmem_capacity_bytes)
        return max(16 * 1024 * 1024, min(cap // 2, 64 * 1024 * 1024))
    except Exception:
        return 32 * 1024 * 1024


_WEIGHT_ORDER = (
    "stem_w", "stem_b", "head_w", "head_b",
    "patch_w", "patch_bias_pos",
    "ln1_g", "ln1_b",
    "wqkv", "bqkv", "wo", "bo",
    "ln2_g", "ln2_b",
    "mlp_w1", "mlp_b1", "mlp_w2", "mlp_b2",
    "lnf_g", "lnf_b",
    "fc_w_cnn", "fc_w_tr", "fc_b",
)


# ----------------------------------------------------------------------------
# The single fused kernel: CNN branch + ViT branch + transformer block + fc
# ----------------------------------------------------------------------------
def _fused_kernel(cnn_patches_ref, vit_patches_ref,
                  stem_w_ref, stem_b_ref, head_w_ref, head_b_ref,
                  patch_w_ref, patch_bp_ref,
                  ln1_g_ref, ln1_b_ref,
                  wqkv_ref, bqkv_ref, wo_ref, bo_ref,
                  ln2_g_ref, ln2_b_ref,
                  w1_ref, b1_ref, w2_ref, b2_ref,
                  lnf_g_ref, lnf_b_ref,
                  fcw_cnn_ref, fcw_tr_ref, fc_b_ref,
                  out_ref, *, num_heads, head_dim, scale, inv_hw):
    d_model = num_heads * head_dim

    # ---- CNN branch: stem matmul + SiLU + MXU global-avg-pool + head matmul + SiLU ----
    cp = cnn_patches_ref[0].astype(jnp.bfloat16)                            # (HW, 32)
    h = jnp.dot(cp, stem_w_ref[...], preferred_element_type=jnp.float32)    # (HW, 32)
    h = _silu(h + stem_b_ref[...])
    hw = h.shape[0]
    ones = jnp.full((1, hw), inv_hw, jnp.bfloat16)                          # pooling on the MXU
    pooled = jnp.dot(ones, h.astype(jnp.bfloat16),
                     preferred_element_type=jnp.float32)                    # (1, 32)
    cnn_feat = _silu(jnp.dot(pooled.astype(jnp.bfloat16), head_w_ref[...],
                             preferred_element_type=jnp.float32)
                     + head_b_ref[...])                                     # (1, 1280)

    # ---- ViT branch: patch embed; row 0 of the patch slab is zero, so the per-token bias
    #      (CLS token + pos[0] in row 0, pos[1:] + patch bias elsewhere) yields the full
    #      (N, D) token block in one matmul — no concat anywhere. ----
    vp = vit_patches_ref[0].astype(jnp.bfloat16)                            # (N, 768)
    x = jnp.dot(vp, patch_w_ref[...],
                preferred_element_type=jnp.float32) + patch_bp_ref[...]     # (N, 384)

    # ---- pre-LN attention: one fused lane-dense QKV matmul ----
    h1 = _ln(x, ln1_g_ref[...], ln1_b_ref[...]).astype(jnp.bfloat16)
    qkv = jnp.dot(h1, wqkv_ref[...],
                  preferred_element_type=jnp.float32) + bqkv_ref[...]       # (N, 1152)
    q = qkv[:, :d_model]
    k = qkv[:, d_model:2 * d_model]
    v = qkv[:, 2 * d_model:]
    head_outs = []
    for i in range(num_heads):                                              # unrolled (NH=6)
        lo, hi = i * head_dim, (i + 1) * head_dim
        qi = q[:, lo:hi].astype(jnp.bfloat16)
        ki = k[:, lo:hi].astype(jnp.bfloat16)
        vi = v[:, lo:hi].astype(jnp.bfloat16)
        s = jax.lax.dot_general(qi, ki, (((1,), (1,)), ((), ())),
                                preferred_element_type=jnp.float32) * scale  # (N, N)
        s = s - jnp.max(s, axis=-1, keepdims=True)
        p = jnp.exp(s)
        p = p * pl.reciprocal(jnp.sum(p, axis=-1, keepdims=True), approx=True)
        head_outs.append(jnp.dot(p.astype(jnp.bfloat16), vi,
                                 preferred_element_type=jnp.float32))        # (N, hd)
    attn = jnp.concatenate(head_outs, axis=-1).astype(jnp.bfloat16)          # (N, 384)
    x = x + jnp.dot(attn, wo_ref[...],
                    preferred_element_type=jnp.float32) + bo_ref[...]        # one fused out-proj

    # ---- pre-LN MLP ----
    h2 = _ln(x, ln2_g_ref[...], ln2_b_ref[...]).astype(jnp.bfloat16)
    h2 = jnp.dot(h2, w1_ref[...], preferred_element_type=jnp.float32) + b1_ref[...]
    h2 = jax.nn.gelu(h2)  # TODO(synk): tanh-approx GELU; timm DeiT uses exact erf (~1e-3 dev)
    h2 = jnp.dot(h2.astype(jnp.bfloat16), w2_ref[...],
                 preferred_element_type=jnp.float32) + b2_ref[...]
    x = x + h2

    # ---- CLS sliced BEFORE the final LayerNorm (only 1 token normalized) ----
    cls = _ln(x[0:1, :], lnf_g_ref[...], lnf_b_ref[...])                     # (1, 384)

    # ---- fused fc: logits = cnn_feat @ W_cnn + cls @ W_tr + b  (no 1664-wide concat) ----
    logits = jnp.dot(cnn_feat.astype(jnp.bfloat16), fcw_cnn_ref[...],
                     preferred_element_type=jnp.float32)
    logits = logits + jnp.dot(cls.astype(jnp.bfloat16), fcw_tr_ref[...],
                              preferred_element_type=jnp.float32)
    out_ref[0] = logits + fc_b_ref[...]                                      # (1, 128) lane-dense


def hybrid_forward(cnn_patches, vit_patches, p, *, num_heads, head_dim):
    B = cnn_patches.shape[0]
    CPAD = p["fc_w_cnn"].shape[1]
    scale = 1.0 / (head_dim ** 0.5)
    inv_hw = 1.0 / cnn_patches.shape[1]

    batch3 = lambda a: pl.BlockSpec((1,) + a.shape[1:], lambda b: (b, 0, 0))
    const2 = lambda a: pl.BlockSpec(a.shape, lambda b: (0, 0))
    weights = [p[k] for k in _WEIGHT_ORDER]

    return pl.pallas_call(
        functools.partial(_fused_kernel, num_heads=num_heads, head_dim=head_dim,
                          scale=scale, inv_hw=inv_hw),
        out_shape=jax.ShapeDtypeStruct((B, 1, CPAD), jnp.float32),
        grid_spec=pltpu.PrefetchScalarGridSpec(
            num_scalar_prefetch=0,
            grid=(B,),
            in_specs=[batch3(cnn_patches), batch3(vit_patches)]
                     + [const2(w) for w in weights],
            out_specs=pl.BlockSpec((1, 1, CPAD), lambda b: (b, 0, 0)),
        ),
        compiler_params=pltpu.CompilerParams(
            dimension_semantics=("parallel",),          # 2-way TC split on v7x
            vmem_limit_bytes=_vmem_limit_bytes(),
        ),
    )(cnn_patches, vit_patches, *weights)


# ----------------------------------------------------------------------------
# Model wrapper
# ----------------------------------------------------------------------------
class HybridFishClassifierPallas:
    CNN_OUT = 1280          # efficientnet_b0 num_features
    TRANS_OUT = 384         # deit_small embed dim
    NUM_HEADS = 6
    PATCH = 16
    STEM_CH = 32
    STEM_KIN = 32           # 3*3*3 = 27 padded to 32
    MLP_HIDDEN = 1536
    LANE = 128

    def __init__(self, num_classes=13, img_size=32, key=jax.random.PRNGKey(42)):
        assert img_size % self.PATCH == 0 and img_size % 2 == 0
        self.num_classes = num_classes
        self.img_size = img_size
        D, NH = self.TRANS_OUT, self.NUM_HEADS
        hd = D // NH
        self.head_dim = hd
        np_ = (img_size // self.PATCH) ** 2
        self.num_tokens = np_ + 1
        cpad = ((num_classes + self.LANE - 1) // self.LANE) * self.LANE
        self.cpad = cpad

        ks = list(jax.random.split(key, 12))
        nrm = lambda k, s: jax.random.normal(k, s, jnp.float32) * 0.02
        bf = lambda a: a.astype(jnp.bfloat16)

        stem_w = jnp.pad(nrm(ks[0], (27, self.STEM_CH)),
                         ((0, self.STEM_KIN - 27), (0, 0)))          # K padded 27 -> 32
        wq, wk, wv, wo = (nrm(ks[i], (D, D)) for i in (5, 6, 7, 8))
        cls = nrm(ks[3], (1, D))
        pos = nrm(ks[4], (np_ + 1, D))
        patch_b = jnp.zeros((1, D), jnp.float32)
        # Per-token bias: row 0 carries (cls + pos[0]); rows 1.. carry pos + patch bias.
        patch_bias_pos = jnp.concatenate([cls + pos[:1], pos[1:] + patch_b], axis=0)
        fc_w = nrm(ks[11], (self.CNN_OUT + D, num_classes))
        fc_b = jnp.zeros((num_classes,), jnp.float32)

        self.p = {
            # CNN stand-in (bf16 weights, f32 biases pre-shaped (1, N))
            "stem_w": bf(stem_w),
            "stem_b": jnp.zeros((1, self.STEM_CH), jnp.float32),
            "head_w": bf(nrm(ks[1], (self.STEM_CH, self.CNN_OUT))),
            "head_b": jnp.zeros((1, self.CNN_OUT), jnp.float32),
            # transformer stand-in
            "patch_w": bf(nrm(ks[2], (3 * self.PATCH * self.PATCH, D))),
            "patch_bias_pos": patch_bias_pos,                          # (np_+1, D)
            "ln1_g": jnp.ones((1, D), jnp.float32), "ln1_b": jnp.zeros((1, D), jnp.float32),
            "wqkv": bf(jnp.concatenate([wq, wk, wv], axis=1)),         # fused (D, 3D) QKV
            "bqkv": jnp.zeros((1, 3 * D), jnp.float32),
            "wo": bf(wo), "bo": jnp.zeros((1, D), jnp.float32),
            "ln2_g": jnp.ones((1, D), jnp.float32), "ln2_b": jnp.zeros((1, D), jnp.float32),
            "mlp_w1": bf(nrm(ks[9], (D, self.MLP_HIDDEN))),
            "mlp_b1": jnp.zeros((1, self.MLP_HIDDEN), jnp.float32),
            "mlp_w2": bf(nrm(ks[10], (self.MLP_HIDDEN, D))),
            "mlp_b2": jnp.zeros((1, D), jnp.float32),
            "lnf_g": jnp.ones((1, D), jnp.float32), "lnf_b": jnp.zeros((1, D), jnp.float32),
            # fc split into CNN/transformer halves, padded to 128 lanes (sliced in wrapper)
            "fc_w_cnn": bf(jnp.pad(fc_w[:self.CNN_OUT], ((0, 0), (0, cpad - num_classes)))),
            "fc_w_tr": bf(jnp.pad(fc_w[self.CNN_OUT:], ((0, 0), (0, cpad - num_classes)))),
            "fc_b": jnp.pad(fc_b, (0, cpad - num_classes)).reshape(1, cpad),
        }

    # ---- XLA glue: im2col for the 3x3/s2 conv stem (tiny at this resolution) ----------
    def _extract_cnn_patches(self, x):
        B, H, W, C = x.shape
        xp = jnp.pad(x, ((0, 0), (1, 1), (1, 1), (0, 0)))
        Ho, Wo = H // 2, W // 2
        cols = []
        for di in range(3):
            for dj in range(3):
                cols.append(xp[:, di: di + Ho * 2: 2, dj: dj + Wo * 2: 2, :])
        patches = jnp.concatenate(cols, axis=-1).reshape(B, Ho * Wo, 9 * C)
        # K padded 27 -> 32 (zero cols match zero stem_w rows)
        return jnp.pad(patches, ((0, 0), (0, 0), (0, self.STEM_KIN - 9 * C)))

    # ---- XLA glue: 16x16 ViT patches, with a leading zero row for the CLS slot --------
    def _extract_vit_patches(self, x):
        B, H, W, C = x.shape
        P = self.PATCH
        gh, gw = H // P, W // P
        patches = x.reshape(B, gh, P, gw, P, C).transpose(0, 1, 3, 2, 4, 5)
        patches = patches.reshape(B, gh * gw, P * P * C)
        return jnp.pad(patches, ((0, 0), (1, 0), (0, 0)))          # row 0 = CLS slot (zeros)

    # ---- forward (mirrors the PyTorch module) ------------------------------------------
    def __call__(self, x_nchw):
        x = jnp.transpose(x_nchw, (0, 2, 3, 1)).astype(jnp.float32)
        cnn_patches = self._extract_cnn_patches(x)                  # (B, HW, 32)
        vit_patches = self._extract_vit_patches(x)                  # (B, N, 768)
        logits = hybrid_forward(cnn_patches, vit_patches, self.p,
                                num_heads=self.NUM_HEADS, head_dim=self.head_dim)
        return logits[:, 0, :self.num_classes]                      # (B, 13)


if __name__ == "__main__":
    key = jax.random.PRNGKey(0)
    x = jax.random.normal(key, (2, 3, 32, 32), jnp.float32)         # NCHW like PyTorch
    model = HybridFishClassifierPallas(num_classes=13, img_size=32)
    fwd = jax.jit(model.__call__)
    out = fwd(x)
    jax.block_until_ready(out)
    assert out.shape == (2, 13) and out.dtype == jnp.float32
    print("KERNEL_OK")
</pallas_src>

<mosaic_0001>
module attributes {stable_mosaic.version = 11 : i64} {
  func.func @_fused_kernel(%arg0: i32, %arg1: memref<1x256x32xf32, #tpu.memory_space<vmem>>, %arg2: memref<1x5x768xf32, #tpu.memory_space<vmem>>, %arg3: memref<32x32xbf16, #tpu.memory_space<vmem>>, %arg4: memref<1x32xf32, #tpu.memory_space<vmem>>, %arg5: memref<32x1280xbf16, #tpu.memory_space<vmem>>, %arg6: memref<1x1280xf32, #tpu.memory_space<vmem>>, %arg7: memref<768x384xbf16, #tpu.memory_space<vmem>>, %arg8: memref<5x384xf32, #tpu.memory_space<vmem>>, %arg9: memref<1x384xf32, #tpu.memory_space<vmem>>, %arg10: memref<1x384xf32, #tpu.memory_space<vmem>>, %arg11: memref<384x1152xbf16, #tpu.memory_space<vmem>>, %arg12: memref<1x1152xf32, #tpu.memory_space<vmem>>, %arg13: memref<384x384xbf16, #tpu.memory_space<vmem>>, %arg14: memref<1x384xf32, #tpu.memory_space<vmem>>, %arg15: memref<1x384xf32, #tpu.memory_space<vmem>>, %arg16: memref<1x384xf32, #tpu.memory_space<vmem>>, %arg17: memref<384x1536xbf16, #tpu.memory_space<vmem>>, %arg18: memref<1x1536xf32, #tpu.memory_space<vmem>>, %arg19: memref<1536x384xbf16, #tpu.memory_space<vmem>>, %arg20: memref<1x384xf32, #tpu.memory_space<vmem>>, %arg21: memref<1x384xf32, #tpu.memory_space<vmem>>, %arg22: memref<1x384xf32, #tpu.memory_space<vmem>>, %arg23: memref<1280x128xbf16, #tpu.memory_space<vmem>>, %arg24: memref<384x128xbf16, #tpu.memory_space<vmem>>, %arg25: memref<1x128xf32, #tpu.memory_space<vmem>>, %arg26: memref<1x1x128xf32, #tpu.memory_space<vmem>>) attributes {dimension_semantics = [#tpu.dimension_semantics<parallel>], iteration_bounds = array<i64: 2>, scalar_prefetch = 0 : i64, scratch_operands = 0 : i64, tpu.core_type = #tpu.core_type<tc>, window_params = [{transform_indices = @transform_0, window_bounds = array<i64: 1, 256, 32>}, {transform_indices = @transform_1, window_bounds = array<i64: 1, 5, 768>}, {pipeline_mode = #tpu.pipeline_mode<synchronous>, transform_indices = @transform_2, window_bounds = array<i64: 32, 32>}, {pipeline_mode = #tpu.pipeline_mode<synchronous>, transform_indices = @transform_3, window_bounds = array<i64: 1, 32>}, {pipeline_mode = #tpu.pipeline_mode<synchronous>, transform_indices = @transform_4, window_bounds = array<i64: 32, 1280>}, {pipeline_mode = #tpu.pipeline_mode<synchronous>, transform_indices = @transform_5, window_bounds = array<i64: 1, 1280>}, {pipeline_mode = #tpu.pipeline_mode<synchronous>, transform_indices = @transform_6, window_bounds = array<i64: 768, 384>}, {pipeline_mode = #tpu.pipeline_mode<synchronous>, transform_indices = @transform_7, window_bounds = array<i64: 5, 384>}, {pipeline_mode = #tpu.pipeline_mode<synchronous>, transform_indices = @transform_8, window_bounds = array<i64: 1, 384>}, {pipeline_mode = #tpu.pipeline_mode<synchronous>, transform_indices = @transform_9, window_bounds = array<i64: 1, 384>}, {pipeline_mode = #tpu.pipeline_mode<synchronous>, transform_indices = @transform_10, window_bounds = array<i64: 384, 1152>}, {pipeline_mode = #tpu.pipeline_mode<synchronous>, transform_indices = @transform_11, window_bounds = array<i64: 1, 1152>}, {pipeline_mode = #tpu.pipeline_mode<synchronous>, transform_indices = @transform_12, window_bounds = array<i64: 384, 384>}, {pipeline_mode = #tpu.pipeline_mode<synchronous>, transform_indices = @transform_13, window_bounds = array<i64: 1, 384>}, {pipeline_mode = #tpu.pipeline_mode<synchronous>, transform_indices = @transform_14, window_bounds = array<i64: 1, 384>}, {pipeline_mode = #tpu.pipeline_mode<synchronous>, transform_indices = @transform_15, window_bounds = array<i64: 1, 384>}, {pipeline_mode = #tpu.pipeline_mode<synchronous>, transform_indices = @transform_16, window_bounds = array<i64: 384, 1536>}, {pipeline_mode = #tpu.pipeline_mode<synchronous>, transform_indices = @transform_17, window_bounds = array<i64: 1, 1536>}, {pipeline_mode = #tpu.pipeline_mode<synchronous>, transform_indices = @transform_18, window_bounds = array<i64: 1536, 384>}, {pipeline_mode = #tpu.pipeline_mode<synchronous>, transform_indices = @transform_19, window_bounds = array<i64: 1, 384>}, {pipeline_mode = #tpu.pipeline_mode<synchronous>, transform_indices = @transform_20, window_bounds = array<i64: 1, 384>}, {pipeline_mode = #tpu.pipeline_mode<synchronous>, transform_indices = @transform_21, window_bounds = array<i64: 1, 384>}, {pipeline_mode = #tpu.pipeline_mode<synchronous>, transform_indices = @transform_22, window_bounds = array<i64: 1280, 128>}, {pipeline_mode = #tpu.pipeline_mode<synchronous>, transform_indices = @transform_23, window_bounds = array<i64: 384, 128>}, {pipeline_mode = #tpu.pipeline_mode<synchronous>, transform_indices = @transform_24, window_bounds = array<i64: 1, 128>}, {transform_indices = @transform_25, window_bounds = array<i64: 1, 1, 128>}]} {
    %c0 = arith.constant 0 : index
    %c0_0 = arith.constant 0 : index
    %c0_1 = arith.constant 0 : index
    %0 = vector.load %arg1[%c0, %c0_0, %c0_1] : memref<1x256x32xf32, #tpu.memory_space<vmem>>, vector<1x256x32xf32>
    %1 = vector.shape_cast %0 : vector<1x256x32xf32> to vector<256x32xf32>
    %2 = arith.truncf %1 : vector<256x32xf32> to vector<256x32xbf16>
    %c0_2 = arith.constant 0 : index
    %c0_3 = arith.constant 0 : index
    %3 = vector.load %arg3[%c0_2, %c0_3] : memref<32x32xbf16, #tpu.memory_space<vmem>>, vector<32x32xbf16>
    %cst = arith.constant dense<0.000000e+00> : vector<256x32xf32>
    %4 = tpu.matmul %2, %3, %cst {dimension_numbers = #tpu.dot_dimension_numbers<[1], [0], [0], [1], [0, 0, 1, 1], [], []>} : vector<256x32xbf16>, vector<32x32xbf16>, vector<256x32xf32> -> vector<256x32xf32>
    %c0_4 = arith.constant 0 : index
    %c0_5 = arith.constant 0 : index
    %5 = vector.load %arg4[%c0_4, %c0_5] : memref<1x32xf32, #tpu.memory_space<vmem>>, vector<1x32xf32>
    %6 = vector.broadcast %5 : vector<1x32xf32> to vector<256x32xf32>
    %7 = arith.addf %4, %6 : vector<256x32xf32>
    %8 = arith.negf %7 : vector<256x32xf32>
    %9 = math.exp %8 : vector<256x32xf32>
    %cst_6 = arith.constant 1.000000e+00 : f32
    %10 = vector.broadcast %cst_6 : f32 to vector<256x32xf32>
    %11 = arith.addf %10, %9 : vector<256x32xf32>
    %12 = arith.divf %10, %11 : vector<256x32xf32>
    %13 = arith.mulf %7, %12 : vector<256x32xf32>
    %cst_7 = arith.constant 3.906250e-03 : bf16
    %14 = vector.broadcast %cst_7 : bf16 to vector<1x256xbf16>
    %15 = arith.truncf %13 : vector<256x32xf32> to vector<256x32xbf16>
    %cst_8 = arith.constant dense<0.000000e+00> : vector<1x32xf32>
    %16 = tpu.matmul %14, %15, %cst_8 {dimension_numbers = #tpu.dot_dimension_numbers<[1], [0], [0], [1], [0, 0, 1, 1], [], []>} : vector<1x256xbf16>, vector<256x32xbf16>, vector<1x32xf32> -> vector<1x32xf32>
    %17 = arith.truncf %16 : vector<1x32xf32> to vector<1x32xbf16>
    %c0_9 = arith.constant 0 : index
    %c0_10 = arith.constant 0 : index
    %18 = vector.load %arg5[%c0_9, %c0_10] : memref<32x1280xbf16, #tpu.memory_space<vmem>>, vector<32x1280xbf16>
    %cst_11 = arith.constant dense<0.000000e+00> : vector<1x1280xf32>
    %19 = tpu.matmul %17, %18, %cst_11 {dimension_numbers = #tpu.dot_dimension_numbers<[1], [0], [0], [1], [0, 0, 1, 1], [], []>} : vector<1x32xbf16>, vector<32x1280xbf16>, vector<1x1280xf32> -> vector<1x1280xf32>
    %c0_12 = arith.constant 0 : index
    %c0_13 = arith.constant 0 : index
    %20 = vector.load %arg6[%c0_12, %c0_13] : memref<1x1280xf32, #tpu.memory_space<vmem>>, vector<1x1280xf32>
    %21 = arith.addf %19, %20 : vector<1x1280xf32>
    %22 = arith.negf %21 : vector<1x1280xf32>
    %23 = math.exp %22 : vector<1x1280xf32>
    %cst_14 = arith.constant 1.000000e+00 : f32
    %24 = vector.broadcast %cst_14 : f32 to vector<1x1280xf32>
    %25 = arith.addf %24, %23 : vector<1x1280xf32>
    %26 = arith.divf %24, %25 : vector<1x1280xf32>
    %27 = arith.mulf %21, %26 : vector<1x1280xf32>
    %c0_15 = arith.constant 0 : index
    %c0_16 = arith.constant 0 : index
    %c0_17 = arith.constant 0 : index
    %28 = vector.load %arg2[%c0_15, %c0_16, %c0_17] : memref<1x5x768xf32, #tpu.memory_space<vmem>>, vector<1x5x768xf32>
    %29 = vector.shape_cast %28 : vector<1x5x768xf32> to vector<5x768xf32>
    %30 = arith.truncf %29 : vector<5x768xf32> to vector<5x768xbf16>
    %c0_18 = arith.constant 0 : index
    %c0_19 = arith.constant 0 : index
    %31 = vector.load %arg7[%c0_18, %c0_19] : memref<768x384xbf16, #tpu.memory_space<vmem>>, vector<768x384xbf16>
    %cst_20 = arith.constant dense<0.000000e+00> : vector<5x384xf32>
    %32 = tpu.matmul %30, %31, %cst_20 {dimension_numbers = #tpu.dot_dimension_numbers<[1], [0], [0], [1], [0, 0, 1, 1], [], []>} : vector<5x768xbf16>, vector<768x384xbf16>, vector<5x384xf32> -> vector<5x384xf32>
    %c0_21 = arith.constant 0 : index
    %c0_22 = arith.constant 0 : index
    %33 = vector.load %arg8[%c0_21, %c0_22] : memref<5x384xf32, #tpu.memory_space<vmem>>, vector<5x384xf32>
    %34 = arith.addf %32, %33 : vector<5x384xf32>
    %c0_23 = arith.constant 0 : index
    %c0_24 = arith.constant 0 : index
    %35 = vector.load %arg9[%c0_23, %c0_24] : memref<1x384xf32, #tpu.memory_space<vmem>>, vector<1x384xf32>
    %c0_25 = arith.constant 0 : index
    %c0_26 = arith.constant 0 : index
    %36 = vector.load %arg10[%c0_25, %c0_26] : memref<1x384xf32, #tpu.memory_space<vmem>>, vector<1x384xf32>
    %cst_27 = arith.constant dense<0.000000e+00> : vector<5xf32>
    %37 = vector.multi_reduction <add>, %34, %cst_27 [1] : vector<5x384xf32> to vector<5xf32>
    %38 = vector.shape_cast %37 : vector<5xf32> to vector<5x1xf32>
    %cst_28 = arith.constant 3.840000e+02 : f32
    %39 = vector.broadcast %cst_28 : f32 to vector<5x1xf32>
    %40 = arith.divf %38, %39 : vector<5x1xf32>
    %41 = vector.broadcast %40 : vector<5x1xf32> to vector<5x384xf32>
    %42 = arith.subf %34, %41 : vector<5x384xf32>
    %43 = arith.mulf %42, %42 : vector<5x384xf32>
    %cst_29 = arith.constant dense<0.000000e+00> : vector<5xf32>
    %44 = vector.multi_reduction <add>, %43, %cst_29 [1] : vector<5x384xf32> to vector<5xf32>
    %45 = vector.shape_cast %44 : vector<5xf32> to vector<5x1xf32>
    %cst_30 = arith.constant 3.840000e+02 : f32
    %46 = vector.broadcast %cst_30 : f32 to vector<5x1xf32>
    %47 = arith.divf %45, %46 : vector<5x1xf32>
    %48 = vector.broadcast %40 : vector<5x1xf32> to vector<5x384xf32>
    %49 = arith.subf %34, %48 : vector<5x384xf32>
    %cst_31 = arith.constant 9.99999997E-7 : f32
    %50 = vector.broadcast %cst_31 : f32 to vector<5x1xf32>
    %51 = arith.addf %47, %50 : vector<5x1xf32>
    %52 = math.rsqrt %51 : vector<5x1xf32>
    %53 = vector.broadcast %52 : vector<5x1xf32> to vector<5x384xf32>
    %54 = arith.mulf %49, %53 : vector<5x384xf32>
    %55 = vector.broadcast %35 : vector<1x384xf32> to vector<5x384xf32>
    %56 = arith.mulf %54, %55 : vector<5x384xf32>
    %57 = vector.broadcast %36 : vector<1x384xf32> to vector<5x384xf32>
    %58 = arith.addf %56, %57 : vector<5x384xf32>
    %59 = arith.truncf %58 : vector<5x384xf32> to vector<5x384xbf16>
    %c0_32 = arith.constant 0 : index
    %c0_33 = arith.constant 0 : index
    %60 = vector.load %arg11[%c0_32, %c0_33] : memref<384x1152xbf16, #tpu.memory_space<vmem>>, vector<384x1152xbf16>
    %cst_34 = arith.constant dense<0.000000e+00> : vector<5x1152xf32>
    %61 = tpu.matmul %59, %60, %cst_34 {dimension_numbers = #tpu.dot_dimension_numbers<[1], [0], [0], [1], [0, 0, 1, 1], [], []>} : vector<5x384xbf16>, vector<384x1152xbf16>, vector<5x1152xf32> -> vector<5x1152xf32>
    %c0_35 = arith.constant 0 : index
    %c0_36 = arith.constant 0 : index
    %62 = vector.load %arg12[%c0_35, %c0_36] : memref<1x1152xf32, #tpu.memory_space<vmem>>, vector<1x1152xf32>
    %63 = vector.broadcast %62 : vector<1x1152xf32> to vector<5x1152xf32>
    %64 = arith.addf %61, %63 : vector<5x1152xf32>
    %65 = vector.extract_strided_slice %64 {offsets = [0, 0], sizes = [5, 384], strides = [1, 1]} : vector<5x1152xf32> to vector<5x384xf32>
    %66 = vector.extract_strided_slice %64 {offsets = [0, 384], sizes = [5, 384], strides = [1, 1]} : vector<5x1152xf32> to vector<5x384xf32>
    %67 = vector.extract_strided_slice %64 {offsets = [0, 768], sizes = [5, 384], strides = [1, 1]} : vector<5x1152xf32> to vector<5x384xf32>
    %68 = vector.extract_strided_slice %65 {offsets = [0, 0], sizes = [5, 64], strides = [1, 1]} : vector<5x384xf32> to vector<5x64xf32>
    %69 = arith.truncf %68 : vector<5x64xf32> to vector<5x64xbf16>
    %70 = vector.extract_strided_slice %66 {offsets = [0, 0], sizes = [5, 64], strides = [1, 1]} : vector<5x384xf32> to vector<5x64xf32>
    %71 = arith.truncf %70 : vector<5x64xf32> to vector<5x64xbf16>
    %72 = vector.extract_strided_slice %67 {offsets = [0, 0], sizes = [5, 64], strides = [1, 1]} : vector<5x384xf32> to vector<5x64xf32>
    %73 = arith.truncf %72 : vector<5x64xf32> to vector<5x64xbf16>
    %cst_37 = arith.constant dense<0.000000e+00> : vector<5x5xf32>
    %74 = tpu.matmul %69, %71, %cst_37 {dimension_numbers = #tpu.dot_dimension_numbers<[1], [1], [0], [0], [0, 0, 1, 0], [], []>} : vector<5x64xbf16>, vector<5x64xbf16>, vector<5x5xf32> -> vector<5x5xf32>
    %cst_38 = arith.constant 1.250000e-01 : f32
    %75 = vector.broadcast %cst_38 : f32 to vector<5x5xf32>
    %76 = arith.mulf %74, %75 : vector<5x5xf32>
    %cst_39 = arith.constant dense<0xFF800000> : vector<5xf32>
    %77 = vector.multi_reduction <maximumf>, %76, %cst_39 [1] : vector<5x5xf32> to vector<5xf32>
    %78 = vector.shape_cast %77 : vector<5xf32> to vector<5x1xf32>
    %79 = vector.broadcast %78 : vector<5x1xf32> to vector<5x5xf32>
    %80 = arith.subf %76, %79 : vector<5x5xf32>
    %81 = math.exp %80 : vector<5x5xf32>
    %cst_40 = arith.constant dense<0.000000e+00> : vector<5xf32>
    %82 = vector.multi_reduction <add>, %81, %cst_40 [1] : vector<5x5xf32> to vector<5xf32>
    %83 = vector.shape_cast %82 : vector<5xf32> to vector<5x1xf32>
    %84 = tpu.reciprocal %83 {approx = true} : vector<5x1xf32> -> vector<5x1xf32>
    %85 = vector.broadcast %84 : vector<5x1xf32> to vector<5x5xf32>
    %86 = arith.mulf %81, %85 : vector<5x5xf32>
    %87 = arith.truncf %86 : vector<5x5xf32> to vector<5x5xbf16>
    %cst_41 = arith.constant dense<0.000000e+00> : vector<5x64xf32>
    %88 = tpu.matmul %87, %73, %cst_41 {dimension_numbers = #tpu.dot_dimension_numbers<[1], [0], [0], [1], [0, 0, 1, 1], [], []>} : vector<5x5xbf16>, vector<5x64xbf16>, vector<5x64xf32> -> vector<5x64xf32>
    %89 = vector.extract_strided_slice %65 {offsets = [0, 64], sizes = [5, 64], strides = [1, 1]} : vector<5x384xf32> to vector<5x64xf32>
    %90 = arith.truncf %89 : vector<5x64xf32> to vector<5x64xbf16>
    %91 = vector.extract_strided_slice %66 {offsets = [0, 64], sizes = [5, 64], strides = [1, 1]} : vector<5x384xf32> to vector<5x64xf32>
    %92 = arith.truncf %91 : vector<5x64xf32> to vector<5x64xbf16>
    %93 = vector.extract_strided_slice %67 {offsets = [0, 64], sizes = [5, 64], strides = [1, 1]} : vector<5x384xf32> to vector<5x64xf32>
    %94 = arith.truncf %93 : vector<5x64xf32> to vector<5x64xbf16>
    %cst_42 = arith.constant dense<0.000000e+00> : vector<5x5xf32>
    %95 = tpu.matmul %90, %92, %cst_42 {dimension_numbers = #tpu.dot_dimension_numbers<[1], [1], [0], [0], [0, 0, 1, 0], [], []>} : vector<5x64xbf16>, vector<5x64xbf16>, vector<5x5xf32> -> vector<5x5xf32>
    %cst_43 = arith.constant 1.250000e-01 : f32
    %96 = vector.broadcast %cst_43 : f32 to vector<5x5xf32>
    %97 = arith.mulf %95, %96 : vector<5x5xf32>
    %cst_44 = arith.constant dense<0xFF800000> : vector<5xf32>
    %98 = vector.multi_reduction <maximumf>, %97, %cst_44 [1] : vector<5x5xf32> to vector<5xf32>
    %99 = vector.shape_cast %98 : vector<5xf32> to vector<5x1xf32>
    %100 = vector.broadcast %99 : vector<5x1xf32> to vector<5x5xf32>
    %101 = arith.subf %97, %100 : vector<5x5xf32>
    %102 = math.exp %101 : vector<5x5xf32>
    %cst_45 = arith.constant dense<0.000000e+00> : vector<5xf32>
    %103 = vector.multi_reduction <add>, %102, %cst_45 [1] : vector<5x5xf32> to vector<5xf32>
    %104 = vector.shape_cast %103 : vector<5xf32> to vector<5x1xf32>
    %105 = tpu.reciprocal %104 {approx = true} : vector<5x1xf32> -> vector<5x1xf32>
    %106 = vector.broadcast %105 : vector<5x1xf32> to vector<5x5xf32>
    %107 = arith.mulf %102, %106 : vector<5x5xf32>
    %108 = arith.truncf %107 : vector<5x5xf32> to vector<5x5xbf16>
    %cst_46 = arith.constant dense<0.000000e+00> : vector<5x64xf32>
    %109 = tpu.matmul %108, %94, %cst_46 {dimension_numbers = #tpu.dot_dimension_numbers<[1], [0], [0], [1], [0, 0, 1, 1], [], []>} : vector<5x5xbf16>, vector<5x64xbf16>, vector<5x64xf32> -> vector<5x64xf32>
    %110 = vector.extract_strided_slice %65 {offsets = [0, 128], sizes = [5, 64], strides = [1, 1]} : vector<5x384xf32> to vector<5x64xf32>
    %111 = arith.truncf %110 : vector<5x64xf32> to vector<5x64xbf16>
    %112 = vector.extract_strided_slice %66 {offsets = [0, 128], sizes = [5, 64], strides = [1, 1]} : vector<5x384xf32> to vector<5x64xf32>
    %113 = arith.truncf %112 : vector<5x64xf32> to vector<5x64xbf16>
    %114 = vector.extract_strided_slice %67 {offsets = [0, 128], sizes = [5, 64], strides = [1, 1]} : vector<5x384xf32> to vector<5x64xf32>
    %115 = arith.truncf %114 : vector<5x64xf32> to vector<5x64xbf16>
    %cst_47 = arith.constant dense<0.000000e+00> : vector<5x5xf32>
    %116 = tpu.matmul %111, %113, %cst_47 {dimension_numbers = #tpu.dot_dimension_numbers<[1], [1], [0], [0], [0, 0, 1, 0], [], []>} : vector<5x64xbf16>, vector<5x64xbf16>, vector<5x5xf32> -> vector<5x5xf32>
    %cst_48 = arith.constant 1.250000e-01 : f32
    %117 = vector.broadcast %cst_48 : f32 to vector<5x5xf32>
    %118 = arith.mulf %116, %117 : vector<5x5xf32>
    %cst_49 = arith.constant dense<0xFF800000> : vector<5xf32>
    %119 = vector.multi_reduction <maximumf>, %118, %cst_49 [1] : vector<5x5xf32> to vector<5xf32>
    %120 = vector.shape_cast %119 : vector<5xf32> to vector<5x1xf32>
    %121 = vector.broadcast %120 : vector<5x1xf32> to vector<5x5xf32>
    %122 = arith.subf %118, %121 : vector<5x5xf32>
    %123 = math.exp %122 : vector<5x5xf32>
    %cst_50 = arith.constant dense<0.000000e+00> : vector<5xf32>
    %124 = vector.multi_reduction <add>, %123, %cst_50 [1] : vector<5x5xf32> to vector<5xf32>
    %125 = vector.shape_cast %124 : vector<5xf32> to vector<5x1xf32>
    %126 = tpu.reciprocal %125 {approx = true} : vector<5x1xf32> -> vector<5x1xf32>
    %127 = vector.broadcast %126 : vector<5x1xf32> to vector<5x5xf32>
    %128 = arith.mulf %123, %127 : vector<5x5xf32>
    %129 = arith.truncf %128 : vector<5x5xf32> to vector<5x5xbf16>
    %cst_51 = arith.constant dense<0.000000e+00> : vector<5x64xf32>
    %130 = tpu.matmul %129, %115, %cst_51 {dimension_numbers = #tpu.dot_dimension_numbers<[1], [0], [0], [1], [0, 0, 1, 1], [], []>} : vector<5x5xbf16>, vector<5x64xbf16>, vector<5x64xf32> -> vector<5x64xf32>
    %131 = vector.extract_strided_slice %65 {offsets = [0, 192], sizes = [5, 64], strides = [1, 1]} : vector<5x384xf32> to vector<5x64xf32>
    %132 = arith.truncf %131 : vector<5x64xf32> to vector<5x64xbf16>
    %133 = vector.extract_strided_slice %66 {offsets = [0, 192], sizes = [5, 64], strides = [1, 1]} : vector<5x384xf32> to vector<5x64xf32>
    %134 = arith.truncf %133 : vector<5x64xf32> to vector<5x64xbf16>
    %135 = vector.extract_strided_slice %67 {offsets = [0, 192], sizes = [5, 64], strides = [1, 1]} : vector<5x384xf32> to vector<5x64xf32>
    %136 = arith.truncf %135 : vector<5x64xf32> to vector<5x64xbf16>
    %cst_52 = arith.constant dense<0.000000e+00> : vector<5x5xf32>
    %137 = tpu.matmul %132, %134, %cst_52 {dimension_numbers = #tpu.dot_dimension_numbers<[1], [1], [0], [0], [0, 0, 1, 0], [], []>} : vector<5x64xbf16>, vector<5x64xbf16>, vector<5x5xf32> -> vector<5x5xf32>
    %cst_53 = arith.constant 1.250000e-01 : f32
    %138 = vector.broadcast %cst_53 : f32 to vector<5x5xf32>
    %139 = arith.mulf %137, %138 : vector<5x5xf32>
    %cst_54 = arith.constant dense<0xFF800000> : vector<5xf32>
    %140 = vector.multi_reduction <maximumf>, %139, %cst_54 [1] : vector<5x5xf32> to vector<5xf32>
    %141 = vector.shape_cast %140 : vector<5xf32> to vector<5x1xf32>
    %142 = vector.broadcast %141 : vector<5x1xf32> to vector<5x5xf32>
    %143 = arith.subf %139, %142 : vector<5x5xf32>
    %144 = math.exp %143 : vector<5x5xf32>
    %cst_55 = arith.constant dense<0.000000e+00> : vector<5xf32>
    %145 = vector.multi_reduction <add>, %144, %cst_55 [1] : vector<5x5xf32> to vector<5xf32>
    %146 = vector.shape_cast %145 : vector<5xf32> to vector<5x1xf32>
    %147 = tpu.reciprocal %146 {approx = true} : vector<5x1xf32> -> vector<5x1xf32>
    %148 = vector.broadcast %147 : vector<5x1xf32> to vector<5x5xf32>
    %149 = arith.mulf %144, %148 : vector<5x5xf32>
    %150 = arith.truncf %149 : vector<5x5xf32> to vector<5x5xbf16>
    %cst_56 = arith.constant dense<0.000000e+00> : vector<5x64xf32>
    %151 = tpu.matmul %150, %136, %cst_56 {dimension_numbers = #tpu.dot_dimension_numbers<[1], [0], [0], [1], [0, 0, 1, 1], [], []>} : vector<5x5xbf16>, vector<5x64xbf16>, vector<5x64xf32> -> vector<5x64xf32>
    %152 = vector.extract_strided_slice %65 {offsets = [0, 256], sizes = [5, 64], strides = [1, 1]} : vector<5x384xf32> to vector<5x64xf32>
    %153 = arith.truncf %152 : vector<5x64xf32> to vector<5x64xbf16>
    %154 = vector.extract_strided_slice %66 {offsets = [0, 256], sizes = [5, 64], strides = [1, 1]} : vector<5x384xf32> to vector<5x64xf32>
    %155 = arith.truncf %154 : vector<5x64xf32> to vector<5x64xbf16>
    %156 = vector.extract_strided_slice %67 {offsets = [0, 256], sizes = [5, 64], strides = [1, 1]} : vector<5x384xf32> to vector<5x64xf32>
    %157 = arith.truncf %156 : vector<5x64xf32> to vector<5x64xbf16>
    %cst_57 = arith.constant dense<0.000000e+00> : vector<5x5xf32>
    %158 = tpu.matmul %153, %155, %cst_57 {dimension_numbers = #tpu.dot_dimension_numbers<[1], [1], [0], [0], [0, 0, 1, 0], [], []>} : vector<5x64xbf16>, vector<5x64xbf16>, vector<5x5xf32> -> vector<5x5xf32>
    %cst_58 = arith.constant 1.250000e-01 : f32
    %159 = vector.broadcast %cst_58 : f32 to vector<5x5xf32>
    %160 = arith.mulf %158, %159 : vector<5x5xf32>
    %cst_59 = arith.constant dense<0xFF800000> : vector<5xf32>
    %161 = vector.multi_reduction <maximumf>, %160, %cst_59 [1] : vector<5x5xf32> to vector<5xf32>
    %162 = vector.shape_cast %161 : vector<5xf32> to vector<5x1xf32>
    %163 = vector.broadcast %162 : vector<5x1xf32> to vector<5x5xf32>
    %164 = arith.subf %160, %163 : vector<5x5xf32>
    %165 = math.exp %164 : vector<5x5xf32>
    %cst_60 = arith.constant dense<0.000000e+00> : vector<5xf32>
    %166 = vector.multi_reduction <add>, %165, %cst_60 [1] : vector<5x5xf32> to vector<5xf32>
    %167 = vector.shape_cast %166 : vector<5xf32> to vector<5x1xf32>
    %168 = tpu.reciprocal %167 {approx = true} : vector<5x1xf32> -> vector<5x1xf32>
    %169 = vector.broadcast %168 : vector<5x1xf32> to vector<5x5xf32>
    %170 = arith.mulf %165, %169 : vector<5x5xf32>
    %171 = arith.truncf %170 : vector<5x5xf32> to vector<5x5xbf16>
    %cst_61 = arith.constant dense<0.000000e+00> : vector<5x64xf32>
    %172 = tpu.matmul %171, %157, %cst_61 {dimension_numbers = #tpu.dot_dimension_numbers<[1], [0], [0], [1], [0, 0, 1, 1], [], []>} : vector<5x5xbf16>, vector<5x64xbf16>, vector<5x64xf32> -> vector<5x64xf32>
    %173 = vector.extract_strided_slice %65 {offsets = [0, 320], sizes = [5, 64], strides = [1, 1]} : vector<5x384xf32> to vector<5x64xf32>
    %174 = arith.truncf %173 : vector<5x64xf32> to vector<5x64xbf16>
    %175 = vector.extract_strided_slice %66 {offsets = [0, 320], sizes = [5, 64], strides = [1, 1]} : vector<5x384xf32> to vector<5x64xf32>
    %176 = arith.truncf %175 : vector<5x64xf32> to vector<5x64xbf16>
    %177 = vector.extract_strided_slice %67 {offsets = [0, 320], sizes = [5, 64], strides = [1, 1]} : vector<5x384xf32> to vector<5x64xf32>
    %178 = arith.truncf %177 : vector<5x64xf32> to vector<5x64xbf16>
    %cst_62 = arith.constant dense<0.000000e+00> : vector<5x5xf32>
    %179 = tpu.matmul %174, %176, %cst_62 {dimension_numbers = #tpu.dot_dimension_numbers<[1], [1], [0], [0], [0, 0, 1, 0], [], []>} : vector<5x64xbf16>, vector<5x64xbf16>, vector<5x5xf32> -> vector<5x5xf32>
    %cst_63 = arith.constant 1.250000e-01 : f32
    %180 = vector.broadcast %cst_63 : f32 to vector<5x5xf32>
    %181 = arith.mulf %179, %180 : vector<5x5xf32>
    %cst_64 = arith.constant dense<0xFF800000> : vector<5xf32>
    %182 = vector.multi_reduction <maximumf>, %181, %cst_64 [1] : vector<5x5xf32> to vector<5xf32>
    %183 = vector.shape_cast %182 : vector<5xf32> to vector<5x1xf32>
    %184 = vector.broadcast %183 : vector<5x1xf32> to vector<5x5xf32>
    %185 = arith.subf %181, %184 : vector<5x5xf32>
    %186 = math.exp %185 : vector<5x5xf32>
    %cst_65 = arith.constant dense<0.000000e+00> : vector<5xf32>
    %187 = vector.multi_reduction <add>, %186, %cst_65 [1] : vector<5x5xf32> to vector<5xf32>
    %188 = vector.shape_cast %187 : vector<5xf32> to vector<5x1xf32>
    %189 = tpu.reciprocal %188 {approx = true} : vector<5x1xf32> -> vector<5x1xf32>
    %190 = vector.broadcast %189 : vector<5x1xf32> to vector<5x5xf32>
    %191 = arith.mulf %186, %190 : vector<5x5xf32>
    %192 = arith.truncf %191 : vector<5x5xf32> to vector<5x5xbf16>
    %cst_66 = arith.constant dense<0.000000e+00> : vector<5x64xf32>
    %193 = tpu.matmul %192, %178, %cst_66 {dimension_numbers = #tpu.dot_dimension_numbers<[1], [0], [0], [1], [0, 0, 1, 1], [], []>} : vector<5x5xbf16>, vector<5x64xbf16>, vector<5x64xf32> -> vector<5x64xf32>
    %194 = tpu.concatenate %88, %109, %130, %151, %172, %193 in 1 : vector<5x64xf32>, vector<5x64xf32>, vector<5x64xf32>, vector<5x64xf32>, vector<5x64xf32>, vector<5x64xf32> -> vector<5x384xf32>
    %195 = arith.truncf %194 : vector<5x384xf32> to vector<5x384xbf16>
    %c0_67 = arith.constant 0 : index
    %c0_68 = arith.constant 0 : index
    %196 = vector.load %arg13[%c0_67, %c0_68] : memref<384x384xbf16, #tpu.memory_space<vmem>>, vector<384x384xbf16>
    %cst_69 = arith.constant dense<0.000000e+00> : vector<5x384xf32>
    %197 = tpu.matmul %195, %196, %cst_69 {dimension_numbers = #tpu.dot_dimension_numbers<[1], [0], [0], [1], [0, 0, 1, 1], [], []>} : vector<5x384xbf16>, vector<384x384xbf16>, vector<5x384xf32> -> vector<5x384xf32>
    %198 = arith.addf %34, %197 : vector<5x384xf32>
    %c0_70 = arith.constant 0 : index
    %c0_71 = arith.constant 0 : index
    %199 = vector.load %arg14[%c0_70, %c0_71] : memref<1x384xf32, #tpu.memory_space<vmem>>, vector<1x384xf32>
    %200 = vector.broadcast %199 : vector<1x384xf32> to vector<5x384xf32>
    %201 = arith.addf %198, %200 : vector<5x384xf32>
    %c0_72 = arith.constant 0 : index
    %c0_73 = arith.constant 0 : index
    %202 = vector.load %arg15[%c0_72, %c0_73] : memref<1x384xf32, #tpu.memory_space<vmem>>, vector<1x384xf32>
    %c0_74 = arith.constant 0 : index
    %c0_75 = arith.constant 0 : index
    %203 = vector.load %arg16[%c0_74, %c0_75] : memref<1x384xf32, #tpu.memory_space<vmem>>, vector<1x384xf32>
    %cst_76 = arith.constant dense<0.000000e+00> : vector<5xf32>
    %204 = vector.multi_reduction <add>, %201, %cst_76 [1] : vector<5x384xf32> to vector<5xf32>
    %205 = vector.shape_cast %204 : vector<5xf32> to vector<5x1xf32>
    %cst_77 = arith.constant 3.840000e+02 : f32
    %206 = vector.broadcast %cst_77 : f32 to vector<5x1xf32>
    %207 = arith.divf %205, %206 : vector<5x1xf32>
    %208 = vector.broadcast %207 : vector<5x1xf32> to vector<5x384xf32>
    %209 = arith.subf %201, %208 : vector<5x384xf32>
    %210 = arith.mulf %209, %209 : vector<5x384xf32>
    %cst_78 = arith.constant dense<0.000000e+00> : vector<5xf32>
    %211 = vector.multi_reduction <add>, %210, %cst_78 [1] : vector<5x384xf32> to vector<5xf32>
    %212 = vector.shape_cast %211 : vector<5xf32> to vector<5x1xf32>
    %cst_79 = arith.constant 3.840000e+02 : f32
    %213 = vector.broadcast %cst_79 : f32 to vector<5x1xf32>
    %214 = arith.divf %212, %213 : vector<5x1xf32>
    %215 = vector.broadcast %207 : vector<5x1xf32> to vector<5x384xf32>
    %216 = arith.subf %201, %215 : vector<5x384xf32>
    %cst_80 = arith.constant 9.99999997E-7 : f32
    %217 = vector.broadcast %cst_80 : f32 to vector<5x1xf32>
    %218 = arith.addf %214, %217 : vector<5x1xf32>
    %219 = math.rsqrt %218 : vector<5x1xf32>
    %220 = vector.broadcast %219 : vector<5x1xf32> to vector<5x384xf32>
    %221 = arith.mulf %216, %220 : vector<5x384xf32>
    %222 = vector.broadcast %202 : vector<1x384xf32> to vector<5x384xf32>
    %223 = arith.mulf %221, %222 : vector<5x384xf32>
    %224 = vector.broadcast %203 : vector<1x384xf32> to vector<5x384xf32>
    %225 = arith.addf %223, %224 : vector<5x384xf32>
    %226 = arith.truncf %225 : vector<5x384xf32> to vector<5x384xbf16>
    %c0_81 = arith.constant 0 : index
    %c0_82 = arith.constant 0 : index
    %227 = vector.load %arg17[%c0_81, %c0_82] : memref<384x1536xbf16, #tpu.memory_space<vmem>>, vector<384x1536xbf16>
    %cst_83 = arith.constant dense<0.000000e+00> : vector<5x1536xf32>
    %228 = tpu.matmul %226, %227, %cst_83 {dimension_numbers = #tpu.dot_dimension_numbers<[1], [0], [0], [1], [0, 0, 1, 1], [], []>} : vector<5x384xbf16>, vector<384x1536xbf16>, vector<5x1536xf32> -> vector<5x1536xf32>
    %c0_84 = arith.constant 0 : index
    %c0_85 = arith.constant 0 : index
    %229 = vector.load %arg18[%c0_84, %c0_85] : memref<1x1536xf32, #tpu.memory_space<vmem>>, vector<1x1536xf32>
    %230 = vector.broadcast %229 : vector<1x1536xf32> to vector<5x1536xf32>
    %231 = arith.addf %228, %230 : vector<5x1536xf32>
    %232 = arith.mulf %231, %231 : vector<5x1536xf32>
    %233 = arith.mulf %231, %232 : vector<5x1536xf32>
    %cst_86 = arith.constant 4.471500e-02 : f32
    %234 = vector.broadcast %cst_86 : f32 to vector<5x1536xf32>
    %235 = arith.mulf %234, %233 : vector<5x1536xf32>
    %236 = arith.addf %231, %235 : vector<5x1536xf32>
    %cst_87 = arith.constant 0.797884583 : f32
    %237 = vector.broadcast %cst_87 : f32 to vector<5x1536xf32>
    %238 = arith.mulf %237, %236 : vector<5x1536xf32>
    %239 = math.tanh %238 : vector<5x1536xf32>
    %cst_88 = arith.constant 1.000000e+00 : f32
    %240 = vector.broadcast %cst_88 : f32 to vector<5x1536xf32>
    %241 = arith.addf %240, %239 : vector<5x1536xf32>
    %cst_89 = arith.constant 5.000000e-01 : f32
    %242 = vector.broadcast %cst_89 : f32 to vector<5x1536xf32>
    %243 = arith.mulf %242, %241 : vector<5x1536xf32>
    %244 = arith.mulf %231, %243 : vector<5x1536xf32>
    %245 = arith.truncf %244 : vector<5x1536xf32> to vector<5x1536xbf16>
    %c0_90 = arith.constant 0 : index
    %c0_91 = arith.constant 0 : index
    %246 = vector.load %arg19[%c0_90, %c0_91] : memref<1536x384xbf16, #tpu.memory_space<vmem>>, vector<1536x384xbf16>
    %cst_92 = arith.constant dense<0.000000e+00> : vector<5x384xf32>
    %247 = tpu.matmul %245, %246, %cst_92 {dimension_numbers = #tpu.dot_dimension_numbers<[1], [0], [0], [1], [0, 0, 1, 1], [], []>} : vector<5x1536xbf16>, vector<1536x384xbf16>, vector<5x384xf32> -> vector<5x384xf32>
    %c0_93 = arith.constant 0 : index
    %c0_94 = arith.constant 0 : index
    %248 = vector.load %arg20[%c0_93, %c0_94] : memref<1x384xf32, #tpu.memory_space<vmem>>, vector<1x384xf32>
    %249 = vector.broadcast %248 : vector<1x384xf32> to vector<5x384xf32>
    %250 = arith.addf %247, %249 : vector<5x384xf32>
    %251 = arith.addf %201, %250 : vector<5x384xf32>
    %252 = vector.extract_strided_slice %251 {offsets = [0, 0], sizes = [1, 384], strides = [1, 1]} : vector<5x384xf32> to vector<1x384xf32>
    %c0_95 = arith.constant 0 : index
    %c0_96 = arith.constant 0 : index
    %253 = vector.load %arg21[%c0_95, %c0_96] : memref<1x384xf32, #tpu.memory_space<vmem>>, vector<1x384xf32>
    %c0_97 = arith.constant 0 : index
    %c0_98 = arith.constant 0 : index
    %254 = vector.load %arg22[%c0_97, %c0_98] : memref<1x384xf32, #tpu.memory_space<vmem>>, vector<1x384xf32>
    %cst_99 = arith.constant dense<0.000000e+00> : vector<1xf32>
    %255 = vector.multi_reduction <add>, %252, %cst_99 [1] : vector<1x384xf32> to vector<1xf32>
    %256 = vector.shape_cast %255 : vector<1xf32> to vector<1x1xf32>
    %cst_100 = arith.constant 3.840000e+02 : f32
    %257 = vector.broadcast %cst_100 : f32 to vector<1x1xf32>
    %258 = arith.divf %256, %257 : vector<1x1xf32>
    %259 = vector.broadcast %258 : vector<1x1xf32> to vector<1x384xf32>
    %260 = arith.subf %252, %259 : vector<1x384xf32>
    %261 = arith.mulf %260, %260 : vector<1x384xf32>
    %cst_101 = arith.constant dense<0.000000e+00> : vector<1xf32>
    %262 = vector.multi_reduction <add>, %261, %cst_101 [1] : vector<1x384xf32> to vector<1xf32>
    %263 = vector.shape_cast %262 : vector<1xf32> to vector<1x1xf32>
    %cst_102 = arith.constant 3.840000e+02 : f32
    %264 = vector.broadcast %cst_102 : f32 to vector<1x1xf32>
    %265 = arith.divf %263, %264 : vector<1x1xf32>
    %266 = vector.broadcast %258 : vector<1x1xf32> to vector<1x384xf32>
    %267 = arith.subf %252, %266 : vector<1x384xf32>
    %cst_103 = arith.constant 9.99999997E-7 : f32
    %268 = vector.broadcast %cst_103 : f32 to vector<1x1xf32>
    %269 = arith.addf %265, %268 : vector<1x1xf32>
    %270 = math.rsqrt %269 : vector<1x1xf32>
    %271 = vector.broadcast %270 : vector<1x1xf32> to vector<1x384xf32>
    %272 = arith.mulf %267, %271 : vector<1x384xf32>
    %273 = arith.mulf %272, %253 : vector<1x384xf32>
    %274 = arith.addf %273, %254 : vector<1x384xf32>
    %275 = arith.truncf %27 : vector<1x1280xf32> to vector<1x1280xbf16>
    %c0_104 = arith.constant 0 : index
    %c0_105 = arith.constant 0 : index
    %276 = vector.load %arg23[%c0_104, %c0_105] : memref<1280x128xbf16, #tpu.memory_space<vmem>>, vector<1280x128xbf16>
    %cst_106 = arith.constant dense<0.000000e+00> : vector<1x128xf32>
    %277 = tpu.matmul %275, %276, %cst_106 {dimension_numbers = #tpu.dot_dimension_numbers<[1], [0], [0], [1], [0, 0, 1, 1], [], []>} : vector<1x1280xbf16>, vector<1280x128xbf16>, vector<1x128xf32> -> vector<1x128xf32>
    %278 = arith.truncf %274 : vector<1x384xf32> to vector<1x384xbf16>
    %c0_107 = arith.constant 0 : index
    %c0_108 = arith.constant 0 : index
    %279 = vector.load %arg24[%c0_107, %c0_108] : memref<384x128xbf16, #tpu.memory_space<vmem>>, vector<384x128xbf16>
    %cst_109 = arith.constant dense<0.000000e+00> : vector<1x128xf32>
    %280 = tpu.matmul %278, %279, %cst_109 {dimension_numbers = #tpu.dot_dimension_numbers<[1], [0], [0], [1], [0, 0, 1, 1], [], []>} : vector<1x384xbf16>, vector<384x128xbf16>, vector<1x128xf32> -> vector<1x128xf32>
    %281 = arith.addf %277, %280 : vector<1x128xf32>
    %c0_110 = arith.constant 0 : index
    %c0_111 = arith.constant 0 : index
    %282 = vector.load %arg25[%c0_110, %c0_111] : memref<1x128xf32, #tpu.memory_space<vmem>>, vector<1x128xf32>
    %283 = arith.addf %281, %282 : vector<1x128xf32>
    %c0_112 = arith.constant 0 : index
    %c0_113 = arith.constant 0 : index
    %c0_114 = arith.constant 0 : index
    %284 = vector.load %arg26[%c0_112, %c0_113, %c0_114] : memref<1x1x128xf32, #tpu.memory_space<vmem>>, vector<1x1x128xf32>
    %285 = vector.shape_cast %284 : vector<1x1x128xf32> to vector<1x128xf32>
    %286 = vector.shape_cast %283 : vector<1x128xf32> to vector<1x1x128xf32>
    tpu.vector_store %arg26[%c0_112, %c0_113, %c0_114], %286 {strides = array<i32>} : memref<1x1x128xf32, #tpu.memory_space<vmem>>, vector<1x1x128xf32>,
    return
  }
  func.func @transform_0(%arg0: i32) -> (i32, i32, i32) {
    %c0_i32 = arith.constant 0 : i32
    %c0_i32_0 = arith.constant 0 : i32
    %c0_i32_1 = arith.constant 0 : i32
    return %arg0, %c0_i32, %c0_i32_0 : i32, i32, i32
  }
  func.func @transform_1(%arg0: i32) -> (i32, i32, i32) {
    %c0_i32 = arith.constant 0 : i32
    %c0_i32_0 = arith.constant 0 : i32
    %c0_i32_1 = arith.constant 0 : i32
    return %arg0, %c0_i32, %c0_i32_0 : i32, i32, i32
  }
  func.func @transform_2(%arg0: i32) -> (i32, i32) {
    %c0_i32 = arith.constant 0 : i32
    %c0_i32_0 = arith.constant 0 : i32
    %c0_i32_1 = arith.constant 0 : i32
    return %c0_i32, %c0_i32_0 : i32, i32
  }
  func.func @transform_3(%arg0: i32) -> (i32, i32) {
    %c0_i32 = arith.constant 0 : i32
    %c0_i32_0 = arith.constant 0 : i32
    %c0_i32_1 = arith.constant 0 : i32
    return %c0_i32, %c0_i32_0 : i32, i32
  }
  func.func @transform_4(%arg0: i32) -> (i32, i32) {
    %c0_i32 = arith.constant 0 : i32
    %c0_i32_0 = arith.constant 0 : i32
    %c0_i32_1 = arith.constant 0 : i32
    return %c0_i32, %c0_i32_0 : i32, i32
  }
  func.func @transform_5(%arg0: i32) -> (i32, i32) {
    %c0_i32 = arith.constant 0 : i32
    %c0_i32_0 = arith.constant 0 : i32
    %c0_i32_1 = arith.constant 0 : i32
    return %c0_i32, %c0_i32_0 : i32, i32
  }
  func.func @transform_6(%arg0: i32) -> (i32, i32) {
    %c0_i32 = arith.constant 0 : i32
    %c0_i32_0 = arith.constant 0 : i32
    %c0_i32_1 = arith.constant 0 : i32
    return %c0_i32, %c0_i32_0 : i32, i32
  }
  func.func @transform_7(%arg0: i32) -> (i32, i32) {
    %c0_i32 = arith.constant 0 : i32
    %c0_i32_0 = arith.constant 0 : i32
    %c0_i32_1 = arith.constant 0 : i32
    return %c0_i32, %c0_i32_0 : i32, i32
  }
  func.func @transform_8(%arg0: i32) -> (i32, i32) {
    %c0_i32 = arith.constant 0 : i32
    %c0_i32_0 = arith.constant 0 : i32
    %c0_i32_1 = arith.constant 0 : i32
    return %c0_i32, %c0_i32_0 : i32, i32
  }
  func.func @transform_9(%arg0: i32) -> (i32, i32) {
    %c0_i32 = arith.constant 0 : i32
    %c0_i32_0 = arith.constant 0 : i32
    %c0_i32_1 = arith.constant 0 : i32
    return %c0_i32, %c0_i32_0 : i32, i32
  }
  func.func @transform_10(%arg0: i32) -> (i32, i32) {
    %c0_i32 = arith.constant 0 : i32
    %c0_i32_0 = arith.constant 0 : i32
    %c0_i32_1 = arith.constant 0 : i32
    return %c0_i32, %c0_i32_0 : i32, i32
  }
  func.func @transform_11(%arg0: i32) -> (i32, i32) {
    %c0_i32 = arith.constant 0 : i32
    %c0_i32_0 = arith.constant 0 : i32
    %c0_i32_1 = arith.constant 0 : i32
    return %c0_i32, %c0_i32_0 : i32, i32
  }
  func.func @transform_12(%arg0: i32) -> (i32, i32) {
    %c0_i32 = arith.constant 0 : i32
    %c0_i32_0 = arith.constant 0 : i32
    %c0_i32_1 = arith.constant 0 : i32
    return %c0_i32, %c0_i32_0 : i32, i32
  }
  func.func @transform_13(%arg0: i32) -> (i32, i32) {
    %c0_i32 = arith.constant 0 : i32
    %c0_i32_0 = arith.constant 0 : i32
    %c0_i32_1 = arith.constant 0 : i32
    return %c0_i32, %c0_i32_0 : i32, i32
  }
  func.func @transform_14(%arg0: i32) -> (i32, i32) {
    %c0_i32 = arith.constant 0 : i32
    %c0_i32_0 = arith.constant 0 : i32
    %c0_i32_1 = arith.constant 0 : i32
    return %c0_i32, %c0_i32_0 : i32, i32
  }
  func.func @transform_15(%arg0: i32) -> (i32, i32) {
    %c0_i32 = arith.constant 0 : i32
    %c0_i32_0 = arith.constant 0 : i32
    %c0_i32_1 = arith.constant 0 : i32
    return %c0_i32, %c0_i32_0 : i32, i32
  }
  func.func @transform_16(%arg0: i32) -> (i32, i32) {
    %c0_i32 = arith.constant 0 : i32
    %c0_i32_0 = arith.constant 0 : i32
    %c0_i32_1 = arith.constant 0 : i32
    return %c0_i32, %c0_i32_0 : i32, i32
  }
  func.func @transform_17(%arg0: i32) -> (i32, i32) {
    %c0_i32 = arith.constant 0 : i32
    %c0_i32_0 = arith.constant 0 : i32
    %c0_i32_1 = arith.constant 0 : i32
    return %c0_i32, %c0_i32_0 : i32, i32
  }
  func.func @transform_18(%arg0: i32) -> (i32, i32) {
    %c0_i32 = arith.constant 0 : i32
    %c0_i32_0 = arith.constant 0 : i32
    %c0_i32_1 = arith.constant 0 : i32
    return %c0_i32, %c0_i32_0 : i32, i32
  }
  func.func @transform_19(%arg0: i32) -> (i32, i32) {
    %c0_i32 = arith.constant 0 : i32
    %c0_i32_0 = arith.constant 0 : i32
    %c0_i32_1 = arith.constant 0 : i32
    return %c0_i32, %c0_i32_0 : i32, i32
  }
  func.func @transform_20(%arg0: i32) -> (i32, i32) {
    %c0_i32 = arith.constant 0 : i32
    %c0_i32_0 = arith.constant 0 : i32
    %c0_i32_1 = arith.constant 0 : i32
    return %c0_i32, %c0_i32_0 : i32, i32
  }
  func.func @transform_21(%arg0: i32) -> (i32, i32) {
    %c0_i32 = arith.constant 0 : i32
    %c0_i32_0 = arith.constant 0 : i32
    %c0_i32_1 = arith.constant 0 : i32
    return %c0_i32, %c0_i32_0 : i32, i32
  }
  func.func @transform_22(%arg0: i32) -> (i32, i32) {
    %c0_i32 = arith.constant 0 : i32
    %c0_i32_0 = arith.constant 0 : i32
    %c0_i32_1 = arith.constant 0 : i32
    return %c0_i32, %c0_i32_0 : i32, i32
  }
  func.func @transform_23(%arg0: i32) -> (i32, i32) {
    %c0_i32 = arith.constant 0 : i32
    %c0_i32_0 = arith.constant 0 : i32
    %c0_i32_1 = arith.constant 0 : i32
    return %c0_i32, %c0_i32_0 : i32, i32
  }
  func.func @transform_24(%arg0: i32) -> (i32, i32) {
    %c0_i32 = arith.constant 0 : i32
    %c0_i32_0 = arith.constant 0 : i32
    %c0_i32_1 = arith.constant 0 : i32
    return %c0_i32, %c0_i32_0 : i32, i32
  }
  func.func @transform_25(%arg0: i32) -> (i32, i32, i32) {
    %c0_i32 = arith.constant 0 : i32
    %c0_i32_0 = arith.constant 0 : i32
    %c0_i32_1 = arith.constant 0 : i32
    return %arg0, %c0_i32, %c0_i32_0 : i32, i32, i32
  }
}

</mosaic_0001>

<bundles_post_ra>
// kernel: a_call__.1
= control target key start
LH: loop header
LB: loop body
LE: loop exit
PB: predicated region body
PF: predicated region fallthrough
CT: control target
= control target key end

     0   :  { %s26626_s0 = inlined_call_operand.vmem [shape: f32[2,256,32], index: 0, kind: input, shape index: {}]   ;;  %s26627_s1 = inlined_call_operand.vmem [shape: f32[2,5,768], index: 1, kind: input, shape index: {}]   ;;  %s26628_s2 = inlined_call_operand.vmem [shape: bf16[32,32], index: 2, kind: input, shape index: {}]   ;;  %s26629_s3 = inlined_call_operand.vmem [shape: f32[1,32], index: 3, kind: input, shape index: {}]   ;;  %s26630_s4 = inlined_call_operand.vmem [shape: bf16[32,1280], index: 4, kind: input, shape index: {}]   ;;  %s26631_s5 = inlined_call_operand.vmem [shape: f32[1,1280], index: 5, kind: input, shape index: {}]   ;;  %s26632_s6 = inlined_call_operand.vmem [shape: bf16[768,384], index: 6, kind: input, shape index: {}]   ;;  %s26633_s7 = inlined_call_operand.vmem [shape: f32[5,384], index: 7, kind: input, shape index: {}]   ;;  %s26634_s8 = inlined_call_operand.vmem [shape: f32[1,384], index: 8, kind: input, shape index: {}, may-alias: {8,14,20}]   ;;  %s26635_s9 = inlined_call_operand.vmem [shape: f32[1,384], index: 9, kind: input, shape index: {}, may-alias: {9,13,15,19,21}]   ;;  %s26636_s10 = inlined_call_operand.vmem [shape: bf16[384,1152], index: 10, kind: input, shape index: {}]   ;;  %s26637_s11 = inlined_call_operand.vmem [shape: f32[1,1152], index: 11, kind: input, shape index: {}]   ;;  %s26638_s12 = inlined_call_operand.vmem [shape: bf16[384,384], index: 12, kind: input, shape index: {}]   ;;  %s26639_s13 = inlined_call_operand.vmem [shape: f32[1,384], index: 13, kind: input, shape index: {}, may-alias: {9,13,15,19,21}]   ;;  %s26640_s14 = inlined_call_operand.vmem [shape: f32[1,384], index: 14, kind: input, shape index: {}, may-alias: {8,14,20}]   ;;  %s26641_s15 = inlined_call_operand.vmem [shape: f32[1,384], index: 15, kind: input, shape index: {}, may-alias: {9,13,15,19,21}]   ;;  %s26642_s16 = inlined_call_operand.vmem [shape: bf16[384,1536], index: 16, kind: input, shape index: {}]   ;;  %s26643_s17 = inlined_call_operand.vmem [shape: f32[1,1536], index: 17, kind: input, shape index: {}]   ;;  %s26644_s18 = inlined_call_operand.vmem [shape: bf16[1536,384], index: 18, kind: input, shape index: {}]   ;;  %s26645_s19 = inlined_call_operand.vmem [shape: f32[1,384], index: 19, kind: input, shape index: {}, may-alias: {9,13,15,19,21}]   ;;  %s26646_s20 = inlined_call_operand.vmem [shape: f32[1,384], index: 20, kind: input, shape index: {}, may-alias: {8,14,20}]   ;;  %s26647_s21 = inlined_call_operand.vmem [shape: f32[1,384], index: 21, kind: input, shape index: {}, may-alias: {9,13,15,19,21}]   ;;  %s26648_s22 = inlined_call_operand.vmem [shape: bf16[1280,128], index: 22, kind: input, shape index: {}]   ;;  %s26649_s23 = inlined_call_operand.vmem [shape: bf16[384,128], index: 23, kind: input, shape index: {}]   ;;  %s26650_s24 = inlined_call_operand.vmem [shape: f32[1,128], index: 24, kind: input, shape index: {}]   ;;  %s26651_s25 = inlined_call_operand.hbm [shape: f32[2,1,128], index: 25, kind: output, shape index: {}]  }
   0x1   :  { %26677 = sst [smem:[#allocation17_spill]] %s26626_s0 }
   0x2   :  { %26678 = sst [smem:[#allocation18_spill]] %s26627_s1 }
   0x3   :  { %26679 = sst [smem:[#allocation19_spill]] %s26628_s2 }
   0x4   :  { %26680 = sst [smem:[#allocation20_spill]] %s26629_s3 }
   0x5   :  { %26681 = sst [smem:[#allocation21_spill]] %s26630_s4 }
   0x6   :  { %26682 = sst [smem:[#allocation22_spill]] %s26631_s5 }
   0x7   :  { %26683 = sst [smem:[#allocation23_spill]] %s26632_s6 }
   0x8   :  { %26684 = sst [smem:[#allocation24_spill]] %s26633_s7 }
   0x9   :  { %26685 = sst [smem:[#allocation25_spill]] %s26634_s8 }
   0xa   :  { %26686 = sst [smem:[#allocation26_spill]] %s26635_s9 }
   0xb   :  { %26687 = sst [smem:[#allocation27_spill]] %s26636_s10 }
   0xc   :  { %26688 = sst [smem:[#allocation28_spill]] %s26650_s24 }
   0xd   :  { %30 = vsyncpa [#allocation3], 0 }
   0xe   :  { %32 = vsyncpa [#allocation3 + $0x1], 0  ;;  %s18322_s29 = smov 0   ;;  %s18324_s2 = smov 0  }
   0xf   :  { %s18326_s6 = smov 0   ;;  %s18328_s30 = smov 0  }
  0x10 LB: > { %26689 = sst [smem:[#allocation5_spill]] %s18174_s29  ;;  %s18343_s7 = sadd.s32 4294967295, %s18186_s30   ;;  %s18186_s30 = sphi %s18328_s30, %s26810_s30   ;;  %s18182_s6 = sphi %s18326_s6, %s26812_s6   ;;  %s18178_s2 = sphi %s18324_s2, %s26814_s2   ;;  %s18174_s29 = sphi %s18322_s29, %s26813_s29  }
  0x11   : > { %26690 = sst [smem:[#allocation6_spill]] %s18182_s6  ;;  %s12083_s3 = sadd.s32 4294967294, %s18186_s30  }
  0x12   : > { %26691 = sst [smem:[#allocation7_spill]] %s18186_s30  ;;  %s18347_s26 = sadd.s32 1, %s18186_s30  }
  0x13   : > { %26692 = sst [smem:[#allocation8_spill]] %s18347_s26  ;;  %s580_s1 = sadd.s32 1, %s18182_s6 }
  0x14   : > { %s577_s8 = ssub.s32 %s18186_s30, %s18347_s26  ;;  %p590_p0 = scmp.ne.s32.totalorder %s18182_s6, %s18178_s2 }
  0x15   : > { %p578_p1 = scmp.eq.s32.totalorder %s577_s8, 0  ;;  %p591_p2 = scmp.eq.s32.totalorder %s18343_s7, 1 }
  0x16   : > { %p596_p3 = scmp.ne.s32.totalorder %s18178_s2, %s18174_s29  ;;  %p597_p4 = scmp.eq.s32.totalorder %s12083_s3, 1 }
  0x17   : > { %s18358_s27 = scalar_select %p578_p1, %s18182_s6, %s580_s1  }
  0x18   : > { %p18360_p5 = por %p591_p2, %p590_p0  ;;  %p18364_p6 = por %p597_p4, %p596_p3 }
  0x19   : > { %26693 = sst [smem:[#allocation9_spill]] %s18358_s27  ;;  %p12086_p7 = scmp.ge.s32.totalorder %s18186_s30, 1 }
  0x1a   : > { %s26694_s4 = scalar_select %p18360_p5, 1, 0 }
  0x1b   : > { %s26696_s28 = scalar_select %p18364_p6, 1, 0 }
  0x1c   : > { %26695 = sst [smem:[#allocation10_spill]] %s26694_s4  ;;  %p700_p8 = scmp.lt.s32.totalorder %s18186_s30, 3 }
  0x1d   : > { %26697 = sst [smem:[#allocation11_spill]] %s26696_s28 }
  0x1e   : > { %p701_p9 = pnand %p12086_p7, %p700_p8 }
  0x20   : > { %704 = sbr.rel (%p701_p9) target bundleno = 3827 (0xef3), region = 120 }
  0x25   : > { %s26698_s0 = sld [smem:[#allocation19_spill]]  ;;  %p772_p10 = scmp.lt.s32.totalorder %s18343_s7, 1  ;;  %vm26663_vm0 = vcmask 261120  }
  0x26   : > { %s26699_s28 = sld [smem:[#allocation17_spill]] }
  0x27   : > { %s18378_s8 = scalar_select %p772_p10, %s18343_s7, 1 }
  0x28   : > { %s26774_s3 = sld [smem:[#allocation21_spill]] }
  0x29   : > { %s16708_s27 = sshll.u32 %s18378_s8, 8  ;;  %s26777_s9 = sld [smem:[#allocation23_spill]] }
  0x2a   : > { %s17845_s26 = smul.u32 48, %s18378_s8  ;;  %s26785_s5 = sld [smem:[#allocation18_spill]] }
  0x2b   : > { %v16710_v0 = vld [vmem:[%s26698_s0 + $0x8] sm:$0xff]  ;;  %v16709_v1 = vld [vmem:[%s26698_s0] sm:$0xff]  ;;  %s26789_s0 = sld [smem:[#allocation24_spill]] }
  0x2c   : > { %907 = vmatpush.bf16.msra.mxu0 %v16710_v0  ;;  %17843 = vmatpush.bf16.msra.mxu3 %v16710_v0  ;;  %s18384_s29 = scalar_lea.vmem %s26699_s28, %s16708_s27  ;;  %s26700_s27 = sld [smem:[#allocation20_spill]] }
  0x2d   : > { %v784_v2 = vld [vmem:[%s18384_s29] sm:$0xff]  ;;  %v785_v3 = vld [vmem:[%s18384_s29 + $0x8] sm:$0xff]  ;;  %v786_v5 = vld [vmem:[%s18384_s29 + $0x10] sm:$0xff]  ;;  %s26790_s10 = sld [smem:[#allocation27_spill]] }
  0x2e   : > { %v816_v4 = vpack.c.bf16 %v785_v3, %v784_v2  ;;  %v787_v6 = vld [vmem:[%s18384_s29 + $0x18] sm:$0xff]  ;;  %v788_v8 = vld [vmem:[%s18384_s29 + $0x20] sm:$0xff]  ;;  %v789_v9 = vld [vmem:[%s18384_s29 + $0x28] sm:$0xff]  ;;  %s26792_s28 = sld [smem:[#allocation26_spill]] }
  0x2f   : > { %v817_v7 = vpack.c.bf16 %v787_v6, %v786_v5  ;;  %v818_v10 = vpack.c.bf16 %v789_v9, %v788_v8  ;;  %v790_v11 = vld [vmem:[%s18384_s29 + $0x30] sm:$0xff]  ;;  %v791_v12 = vld [vmem:[%s18384_s29 + $0x38] sm:$0xff]  ;;  %v792_v14 = vld [vmem:[%s18384_s29 + $0x40] sm:$0xff]  ;;  %s26806_s30 = sld [smem:[#allocation28_spill]] }
  0x30   : > { %908 = vmatpush.bf16.msra.mxu0 %v16709_v1  ;;  %17844 = vmatpush.bf16.msra.mxu3 %v16709_v1  ;;  %v819_v13 = vpack.c.bf16 %v791_v12, %v790_v11  ;;  %v793_v15 = vld [vmem:[%s18384_s29 + $0x48] sm:$0xff]  ;;  %v794_v17 = vld [vmem:[%s18384_s29 + $0x50] sm:$0xff]  ;;  %v795_v18 = vld [vmem:[%s18384_s29 + $0x58] sm:$0xff]  ;;  %s19565_s1 = scalar_lea.vmem %s26785_s5, %s17845_s26  ;;  %s18144_s5 = scalar_lea.hbm %s26651_s25, 2 }
  0x31   : > { %v820_v16 = vpack.c.bf16 %v793_v15, %v792_v14  ;;  %v821_v19 = vpack.c.bf16 %v795_v18, %v794_v17  ;;  %v796_v20 = vld [vmem:[%s18384_s29 + $0x60] sm:$0xff]  ;;  %v797_v21 = vld [vmem:[%s18384_s29 + $0x68] sm:$0xff]  ;;  %v798_v23 = vld [vmem:[%s18384_s29 + $0x70] sm:$0xff] }
  0x32   : > { %v822_v22 = vpack.c.bf16 %v797_v21, %v796_v20  ;;  %v799_v24 = vld [vmem:[%s18384_s29 + $0x78] sm:$0xff]  ;;  %v800_v26 = vld [vmem:[%s18384_s29 + $0x80] sm:$0xff]  ;;  %v801_v27 = vld [vmem:[%s18384_s29 + $0x88] sm:$0xff] }
  0x33   : > { %12098 = vmatmul.msk.bf16.vlgmr.msra.gmra.mxu0 %vm26663_vm0, %v816_v4  ;;  %v823_v25 = vpack.c.bf16 %v799_v24, %v798_v23  ;;  %v18415_v28 = vld [vmem:[%s26700_s27] ss:$0 sm:$0xff]  ;;  %v824_v29 = vpack.c.bf16 %v801_v27, %v800_v26  ;;  %v802_v38 = vld [vmem:[%s18384_s29 + $0x90] sm:$0xff]  ;;  %v803_v39 = vld [vmem:[%s18384_s29 + $0x98] sm:$0xff] }
  0x34   : > { %v825_v40 = vpack.c.bf16 %v803_v39, %v802_v38  ;;  %v814_v45 = vld [vmem:[%s18384_s29 + $0xf0] sm:$0xff]  ;;  %v815_v46 = vld [vmem:[%s18384_s29 + $0xf8] sm:$0xff]  ;;  %v804_v59 = vld [vmem:[%s18384_s29 + $0xa0] sm:$0xff] }
  0x35   : > { %v831_v49 = vpack.c.bf16 %v815_v46, %v814_v45  ;;  %v805_v60 = vld [vmem:[%s18384_s29 + $0xa8] sm:$0xff] }
  0x36   : > { %v826_v0 = vpack.c.bf16 %v805_v60, %v804_v59 }
  0x37   : > { %12113 = vmatmul.msk.bf16.vlgmr.msra.gmra.mxu3 %vm26663_vm0, %v831_v49 }
  0x43   : > { %12099 = vmatmul.msk.bf16.gmra.mxu0 %vm26663_vm0, %v817_v7 }
  0x53   : > { %12100 = vmatmul.msk.bf16.gmra.mxu0 %vm26663_vm0, %v818_v10 }
  0x63   : > { %12101 = vmatmul.msk.bf16.gmra.mxu0 %vm26663_vm0, %v819_v13 }
  0x73   : > { %12102 = vmatmul.msk.bf16.gmra.mxu0 %vm26663_vm0, %v820_v16 }
  0x83   : > { %12103 = vmatmul.msk.bf16.gmra.mxu0 %vm26663_vm0, %v821_v19 }
  0x93   : > { %12104 = vmatmul.msk.bf16.gmra.mxu0 %vm26663_vm0, %v822_v22 }
  0xa3   : > { %12105 = vmatmul.msk.bf16.gmra.mxu0 %vm26663_vm0, %v823_v25 }
  0xb0   : > { %v910_v30 = vpop.f32.mrf.mxu0 }
  0xb1   : > { %v18418_v31 = vadd.f32 %v18415_v28, %v910_v30 }
  0xb3   : > { %v12114_v32 = vmul.f32 -1.442695, %v18418_v31  ;;  %12106 = vmatmul.msk.bf16.gmra.mxu0 %vm26663_vm0, %v824_v29 }
  0xb5   : > { %17896 = vpow2.f32 %v12114_v32 }
  0xb8   : > { %v912_v33 = vpop.f32.mrf.mxu0 }
  0xb9   : > { %v18423_v34 = vadd.f32 %v18415_v28, %v912_v33 }
  0xbb   : > { %v17897_v35 = vpop.eup %17896  ;;  %v12115_v36 = vmul.f32 -1.442695, %v18423_v34 }
  0xbc   : > { %v1086_v37 = vadd.f32 1.0, %v17897_v35  ;;  %v806_v35 = vld [vmem:[%s18384_s29 + $0xb0] sm:$0xff] }
  0xbd   : > { %17898 = vpow2.f32 %v12115_v36 }
  0xbe   : > { %17900 = vrcp.f32 %v1086_v37  ;;  %v1129_v63 = vand.u32 2147483648, %v1086_v37  ;;  %vm1123_vm2 = vweird.f32 %v1086_v37  ;;  %v1127_v2 = vand.u32 2147483647, %v1086_v37 }
  0xc0   : > { %v915_v41 = vpop.f32.mrf.mxu0  ;;  %v1130_v11 = vor.u32 1.1754944e-38, %v1129_v63  ;;  %vm1128_vm6 = vcmp.eq.f32.partialorder %v1127_v2, 8.507059e+37  ;;  %v808_v2 = vld [vmem:[%s18384_s29 + $0xc0] sm:$0xff] }
  0xc1   : > { %v18429_v42 = vadd.f32 %v18415_v28, %v915_v41 }
  0xc3   : > { %v17899_v43 = vpop.eup %17898  ;;  %v12116_v44 = vmul.f32 -1.442695, %v18429_v42  ;;  %12107 = vmatmul.msk.bf16.gmra.mxu0 %vm26663_vm0, %v825_v40 }
  0xc4   : > { %v17901_v47 = vpop.eup %17900  ;;  %v1087_v48 = vadd.f32 1.0, %v17899_v43 }
  0xc5   : > { %v1119_v50 = vmul.f32 %v17901_v47, %v1086_v37  ;;  %17902 = vpow2.f32 %v12116_v44  ;;  %vm1124_vm1 = vweird.f32 %v17901_v47 }
  0xc6   : > { %17904 = vrcp.f32 %v1087_v48  ;;  %v1144_v4 = vand.u32 2147483648, %v1087_v48  ;;  %vm18445_vm3 = vmor %vm1123_vm2, %vm1124_vm1  ;;  %v1142_v9 = vand.u32 2147483647, %v1087_v48  ;;  %vm1138_vm5 = vweird.f32 %v1087_v48 }
  0xc7   : > { %v1120_v51 = vsub.f32 1.0, %v1119_v50 }
  0xc8   : > { %v917_v52 = vpop.f32.mrf.mxu0  ;;  %v1145_v16 = vor.u32 1.1754944e-38, %v1144_v4  ;;  %vm1143_vm8 = vcmp.eq.f32.partialorder %v1142_v9, 8.507059e+37 }
  0xc9   : > { %v18437_v53 = vadd.f32 %v18415_v28, %v917_v52  ;;  %v1121_v54 = vmul.f32 %v17901_v47, %v1120_v51 }
  0xcb   : > { %v17903_v55 = vpop.eup %17902  ;;  %v12117_v56 = vmul.f32 -1.442695, %v18437_v53  ;;  %v1122_v62 = vadd.f32 %v17901_v47, %v1121_v54 }
  0xcc   : > { %v17905_v57 = vpop.eup %17904  ;;  %v18440_v58 = vadd.f32 1.0, %v17903_v55 }
  0xcd   : > { %17906 = vpow2.f32 %v12117_v56  ;;  %v1134_v61 = vmul.f32 %v17905_v57, %v1087_v48  ;;  %vm1139_vm4 = vweird.f32 %v17905_v57  ;;  %v1126_v8 = vsel %vm18445_vm3, %v17901_v47, %v1122_v62 }
  0xce   : > { %17908 = vrcp.f32 %v18440_v58  ;;  %vm1140_vm7 = vmor %vm1138_vm5, %vm1139_vm4  ;;  %v1131_v17 = vsel %vm1128_vm6, %v1130_v11, %v1126_v8  ;;  %vm1153_vm10 = vweird.f32 %v18440_v58  ;;  %v1157_v40 = vand.u32 2147483647, %v18440_v58 }
  0xcf   : > { %v1135_v1 = vsub.f32 1.0, %v1134_v61  ;;  %v18458_v22 = vmul.f32 %v1131_v17, %v18418_v31  ;;  %v807_v31 = vld [vmem:[%s18384_s29 + $0xb8] sm:$0xff] }
  0xd0   : > { %v920_v3 = vpop.f32.mrf.mxu0  ;;  %v827_v38 = vpack.c.bf16 %v807_v31, %v806_v35  ;;  %vm1158_vm14 = vcmp.eq.f32.partialorder %v1157_v40, 8.507059e+37  ;;  %v812_v31 = vld [vmem:[%s18384_s29 + $0xe0] sm:$0xff] }
  0xd1   : > { %v18450_v6 = vadd.f32 %v18415_v28, %v920_v3  ;;  %v1136_v7 = vmul.f32 %v17905_v57, %v1135_v1  ;;  %v809_v3 = vld [vmem:[%s18384_s29 + $0xc8] sm:$0xff] }
  0xd2   : > { %v828_v8 = vpack.c.bf16 %v809_v3, %v808_v2 }
  0xd3   : > { %v17907_v10 = vpop.eup %17906  ;;  %v12118_v12 = vmul.f32 -1.442695, %v18450_v6  ;;  %12108 = vmatmul.msk.bf16.gmra.mxu0 %vm26663_vm0, %v826_v0  ;;  %v1137_v13 = vadd.f32 %v17905_v57, %v1136_v7 }
  0xd4   : > { %v17909_v14 = vpop.eup %17908  ;;  %v1089_v15 = vadd.f32 1.0, %v17907_v10 }
  0xd5   : > { %v1149_v18 = vmul.f32 %v17909_v14, %v18440_v58  ;;  %17910 = vpow2.f32 %v12118_v12  ;;  %v1141_v19 = vsel %vm1140_vm7, %v17905_v57, %v1137_v13  ;;  %vm1154_vm9 = vweird.f32 %v17909_v14 }
  0xd6   : > { %17912 = vrcp.f32 %v1089_v15  ;;  %v1146_v21 = vsel %vm1143_vm8, %v1145_v16, %v1141_v19  ;;  %vm18479_vm11 = vmor %vm1153_vm10, %vm1154_vm9  ;;  %v1174_v45 = vand.u32 2147483648, %v1089_v15  ;;  %v1172_v47 = vand.u32 2147483647, %v1089_v15 }
  0xd7   : > { %v1150_v20 = vsub.f32 1.0, %v1149_v18  ;;  %v18461_v24 = vmul.f32 %v1146_v21, %v18423_v34  ;;  %v1159_v34 = vand.u32 2147483648, %v18440_v58  ;;  %vm1168_vm13 = vweird.f32 %v1089_v15 }
  0xd8   : > { %v922_v23 = vpop.f32.mrf.mxu0  ;;  %v1175_v57 = vor.u32 1.1754944e-38, %v1174_v45  ;;  %vm1173_vm1 = vcmp.eq.f32.partialorder %v1172_v47, 8.507059e+37 }
  0xd9   : > { %v18464_v25 = vadd.f32 %v18415_v28, %v922_v23  ;;  %v1151_v26 = vmul.f32 %v17909_v14, %v1150_v20  ;;  %v1160_v49 = vor.u32 1.1754944e-38, %v1159_v34 }
  0xdb   : > { %v17911_v29 = vpop.eup %17910  ;;  %v12119_v30 = vmul.f32 -1.442695, %v18464_v25  ;;  %v1152_v37 = vadd.f32 %v17909_v14, %v1151_v26 }
  0xdc   : > { %v17913_v32 = vpop.eup %17912  ;;  %v18469_v33 = vadd.f32 1.0, %v17911_v29  ;;  %v810_v29 = vld [vmem:[%s18384_s29 + $0xd0] sm:$0xff] }
  0xdd   : > { %17914 = vpow2.f32 %v12119_v30  ;;  %v1164_v36 = vmul.f32 %v17913_v32, %v1089_v15  ;;  %vm1169_vm12 = vweird.f32 %v17913_v32  ;;  %v1156_v46 = vsel %vm18479_vm11, %v17909_v14, %v1152_v37  ;;  %v811_v30 = vld [vmem:[%s18384_s29 + $0xd8] sm:$0xff] }
  0xde   : > { %17916 = vrcp.f32 %v18469_v33  ;;  %vm1170_vm15 = vmor %vm1168_vm13, %vm1169_vm12  ;;  %v1161_v54 = vsel %vm1158_vm14, %v1160_v49, %v1156_v46  ;;  %v1189_v7 = vand.u32 2147483648, %v18469_v33  ;;  %vm1183_vm3 = vweird.f32 %v18469_v33 }
  0xdf   : > { %v1165_v39 = vsub.f32 1.0, %v1164_v36  ;;  %v18488_v60 = vmul.f32 %v1161_v54, %v18429_v42  ;;  %v1187_v42 = vand.u32 2147483647, %v18469_v33  ;;  %v813_v36 = vld [vmem:[%s18384_s29 + $0xe8] sm:$0xff]  ;;  %s26787_s29 = sld [smem:[#allocation22_spill]] }
  0xe0   : > { %v18477_v41 = vpop.f32.mrf.mxu0  ;;  %v1190_v14 = vor.u32 1.1754944e-38, %v1189_v7  ;;  %v830_v37 = vpack.c.bf16 %v813_v36, %v812_v31 }
  0xe1   : > { %v1166_v44 = vmul.f32 %v17913_v32, %v1165_v39  ;;  %vm1188_vm7 = vcmp.eq.f32.partialorder %v1187_v42, 8.507059e+37 }
  0xe3   : > { %v17915_v48 = vpop.eup %17914  ;;  %12109 = vmatmul.msk.bf16.gmra.mxu0 %vm26663_vm0, %v827_v38  ;;  %v1167_v50 = vadd.f32 %v17913_v32, %v1166_v44 }
  0xe4   : > { %v17917_v51 = vpop.eup %17916  ;;  %v1091_v52 = vadd.f32 1.0, %v17915_v48 }
  0xe5   : > { %v1179_v55 = vmul.f32 %v17917_v51, %v18469_v33  ;;  %v1171_v56 = vsel %vm1170_vm15, %v17913_v32, %v1167_v50  ;;  %vm1184_vm2 = vweird.f32 %v17917_v51  ;;  %v829_v32 = vpack.c.bf16 %v811_v30, %v810_v29  ;;  %s26788_s26 = smov %s26787_s29 }
  0xe6   : > { %17918 = vrcp.f32 %v1091_v52  ;;  %v1176_v59 = vsel %vm1173_vm1, %v1175_v57, %v1171_v56  ;;  %vm1185_vm4 = vmor %vm1183_vm3, %vm1184_vm2  ;;  %v1204_v11 = vand.u32 2147483648, %v1091_v52  ;;  %v1202_v13 = vand.u32 2147483647, %v1091_v52 }
  0xe7   : > { %v1180_v58 = vsub.f32 1.0, %v1179_v55  ;;  %v18491_v62 = vmul.f32 %v1176_v59, %v18437_v53  ;;  %vm1198_vm6 = vweird.f32 %v1091_v52 }
  0xe8   : > { %v927_v61 = vpop.f32.mrf.mxu0  ;;  %v1205_v18 = vor.u32 1.1754944e-38, %v1204_v11  ;;  %vm1203_vm9 = vcmp.eq.f32.partialorder %v1202_v13, 8.507059e+37 }
  0xe9   : > { %v1181_v63 = vmul.f32 %v17917_v51, %v1180_v58 }
  0xeb   : > { %v1182_v5 = vadd.f32 %v17917_v51, %v1181_v63 }
  0xec   : > { %v17919_v1 = vpop.eup %17918 }
  0xed   : > { %v1194_v4 = vmul.f32 %v17919_v1, %v1091_v52  ;;  %vm1199_vm5 = vweird.f32 %v17919_v1  ;;  %v1186_v12 = vsel %vm1185_vm4, %v17917_v51, %v1182_v5 }
  0xee   : > { %vm1200_vm8 = vmor %vm1198_vm6, %vm1199_vm5  ;;  %v1191_v16 = vsel %vm1188_vm7, %v1190_v14, %v1186_v12 }
  0xef   : > { %v1195_v9 = vsub.f32 1.0, %v1194_v4  ;;  %v18502_v20 = vmul.f32 %v1191_v16, %v18450_v6  ;;  %v18516_v6 = vadd.f32 %v18415_v28, %v18477_v41 }
  0xf0   : > { %v930_v53 = vpop.f32.mrf.mxu0 }
  0xf1   : > { %v1196_v10 = vmul.f32 %v17919_v1, %v1195_v9  ;;  %v18522_v38 = vadd.f32 %v18415_v28, %v930_v53  ;;  %v12120_v39 = vmul.f32 -1.442695, %v18516_v6 }
  0xf3   : > { %12110 = vmatmul.msk.bf16.gmra.mxu0 %vm26663_vm0, %v828_v8  ;;  %v1197_v15 = vadd.f32 %v17919_v1, %v1196_v10  ;;  %v12122_v44 = vmul.f32 -1.442695, %v18522_v38  ;;  %17920 = vpow2.f32 %v12120_v39 }
  0xf5   : > { %v1201_v17 = vsel %vm1200_vm8, %v17919_v1, %v1197_v15 }
  0xf6   : > { %v1206_v19 = vsel %vm1203_vm9, %v1205_v18, %v1201_v17 }
  0xf7   : > { %v18505_v23 = vmul.f32 %v1206_v19, %v18464_v25  ;;  %v18519_v25 = vadd.f32 %v18415_v28, %v927_v61 }
  0xf8   : > { %v932_v21 = vpop.f32.mrf.mxu0 }
  0xf9   : > { %v18526_v40 = vadd.f32 %v18415_v28, %v932_v21  ;;  %v12121_v41 = vmul.f32 -1.442695, %v18519_v25  ;;  %v17921_v55 = vpop.eup %17920 }
  0xfa   : > { %v18548_v58 = vadd.f32 1.0, %v17921_v55 }
  0xfb   : > { %v12123_v46 = vmul.f32 -1.442695, %v18526_v40  ;;  %17922 = vpow2.f32 %v12121_v41 }
  0xfc   : > { %17924 = vpow2.f32 %v12122_v44 }
  0xfd   : > { %17926 = vpow2.f32 %v12123_v46 }
 0x100   : > { %v935_v33 = vpop.f32.mrf.mxu0 }
 0x101   : > { %v18530_v43 = vadd.f32 %v18415_v28, %v935_v33  ;;  %v17923_v56 = vpop.eup %17922 }
 0x102   : > { %v17925_v57 = vpop.eup %17924  ;;  %v18553_v2 = vadd.f32 1.0, %v17923_v56 }
 0x103   : > { %12111 = vmatmul.msk.bf16.gmra.mxu0 %vm26663_vm0, %v829_v32  ;;  %v12124_v48 = vmul.f32 -1.442695, %v18530_v43  ;;  %v17927_v61 = vpop.eup %17926  ;;  %v18555_v4 = vadd.f32 1.0, %v17925_v57 }
 0x104   : > { %v18559_v8 = vadd.f32 1.0, %v17927_v61 }
 0x105   : > { %17928 = vpow2.f32 %v12124_v48 }
 0x106   : > { %vm1258_vm9 = vweird.f32 %v18559_v8 }
 0x108   : > { %v937_v35 = vpop.f32.mrf.mxu0 }
 0x109   : > { %v18539_v47 = vadd.f32 %v18415_v28, %v937_v35 }
 0x10b   : > { %v12125_v52 = vmul.f32 -1.442695, %v18539_v47  ;;  %v17929_v1 = vpop.eup %17928 }
 0x10c   : > { %v18561_v42 = vadd.f32 1.0, %v17929_v1 }
 0x10e   : > { %vm1273_vm3 = vweird.f32 %v18561_v42 }
 0x110   : > { %v940_v34 = vpop.f32.mrf.mxu0 }
 0x111   : > { %v18535_v45 = vadd.f32 %v18415_v28, %v940_v34 }
 0x113   : > { %12112 = vmatmul.msk.bf16.gmra.mxu0 %vm26663_vm0, %v830_v37  ;;  %v12126_v51 = vmul.f32 -1.442695, %v18535_v45 }
 0x118   : > { %v942_v49 = vpop.f32.mrf.mxu0 }
 0x119   : > { %v18543_v50 = vadd.f32 %v18415_v28, %v942_v49 }
 0x11b   : > { %v12127_v54 = vmul.f32 -1.442695, %v18543_v50 }
 0x11d   : > { %17930 = vpow2.f32 %v12127_v54 }
 0x11e   : > { %17932 = vpow2.f32 %v12126_v51 }
 0x11f   : > { %17934 = vpow2.f32 %v12125_v52 }
 0x120   : > { %v945_v59 = vpop.f32.mrf.mxu0  ;;  %17936 = vrcp.f32 %v18548_v58 }
 0x121   : > { %v18551_v63 = vadd.f32 %v18415_v28, %v945_v59 }
 0x123   : > { %v17931_v3 = vpop.eup %17930  ;;  %v12128_v5 = vmul.f32 -1.442695, %v18551_v63 }
 0x124   : > { %v17933_v7 = vpop.eup %17932  ;;  %v18564_v53 = vadd.f32 1.0, %v17931_v3 }
 0x125   : > { %v17935_v9 = vpop.eup %17934  ;;  %17938 = vpow2.f32 %v12128_v5  ;;  %v18567_v10 = vadd.f32 1.0, %v17933_v7 }
 0x126   : > { %17940 = vrcp.f32 %v18553_v2  ;;  %v18570_v11 = vadd.f32 1.0, %v17935_v9  ;;  %v18576_v14 = vpop.eup %17936  ;;  %vm1318_vm1 = vweird.f32 %v18564_v53  ;;  %v1322_v26 = vand.u32 2147483647, %v18564_v53 }
 0x127   : > { %17942 = vrcp.f32 %v18555_v4  ;;  %v1209_v35 = vmul.f32 %v18576_v14, %v18548_v58  ;;  %vm1303_vm10 = vweird.f32 %v18567_v10  ;;  %v1307_v7 = vand.u32 2147483647, %v18567_v10 }
 0x128   : > { %17944 = vrcp.f32 %v18559_v8  ;;  %v947_v12 = vpop.f32.mrf.mxu0  ;;  %vm1288_vm14 = vweird.f32 %v18570_v11 }
 0x129   : > { %17946 = vrcp.f32 %v18561_v42  ;;  %v18574_v13 = vadd.f32 %v18415_v28, %v947_v12  ;;  %v1210_v51 = vsub.f32 1.0, %v1209_v35 }
 0x12a   : > { %17948 = vrcp.f32 %v18564_v53 }
 0x12b   : > { %v17939_v15 = vpop.eup %17938  ;;  %17950 = vrcp.f32 %v18567_v10  ;;  %v12129_v16 = vmul.f32 -1.442695, %v18574_v13  ;;  %v18628_v9 = vmul.f32 %v18576_v14, %v1210_v51 }
 0x12c   : > { %v18581_v17 = vpop.eup %17940  ;;  %17952 = vrcp.f32 %v18570_v11  ;;  %v18584_v18 = vadd.f32 1.0, %v17939_v15 }
 0x12d   : > { %v18586_v19 = vpop.eup %17942  ;;  %17954 = vpow2.f32 %v12129_v16  ;;  %v1224_v31 = vmul.f32 %v18581_v17, %v18553_v2 }
 0x12e   : > { %v18588_v21 = vpop.eup %17944  ;;  %17956 = vrcp.f32 %v18584_v18  ;;  %v1239_v37 = vmul.f32 %v18586_v19, %v18555_v4  ;;  %vm1333_vm4 = vweird.f32 %v18584_v18 }
 0x12f   : > { %v18591_v29 = vpop.eup %17946  ;;  %v1254_v41 = vmul.f32 %v18588_v21, %v18559_v8  ;;  %v1225_v55 = vsub.f32 1.0, %v1224_v31  ;;  %vm1259_vm5 = vweird.f32 %v18588_v21 }
 0x130   : > { %v18593_v30 = vpop.eup %17948  ;;  %v18595_v32 = vpop.f32.mrf.mxu0  ;;  %v1269_v46 = vmul.f32 %v18591_v29, %v18561_v42  ;;  %v1240_v56 = vsub.f32 1.0, %v1239_v37  ;;  %vm1274_vm12 = vweird.f32 %v18591_v29 }
 0x131   : > { %v18597_v33 = vpop.eup %17950  ;;  %v1314_v39 = vmul.f32 %v18593_v30, %v18564_v53  ;;  %v1255_v61 = vsub.f32 1.0, %v1254_v41  ;;  %v18632_v16 = vmul.f32 %v18581_v17, %v1225_v55  ;;  %v1292_v41 = vand.u32 2147483647, %v18570_v11 }
 0x132   : > { %v18603_v36 = vpop.eup %17952  ;;  %v1299_v48 = vmul.f32 %v18597_v33, %v18567_v10  ;;  %v1270_v1 = vsub.f32 1.0, %v1269_v46  ;;  %v18635_v35 = vmul.f32 %v18586_v19, %v1240_v56  ;;  %v1294_v46 = vand.u32 2147483648, %v18570_v11 }
 0x133   : > { %v17955_v34 = vpop.eup %17954  ;;  %v1284_v54 = vmul.f32 %v18603_v36, %v18570_v11  ;;  %v1315_v59 = vsub.f32 1.0, %v1314_v39  ;;  %vm1289_vm11 = vweird.f32 %v18603_v36  ;;  %vm1304_vm15 = vweird.f32 %v18597_v33 }
 0x134   : > { %v18611_v44 = vpop.eup %17956  ;;  %v18617_v49 = vadd.f32 1.0, %v17955_v34  ;;  %v1300_v3 = vsub.f32 1.0, %v1299_v48  ;;  %v1256_v48 = vmul.f32 %v18588_v21, %v1255_v61  ;;  %vm1319_vm2 = vweird.f32 %v18593_v30 }
 0x135   : > { %v1329_v52 = vmul.f32 %v18611_v44, %v18584_v18  ;;  %v1285_v15 = vsub.f32 1.0, %v1284_v54  ;;  %v1316_v39 = vmul.f32 %v18593_v30, %v1315_v59  ;;  %vm1334_vm13 = vweird.f32 %v18611_v44 }
 0x136   : > { %17958 = vrcp.f32 %v18617_v49  ;;  %v1301_v54 = vmul.f32 %v18597_v33, %v1300_v3  ;;  %v1339_v59 = vand.u32 2147483648, %v18584_v18  ;;  %v1337_v61 = vand.u32 2147483647, %v18584_v18  ;;  %vm18668_vm6 = vmor %vm1333_vm4, %vm1334_vm13 }
 0x137   : > { %v1330_v57 = vsub.f32 1.0, %v1329_v52  ;;  %v1271_v52 = vmul.f32 %v18591_v29, %v1270_v1  ;;  %v1317_v3 = vadd.f32 %v18593_v30, %v1316_v39  ;;  %v1354_v0 = vand.u32 2147483648, %v18617_v49  ;;  %vm18687_vm13 = vmor %vm1318_vm1, %vm1319_vm2 }
 0x138   : > { %v18624_v5 = vpop.f32.mrf.mxu0  ;;  %v1324_v18 = vand.u32 2147483648, %v18564_v53  ;;  %v1309_v34 = vand.u32 2147483648, %v18567_v10  ;;  %v1340_v31 = vor.u32 1.1754944e-38, %v1339_v59  ;;  %vm1338_vm0 = vcmp.eq.f32.partialorder %v1337_v61, 8.507059e+37 }
 0x139   : > { %v1331_v12 = vmul.f32 %v18611_v44, %v1330_v57  ;;  %v1286_v57 = vmul.f32 %v18603_v36, %v1285_v15  ;;  %vm1348_vm7 = vweird.f32 %v18617_v49  ;;  %v1321_v53 = vsel %vm18687_vm13, %v18593_v30, %v1317_v3 }
 0x13a   : > { %vm1229_vm1 = vweird.f32 %v18581_v17  ;;  %v1355_v10 = vor.u32 1.1754944e-38, %v1354_v0  ;;  %vm1323_vm4 = vcmp.eq.f32.partialorder %v1322_v26, 8.507059e+37  ;;  %vm1228_vm13 = vweird.f32 %v18553_v2 }
 0x13b   : > { %v1332_v55 = vadd.f32 %v18611_v44, %v1331_v12  ;;  %v1302_v12 = vadd.f32 %v18597_v33, %v1301_v54  ;;  %v1287_v27 = vadd.f32 %v18603_v36, %v1286_v57  ;;  %v1272_v57 = vadd.f32 %v18591_v29, %v1271_v52 }
 0x13c   : > { %v17959_v51 = vpop.eup %17958  ;;  %v1310_v30 = vor.u32 1.1754944e-38, %v1309_v34 }
 0x13d   : > { %v1344_v56 = vmul.f32 %v17959_v51, %v18617_v49  ;;  %v1336_v39 = vsel %vm18668_vm6, %v18611_v44, %v1332_v55  ;;  %vm1349_vm8 = vweird.f32 %v17959_v51  ;;  %vm18697_vm6 = vmor %vm1303_vm10, %vm1304_vm15  ;;  %vm1214_vm10 = vweird.f32 %v18576_v14 }
 0x13e   : > { %v1341_v59 = vsel %vm1338_vm0, %v1340_v31, %v1336_v39  ;;  %vm1350_vm2 = vmor %vm1348_vm7, %vm1349_vm8  ;;  %v1306_v61 = vsel %vm18697_vm6, %v18597_v33, %v1302_v12  ;;  %v1257_v31 = vadd.f32 %v18588_v21, %v1256_v48  ;;  %vm1308_vm7 = vcmp.eq.f32.partialorder %v1307_v7, 8.507059e+37 }
 0x13f   : > { %v1345_v1 = vsub.f32 1.0, %v1344_v56  ;;  %v1352_v56 = vand.u32 2147483647, %v18617_v49  ;;  %vm18717_vm0 = vmor %vm1288_vm14, %vm1289_vm11  ;;  %v1612_v33 = vmul.f32 %v1341_v59, %v18551_v63  ;;  %v1311_v7 = vsel %vm1308_vm7, %v1310_v30, %v1306_v61 }
 0x140   : > { %v18664_v15 = vpop.f32.mrf.mxu0  ;;  %v1291_v34 = vsel %vm18717_vm0, %v18603_v36, %v1287_v27  ;;  %vm18733_vm11 = vmor %vm1273_vm3, %vm1274_vm12  ;;  %v1295_v63 = vor.u32 1.1754944e-38, %v1294_v46  ;;  %vm1293_vm12 = vcmp.eq.f32.partialorder %v1292_v41, 8.507059e+37  ;;  %v1247_v39 = vand.u32 2147483647, %v18555_v4 }
 0x141   : > { %v1346_v54 = vmul.f32 %v17959_v51, %v1345_v1  ;;  %v1325_v1 = vor.u32 1.1754944e-38, %v1324_v18  ;;  %vm1353_vm15 = vcmp.eq.f32.partialorder %v1352_v56, 8.507059e+37  ;;  %v1276_v36 = vsel %vm18733_vm11, %v18591_v29, %v1272_v57  ;;  %v985_v18 = vpop.f32.mrf.mxu3  ;;  %vm18756_vm14 = vmor %vm1258_vm9, %vm1259_vm5 }
 0x142   : > { %v26715_v56 = vand.u32 2147483648, %v18561_v42  ;;  %v1296_v27 = vsel %vm1293_vm12, %v1295_v63, %v1291_v34  ;;  %v1610_v11 = vmul.f32 %v1311_v7, %v18535_v45  ;;  %v1261_v41 = vsel %vm18756_vm14, %v18588_v21, %v1257_v31 }
 0x143   : > { %v1347_v55 = vadd.f32 %v17959_v51, %v1346_v54  ;;  %v1326_v3 = vsel %vm1323_vm4, %v1325_v1, %v1321_v53  ;;  %v1249_v54 = vand.u32 2147483648, %v18555_v4  ;;  %v1227_v44 = vadd.f32 %v18581_v17, %v18632_v16 }
 0x144   : > { %v1611_v12 = vmul.f32 %v1326_v3, %v18543_v50  ;;  %v1280_v46 = vor.u32 1.1754944e-38, %v26715_v56  ;;  %v26718_v50 = vand.u32 2147483647, %v18561_v42  ;;  %vm26719_vm5 = vweird.f32 %v18586_v19 }
 0x145   : > { %v1351_v49 = vsel %vm1350_vm2, %v17959_v51, %v1347_v55  ;;  %v1242_v51 = vadd.f32 %v18586_v19, %v18635_v35  ;;  %v1212_v55 = vadd.f32 %v18576_v14, %v18628_v9  ;;  %vm26720_vm8 = vweird.f32 %v18555_v4  ;;  %vm18791_vm2 = vmor %vm1228_vm13, %vm1229_vm1 }
 0x146   : > { %v1356_v37 = vsel %vm1353_vm15, %v1355_v10, %v1351_v49  ;;  %vm1278_vm3 = vcmp.eq.f32.partialorder %v26718_v50, 8.507059e+37  ;;  %vm18774_vm9 = vmor %vm26720_vm8, %vm26719_vm5  ;;  %v1234_v57 = vand.u32 2147483648, %v18553_v2  ;;  %v1636_v16 = vpack.c.bf16 %v1611_v12, %v1610_v11 }
 0x147   : > { %v1613_v26 = vmul.f32 %v1356_v37, %v18574_v13  ;;  %v1264_v13 = vand.u32 2147483648, %v18559_v8  ;;  %v1281_v45 = vsel %vm1278_vm3, %v1280_v46, %v1276_v36  ;;  %v1246_v21 = vsel %vm18774_vm9, %v18586_v19, %v1242_v51 }
 0x148   : > { %v18737_v48 = vpop.f32.mrf.mxu0  ;;  %v1609_v59 = vmul.f32 %v1296_v27, %v18539_v47  ;;  %v26723_v9 = vand.u32 2147483647, %v18559_v8  ;;  %vm1213_vm6 = vweird.f32 %v18548_v58  ;;  %v1219_v4 = vand.u32 2147483648, %v18548_v58 }
 0x149   : > { %v1637_v35 = vpack.c.bf16 %v1613_v26, %v1612_v33  ;;  %v1265_v53 = vor.u32 1.1754944e-38, %v1264_v13  ;;  %v1250_v10 = vor.u32 1.1754944e-38, %v1249_v54  ;;  %v1217_v19 = vand.u32 2147483647, %v18548_v58  ;;  %vm18802_vm0 = vmor %vm1213_vm6, %vm1214_vm10 }
 0x14a   : > { %vm1263_vm4 = vcmp.eq.f32.partialorder %v26723_v9, 8.507059e+37  ;;  %vm1248_vm15 = vcmp.eq.f32.partialorder %v1247_v39, 8.507059e+37  ;;  %v1608_v47 = vmul.f32 %v1281_v45, %v18530_v43  ;;  %v1231_v8 = vsel %vm18791_vm2, %v18581_v17, %v1227_v44  ;;  %v987_v17 = vpop.f32.mrf.mxu3 }
 0x14b   : > { %1646 = vmatpush.bf16.msra.mxu1 %v1637_v35  ;;  %v1266_v1 = vsel %vm1263_vm4, %v1265_v53, %v1261_v41  ;;  %v1251_v30 = vsel %vm1248_vm15, %v1250_v10, %v1246_v21  ;;  %v1235_v3 = vor.u32 1.1754944e-38, %v1234_v57  ;;  %v1216_v58 = vsel %vm18802_vm0, %v18576_v14, %v1212_v55 }
 0x14c   : > { %v1635_v43 = vpack.c.bf16 %v1609_v59, %v1608_v47  ;;  %v1607_v0 = vmul.f32 %v1266_v1, %v18526_v40  ;;  %v26728_v31 = vand.u32 2147483647, %v18553_v2  ;;  %v1220_v33 = vor.u32 1.1754944e-38, %v1219_v4 }
 0x14d   : > { %v986_v34 = vadd.f32 %v18415_v28, %v985_v18  ;;  %v988_v51 = vadd.f32 %v18415_v28, %v987_v17  ;;  %vm1218_vm10 = vcmp.eq.f32.partialorder %v1217_v19, 8.507059e+37  ;;  %v1606_v52 = vmul.f32 %v1251_v30, %v18522_v38 }
 0x14e   : > { %vm1233_vm1 = vcmp.eq.f32.partialorder %v26728_v31, 8.507059e+37  ;;  %v1221_v7 = vsel %vm1218_vm10, %v1220_v33, %v1216_v58  ;;  %v26729_v38 = vpack.c.bf16 %v18505_v23, %v18502_v20  ;;  %v26731_v46 = vpack.c.bf16 %v18461_v24, %v18458_v22 }
 0x14f   : > { %1647 = vmatpush.bf16.msra.mxu1 %v1636_v16  ;;  %v1236_v26 = vsel %vm1233_vm1, %v1235_v3, %v1231_v8  ;;  %v12144_v63 = vmul.f32 -1.442695, %v986_v34  ;;  %v12145_v14 = vmul.f32 -1.442695, %v988_v51  ;;  %v1634_v13 = vpack.c.bf16 %v1607_v0, %v1606_v52 }
 0x150   : > { %v18806_v37 = vpop.f32.mrf.mxu0  ;;  %v1605_v40 = vmul.f32 %v1236_v26, %v18519_v25  ;;  %v1604_v2 = vmul.f32 %v1221_v7, %v18516_v6  ;;  %v26730_v6 = vpack.c.bf16 %v18491_v62, %v18488_v60  ;;  %v18830_v19 = vadd.f32 %v18415_v28, %v18595_v32 }
 0x151   : > { %17960 = vpow2.f32 %v12144_v63  ;;  %v18834_v47 = vadd.f32 %v18415_v28, %v18624_v5  ;;  %v18838_v8 = vadd.f32 %v18415_v28, %v18664_v15  ;;  %v18842_v49 = vadd.f32 %v18415_v28, %v18737_v48 }
 0x152   : > { %17962 = vpow2.f32 %v12145_v14  ;;  %v1633_v35 = vpack.c.bf16 %v1605_v40, %v1604_v2  ;;  %26732 = vst [vmem:[#allocation12_spill] sm:$0xff] %v18830_v19  ;;  %v12130_v30 = vmul.f32 -1.442695, %v18830_v19  ;;  %v18847_v3 = vadd.f32 %v18415_v28, %v18806_v37 }
 0x153   : > { %1648 = vmatpush.bf16.msra.mxu1 %v1635_v43  ;;  %26733 = vst [vmem:[#allocation13_spill] sm:$0xff] %v18834_v47  ;;  %v12131_v32 = vmul.f32 -1.442695, %v18834_v47  ;;  %v12132_v5 = vmul.f32 -1.442695, %v18838_v8 }
 0x154   : > { %26734 = vst [vmem:[#allocation14_spill] sm:$0xff] %v18838_v8  ;;  %v12133_v15 = vmul.f32 -1.442695, %v18842_v49  ;;  %v12134_v48 = vmul.f32 -1.442695, %v18847_v3 }
 0x155   : > { %26735 = vst [vmem:[#allocation15_spill] sm:$0xff] %v18842_v49 }
 0x156   : > { %26736 = vst [vmem:[#allocation16_spill] sm:$0xff] %v18847_v3  ;;  %v18188_v3 = vmov 998259584  }
 0x157   : > { %1649 = vmatpush.bf16.msra.mxu1 %v1634_v13  ;;  %v17961_v12 = vpop.eup %17960 }
 0x158   : > { %v962_v36 = vpop.f32.mrf.mxu0  ;;  %v17963_v18 = vpop.eup %17962  ;;  %v1116_v39 = vadd.f32 1.0, %v17961_v12 }
 0x159   : > { %v1117_v54 = vadd.f32 1.0, %v17963_v18  ;;  %v18852_v43 = vadd.f32 %v18415_v28, %v962_v36 }
 0x15a   : > { %17964 = vrcp.f32 %v1116_v39  ;;  %v1579_v23 = vand.u32 2147483648, %v1116_v39  ;;  %vm1573_vm13 = vweird.f32 %v1116_v39  ;;  %v1577_v55 = vand.u32 2147483647, %v1116_v39 }
 0x15b   : > { %1650 = vmatpush.bf16.msra.mxu1 %v1633_v35  ;;  %17966 = vrcp.f32 %v1117_v54  ;;  %vm1588_vm14 = vweird.f32 %v1117_v54  ;;  %v1592_v24 = vand.u32 2147483647, %v1117_v54  ;;  %v1594_v21 = vand.u32 2147483648, %v1117_v54 }
 0x15c   : > { %v1580_v42 = vor.u32 1.1754944e-38, %v1579_v23  ;;  %vm1578_vm12 = vcmp.eq.f32.partialorder %v1577_v55, 8.507059e+37  ;;  %17968 = vpow2.f32 %v12130_v30  ;;  %v12135_v17 = vmul.f32 -1.442695, %v18852_v43 }
 0x15d   : > { %vm1593_vm8 = vcmp.eq.f32.partialorder %v1592_v24, 8.507059e+37  ;;  %v1595_v59 = vor.u32 1.1754944e-38, %v1594_v21  ;;  %17970 = vpow2.f32 %v12131_v32 }
 0x15e   : > { %17972 = vpow2.f32 %v12132_v5 }
 0x15f   : > { %1651 = vmatpush.bf16.msra.mxu1 %v26729_v38  ;;  %17974 = vpow2.f32 %v12133_v15 }
 0x160   : > { %v965_v56 = vpop.f32.mrf.mxu0  ;;  %v17965_v25 = vpop.eup %17964  ;;  %17976 = vpow2.f32 %v12134_v48 }
 0x161   : > { %v17967_v27 = vpop.eup %17966  ;;  %v1569_v50 = vmul.f32 %v17965_v25, %v1116_v39  ;;  %vm1574_vm7 = vweird.f32 %v17965_v25  ;;  %v18856_v0 = vadd.f32 %v18415_v28, %v965_v56  ;;  %17978 = vpow2.f32 %v12135_v17 }
 0x162   : > { %v1584_v11 = vmul.f32 %v17967_v27, %v1117_v54  ;;  %vm1575_vm11 = vmor %vm1573_vm13, %vm1574_vm7  ;;  %vm1589_vm3 = vweird.f32 %v17967_v27  ;;  %v17969_v63 = vpop.eup %17968 }
 0x163   : > { %1652 = vmatpush.bf16.msra.mxu1 %v26730_v6  ;;  %v1570_v20 = vsub.f32 1.0, %v1569_v50  ;;  %vm1590_vm5 = vmor %vm1588_vm14, %vm1589_vm3  ;;  %v12136_v33 = vmul.f32 -1.442695, %v18856_v0  ;;  %v17971_v13 = vpop.eup %17970  ;;  %v18881_v18 = vadd.f32 1.0, %v17969_v63 }
 0x164   : > { %v1585_v44 = vsub.f32 1.0, %v1584_v11  ;;  %v17973_v2 = vpop.eup %17972  ;;  %v18883_v39 = vadd.f32 1.0, %v17971_v13 }
 0x165   : > { %v1571_v41 = vmul.f32 %v17965_v25, %v1570_v20  ;;  %17980 = vpow2.f32 %v12136_v33  ;;  %v17975_v12 = vpop.eup %17974  ;;  %v18885_v54 = vadd.f32 1.0, %v17973_v2 }
 0x166   : > { %v1586_v45 = vmul.f32 %v17967_v27, %v1585_v44  ;;  %v17977_v38 = vpop.eup %17976  ;;  %v18887_v6 = vadd.f32 1.0, %v17975_v12 }
 0x167   : > { %1653 = vmatpush.bf16.msra.mxu1 %v26731_v46  ;;  %v1572_v60 = vadd.f32 %v17965_v25, %v1571_v41  ;;  %v17979_v56 = vpop.eup %17978  ;;  %v18890_v46 = vadd.f32 1.0, %v17977_v38 }
 0x168   : > { %v967_v29 = vpop.f32.mrf.mxu0  ;;  %v1587_v57 = vadd.f32 %v17967_v27, %v1586_v45  ;;  %v18897_v20 = vadd.f32 1.0, %v17979_v56 }
 0x169   : > { %v1576_v22 = vsel %vm1575_vm11, %v17965_v25, %v1572_v60  ;;  %v18860_v31 = vadd.f32 %v18415_v28, %v967_v29 }
 0x16a   : > { %v1581_v53 = vsel %vm1578_vm12, %v1580_v42, %v1576_v22  ;;  %v1591_v16 = vsel %vm1590_vm5, %v17967_v27, %v1587_v57  ;;  %1654 = vmatmul.bf16.vlgmr.msra.gmra.mxu1 %v18188_v3 }
 0x16b   : > { %v1628_v9 = vmul.f32 %v1581_v53, %v986_v34  ;;  %v1596_v4 = vsel %vm1593_vm8, %v1595_v59, %v1591_v16  ;;  %v12137_v34 = vmul.f32 -1.442695, %v18860_v31  ;;  %v17981_v25 = vpop.eup %17980  ;;  %v18120_v59 = vld [vmem:[%s26700_s27] ss:$0 sm:$0xff] }
 0x16c   : > { %v1629_v10 = vmul.f32 %v1596_v4, %v988_v51  ;;  %v18900_v41 = vadd.f32 1.0, %v17981_v25 }
 0x16d   : > { %17982 = vpow2.f32 %v12137_v34 }
 0x16e   : > { %v1645_v61 = vpack.c.bf16 %v1629_v10, %v1628_v9 }
 0x170   : > { %v970_v62 = vpop.f32.mrf.mxu0  ;;  %1659 = vmatpush.bf16.msra.mxu2 %v1645_v61 }
 0x171   : > { %v18863_v37 = vadd.f32 %v18415_v28, %v970_v62 }
 0x173   : > { %v12138_v52 = vmul.f32 -1.442695, %v18863_v37  ;;  %v17983_v29 = vpop.eup %17982 }
 0x174   : > { %v18904_v42 = vadd.f32 1.0, %v17983_v29 }
 0x175   : > { %17984 = vpow2.f32 %v12138_v52 }
 0x176   : > { %vm1468_vm5 = vweird.f32 %v18904_v42 }
 0x178   : > { %v972_v1 = vpop.f32.mrf.mxu0 }
 0x179   : > { %v18872_v51 = vadd.f32 %v18415_v28, %v972_v1 }
 0x17b   : > { %v12139_v36 = vmul.f32 -1.442695, %v18872_v51  ;;  %v17985_v11 = vpop.eup %17984 }
 0x180   : > { %v975_v58 = vpop.f32.mrf.mxu0 }
 0x181   : > { %v18868_v26 = vadd.f32 %v18415_v28, %v975_v58 }
 0x183   : > { %v12140_v40 = vmul.f32 -1.442695, %v18868_v26 }
 0x188   : > { %v977_v7 = vpop.f32.mrf.mxu0 }
 0x189   : > { %v18876_v14 = vadd.f32 %v18415_v28, %v977_v7 }
 0x18b   : > { %v12141_v35 = vmul.f32 -1.442695, %v18876_v14 }
 0x18d   : > { %17986 = vpow2.f32 %v12141_v35 }
 0x18e   : > { %17988 = vpow2.f32 %v12140_v40 }
 0x18f   : > { %17990 = vpow2.f32 %v12139_v36 }
 0x190   : > { %17992 = vrcp.f32 %v18881_v18  ;;  %v980_v27 = vpop.f32.mrf.mxu0 }
 0x191   : > { %17994 = vrcp.f32 %v18883_v39  ;;  %v18894_v50 = vadd.f32 %v18415_v28, %v980_v27  ;;  %v18906_v28 = vadd.f32 1.0, %v17985_v11 }
 0x192   : > { %17996 = vrcp.f32 %v18885_v54 }
 0x193   : > { %v17987_v23 = vpop.eup %17986  ;;  %17998 = vrcp.f32 %v18887_v6  ;;  %v12142_v44 = vmul.f32 -1.442695, %v18894_v50  ;;  %vm1483_vm10 = vweird.f32 %v18906_v28 }
 0x194   : > { %v17989_v55 = vpop.eup %17988  ;;  %18000 = vrcp.f32 %v18890_v46  ;;  %v18911_v45 = vadd.f32 1.0, %v17987_v23 }
 0x195   : > { %v17991_v60 = vpop.eup %17990  ;;  %18002 = vpow2.f32 %v12142_v44  ;;  %v18916_v24 = vadd.f32 1.0, %v17989_v55 }
 0x196   : > { %v18908_v62 = vpop.eup %17992  ;;  %18004 = vrcp.f32 %v18897_v20  ;;  %v18921_v57 = vadd.f32 1.0, %v17991_v60  ;;  %vm1528_vm1 = vweird.f32 %v18911_v45 }
 0x197   : > { %v18913_v22 = vpop.eup %17994  ;;  %18006 = vrcp.f32 %v18900_v41  ;;  %v1359_v1 = vmul.f32 %v18908_v62, %v18881_v18  ;;  %vm1513_vm9 = vweird.f32 %v18916_v24 }
 0x198   : > { %v18918_v53 = vpop.eup %17996  ;;  %18008 = vrcp.f32 %v18904_v42  ;;  %v982_v21 = vpop.f32.mrf.mxu0  ;;  %v1374_v58 = vmul.f32 %v18913_v22, %v18883_v39  ;;  %vm1498_vm15 = vweird.f32 %v18921_v57 }
 0x199   : > { %v18923_v16 = vpop.eup %17998  ;;  %18010 = vrcp.f32 %v18906_v28  ;;  %v18929_v9 = vadd.f32 %v18120_v59, %v982_v21  ;;  %v1389_v48 = vmul.f32 %v18918_v53, %v18885_v54  ;;  %v1360_v33 = vsub.f32 1.0, %v1359_v1 }
 0x19a   : > { %v18931_v4 = vpop.eup %18000  ;;  %18012 = vrcp.f32 %v18911_v45  ;;  %v1404_v34 = vmul.f32 %v18923_v16, %v18887_v6  ;;  %v1375_v63 = vsub.f32 1.0, %v1374_v58 }
 0x19b   : > { %v18003_v10 = vpop.eup %18002  ;;  %18014 = vrcp.f32 %v18916_v24  ;;  %v12143_v61 = vmul.f32 -1.442695, %v18929_v9  ;;  %v1419_v7 = vmul.f32 %v18931_v4, %v18890_v46  ;;  %v1390_v36 = vsub.f32 1.0, %v1389_v48 }
 0x19c   : > { %v18938_v30 = vpop.eup %18004  ;;  %18016 = vrcp.f32 %v18921_v57  ;;  %v18941_v32 = vadd.f32 1.0, %v18003_v10  ;;  %v18972_v25 = vmul.f32 %v18908_v62, %v1360_v33  ;;  %v1405_v11 = vsub.f32 1.0, %v1404_v34 }
 0x19d   : > { %v18945_v5 = vpop.eup %18006  ;;  %18018 = vpow2.f32 %v12143_v61  ;;  %v1434_v40 = vmul.f32 %v18938_v30, %v18897_v20  ;;  %v1420_v44 = vsub.f32 1.0, %v1419_v7  ;;  %v18985_v21 = vmul.f32 %v18913_v22, %v1375_v63 }
 0x19e   : > { %v18947_v15 = vpop.eup %18008  ;;  %18020 = vrcp.f32 %v18941_v32  ;;  %v1449_v35 = vmul.f32 %v18945_v5, %v18900_v41  ;;  %v18993_v58 = vmul.f32 %v18918_v53, %v1390_v36  ;;  %vm1543_vm13 = vweird.f32 %v18941_v32 }
 0x19f   : > { %v18952_v17 = vpop.eup %18010  ;;  %v1464_v12 = vmul.f32 %v18947_v15, %v18904_v42  ;;  %v1435_v1 = vsub.f32 1.0, %v1434_v40  ;;  %v19000_v38 = vmul.f32 %v18931_v4, %v1420_v44  ;;  %v1549_v40 = vand.u32 2147483648, %v18941_v32 }
 0x1a0   : > { %v18956_v52 = vpop.eup %18012  ;;  %v1479_v27 = vmul.f32 %v18952_v17, %v18906_v28  ;;  %v1450_v48 = vsub.f32 1.0, %v1449_v35  ;;  %vm1484_vm6 = vweird.f32 %v18952_v17  ;;  %vm1469_vm11 = vweird.f32 %v18947_v15 }
 0x1a1   : > { %v18960_v13 = vpop.eup %18014  ;;  %v1524_v29 = vmul.f32 %v18956_v52, %v18911_v45  ;;  %v1465_v33 = vsub.f32 1.0, %v1464_v12  ;;  %v19007_v12 = vmul.f32 %v18938_v30, %v1435_v1  ;;  %vm1529_vm7 = vweird.f32 %v18956_v52 }
 0x1a2   : > { %v18964_v2 = vpop.eup %18016  ;;  %v1509_v55 = vmul.f32 %v18960_v13, %v18916_v24  ;;  %v1480_v34 = vsub.f32 1.0, %v1479_v27  ;;  %v19010_v27 = vmul.f32 %v18945_v5, %v1450_v48  ;;  %v1517_v48 = vand.u32 2147483647, %v18916_v24 }
 0x1a3   : > { %v18019_v56 = vpop.eup %18018  ;;  %v1494_v10 = vmul.f32 %v18964_v2, %v18921_v57  ;;  %v1525_v63 = vsub.f32 1.0, %v1524_v29  ;;  %v19015_v44 = vmul.f32 %v18947_v15, %v1465_v33  ;;  %vm1499_vm4 = vweird.f32 %v18964_v2 }
 0x1a4   : > { %v18978_v23 = vpop.eup %18020  ;;  %v18982_v60 = vadd.f32 1.0, %v18019_v56  ;;  %v18997_v56 = vmul.f32 %v18923_v16, %v1405_v11  ;;  %v1510_v19 = vsub.f32 1.0, %v1509_v55  ;;  %v1481_v55 = vmul.f32 %v18952_v17, %v1480_v34 }
 0x1a5   : > { %v1539_v59 = vmul.f32 %v18978_v23, %v18941_v32  ;;  %v1495_v35 = vsub.f32 1.0, %v1494_v10  ;;  %vm1544_vm2 = vweird.f32 %v18978_v23  ;;  %vm1514_vm0 = vweird.f32 %v18960_v13 }
 0x1a6   : > { %18022 = vrcp.f32 %v18982_v60  ;;  %v1511_v61 = vmul.f32 %v18960_v13, %v1510_v19  ;;  %v1547_v19 = vand.u32 2147483647, %v18941_v32  ;;  %vm19043_vm12 = vmor %vm1543_vm13, %vm1544_vm2  ;;  %v1564_v11 = vand.u32 2147483648, %v18982_v60 }
 0x1a7   : > { %v1540_v7 = vsub.f32 1.0, %v1539_v59  ;;  %v1526_v59 = vmul.f32 %v18956_v52, %v1525_v63  ;;  %v1496_v63 = vmul.f32 %v18964_v2, %v1495_v35  ;;  %v1532_v10 = vand.u32 2147483647, %v18911_v45  ;;  %vm19061_vm2 = vmor %vm1528_vm1, %vm1529_vm7 }
 0x1a8   : > { %v1512_v35 = vadd.f32 %v18960_v13, %v1511_v61  ;;  %v1534_v32 = vand.u32 2147483648, %v18911_v45  ;;  %v1562_v61 = vand.u32 2147483647, %v18982_v60  ;;  %vm1548_vm8 = vcmp.eq.f32.partialorder %v1547_v19, 8.507059e+37 }
 0x1a9   : > { %v1541_v36 = vmul.f32 %v18978_v23, %v1540_v7  ;;  %v1527_v47 = vadd.f32 %v18956_v52, %v1526_v59  ;;  %v1519_v7 = vand.u32 2147483648, %v18916_v24  ;;  %v1550_v8 = vor.u32 1.1754944e-38, %v1549_v40 }
 0x1aa   : > { %vm1453_vm13 = vweird.f32 %v18900_v41  ;;  %vm1558_vm14 = vweird.f32 %v18982_v60  ;;  %v1565_v19 = vor.u32 1.1754944e-38, %v1564_v11  ;;  %vm1533_vm7 = vcmp.eq.f32.partialorder %v1532_v10, 8.507059e+37 }
 0x1ab   : > { %v1542_v33 = vadd.f32 %v18978_v23, %v1541_v36  ;;  %v1531_v45 = vsel %vm19061_vm2, %v18956_v52, %v1527_v47  ;;  %vm1438_vm2 = vweird.f32 %v18897_v20  ;;  %v1520_v47 = vor.u32 1.1754944e-38, %v1519_v7 }
 0x1ac   : > { %v18023_v1 = vpop.eup %18022  ;;  %v1467_v11 = vadd.f32 %v18947_v15, %v19015_v44  ;;  %v1452_v7 = vadd.f32 %v18945_v5, %v19010_v27  ;;  %v1392_v52 = vadd.f32 %v18918_v53, %v18993_v58  ;;  %v26762_v58 = vand.u32 2147483647, %v18897_v20 }
 0x1ad   : > { %v1554_v34 = vmul.f32 %v18023_v1, %v18982_v60  ;;  %v1546_v59 = vsel %vm19043_vm12, %v18978_v23, %v1542_v33  ;;  %vm1559_vm3 = vweird.f32 %v18023_v1  ;;  %v1497_v23 = vadd.f32 %v18964_v2, %v1496_v63  ;;  %vm19071_vm12 = vmor %vm1513_vm9, %vm1514_vm0 }
 0x1ae   : > { %v1482_v33 = vadd.f32 %v18952_v17, %v1481_v55  ;;  %v1551_v63 = vsel %vm1548_vm8, %v1550_v8, %v1546_v59  ;;  %vm1560_vm1 = vmor %vm1558_vm14, %vm1559_vm3  ;;  %vm1424_vm9 = vweird.f32 %v18931_v4  ;;  %v1516_v24 = vsel %vm19071_vm12, %v18960_v13, %v1512_v35 }
 0x1af   : > { %v1555_v36 = vsub.f32 1.0, %v1554_v34  ;;  %vm1563_vm0 = vcmp.eq.f32.partialorder %v1562_v61, 8.507059e+37  ;;  %vm19091_vm14 = vmor %vm1498_vm15, %vm1499_vm4  ;;  %vm1423_vm3 = vweird.f32 %v18890_v46  ;;  %vm1518_vm8 = vcmp.eq.f32.partialorder %v1517_v48, 8.507059e+37 }
 0x1b0   : > { %v1626_v13 = vmul.f32 %v1551_v63, %v18894_v50  ;;  %v1501_v10 = vsel %vm19091_vm14, %v18964_v2, %v1497_v23  ;;  %vm1409_vm12 = vweird.f32 %v18923_v16  ;;  %vm19110_vm4 = vmor %vm1483_vm10, %vm1484_vm6  ;;  %v1521_v50 = vsel %vm1518_vm8, %v1520_v47, %v1516_v24 }
 0x1b1   : > { %v1556_v34 = vmul.f32 %v18023_v1, %v1555_v36  ;;  %v1535_v36 = vor.u32 1.1754944e-38, %v1534_v32  ;;  %v1474_v48 = vand.u32 2147483648, %v18904_v42  ;;  %vm1394_vm15 = vweird.f32 %v18918_v53 }
 0x1b2   : > { %v1486_v2 = vsel %vm19110_vm4, %v18952_v17, %v1482_v33  ;;  %v26748_v32 = vand.u32 2147483647, %v18921_v57  ;;  %vm1408_vm10 = vweird.f32 %v18887_v6  ;;  %v1459_v59 = vand.u32 2147483648, %v18900_v41 }
 0x1b3   : > { %v1557_v40 = vadd.f32 %v18023_v1, %v1556_v34  ;;  %v1536_v49 = vsel %vm1533_vm7, %v1535_v36, %v1531_v45  ;;  %v26749_v34 = vand.u32 2147483648, %v18906_v28  ;;  %vm1393_vm7 = vweird.f32 %v18885_v54 }
 0x1b4   : > { %v1625_v35 = vmul.f32 %v1536_v49, %v18876_v14  ;;  %vm1503_vm6 = vcmp.eq.f32.partialorder %v26748_v32, 8.507059e+37  ;;  %v26752_v14 = vand.u32 2147483647, %v18906_v28  ;;  %v1422_v45 = vadd.f32 %v18931_v4, %v19000_v38 }
 0x1b5   : > { %v1561_v60 = vsel %vm1560_vm1, %v18023_v1, %v1557_v40  ;;  %v1490_v61 = vor.u32 1.1754944e-38, %v26749_v34  ;;  %vm19132_vm1 = vmor %vm1468_vm5, %vm1469_vm11  ;;  %v1437_v40 = vadd.f32 %v18938_v30, %v19007_v12  ;;  %vm1379_vm11 = vweird.f32 %v18913_v22 }
 0x1b6   : > { %v1566_v8 = vsel %vm1563_vm0, %v1565_v19, %v1561_v60  ;;  %vm1439_vm0 = vweird.f32 %v18938_v30  ;;  %vm1488_vm14 = vcmp.eq.f32.partialorder %v26752_v14, 8.507059e+37  ;;  %v1471_v29 = vsel %vm19132_vm1, %v18947_v15, %v1467_v11  ;;  %v26769_v14 = vld [vmem:[#allocation15_spill] sm:$0xff] }
 0x1b7   : > { %v1627_v55 = vmul.f32 %v1566_v8, %v18929_v9  ;;  %v26747_v9 = vand.u32 2147483648, %v18921_v57  ;;  %v1624_v57 = vmul.f32 %v1521_v50, %v18868_v26  ;;  %vm26753_vm5 = vweird.f32 %v18945_v5  ;;  %vm19172_vm1 = vmor %vm1438_vm2, %vm1439_vm0  ;;  %v12214_v50 = vld [vmem:[%s26774_s3 + $0x90] sm:$0xf0] }
 0x1b8   : > { %vm19153_vm8 = vmor %vm1453_vm13, %vm26753_vm5  ;;  %v1491_v26 = vsel %vm1488_vm14, %v1490_v61, %v1486_v2  ;;  %v1475_v33 = vor.u32 1.1754944e-38, %v1474_v48  ;;  %v1444_v15 = vand.u32 2147483648, %v18897_v20  ;;  %vm1364_vm4 = vweird.f32 %v18908_v62 }
 0x1b9   : > { %v1505_v1 = vor.u32 1.1754944e-38, %v26747_v9  ;;  %v1644_v27 = vpack.c.bf16 %v1627_v55, %v1626_v13  ;;  %v1456_v12 = vsel %vm19153_vm8, %v18945_v5, %v1452_v7  ;;  %v1643_v63 = vpack.c.bf16 %v1625_v35, %v1624_v57  ;;  %vm19190_vm2 = vmor %vm1423_vm3, %vm1424_vm9 }
 0x1ba   : > { %v26756_v19 = vand.u32 2147483647, %v18904_v42  ;;  %vm1378_vm13 = vweird.f32 %v18883_v39  ;;  %v1427_v36 = vand.u32 2147483647, %v18890_v46  ;;  %v1429_v24 = vand.u32 2147483648, %v18890_v46  ;;  %vm19207_vm9 = vmor %vm1408_vm10, %vm1409_vm12 }
 0x1bb   : > { %v1506_v23 = vsel %vm1503_vm6, %v1505_v1, %v1501_v10  ;;  %1660 = vmatpush.bf16.msra.mxu2 %v1644_v27  ;;  %v1460_v60 = vor.u32 1.1754944e-38, %v1459_v59  ;;  %v1622_v42 = vmul.f32 %v1491_v26, %v18863_v37  ;;  %v1441_v8 = vsel %vm19172_vm1, %v18938_v30, %v1437_v40  ;;  %vm19223_vm12 = vmor %vm1393_vm7, %vm1394_vm15  ;;  %v12172_v1 = vld [vmem:[%s26774_s3 + $0x18] sm:$0xf] }
 0x1bc   : > { %v1623_v38 = vmul.f32 %v1506_v23, %v18872_v51  ;;  %vm1473_vm6 = vcmp.eq.f32.partialorder %v26756_v19, 8.507059e+37  ;;  %v26759_v51 = vand.u32 2147483647, %v18900_v41  ;;  %v1407_v49 = vadd.f32 %v18923_v16, %v18997_v56  ;;  %vm1380_vm15 = vmor %vm1378_vm13, %vm1379_vm11  ;;  %v16722_v19 = vld [vmem:[%s26774_s3 + $0x5c] sm:$0xf] }
 0x1bd   : > { %v1476_v47 = vsel %vm1473_vm6, %v1475_v33, %v1471_v29  ;;  %v1445_v11 = vor.u32 1.1754944e-38, %v1444_v15  ;;  %v1414_v13 = vand.u32 2147483648, %v18887_v6  ;;  %v1426_v30 = vsel %vm19190_vm2, %v18931_v4, %v1422_v45  ;;  %v26771_v45 = vld [vmem:[#allocation14_spill] sm:$0xff]  ;;  %v26772_v33 = vld [vmem:[#allocation13_spill] sm:$0xff] }
 0x1be   : > { %vm1458_vm14 = vcmp.eq.f32.partialorder %v26759_v51, 8.507059e+37  ;;  %v1642_v56 = vpack.c.bf16 %v1623_v38, %v1622_v42  ;;  %v1621_v55 = vmul.f32 %v1476_v47, %v18860_v31  ;;  %vm1443_vm0 = vcmp.eq.f32.partialorder %v26762_v58, 8.507059e+37  ;;  %v16726_v38 = vld [vmem:[%s26774_s3 + $0x74] sm:$0xf0]  ;;  %v12190_v58 = vld [vmem:[%s26774_s3 + $0x78] sm:$0xf0] }
 0x1bf   : > { %1661 = vmatpush.bf16.msra.mxu2 %v1643_v63  ;;  %v1461_v37 = vsel %vm1458_vm14, %v1460_v60, %v1456_v12  ;;  %v1397_v46 = vand.u32 2147483647, %v18885_v54  ;;  %v1399_v10 = vand.u32 2147483648, %v18885_v54  ;;  %v1430_v7 = vor.u32 1.1754944e-38, %v1429_v24  ;;  %v26773_v12 = vld [vmem:[#allocation12_spill] sm:$0xff] }
 0x1c0   : > { %v1446_v44 = vsel %vm1443_vm0, %v1445_v11, %v1441_v8  ;;  %vm1428_vm3 = vcmp.eq.f32.partialorder %v1427_v36, 8.507059e+37  ;;  %v1620_v31 = vmul.f32 %v1461_v37, %v18856_v0  ;;  %v1411_v20 = vsel %vm19207_vm9, %v18923_v16, %v1407_v49  ;;  %v12198_v24 = vld [vmem:[%s26774_s3 + $0x80] sm:$0xf0]  ;;  %v16728_v60 = vld [vmem:[%s26774_s3 + $0x84] sm:$0xf0] }
 0x1c1   : > { %v1377_v4 = vadd.f32 %v18913_v22, %v18985_v21  ;;  %v1362_v9 = vadd.f32 %v18908_v62, %v18972_v25  ;;  %v1431_v0 = vsel %vm1428_vm3, %v1430_v7, %v1426_v30  ;;  %v1415_v48 = vor.u32 1.1754944e-38, %v1414_v13  ;;  %v12148_v8 = vld [vmem:[%s26774_s3] sm:$0xf]  ;;  %v16716_v49 = vld [vmem:[%s26774_s3 + $0x24] sm:$0xf0] }
 0x1c2   : > { %v1384_v2 = vand.u32 2147483648, %v18883_v39  ;;  %v1396_v16 = vsel %vm19223_vm12, %v18918_v53, %v1392_v52  ;;  %v1641_v21 = vpack.c.bf16 %v1621_v55, %v1620_v31  ;;  %v1619_v27 = vmul.f32 %v1446_v44, %v18852_v43  ;;  %v26768_v53 = vld [vmem:[#allocation16_spill] sm:$0xff]  ;;  %v16712_v52 = vld [vmem:[%s26774_s3 + $0xc] sm:$0xf]  ;;  %v12158_v37 = vld [vmem:[%s26774_s3 + $0x30] sm:$0xf0] }
 0x1c3   : > { %1662 = vmatpush.bf16.msra.mxu2 %v1642_v56  ;;  %v26767_v25 = vand.u32 2147483647, %v18887_v6  ;;  %vm1363_vm5 = vweird.f32 %v18881_v18  ;;  %v1369_v54 = vand.u32 2147483648, %v18881_v18  ;;  %v1400_v35 = vor.u32 1.1754944e-38, %v1399_v10  ;;  %v12164_v11 = vld [vmem:[%s26774_s3 + $0x10] sm:$0xf] }
 0x1c4   : > { %v1367_v59 = vand.u32 2147483647, %v18881_v18  ;;  %vm1398_vm7 = vcmp.eq.f32.partialorder %v1397_v46, 8.507059e+37  ;;  %v1618_v34 = vmul.f32 %v1431_v0, %v26768_v53  ;;  %v1381_v43 = vsel %vm1380_vm15, %v18913_v22, %v1377_v4  ;;  %vm1365_vm8 = vmor %vm1363_vm5, %vm1364_vm4  ;;  %v16718_v13 = vld [vmem:[%s26774_s3 + $0x34] sm:$0xf0] }
 0x1c5   : > { %vm1413_vm10 = vcmp.eq.f32.partialorder %v26767_v25, 8.507059e+37  ;;  %v1401_v6 = vsel %vm1398_vm7, %v1400_v35, %v1396_v16  ;;  %v1385_v61 = vor.u32 1.1754944e-38, %v1384_v2  ;;  %v1366_v23 = vsel %vm1365_vm8, %v18908_v62, %v1362_v9  ;;  %v16721_v55 = vld [vmem:[%s26774_s3 + $0x54] sm:$0xf]  ;;  %v12212_v46 = vld [vmem:[%s26774_s3 + $0x68] sm:$0xf] }
 0x1c6   : > { %v1416_v32 = vsel %vm1413_vm10, %v1415_v48, %v1411_v20  ;;  %v1640_v17 = vpack.c.bf16 %v1619_v27, %v1618_v34  ;;  %v26770_v29 = vand.u32 2147483647, %v18883_v39  ;;  %v1370_v18 = vor.u32 1.1754944e-38, %v1369_v54  ;;  %v12188_v39 = vld [vmem:[%s26774_s3 + $0x50] sm:$0xf] }
 0x1c7   : > { %1663 = vmatpush.bf16.msra.mxu2 %v1641_v21  ;;  %v1617_v57 = vmul.f32 %v1416_v32, %v26769_v14  ;;  %vm1368_vm6 = vcmp.eq.f32.partialorder %v1367_v59, 8.507059e+37  ;;  %v1616_v28 = vmul.f32 %v1401_v6, %v26771_v45  ;;  %v12189_v36 = vor.u32 %v16726_v38, %v12188_v39  ;;  %v16729_v7 = vld [vmem:[%s26774_s3 + $0x8c] sm:$0xf0]  ;;  %v16724_v44 = vld [vmem:[%s26774_s3 + $0x6c] sm:$0xf] }
 0x1c8   : > { %vm1383_vm11 = vcmp.eq.f32.partialorder %v26770_v29, 8.507059e+37  ;;  %v1371_v22 = vsel %vm1368_vm6, %v1370_v18, %v1366_v23  ;;  %v12201_v47 = vor.u32 %v16722_v19, %v12198_v24  ;;  %v12149_v41 = vor.u32 %v16716_v49, %v12148_v8  ;;  %v16711_v4 = vld [vmem:[%s26774_s3 + $0x4] sm:$0xf]  ;;  %v12150_v9 = vld [vmem:[%s26774_s3 + $0x28] sm:$0xf0] }
 0x1c9   : > { %v1386_v40 = vsel %vm1383_vm11, %v1385_v61, %v1381_v43  ;;  %v1639_v26 = vpack.c.bf16 %v1617_v57, %v1616_v28  ;;  %v1614_v63 = vmul.f32 %v1371_v22, %v26773_v12  ;;  %1826 = vmatpush.bf16.msrb.mxu3 %v12189_v36  ;;  %v12161_v30 = vor.u32 %v16712_v52, %v12158_v37  ;;  %v16719_v48 = vld [vmem:[%s26774_s3 + $0x3c] sm:$0xf0]  ;;  %v16714_v2 = vld [vmem:[%s26774_s3 + $0x1c] sm:$0xf]  ;;  %v12174_v16 = vld [vmem:[%s26774_s3 + $0x40] sm:$0xf0] }
 0x1ca   : > { %v1615_v15 = vmul.f32 %v1386_v40, %v26772_v33  ;;  %1865 = vmatpush.bf16.msrb.mxu1 %v12201_v47  ;;  %v12165_v56 = vor.u32 %v16718_v13, %v12164_v11  ;;  %v12193_v10 = vor.u32 %v16721_v55, %v12190_v58  ;;  %v12213_v31 = vor.u32 %v16729_v7, %v12212_v46  ;;  %v12196_v25 = vld [vmem:[%s26774_s3 + $0x58] sm:$0xf]  ;;  %v16727_v54 = vld [vmem:[%s26774_s3 + $0x7c] sm:$0xf0]  ;;  %v16725_v32 = vld [vmem:[%s26774_s3 + $0x74] sm:$0xf] }
 0x1cb   : > { %1664 = vmatpush.bf16.msra.mxu2 %v1640_v17  ;;  %v12217_v20 = vor.u32 %v16724_v44, %v12214_v50  ;;  %v12153_v0 = vor.u32 %v16711_v4, %v12150_v9  ;;  %v12173_v21 = vor.u32 %v16719_v48, %v12172_v1  ;;  %v12177_v27 = vor.u32 %v16714_v2, %v12174_v16  ;;  %v12222_v59 = vld [vmem:[%s26774_s3 + $0x98] sm:$0xf0]  ;;  %v12156_v61 = vld [vmem:[%s26774_s3 + $0x8] sm:$0xf]  ;;  %v16717_v23 = vld [vmem:[%s26774_s3 + $0x2c] sm:$0xf0] }
 0x1cc   : > { %v1638_v62 = vpack.c.bf16 %v1615_v15, %v1614_v63  ;;  %v12197_v34 = vor.u32 %v16727_v54, %v12196_v25  ;;  %v12225_v6 = vor.u32 %v16725_v32, %v12222_v59  ;;  %v16715_v17 = vld [vmem:[%s26774_s3 + $0x24] sm:$0xf]  ;;  %v12182_v14 = vld [vmem:[%s26774_s3 + $0x48] sm:$0xf0]  ;;  %vm26775_vm4 = vcmask 261120  }
 0x1cd   : > { %1827 = vmatpush.bf16.msrb.mxu3 %v12149_v41  ;;  %vm26776_vm13 = vmmov %vm26775_vm4  ;;  %v12332_v57 = vld [vmem:[%s26777_s9 + $0xa8] sm:$0xf]  ;;  %v16753_v29 = vld [vmem:[%s26777_s9 + $0xb0] sm:$0xf0]  ;;  %v12157_v18 = vor.u32 %v16717_v23, %v12156_v61  ;;  %v12185_v22 = vor.u32 %v16715_v17, %v12182_v14  ;;  %vm3361_vm5 = vcmask 1044480   ;;  %vm5148_vm6 = vcmask 523264  }
 0x1ce   : > { %1866 = vmatpush.bf16.msrb.mxu1 %v12161_v30  ;;  %vm26778_vm1 = vmmov %vm26775_vm4  ;;  %v12333_v40 = vor.u32 %v16753_v29, %v12332_v57  ;;  %v12320_v45 = vld [vmem:[%s26777_s9 + $0x90] sm:$0xf]  ;;  %v16750_v28 = vld [vmem:[%s26777_s9 + $0x98] sm:$0xf0] }
 0x1cf   : > { %1665 = vmatpush.bf16.msra.mxu2 %v1639_v26  ;;  %v12321_v33 = vor.u32 %v16750_v28, %v12320_v45  ;;  %v12308_v15 = vld [vmem:[%s26777_s9 + $0x78] sm:$0xf]  ;;  %v16747_v12 = vld [vmem:[%s26777_s9 + $0x80] sm:$0xf0]  ;;  %v16744_v39 = vld [vmem:[%s26777_s9 + $0x68] sm:$0xf0] }
 0x1d0   : > { %v12309_v63 = vor.u32 %v16747_v12, %v12308_v15  ;;  %v16723_v38 = vld [vmem:[%s26774_s3 + $0x64] sm:$0xf]  ;;  %v12206_v19 = vld [vmem:[%s26774_s3 + $0x88] sm:$0xf0]  ;;  %vm26779_vm14 = vmmov %vm26778_vm1 }
 0x1d1   : > { %1839 = vmatpush.bf16.msra.mxu3 %v12193_v10  ;;  %v12209_v24 = vor.u32 %v16723_v38, %v12206_v19  ;;  %vm26780_vm2 = vmmov %vm26778_vm1  ;;  %v12272_v8 = vld [vmem:[%s26777_s9 + $0x30] sm:$0xf]  ;;  %v16738_v49 = vld [vmem:[%s26777_s9 + $0x38] sm:$0xf0] }
 0x1d2   : > { %1904 = vmatpush.bf16.msra.mxu1 %v12213_v31  ;;  %vm26781_vm0 = vmmov %vm26778_vm1  ;;  %v12273_v52 = vor.u32 %v16738_v49, %v12272_v8  ;;  %v12524_v41 = vld [vmem:[%s26777_s9 + $0x228] sm:$0xf]  ;;  %v16801_v37 = vld [vmem:[%s26777_s9 + $0x230] sm:$0xf0] }
 0x1d3   : > { %1666 = vmatpush.bf16.msra.mxu2 %v1638_v62  ;;  %v12296_v62 = vld [vmem:[%s26777_s9 + $0x60] sm:$0xf]  ;;  %v12260_v11 = vld [vmem:[%s26777_s9 + $0x18] sm:$0xf]  ;;  %v12220_v13 = vld [vmem:[%s26774_s3 + $0x70] sm:$0xf] }
 0x1d4   : > { %v12297_v36 = vor.u32 %v16744_v39, %v12296_v62  ;;  %v16730_v30 = vld [vmem:[%s26774_s3 + $0x94] sm:$0xf0]  ;;  %v16735_v55 = vld [vmem:[%s26777_s9 + $0x20] sm:$0xf0]  ;;  %v12180_v46 = vld [vmem:[%s26774_s3 + $0x20] sm:$0xf] }
 0x1d5   : > { %1840 = vmatpush.bf16.msra.mxu3 %v12153_v0  ;;  %v12261_v58 = vor.u32 %v16735_v55, %v12260_v11  ;;  %v16720_v10 = vld [vmem:[%s26774_s3 + $0x44] sm:$0xf0]  ;;  %v12221_v7 = vor.u32 %v16730_v30, %v12220_v13  ;;  %v12512_v44 = vld [vmem:[%s26777_s9 + $0x210] sm:$0xf]  ;;  %v16798_v50 = vld [vmem:[%s26777_s9 + $0x218] sm:$0xf0] }
 0x1d6   : > { %1667 = vmatmul.bf16.vlgmr.msra.gmra.mxu2 %v18188_v3  ;;  %v12204_v3 = vld [vmem:[%s26774_s3 + $0x60] sm:$0xf]  ;;  %1905 = vmatpush.bf16.msra.mxu1 %v12173_v21  ;;  %v16732_v4 = vld [vmem:[%s26777_s9 + $0x8] sm:$0xf0]  ;;  %v12620_v9 = vld [vmem:[%s26777_s9 + $0x2e8] sm:$0xf]  ;;  %v12181_v2 = vor.u32 %v16720_v10, %v12180_v46 }
 0x1d7   : > { %v12205_v5 = vor.u32 %v16728_v60, %v12204_v3  ;;  %v16713_v3 = vld [vmem:[%s26774_s3 + $0x14] sm:$0xf]  ;;  %v12166_v60 = vld [vmem:[%s26774_s3 + $0x38] sm:$0xf0]  ;;  %v12248_v31 = vld [vmem:[%s26777_s9] sm:$0xf] }
 0x1d8   : > { %v12169_v47 = vor.u32 %v16713_v3, %v12166_v60  ;;  %v16825_v1 = vld [vmem:[%s26777_s9 + $0x2f0] sm:$0xf0]  ;;  %v12249_v0 = vor.u32 %v16732_v4, %v12248_v31  ;;  %vm26782_vm9 = vmmov %vm26781_vm0  ;;  %v12500_v16 = vld [vmem:[%s26777_s9 + $0x1f8] sm:$0xf] }
 0x1d9   : > { %1878 = vmatpush.bf16.msrb.mxu2 %v12205_v5  ;;  %v12284_v5 = vld [vmem:[%s26777_s9 + $0x48] sm:$0xf]  ;;  %v12621_v48 = vor.u32 %v16825_v1, %v12620_v9  ;;  %vm26783_vm3 = vmmov %vm26781_vm0  ;;  %v16795_v21 = vld [vmem:[%s26777_s9 + $0x200] sm:$0xf0] }
 0x1da   : > { %v12501_v25 = vor.u32 %v16795_v21, %v12500_v16  ;;  %v16822_v54 = vld [vmem:[%s26777_s9 + $0x2d8] sm:$0xf0]  ;;  %v12488_v32 = vld [vmem:[%s26777_s9 + $0x1e0] sm:$0xf]  ;;  %v16792_v59 = vld [vmem:[%s26777_s9 + $0x1e8] sm:$0xf0] }
 0x1db   : > { %v12476_v23 = vld [vmem:[%s26777_s9 + $0x1c8] sm:$0xf]  ;;  %v16789_v17 = vld [vmem:[%s26777_s9 + $0x1d0] sm:$0xf0]  ;;  %v12584_v14 = vld [vmem:[%s26777_s9 + $0x2a0] sm:$0xf] }
 0x1dc   : > { %v12428_v57 = vld [vmem:[%s26777_s9 + $0x168] sm:$0xf]  ;;  %v16777_v29 = vld [vmem:[%s26777_s9 + $0x170] sm:$0xf0]  ;;  %v16774_v15 = vld [vmem:[%s26777_s9 + $0x158] sm:$0xf0] }
 0x1dd   : > { %1879 = vmatpush.bf16.msrb.mxu2 %v12165_v56  ;;  %v12525_v56 = vor.u32 %v16801_v37, %v12524_v41  ;;  %v12429_v28 = vor.u32 %v16777_v29, %v12428_v57  ;;  %v16813_v62 = vld [vmem:[%s26777_s9 + $0x290] sm:$0xf0]  ;;  %v12452_v38 = vld [vmem:[%s26777_s9 + $0x198] sm:$0xf]  ;;  %v16783_v19 = vld [vmem:[%s26777_s9 + $0x1a0] sm:$0xf0] }
 0x1de   : > { %vm26784_vm12 = vmmov %vm26781_vm0  ;;  %v16771_v3 = vld [vmem:[%s26777_s9 + $0x140] sm:$0xf0]  ;;  %v12453_v60 = vor.u32 %v16783_v19, %v12452_v38  ;;  %v16780_v8 = vld [vmem:[%s26777_s9 + $0x188] sm:$0xf0] }
 0x1df   : > { %v16768_v41 = vld [vmem:[%s26777_s9 + $0x128] sm:$0xf0]  ;;  %v12812_v11 = vld [vmem:[%s26777_s9 + $0x468] sm:$0xf]  ;;  %v16873_v13 = vld [vmem:[%s26777_s9 + $0x470] sm:$0xf0] }
 0x1e0   : > { %v12548_v30 = vld [vmem:[%s26777_s9 + $0x258] sm:$0xf]  ;;  %v16807_v55 = vld [vmem:[%s26777_s9 + $0x260] sm:$0xf0]  ;;  %v12380_v10 = vld [vmem:[%s26777_s9 + $0x108] sm:$0xf] }
 0x1e1   : > { %1917 = vmatpush.bf16.msra.mxu2 %v12217_v20  ;;  %v12513_v20 = vor.u32 %v16798_v50, %v12512_v44  ;;  %v12800_v44 = vld [vmem:[%s26777_s9 + $0x450] sm:$0xf]  ;;  %v16870_v50 = vld [vmem:[%s26777_s9 + $0x458] sm:$0xf0]  ;;  %v12536_v31 = vld [vmem:[%s26777_s9 + $0x240] sm:$0xf] }
 0x1e2   : > { %v16804_v4 = vld [vmem:[%s26777_s9 + $0x248] sm:$0xf0]  ;;  %v2150_v9 = vld [vmem:[%s19565_s1] sm:$0x1f]  ;;  %v12368_v21 = vld [vmem:[%s26777_s9 + $0xf0] sm:$0xf] }
 0x1e3   : > { %v16752_v1 = vld [vmem:[%s26777_s9 + $0xac] sm:$0xf]  ;;  %vm26786_vm10 = vmmov %vm26781_vm0  ;;  %v12310_v29 = vld [vmem:[%s26777_s9 + $0x84] sm:$0xf0] }
 0x1e4   : > { %v12298_v38 = vld [vmem:[%s26777_s9 + $0x6c] sm:$0xf0] }
 0x1e5   : > { %1918 = vmatpush.bf16.msra.mxu2 %v12177_v27  ;;  %v12608_v27 = vld [vmem:[%s26777_s9 + $0x2d0] sm:$0xf] }
 0x1e7   : > { %v1655_v51 = vpop.f32.mrf.mxu1 }
 0x1ef   : > { %v1657_v42 = vpop.f32.mrf.mxu1 }
 0x259   : > { %v1668_v35 = vpop.f32.mrf.mxu2 }
 0x25a   : > { %v1669_v53 = vadd.f32 %v1668_v35, %v1655_v51  ;;  %v16741_v51 = vld [vmem:[%s26777_s9 + $0x50] sm:$0xf0]  ;;  %v12609_v35 = vor.u32 %v16822_v54, %v12608_v27  ;;  %v12788_v54 = vld [vmem:[%s26777_s9 + $0x438] sm:$0xf] }
 0x25b   : > { %v12285_v42 = vor.u32 %v16741_v51, %v12284_v5  ;;  %v16810_v5 = vld [vmem:[%s26777_s9 + $0x278] sm:$0xf0]  ;;  %v12440_v51 = vld [vmem:[%s26777_s9 + $0x180] sm:$0xf] }
 0x25c   : > { %v19337_v43 = vpack.c.bf16 %v1669_v53, %v1669_v53  ;;  %v12596_v53 = vld [vmem:[%s26777_s9 + $0x2b8] sm:$0xf]  ;;  %v12441_v37 = vor.u32 %v16780_v8, %v12440_v51  ;;  %v16846_v51 = vld [vmem:[%s26777_s9 + $0x398] sm:$0xf0] }
 0x25d   : > { %v2153_v8 = vld [vmem:[%s19565_s1 + $0x18] sm:$0x1f] }
 0x25e   : > { %12226 = vmatmul.msk.bf16.vlgmr.msrb.gmra.mxu3 %vm26775_vm4, %v19337_v43  ;;  %12229 = vmatmul.msk.bf16.vlgmr.msrb.gmra.mxu1 %vm26776_vm13, %v19337_v43  ;;  %vm5186_vm4 = vcmask 1041408   ;;  %vm5187_vm13 = vcmask 1042432  }
 0x25f   : > { %12230 = vmatmul.msk.bf16.vlgmr.msrb.gmra.mxu2 %vm26778_vm1, %v19337_v43  ;;  %1852 = vmatpush.bf16.msrb.mxu3 %v12197_v34  ;;  %v12489_v34 = vor.u32 %v16792_v59, %v12488_v32  ;;  %v16749_v59 = vld [vmem:[%s26777_s9 + $0x94] sm:$0xf]  ;;  %vm5169_vm1 = vcmask 36864  }
 0x260   : > { %1943 = vmatpush.bf16.msrb.mxu1 %v12225_v6  ;;  %3125 = vmatpush.bf16.msrb.mxu2 %v12333_v40  ;;  %v16819_v6 = vld [vmem:[%s26777_s9 + $0x2c0] sm:$0xf0]  ;;  %v16816_v40 = vld [vmem:[%s26777_s9 + $0x2a8] sm:$0xf0] }
 0x261   : > { %v1670_v26 = vpop.f32.mrf.mxu2  ;;  %v12597_v61 = vor.u32 %v16819_v6, %v12596_v53  ;;  %v12585_v45 = vor.u32 %v16816_v40, %v12584_v14  ;;  %v12322_v53 = vld [vmem:[%s26777_s9 + $0x9c] sm:$0xf0]  ;;  %v16746_v14 = vld [vmem:[%s26777_s9 + $0x7c] sm:$0xf] }
 0x262   : > { %v12464_v26 = vld [vmem:[%s26777_s9 + $0x1b0] sm:$0xf] }
 0x263   : > { %1853 = vmatpush.bf16.msrb.mxu3 %v12157_v18  ;;  %v12477_v18 = vor.u32 %v16789_v17, %v12476_v23  ;;  %v16759_v23 = vld [vmem:[%s26777_s9 + $0xe0] sm:$0xf0]  ;;  %v12776_v17 = vld [vmem:[%s26777_s9 + $0x420] sm:$0xf] }
 0x264   : > { %1944 = vmatpush.bf16.msrb.mxu1 %v12185_v22  ;;  %3126 = vmatpush.bf16.msrb.mxu2 %v12321_v33  ;;  %v12416_v22 = vld [vmem:[%s26777_s9 + $0x150] sm:$0xf]  ;;  %v16786_v33 = vld [vmem:[%s26777_s9 + $0x1b8] sm:$0xf0] }
 0x265   : > { %v12465_v12 = vor.u32 %v16786_v33, %v12464_v26  ;;  %v12764_v26 = vld [vmem:[%s26777_s9 + $0x408] sm:$0xf]  ;;  %v16861_v33 = vld [vmem:[%s26777_s9 + $0x410] sm:$0xf0] }
 0x268   : > { %3127 = vmatpush.bf16.msrb.mxu2 %v12309_v63  ;;  %v12572_v63 = vld [vmem:[%s26777_s9 + $0x288] sm:$0xf] }
 0x269   : > { %v12573_v39 = vor.u32 %v16813_v62, %v12572_v63  ;;  %v12765_v63 = vor.u32 %v16861_v33, %v12764_v26 }
 0x26c   : > { %3128 = vmatpush.bf16.msrb.mxu2 %v12297_v36  ;;  %v12417_v36 = vor.u32 %v16774_v15, %v12416_v22  ;;  %v12716_v22 = vld [vmem:[%s26777_s9 + $0x3a8] sm:$0xf]  ;;  %v2152_v15 = vld [vmem:[%s19565_s1 + $0x10] sm:$0x1f] }
 0x26d   : > { %v19652_v62 = vpack.c.bf16 %v2152_v15, %v2152_v15  ;;  %v12644_v15 = vld [vmem:[%s26777_s9 + $0x318] sm:$0xf] }
 0x26e   : > { %12227 = vmatmul.msk.bf16.vlgmr.msra.gmra.mxu3 %vm26779_vm14, %v19337_v43  ;;  %12232 = vmatmul.msk.bf16.vlgmr.msra.gmra.mxu1 %vm26780_vm2, %v19337_v43  ;;  %vm5182_vm14 = vcmask 39936  }
 0x26f   : > { %12233 = vmatmul.msk.bf16.vlgmr.msra.gmra.mxu2 %vm26781_vm0, %v19337_v43  ;;  %1891 = vmatpush.bf16.msra.mxu3 %v12209_v24  ;;  %v12404_v24 = vld [vmem:[%s26777_s9 + $0x138] sm:$0xf] }
 0x270   : > { %3129 = vmatpush.bf16.msrb.mxu2 %v12285_v42  ;;  %3151 = vmatpush.bf16.msra.mxu1 %v12525_v56  ;;  %v12405_v49 = vor.u32 %v16771_v3, %v12404_v24  ;;  %v12813_v56 = vor.u32 %v16873_v13, %v12812_v11  ;;  %v2151_v24 = vld [vmem:[%s19565_s1 + $0x8] sm:$0x1f]  ;;  %v12740_v11 = vld [vmem:[%s26777_s9 + $0x3d8] sm:$0xf]  ;;  %v16855_v13 = vld [vmem:[%s26777_s9 + $0x3e0] sm:$0xf0] }
 0x273   : > { %1892 = vmatpush.bf16.msra.mxu3 %v12169_v47  ;;  %v12560_v47 = vld [vmem:[%s26777_s9 + $0x270] sm:$0xf] }
 0x274   : > { %3130 = vmatpush.bf16.msrb.mxu2 %v12273_v52  ;;  %3152 = vmatpush.bf16.msra.mxu1 %v12513_v20  ;;  %v12561_v42 = vor.u32 %v16810_v5, %v12560_v47  ;;  %v12392_v52 = vld [vmem:[%s26777_s9 + $0x120] sm:$0xf]  ;;  %v12801_v20 = vor.u32 %v16870_v50, %v12800_v44  ;;  %v12752_v47 = vld [vmem:[%s26777_s9 + $0x3f0] sm:$0xf]  ;;  %v16858_v5 = vld [vmem:[%s26777_s9 + $0x3f8] sm:$0xf0] }
 0x275   : > { %v12393_v46 = vor.u32 %v16768_v41, %v12392_v52  ;;  %v19678_v52 = vpack.c.bf16 %v2151_v24, %v2151_v24  ;;  %v19680_v41 = vpack.c.bf16 %v2153_v8, %v2153_v8  ;;  %v12728_v44 = vld [vmem:[%s26777_s9 + $0x3c0] sm:$0xf]  ;;  %v16773_v8 = vld [vmem:[%s26777_s9 + $0x154] sm:$0xf] }
 0x278   : > { %3131 = vmatpush.bf16.msrb.mxu2 %v12261_v58  ;;  %3153 = vmatpush.bf16.msra.mxu1 %v12501_v25  ;;  %v12549_v58 = vor.u32 %v16807_v55, %v12548_v30  ;;  %v16762_v25 = vld [vmem:[%s26777_s9 + $0xf8] sm:$0xf0]  ;;  %v12692_v55 = vld [vmem:[%s26777_s9 + $0x378] sm:$0xf] }
 0x279   : > { %v12369_v6 = vor.u32 %v16762_v25, %v12368_v21  ;;  %v2155_v25 = vld [vmem:[%s19565_s1 + $0x28] sm:$0x1f] }
 0x27c   : > { %3132 = vmatpush.bf16.msrb.mxu2 %v12249_v0  ;;  %3154 = vmatpush.bf16.msra.mxu1 %v12489_v34  ;;  %v12537_v0 = vor.u32 %v16804_v4, %v12536_v31  ;;  %v12325_v34 = vor.u32 %v16749_v59, %v12322_v53  ;;  %v16852_v31 = vld [vmem:[%s26777_s9 + $0x3c8] sm:$0xf0]  ;;  %v12680_v4 = vld [vmem:[%s26777_s9 + $0x360] sm:$0xf]  ;;  %v12668_v59 = vld [vmem:[%s26777_s9 + $0x348] sm:$0xf] }
 0x27d   : > { %v16837_v53 = vld [vmem:[%s26777_s9 + $0x350] sm:$0xf0] }
 0x27e   : > { %12228 = vmatmul.msk.bf16.vlgmr.msrb.gmra.mxu3 %vm26782_vm9, %v19337_v43  ;;  %12235 = vmatmul.msk.bf16.vlgmr.msrb.gmra.mxu1 %vm26783_vm3, %v19337_v43 }
 0x27f   : > { %1930 = vmatpush.bf16.msrb.mxu3 %v12221_v7  ;;  %v16765_v7 = vld [vmem:[%s26777_s9 + $0x110] sm:$0xf0] }
 0x280   : > { %3164 = vmatpush.bf16.msra.mxu2 %v12621_v48  ;;  %3155 = vmatpush.bf16.msra.mxu1 %v12477_v18  ;;  %v19589_v48 = vpack.c.bf16 %v2150_v9, %v2150_v9  ;;  %v12381_v16 = vor.u32 %v16765_v7, %v12380_v10  ;;  %v12313_v18 = vor.u32 %v16746_v14, %v12310_v29  ;;  %v16737_v10 = vld [vmem:[%s26777_s9 + $0x34] sm:$0xf]  ;;  %v12274_v7 = vld [vmem:[%s26777_s9 + $0x3c] sm:$0xf0]  ;;  %v16840_v9 = vld [vmem:[%s26777_s9 + $0x368] sm:$0xf0] }
 0x281   : > { %v12277_v50 = vor.u32 %v16737_v10, %v12274_v7  ;;  %v12622_v14 = vld [vmem:[%s26777_s9 + $0x2f4] sm:$0xf0]  ;;  %v16770_v10 = vld [vmem:[%s26777_s9 + $0x13c] sm:$0xf]  ;;  %v12406_v7 = vld [vmem:[%s26777_s9 + $0x144] sm:$0xf0] }
 0x282   : > { %3133 = vmatmul.bf16.vlgmr.msrb.gmra.mxu2 %v19589_v48 }
 0x283   : > { %1931 = vmatpush.bf16.msrb.mxu3 %v12181_v2  ;;  %v12334_v2 = vld [vmem:[%s26777_s9 + $0xb4] sm:$0xf0] }
 0x284   : > { %3165 = vmatpush.bf16.msra.mxu2 %v12609_v35  ;;  %3156 = vmatpush.bf16.msra.mxu1 %v12465_v12  ;;  %v12337_v27 = vor.u32 %v16752_v1, %v12334_v2  ;;  %v16867_v35 = vld [vmem:[%s26777_s9 + $0x440] sm:$0xf0]  ;;  %v16849_v12 = vld [vmem:[%s26777_s9 + $0x3b0] sm:$0xf0]  ;;  %v12729_v1 = vor.u32 %v16852_v31, %v12728_v44  ;;  %v12526_v2 = vld [vmem:[%s26777_s9 + $0x234] sm:$0xf0] }
 0x285   : > { %v12789_v32 = vor.u32 %v16867_v35, %v12788_v54  ;;  %v12717_v3 = vor.u32 %v16849_v12, %v12716_v22  ;;  %v19730_v35 = vpack.c.bf16 %v2155_v25, %v2155_v25  ;;  %v12502_v22 = vld [vmem:[%s26777_s9 + $0x204] sm:$0xf0]  ;;  %v16831_v12 = vld [vmem:[%s26777_s9 + $0x320] sm:$0xf0]  ;;  %v12478_v44 = vld [vmem:[%s26777_s9 + $0x1d4] sm:$0xf0] }
 0x286   : > { %v16815_v31 = vld [vmem:[%s26777_s9 + $0x2a4] sm:$0xf]  ;;  %v12574_v25 = vld [vmem:[%s26777_s9 + $0x294] sm:$0xf0] }
 0x288   : > { %3166 = vmatpush.bf16.msra.mxu2 %v12597_v61  ;;  %3157 = vmatpush.bf16.msra.mxu1 %v12453_v60  ;;  %v12356_v61 = vld [vmem:[%s26777_s9 + $0xd8] sm:$0xf]  ;;  %v12704_v60 = vld [vmem:[%s26777_s9 + $0x390] sm:$0xf] }
 0x289   : > { %v12357_v40 = vor.u32 %v16759_v23, %v12356_v61  ;;  %v16731_v61 = vld [vmem:[%s26777_s9 + $0x4] sm:$0xf] }
 0x28c   : > { %3167 = vmatpush.bf16.msra.mxu2 %v12585_v45  ;;  %3158 = vmatpush.bf16.msra.mxu1 %v12441_v37  ;;  %v12344_v45 = vld [vmem:[%s26777_s9 + $0xc0] sm:$0xf]  ;;  %v12286_v37 = vld [vmem:[%s26777_s9 + $0x54] sm:$0xf0] }
 0x28e   : > { %12231 = vmatmul.msk.bf16.vlgmr.msra.gmra.mxu3 %vm26784_vm12, %v19337_v43 }
 0x28f   : > { %3138 = vmatpush.bf16.msra.mxu3 %v12429_v28  ;;  %v16756_v28 = vld [vmem:[%s26777_s9 + $0xc8] sm:$0xf0]  ;;  %3159 = vmatmul.bf16.vlgmr.msra.gmra.mxu1 %v19652_v62 }
 0x290   : > { %3168 = vmatpush.bf16.msra.mxu2 %v12573_v39  ;;  %3190 = vmatpush.bf16.msrb.mxu1 %v12813_v56  ;;  %v16743_v39 = vld [vmem:[%s26777_s9 + $0x64] sm:$0xf]  ;;  %v12705_v56 = vor.u32 %v16846_v51, %v12704_v60  ;;  %v16821_v60 = vld [vmem:[%s26777_s9 + $0x2d4] sm:$0xf] }
 0x291   : > { %v12301_v19 = vor.u32 %v16743_v39, %v12298_v38  ;;  %v12632_v39 = vld [vmem:[%s26777_s9 + $0x300] sm:$0xf]  ;;  %v16828_v38 = vld [vmem:[%s26777_s9 + $0x308] sm:$0xf0] }
 0x292   : > { %v12633_v24 = vor.u32 %v16828_v38, %v12632_v39  ;;  %v16758_v39 = vld [vmem:[%s26777_s9 + $0xdc] sm:$0xf]  ;;  %v12358_v38 = vld [vmem:[%s26777_s9 + $0xe4] sm:$0xf0] }
 0x293   : > { %3139 = vmatpush.bf16.msra.mxu3 %v12417_v36  ;;  %v12345_v36 = vor.u32 %v16756_v28, %v12344_v45  ;;  %v16834_v45 = vld [vmem:[%s26777_s9 + $0x338] sm:$0xf0] }
 0x294   : > { %3169 = vmatpush.bf16.msra.mxu2 %v12561_v42  ;;  %3191 = vmatpush.bf16.msrb.mxu1 %v12801_v20  ;;  %v12753_v42 = vor.u32 %v16858_v5, %v12752_v47  ;;  %v16794_v28 = vld [vmem:[%s26777_s9 + $0x1fc] sm:$0xf]  ;;  %v12610_v47 = vld [vmem:[%s26777_s9 + $0x2dc] sm:$0xf0] }
 0x295   : > { %v12505_v26 = vor.u32 %v16794_v28, %v12502_v22  ;;  %v12613_v51 = vor.u32 %v16821_v60, %v12610_v47  ;;  %v16872_v28 = vld [vmem:[%s26777_s9 + $0x46c] sm:$0xf]  ;;  %v12814_v22 = vld [vmem:[%s26777_s9 + $0x474] sm:$0xf0]  ;;  %v16803_v60 = vld [vmem:[%s26777_s9 + $0x244] sm:$0xf] }
 0x296   : > { %v12538_v47 = vld [vmem:[%s26777_s9 + $0x24c] sm:$0xf0] }
 0x297   : > { %3140 = vmatpush.bf16.msra.mxu3 %v12405_v49  ;;  %v16740_v49 = vld [vmem:[%s26777_s9 + $0x4c] sm:$0xf] }
 0x298   : > { %3170 = vmatpush.bf16.msra.mxu2 %v12549_v58  ;;  %3192 = vmatpush.bf16.msrb.mxu1 %v12789_v32  ;;  %v12289_v30 = vor.u32 %v16740_v49, %v12286_v37  ;;  %v16843_v58 = vld [vmem:[%s26777_s9 + $0x380] sm:$0xf0]  ;;  %v12681_v32 = vor.u32 %v16840_v9, %v12680_v4  ;;  %v12418_v49 = vld [vmem:[%s26777_s9 + $0x15c] sm:$0xf0]  ;;  %v12490_v37 = vld [vmem:[%s26777_s9 + $0x1ec] sm:$0xf0]  ;;  %v12409_v4 = vor.u32 %v16770_v10, %v12406_v7 }
 0x299   : > { %v12693_v20 = vor.u32 %v16843_v58, %v12692_v55  ;;  %v12421_v55 = vor.u32 %v16773_v8, %v12418_v49  ;;  %v16754_v8 = vld [vmem:[%s26777_s9 + $0xb8] sm:$0xf0]  ;;  %v16755_v49 = vld [vmem:[%s26777_s9 + $0xc4] sm:$0xf] }
 0x29b   : > { %3141 = vmatpush.bf16.msra.mxu3 %v12393_v46  ;;  %v12741_v46 = vor.u32 %v16855_v13, %v12740_v11 }
 0x29c   : > { %3171 = vmatpush.bf16.msra.mxu2 %v12537_v0  ;;  %v16800_v0 = vld [vmem:[%s26777_s9 + $0x22c] sm:$0xf] }
 0x29d   : > { %v12529_v21 = vor.u32 %v16800_v0, %v12526_v2  ;;  %v16767_v0 = vld [vmem:[%s26777_s9 + $0x124] sm:$0xf]  ;;  %v12394_v2 = vld [vmem:[%s26777_s9 + $0x12c] sm:$0xf0] }
 0x29e   : > { %12234 = vmatmul.msk.bf16.vlgmr.msrb.gmra.mxu3 %vm26786_vm10, %v19337_v43  ;;  %v16864_v43 = vld [vmem:[%s26777_s9 + $0x428] sm:$0xf0] }
 0x29f   : > { %3142 = vmatpush.bf16.msra.mxu3 %v12381_v16  ;;  %v12777_v57 = vor.u32 %v16864_v43, %v12776_v17  ;;  %3172 = vmatmul.bf16.vlgmr.msra.gmra.mxu2 %v19680_v41  ;;  %v16734_v16 = vld [vmem:[%s26777_s9 + $0x1c] sm:$0xf]  ;;  %v12250_v17 = vld [vmem:[%s26777_s9 + $0xc] sm:$0xf0]  ;;  %v16824_v43 = vld [vmem:[%s26777_s9 + $0x2ec] sm:$0xf] }
 0x2a0   : > { %3203 = vmatpush.bf16.msrb.mxu2 %v12337_v27  ;;  %v12262_v27 = vld [vmem:[%s26777_s9 + $0x24] sm:$0xf0]  ;;  %v12625_v29 = vor.u32 %v16824_v43, %v12622_v14 }
 0x2a1   : > { %3193 = vmatpush.bf16.msrb.mxu1 %v12777_v57  ;;  %v12265_v54 = vor.u32 %v16734_v16, %v12262_v27  ;;  %v12253_v57 = vor.u32 %v16731_v61, %v12250_v17  ;;  %v12466_v16 = vld [vmem:[%s26777_s9 + $0x1bc] sm:$0xf0]  ;;  %v16812_v27 = vld [vmem:[%s26777_s9 + $0x28c] sm:$0xf] }
 0x2a2   : > { %v12562_v17 = vld [vmem:[%s26777_s9 + $0x27c] sm:$0xf0] }
 0x2a3   : > { %3143 = vmatpush.bf16.msra.mxu3 %v12369_v6  ;;  %v12514_v6 = vld [vmem:[%s26777_s9 + $0x21c] sm:$0xf0] }
 0x2a4   : > { %3204 = vmatpush.bf16.msrb.mxu2 %v12325_v34  ;;  %v16797_v34 = vld [vmem:[%s26777_s9 + $0x214] sm:$0xf] }
 0x2a5   : > { %3194 = vmatpush.bf16.msrb.mxu1 %v12765_v63  ;;  %v12517_v23 = vor.u32 %v16797_v34, %v12514_v6  ;;  %v12645_v63 = vor.u32 %v16831_v12, %v12644_v15  ;;  %v16764_v34 = vld [vmem:[%s26777_s9 + $0x10c] sm:$0xf]  ;;  %v12382_v6 = vld [vmem:[%s26777_s9 + $0x114] sm:$0xf0]  ;;  %v12550_v15 = vld [vmem:[%s26777_s9 + $0x264] sm:$0xf0] }
 0x2a6   : > { %v12385_v43 = vor.u32 %v16764_v34, %v12382_v6  ;;  %v16842_v34 = vld [vmem:[%s26777_s9 + $0x37c] sm:$0xf]  ;;  %v12694_v6 = vld [vmem:[%s26777_s9 + $0x384] sm:$0xf0] }
 0x2a7   : > { %3144 = vmatpush.bf16.msra.mxu3 %v12357_v40  ;;  %v12656_v40 = vld [vmem:[%s26777_s9 + $0x330] sm:$0xf] }
 0x2a8   : > { %3205 = vmatpush.bf16.msrb.mxu2 %v12313_v18  ;;  %v12669_v18 = vor.u32 %v16837_v53, %v12668_v59  ;;  %v12657_v33 = vor.u32 %v16834_v45, %v12656_v40  ;;  %v16782_v59 = vld [vmem:[%s26777_s9 + $0x19c] sm:$0xf]  ;;  %v12454_v53 = vld [vmem:[%s26777_s9 + $0x1a4] sm:$0xf0]  ;;  %v12370_v40 = vld [vmem:[%s26777_s9 + $0xfc] sm:$0xf0] }
 0x2a9   : > { %3195 = vmatpush.bf16.msrb.mxu1 %v12753_v42  ;;  %v16791_v42 = vld [vmem:[%s26777_s9 + $0x1e4] sm:$0xf]  ;;  %v12457_v61 = vor.u32 %v16782_v59, %v12454_v53  ;;  %v16748_v53 = vld [vmem:[%s26777_s9 + $0x88] sm:$0xf0] }
 0x2aa   : > { %v12493_v13 = vor.u32 %v16791_v42, %v12490_v37  ;;  %v12340_v42 = vld [vmem:[%s26777_s9 + $0xb0] sm:$0xf] }
 0x2ab   : > { %3145 = vmatpush.bf16.msra.mxu3 %v12345_v36  ;;  %v12430_v36 = vld [vmem:[%s26777_s9 + $0x174] sm:$0xf0]  ;;  %v12346_v37 = vld [vmem:[%s26777_s9 + $0xcc] sm:$0xf0] }
 0x2ac   : > { %3206 = vmatpush.bf16.msrb.mxu2 %v12301_v19  ;;  %v16776_v19 = vld [vmem:[%s26777_s9 + $0x16c] sm:$0xf]  ;;  %v12349_v7 = vor.u32 %v16755_v49, %v12346_v37  ;;  %v12280_v37 = vld [vmem:[%s26777_s9 + $0x38] sm:$0xf] }
 0x2ad   : > { %3196 = vmatpush.bf16.msrb.mxu1 %v12741_v46  ;;  %v12433_v5 = vor.u32 %v16776_v19, %v12430_v36  ;;  %v16788_v46 = vld [vmem:[%s26777_s9 + $0x1cc] sm:$0xf]  ;;  %v16869_v19 = vld [vmem:[%s26777_s9 + $0x454] sm:$0xf] }
 0x2ae   : > { %3146 = vmatmul.bf16.vlgmr.msra.gmra.mxu3 %v19678_v52 }
 0x2af   : > { %3177 = vmatpush.bf16.msrb.mxu3 %v12717_v3  ;;  %v2154_v3 = vld [vmem:[%s19565_s1 + $0x20] sm:$0x1f]  ;;  %s18190_s1 = smov 64  }
 0x2b0   : > { %3207 = vmatpush.bf16.msrb.mxu2 %v12289_v30  ;;  %v19807_v11 = vpack.c.bf16 %v2154_v3, %v2154_v3  ;;  %v16818_v30 = vld [vmem:[%s26777_s9 + $0x2bc] sm:$0xf] }
 0x2b1   : > { %3197 = vmatpush.bf16.msrb.mxu1 %v12729_v1  ;;  %v16785_v1 = vld [vmem:[%s26777_s9 + $0x1b4] sm:$0xf] }
 0x2b3   : > { %3178 = vmatpush.bf16.msrb.mxu3 %v12705_v56  ;;  %v12598_v56 = vld [vmem:[%s26777_s9 + $0x2c4] sm:$0xf0] }
 0x2b4   : > { %3208 = vmatpush.bf16.msrb.mxu2 %v12277_v50  ;;  %3198 = vmatmul.bf16.vlgmr.msrb.gmra.mxu1 %v19730_v35  ;;  %v12601_v58 = vor.u32 %v16818_v30, %v12598_v56  ;;  %v12481_v50 = vor.u32 %v16788_v46, %v12478_v44  ;;  %v12341_v30 = vor.u32 %v16754_v8, %v12340_v42  ;;  %v12718_v56 = vld [vmem:[%s26777_s9 + $0x3b4] sm:$0xf0]  ;;  %v16833_v8 = vld [vmem:[%s26777_s9 + $0x334] sm:$0xf] }
 0x2b5   : > { %3229 = vmatpush.bf16.msra.mxu1 %v12529_v21  ;;  %v12469_v21 = vor.u32 %v16785_v1, %v12466_v16  ;;  %v12328_v44 = vld [vmem:[%s26777_s9 + $0x98] sm:$0xf]  ;;  %v12724_v16 = vld [vmem:[%s26777_s9 + $0x3b0] sm:$0xf] }
 0x2b7   : > { %3179 = vmatpush.bf16.msrb.mxu3 %v12693_v20  ;;  %v12586_v20 = vld [vmem:[%s26777_s9 + $0x2ac] sm:$0xf0] }
 0x2b8   : > { %3209 = vmatpush.bf16.msrb.mxu2 %v12265_v54  ;;  %v12589_v9 = vor.u32 %v16815_v31, %v12586_v20  ;;  %v12397_v54 = vor.u32 %v16767_v0, %v12394_v2  ;;  %v16863_v0 = vld [vmem:[%s26777_s9 + $0x424] sm:$0xf] }
 0x2b9   : > { %3230 = vmatpush.bf16.msra.mxu1 %v12517_v23  ;;  %v16809_v23 = vld [vmem:[%s26777_s9 + $0x274] sm:$0xf] }
 0x2ba   : > { %v12565_v14 = vor.u32 %v16809_v23, %v12562_v17  ;;  %v16860_v23 = vld [vmem:[%s26777_s9 + $0x40c] sm:$0xf]  ;;  %v12766_v17 = vld [vmem:[%s26777_s9 + $0x414] sm:$0xf0] }
 0x2bb   : > { %3180 = vmatpush.bf16.msrb.mxu3 %v12681_v32  ;;  %v12577_v32 = vor.u32 %v16812_v27, %v12574_v25  ;;  %v12778_v27 = vld [vmem:[%s26777_s9 + $0x42c] sm:$0xf0] }
 0x2bc   : > { %3210 = vmatpush.bf16.msrb.mxu2 %v12253_v57  ;;  %v16779_v57 = vld [vmem:[%s26777_s9 + $0x184] sm:$0xf] }
 0x2bd   : > { %3231 = vmatpush.bf16.msra.mxu1 %v12505_v26  ;;  %v12817_v26 = vor.u32 %v16872_v28, %v12814_v22  ;;  %v12682_v22 = vld [vmem:[%s26777_s9 + $0x36c] sm:$0xf0] }
 0x2bf   : > { %3181 = vmatpush.bf16.msrb.mxu3 %v12669_v18  ;;  %3211 = vmatmul.bf16.vlgmr.msrb.gmra.mxu2 %v19589_v48  ;;  %v16761_v18 = vld [vmem:[%s26777_s9 + $0xf4] sm:$0xf] }
 0x2c0   : > { %3242 = vmatpush.bf16.msra.mxu2 %v12625_v29  ;;  %v12442_v29 = vld [vmem:[%s26777_s9 + $0x18c] sm:$0xf0]  ;;  %v12373_v12 = vor.u32 %v16761_v18, %v12370_v40  ;;  %v16839_v18 = vld [vmem:[%s26777_s9 + $0x364] sm:$0xf]  ;;  %v12769_v40 = vor.u32 %v16860_v23, %v12766_v17  ;;  %v16778_v23 = vld [vmem:[%s26777_s9 + $0x178] sm:$0xf0] }
 0x2c1   : > { %3232 = vmatpush.bf16.msra.mxu1 %v12493_v13  ;;  %v12445_v45 = vor.u32 %v16779_v57, %v12442_v29  ;;  %v16848_v13 = vld [vmem:[%s26777_s9 + $0x3ac] sm:$0xf]  ;;  %v12697_v29 = vor.u32 %v16842_v34, %v12694_v6  ;;  %v12634_v34 = vld [vmem:[%s26777_s9 + $0x30c] sm:$0xf0] }
 0x2c2   : > { %v12721_v20 = vor.u32 %v16848_v13, %v12718_v56  ;;  %v16739_v13 = vld [vmem:[%s26777_s9 + $0x40] sm:$0xf0]  ;;  %v12658_v56 = vld [vmem:[%s26777_s9 + $0x33c] sm:$0xf0] }
 0x2c3   : > { %3182 = vmatpush.bf16.msrb.mxu3 %v12657_v33  ;;  %v16806_v33 = vld [vmem:[%s26777_s9 + $0x25c] sm:$0xf] }
 0x2c4   : > { %3243 = vmatpush.bf16.msra.mxu2 %v12613_v51  ;;  %v12541_v51 = vor.u32 %v16803_v60, %v12538_v47  ;;  %v16854_v60 = vld [vmem:[%s26777_s9 + $0x3dc] sm:$0xf]  ;;  %v12742_v47 = vld [vmem:[%s26777_s9 + $0x3e4] sm:$0xf0] }
 0x2c5   : > { %3233 = vmatpush.bf16.msra.mxu1 %v12481_v50  ;;  %v16751_v50 = vld [vmem:[%s26777_s9 + $0xa0] sm:$0xf0]  ;;  %v12745_v49 = vor.u32 %v16854_v60, %v12742_v47 }
 0x2c6   : > { %v12329_v1 = vor.u32 %v16751_v50, %v12328_v44  ;;  %v1694_v44 = vld [vmem:[%s26787_s29 + $0x8] sm:$0x3]  ;;  %v12268_v50 = vld [vmem:[%s26777_s9 + $0x20] sm:$0xf]  ;;  %s26791_s29 = sld [smem:[#allocation25_spill]] }
 0x2c7   : > { %3183 = vmatpush.bf16.msrb.mxu3 %v12645_v63  ;;  %v12553_v63 = vor.u32 %v16806_v33, %v12550_v15  ;;  %v16857_v33 = vld [vmem:[%s26777_s9 + $0x3f4] sm:$0xf]  ;;  %v12754_v15 = vld [vmem:[%s26777_s9 + $0x3fc] sm:$0xf0] }
 0x2c8   : > { %3244 = vmatpush.bf16.msra.mxu2 %v12601_v58  ;;  %v12790_v58 = vld [vmem:[%s26777_s9 + $0x444] sm:$0xf0] }
 0x2c9   : > { %3234 = vmatpush.bf16.msra.mxu1 %v12469_v21  ;;  %v16850_v21 = vld [vmem:[%s26777_s9 + $0x3b8] sm:$0xf0] }
 0x2ca   : > { %v12725_v25 = vor.u32 %v16850_v21, %v12724_v16  ;;  %v12256_v21 = vld [vmem:[%s26777_s9 + $0x8] sm:$0xf] }
 0x2cb   : > { %3184 = vmatpush.bf16.msrb.mxu3 %v12633_v24  ;;  %v12802_v24 = vld [vmem:[%s26777_s9 + $0x45c] sm:$0xf0] }
 0x2cc   : > { %3245 = vmatpush.bf16.msra.mxu2 %v12589_v9  ;;  %v12805_v3 = vor.u32 %v16869_v19, %v12802_v24  ;;  %v12706_v9 = vld [vmem:[%s26777_s9 + $0x39c] sm:$0xf0]  ;;  %3333 = vmatpush.bf16.msrb.mxu0 %v12725_v25  ;;  %v16836_v19 = vld [vmem:[%s26777_s9 + $0x34c] sm:$0xf] }
 0x2cd   : > { %3235 = vmatpush.bf16.msra.mxu1 %v12457_v61 }
 0x2ce   : > { %3185 = vmatmul.bf16.vlgmr.msrb.gmra.mxu3 %v19807_v11 }
 0x2cf   : > { %3216 = vmatpush.bf16.msra.mxu3 %v12433_v5  ;;  %v12361_v5 = vor.u32 %v16758_v39, %v12358_v38  ;;  %v16742_v39 = vld [vmem:[%s26777_s9 + $0x58] sm:$0xf0]  ;;  %v12685_v38 = vor.u32 %v16839_v18, %v12682_v22  ;;  %v12628_v18 = vld [vmem:[%s26777_s9 + $0x2f0] sm:$0xf] }
 0x2d0   : > { %3246 = vmatpush.bf16.msra.mxu2 %v12577_v32  ;;  %v12316_v32 = vld [vmem:[%s26777_s9 + $0x80] sm:$0xf]  ;;  %v16802_v22 = vld [vmem:[%s26777_s9 + $0x238] sm:$0xf0] }
 0x2d1   : > { %3236 = vmatpush.bf16.msra.mxu1 %v12445_v45  ;;  %v12317_v61 = vor.u32 %v16748_v53, %v12316_v32  ;;  %v16745_v45 = vld [vmem:[%s26777_s9 + $0x70] sm:$0xf0]  ;;  %v16827_v53 = vld [vmem:[%s26777_s9 + $0x304] sm:$0xf] }
 0x2d2   : > { %v12637_v17 = vor.u32 %v16827_v53, %v12634_v34  ;;  %v12580_v34 = vld [vmem:[%s26777_s9 + $0x290] sm:$0xf] }
 0x2d3   : > { %3217 = vmatpush.bf16.msra.mxu3 %v12421_v55  ;;  %v16866_v55 = vld [vmem:[%s26777_s9 + $0x43c] sm:$0xf] }
 0x2d4   : > { %3247 = vmatpush.bf16.msra.mxu2 %v12565_v14  ;;  %3237 = vmatmul.bf16.vlgmr.msra.gmra.mxu1 %v19652_v62  ;;  %v12793_v46 = vor.u32 %v16866_v55, %v12790_v58  ;;  %v12304_v14 = vld [vmem:[%s26777_s9 + $0x68] sm:$0xf]  ;;  %v16851_v55 = vld [vmem:[%s26777_s9 + $0x3c4] sm:$0xf]  ;;  %v12730_v58 = vld [vmem:[%s26777_s9 + $0x3cc] sm:$0xf0] }
 0x2d5   : > { %3268 = vmatpush.bf16.msrb.mxu1 %v12817_v26  ;;  %v12305_v26 = vor.u32 %v16745_v45, %v12304_v14  ;;  %v12424_v14 = vld [vmem:[%s26777_s9 + $0x158] sm:$0xf]  ;;  %v12532_v45 = vld [vmem:[%s26777_s9 + $0x230] sm:$0xf] }
 0x2d6   : > { %v12533_v60 = vor.u32 %v16802_v22, %v12532_v45 }
 0x2d7   : > { %3218 = vmatpush.bf16.msra.mxu3 %v12409_v4  ;;  %v16845_v4 = vld [vmem:[%s26777_s9 + $0x394] sm:$0xf] }
 0x2d8   : > { %3248 = vmatpush.bf16.msra.mxu2 %v12553_v63  ;;  %v12709_v59 = vor.u32 %v16845_v4, %v12706_v9  ;;  %v12292_v63 = vld [vmem:[%s26777_s9 + $0x50] sm:$0xf]  ;;  %v12661_v4 = vor.u32 %v16833_v8, %v12658_v56  ;;  %v16830_v9 = vld [vmem:[%s26777_s9 + $0x31c] sm:$0xf]  ;;  %v16769_v56 = vld [vmem:[%s26777_s9 + $0x130] sm:$0xf0] }
 0x2d9   : > { %3269 = vmatpush.bf16.msrb.mxu1 %v12805_v3  ;;  %v12293_v24 = vor.u32 %v16742_v39, %v12292_v63  ;;  %v12670_v3 = vld [vmem:[%s26777_s9 + $0x354] sm:$0xf0]  ;;  %v16772_v63 = vld [vmem:[%s26777_s9 + $0x148] sm:$0xf0] }
 0x2da   : > { %v12673_v42 = vor.u32 %v16836_v19, %v12670_v3  ;;  %v16799_v19 = vld [vmem:[%s26777_s9 + $0x220] sm:$0xf0] }
 0x2db   : > { %3219 = vmatpush.bf16.msra.mxu3 %v12397_v54  ;;  %v19903_v36 = vpop.f32.mrf.mxu1  ;;  %v12781_v54 = vor.u32 %v16863_v0, %v12778_v27  ;;  %v16733_v27 = vld [vmem:[%s26777_s9 + $0x10] sm:$0xf0]  ;;  %v16847_v3 = vld [vmem:[%s26777_s9 + $0x3a0] sm:$0xf0] }
 0x2dc   : > { %3249 = vmatpush.bf16.msra.mxu2 %v12541_v51  ;;  %v12257_v32 = vor.u32 %v16733_v27, %v12256_v21  ;;  %v12496_v21 = vld [vmem:[%s26777_s9 + $0x1e8] sm:$0xf]  ;;  %v16793_v27 = vld [vmem:[%s26777_s9 + $0x1f0] sm:$0xf0] }
 0x2dd   : > { %3270 = vmatpush.bf16.msrb.mxu1 %v12793_v46  ;;  %v12281_v46 = vor.u32 %v16739_v13, %v12280_v37  ;;  %v12604_v13 = vld [vmem:[%s26777_s9 + $0x2c0] sm:$0xf]  ;;  %v12497_v53 = vor.u32 %v16793_v27, %v12496_v21  ;;  %v16781_v21 = vld [vmem:[%s26777_s9 + $0x190] sm:$0xf0]  ;;  %v12808_v27 = vld [vmem:[%s26777_s9 + $0x458] sm:$0xf] }
 0x2df   : > { %3220 = vmatpush.bf16.msra.mxu3 %v12385_v43  ;;  %3250 = vmatmul.bf16.vlgmr.msra.gmra.mxu2 %v19680_v41 }
 0x2e0   : > { %3281 = vmatpush.bf16.msrb.mxu2 %v12341_v30 }
 0x2e1   : > { %v19939_v10 = vpop.f32.mrf.mxu3  ;;  %3271 = vmatpush.bf16.msrb.mxu1 %v12781_v54 }
 0x2e2   : > { %v19947_v31 = vpop.f32.mrf.mxu2 }
 0x2e3   : > { %3221 = vmatpush.bf16.msra.mxu3 %v12373_v12  ;;  %v1870_v2 = vpop.f32.mrf.mxu1  ;;  %v12757_v12 = vor.u32 %v16857_v33, %v12754_v15  ;;  %v12412_v15 = vld [vmem:[%s26777_s9 + $0x140] sm:$0xf] }
 0x2e4   : > { %3282 = vmatpush.bf16.msrb.mxu2 %v12329_v1  ;;  %v12646_v1 = vld [vmem:[%s26777_s9 + $0x324] sm:$0xf0]  ;;  %v1806_v2 = vperm.slane %v1694_v44, 1  ;;  %v12413_v8 = vor.u32 %v16772_v63, %v12412_v15  ;;  %v12700_v44 = vld [vmem:[%s26777_s9 + $0x380] sm:$0xf] }
 0x2e5   : > { %3272 = vmatpush.bf16.msrb.mxu1 %v12769_v40  ;;  %v12649_v54 = vor.u32 %v16830_v9, %v12646_v1  ;;  %v16826_v40 = vld [vmem:[%s26777_s9 + $0x2f8] sm:$0xf0]  ;;  %v12592_v1 = vld [vmem:[%s26777_s9 + $0x2a8] sm:$0xf]  ;;  %v16811_v15 = vld [vmem:[%s26777_s9 + $0x280] sm:$0xf0] }
 0x2e6   : > { %v12629_v39 = vor.u32 %v16826_v40, %v12628_v18  ;;  %v12364_v18 = vld [vmem:[%s26777_s9 + $0xe0] sm:$0xf]  ;;  %v16760_v40 = vld [vmem:[%s26777_s9 + $0xe8] sm:$0xf0]  ;;  %v16787_v63 = vld [vmem:[%s26777_s9 + $0x1c0] sm:$0xf0] }
 0x2e7   : > { %3222 = vmatpush.bf16.msra.mxu3 %v12361_v5 }
 0x2e8   : > { %3283 = vmatpush.bf16.msrb.mxu2 %v12317_v61  ;;  %v12436_v61 = vld [vmem:[%s26777_s9 + $0x170] sm:$0xf] }
 0x2e9   : > { %v1831_v43 = vpop.f32.mrf.mxu3  ;;  %3273 = vmatpush.bf16.msrb.mxu1 %v12757_v12  ;;  %v16823_v12 = vld [vmem:[%s26777_s9 + $0x2e0] sm:$0xf0] }
 0x2ea   : > { %v1883_v57 = vpop.f32.mrf.mxu2  ;;  %v12437_v43 = vor.u32 %v16778_v23, %v12436_v61  ;;  %v16814_v61 = vld [vmem:[%s26777_s9 + $0x298] sm:$0xf0]  ;;  %v12484_v23 = vld [vmem:[%s26777_s9 + $0x1d0] sm:$0xf] }
 0x2eb   : > { %3223 = vmatpush.bf16.msra.mxu3 %v12349_v7  ;;  %v19996_v28 = vpop.f32.mrf.mxu1  ;;  %v12733_v7 = vor.u32 %v16851_v55, %v12730_v58  ;;  %v16775_v57 = vld [vmem:[%s26777_s9 + $0x160] sm:$0xf0]  ;;  %v12508_v55 = vld [vmem:[%s26777_s9 + $0x200] sm:$0xf]  ;;  %v16796_v58 = vld [vmem:[%s26777_s9 + $0x208] sm:$0xf0]  ;;  %v12581_v45 = vor.u32 %v16814_v61, %v12580_v34 }
 0x2ec   : > { %3284 = vmatpush.bf16.msrb.mxu2 %v12305_v26  ;;  %v12425_v33 = vor.u32 %v16775_v57, %v12424_v14  ;;  %v12509_v9 = vor.u32 %v16796_v58, %v12508_v55  ;;  %v16841_v57 = vld [vmem:[%s26777_s9 + $0x370] sm:$0xf0]  ;;  %v12820_v58 = vld [vmem:[%s26777_s9 + $0x470] sm:$0xf] }
 0x2ed   : > { %3274 = vmatpush.bf16.msrb.mxu1 %v12745_v49  ;;  %v12400_v49 = vld [vmem:[%s26777_s9 + $0x128] sm:$0xf] }
 0x2ee   : > { %3224 = vmatmul.bf16.vlgmr.msra.gmra.mxu3 %v19678_v52 }
 0x2ef   : > { %3255 = vmatpush.bf16.msrb.mxu3 %v12721_v20  ;;  %v16736_v20 = vld [vmem:[%s26777_s9 + $0x28] sm:$0xf0] }
 0x2f0   : > { %3285 = vmatpush.bf16.msrb.mxu2 %v12293_v24  ;;  %v12269_v0 = vor.u32 %v16736_v20, %v12268_v50  ;;  %v12712_v24 = vld [vmem:[%s26777_s9 + $0x398] sm:$0xf]  ;;  %v16844_v50 = vld [vmem:[%s26777_s9 + $0x388] sm:$0xf0]  ;;  %v12401_v20 = vor.u32 %v16769_v56, %v12400_v49  ;;  %v16835_v56 = vld [vmem:[%s26777_s9 + $0x340] sm:$0xf0] }
 0x2f1   : > { %v20025_v5 = vpop.f32.mrf.mxu3  ;;  %3275 = vmatpush.bf16.msrb.mxu1 %v12733_v7  ;;  %v16808_v49 = vld [vmem:[%s26777_s9 + $0x268] sm:$0xf0] }
 0x2f2   : > { %v20027_v51 = vpop.f32.mrf.mxu2 }
 0x2f3   : > { %3256 = vmatpush.bf16.msrb.mxu3 %v12709_v59  ;;  %v1909_v30 = vpop.f32.mrf.mxu1 }
 0x2f4   : > { %3286 = vmatpush.bf16.msrb.mxu2 %v12281_v46  ;;  %3276 = vmatmul.bf16.vlgmr.msrb.gmra.mxu1 %v19730_v35  ;;  %v16820_v30 = vld [vmem:[%s26777_s9 + $0x2c8] sm:$0xf0] }
 0x2f5   : > { %3307 = vmatpush.bf16.msra.mxu1 %v12533_v60  ;;  %v12605_v7 = vor.u32 %v16820_v30, %v12604_v13  ;;  %v12460_v13 = vld [vmem:[%s26777_s9 + $0x1a0] sm:$0xf]  ;;  %v16784_v30 = vld [vmem:[%s26777_s9 + $0x1a8] sm:$0xf0] }
 0x2f7   : > { %3257 = vmatpush.bf16.msrb.mxu3 %v12697_v29 }
 0x2f8   : > { %3287 = vmatpush.bf16.msrb.mxu2 %v12269_v0  ;;  %v16817_v0 = vld [vmem:[%s26777_s9 + $0x2b0] sm:$0xf0] }
 0x2f9   : > { %v1844_v16 = vpop.f32.mrf.mxu3 }
 0x2fa   : > { %v1922_v25 = vpop.f32.mrf.mxu2  ;;  %v16766_v16 = vld [vmem:[%s26777_s9 + $0x118] sm:$0xf0] }
 0x2fb   : > { %3258 = vmatpush.bf16.msrb.mxu3 %v12685_v38  ;;  %v1946_v59 = vpop.f32.mrf.mxu1  ;;  %v12520_v38 = vld [vmem:[%s26777_s9 + $0x218] sm:$0xf] }
 0x2fc   : > { %v20075_v6 = vadd.f32 %v1946_v59, %v1806_v2  ;;  %3288 = vmatpush.bf16.msrb.mxu2 %v12257_v32  ;;  %v12521_v37 = vor.u32 %v16799_v19, %v12520_v38  ;;  %v12701_v2 = vor.u32 %v16844_v50, %v12700_v44  ;;  %v12376_v25 = vld [vmem:[%s26777_s9 + $0xf8] sm:$0xf]  ;;  %v16763_v59 = vld [vmem:[%s26777_s9 + $0x100] sm:$0xf0]  ;;  %v16838_v38 = vld [vmem:[%s26777_s9 + $0x358] sm:$0xf0] }
 0x2fd   : > { %v12377_v22 = vor.u32 %v16763_v59, %v12376_v25  ;;  %v12352_v19 = vld [vmem:[%s26777_s9 + $0xc8] sm:$0xf]  ;;  %v16871_v25 = vld [vmem:[%s26777_s9 + $0x460] sm:$0xf0] }
 0x2fe   : > { %3308 = vmatpush.bf16.msra.mxu1 %v12521_v37  ;;  %v12664_v37 = vld [vmem:[%s26777_s9 + $0x338] sm:$0xf]  ;;  %v12544_v50 = vld [vmem:[%s26777_s9 + $0x248] sm:$0xf]  ;;  %v12809_v61 = vor.u32 %v16871_v25, %v12808_v27 }
 0x2ff   : > { %3259 = vmatpush.bf16.msrb.mxu3 %v12673_v42  ;;  %3289 = vmatmul.bf16.vlgmr.msrb.gmra.mxu2 %v19589_v48  ;;  %v12616_v48 = vld [vmem:[%s26777_s9 + $0x2d8] sm:$0xf]  ;;  %v12713_v42 = vor.u32 %v16847_v3, %v12712_v24  ;;  %v16757_v24 = vld [vmem:[%s26777_s9 + $0xd0] sm:$0xf0]  ;;  %v12640_v59 = vld [vmem:[%s26777_s9 + $0x308] sm:$0xf] }
 0x300   : > { %3320 = vmatpush.bf16.msra.mxu2 %v12629_v39  ;;  %v12617_v47 = vor.u32 %v16823_v12, %v12616_v48  ;;  %v12472_v12 = vld [vmem:[%s26777_s9 + $0x1b8] sm:$0xf]  ;;  %v12676_v39 = vld [vmem:[%s26777_s9 + $0x350] sm:$0xf] }
 0x301   : > { %v20089_v29 = vpop.f32.mrf.mxu3  ;;  %3334 = vmatpush.bf16.msrb.mxu0 %v12713_v42  ;;  %v12677_v60 = vor.u32 %v16838_v38, %v12676_v39  ;;  %v12473_v42 = vor.u32 %v16787_v63, %v12472_v12  ;;  %v16859_v39 = vld [vmem:[%s26777_s9 + $0x400] sm:$0xf0] }
 0x302   : > { %3309 = vmatpush.bf16.msra.mxu1 %v12509_v9  ;;  %v16805_v9 = vld [vmem:[%s26777_s9 + $0x250] sm:$0xf0] }
 0x303   : > { %3260 = vmatpush.bf16.msrb.mxu3 %v12661_v4  ;;  %v1948_v26 = vpop.f32.mrf.mxu1  ;;  %v12388_v4 = vld [vmem:[%s26777_s9 + $0x110] sm:$0xf] }
 0x304   : > { %3321 = vmatpush.bf16.msra.mxu2 %v12617_v47  ;;  %v12389_v32 = vor.u32 %v16766_v16, %v12388_v4  ;;  %v12365_v47 = vor.u32 %v16760_v40, %v12364_v18  ;;  %v12461_v4 = vor.u32 %v16784_v30, %v12460_v13  ;;  %v12448_v16 = vld [vmem:[%s26777_s9 + $0x188] sm:$0xf]  ;;  %v16853_v30 = vld [vmem:[%s26777_s9 + $0x3d0] sm:$0xf0] }
 0x305   : > { %3335 = vmatpush.bf16.msrb.mxu0 %v12701_v2  ;;  %v12449_v34 = vor.u32 %v16781_v21, %v12448_v16  ;;  %v3134_v18 = vpop.f32.mrf.mxu2  ;;  %v12736_v13 = vld [vmem:[%s26777_s9 + $0x3c8] sm:$0xf] }
 0x306   : > { %3310 = vmatpush.bf16.msra.mxu1 %v12497_v53  ;;  %v16829_v53 = vld [vmem:[%s26777_s9 + $0x310] sm:$0xf0]  ;;  %v2355_v16 = vld [vmem:[%s26789_s0 + $0x8] sm:$0x1f] }
 0x307   : > { %3261 = vmatpush.bf16.msrb.mxu3 %v12649_v54  ;;  %v12593_v54 = vor.u32 %v16817_v0, %v12592_v1  ;;  %v12652_v1 = vld [vmem:[%s26777_s9 + $0x320] sm:$0xf]  ;;  %v16832_v0 = vld [vmem:[%s26777_s9 + $0x328] sm:$0xf0] }
 0x308   : > { %3322 = vmatpush.bf16.msra.mxu2 %v12605_v7  ;;  %v12665_v7 = vor.u32 %v16835_v56, %v12664_v37 }
 0x309   : > { %v1857_v46 = vpop.f32.mrf.mxu3 }
 0x30a   : > { %v16874_v46 = vld [vmem:[%s26777_s9 + $0x478] sm:$0xf0] }
 0x30b   : > { %3262 = vmatpush.bf16.msrb.mxu3 %v12637_v17  ;;  %v16790_v17 = vld [vmem:[%s26777_s9 + $0x1d8] sm:$0xf0]  ;;  %v12821_v2 = vor.u32 %v16874_v46, %v12820_v58 }
 0x30c   : > { %3323 = vmatpush.bf16.msra.mxu2 %v12593_v54  ;;  %v12485_v26 = vor.u32 %v16790_v17, %v12484_v23  ;;  %v12653_v54 = vor.u32 %v16832_v0, %v12652_v1  ;;  %v12796_v17 = vld [vmem:[%s26777_s9 + $0x440] sm:$0xf] }
 0x30d   : > { %v3136_v12 = vpop.f32.mrf.mxu2 }
 0x30e   : > { %3263 = vmatmul.bf16.vlgmr.msrb.gmra.mxu3 %v19807_v11  ;;  %3311 = vmatpush.bf16.msra.mxu1 %v12485_v26  ;;  %v16865_v26 = vld [vmem:[%s26777_s9 + $0x430] sm:$0xf0] }
 0x30f   : > { %3294 = vmatpush.bf16.msra.mxu3 %v12437_v43  ;;  %v12688_v43 = vld [vmem:[%s26777_s9 + $0x368] sm:$0xf] }
 0x310   : > { %v12689_v48 = vor.u32 %v16841_v57, %v12688_v43  ;;  %3324 = vmatpush.bf16.msra.mxu2 %v12581_v45  ;;  %v16868_v43 = vld [vmem:[%s26777_s9 + $0x448] sm:$0xf0]  ;;  %v12641_v57 = vor.u32 %v16829_v53, %v12640_v59  ;;  %v3160_v45 = vpop.f32.mrf.mxu1 }
 0x311   : > { %v20192_v14 = vpop.f32.mrf.mxu3  ;;  %v12797_v40 = vor.u32 %v16868_v43, %v12796_v17 }
 0x312   : > { %3336 = vmatpush.bf16.msrb.mxu0 %v12689_v48  ;;  %3312 = vmatpush.bf16.msra.mxu1 %v12473_v42  ;;  %v16862_v48 = vld [vmem:[%s26777_s9 + $0x418] sm:$0xf0] }
 0x313   : > { %3295 = vmatpush.bf16.msra.mxu3 %v12425_v33  ;;  %v12568_v33 = vld [vmem:[%s26777_s9 + $0x278] sm:$0xf] }
 0x314   : > { %v12569_v3 = vor.u32 %v16811_v15, %v12568_v33  ;;  %v12772_v15 = vld [vmem:[%s26777_s9 + $0x410] sm:$0xf] }
 0x316   : > { %3337 = vmatpush.bf16.msrb.mxu0 %v12677_v60  ;;  %3325 = vmatpush.bf16.msra.mxu2 %v12569_v3  ;;  %v16856_v3 = vld [vmem:[%s26777_s9 + $0x3e8] sm:$0xf0] }
 0x317   : > { %3296 = vmatpush.bf16.msra.mxu3 %v12413_v8  ;;  %v12556_v8 = vld [vmem:[%s26777_s9 + $0x260] sm:$0xf]  ;;  %3313 = vmatpush.bf16.msra.mxu1 %v12461_v4 }
 0x318   : > { %v12557_v44 = vor.u32 %v16808_v49, %v12556_v8  ;;  %v3162_v63 = vpop.f32.mrf.mxu1 }
 0x319   : > { %v1896_v55 = vpop.f32.mrf.mxu3 }
 0x31a   : > { %3338 = vmatpush.bf16.msrb.mxu0 %v12665_v7  ;;  %3326 = vmatpush.bf16.msra.mxu2 %v12557_v44  ;;  %v12737_v55 = vor.u32 %v16853_v30, %v12736_v13  ;;  %v18189_v13 = vmov 384.0  }
 0x31b   : > { %3297 = vmatpush.bf16.msra.mxu3 %v12401_v20  ;;  %v12353_v20 = vor.u32 %v16757_v24, %v12352_v19  ;;  %3314 = vmatpush.bf16.msra.mxu1 %v12449_v34  ;;  %v12748_v24 = vld [vmem:[%s26777_s9 + $0x3e0] sm:$0xf]  ;;  %18024 = vrcp.f32 %v18189_v13 }
 0x31c   : > { %v12749_v8 = vor.u32 %v16856_v3, %v12748_v24 }
 0x31e   : > { %3339 = vmatpush.bf16.msrb.mxu0 %v12653_v54  ;;  %3315 = vmatmul.bf16.vlgmr.msra.gmra.mxu1 %v19652_v62  ;;  %v12773_v62 = vor.u32 %v16862_v48, %v12772_v15 }
 0x31f   : > { %3298 = vmatpush.bf16.msra.mxu3 %v12389_v32  ;;  %v12545_v32 = vor.u32 %v16805_v9, %v12544_v50 }
 0x321   : > { %v20281_v23 = vpop.f32.mrf.mxu3  ;;  %3327 = vmatpush.bf16.msra.mxu2 %v12545_v32  ;;  %v20345_v30 = vpop.eup %18024 }
 0x322   : > { %3340 = vmatpush.bf16.msrb.mxu0 %v12641_v57  ;;  %v3173_v42 = vpop.f32.mrf.mxu2  ;;  %vm3374_vm15 = vweird.f32 %v20345_v30 }
 0x323   : > { %3299 = vmatpush.bf16.msra.mxu3 %v12377_v22  ;;  %v12784_v22 = vld [vmem:[%s26777_s9 + $0x428] sm:$0xf] }
 0x324   : > { %3328 = vmatmul.bf16.vlgmr.msra.gmra.mxu2 %v19680_v41  ;;  %v2354_v41 = vld [vmem:[%s26789_s0] sm:$0x1f] }
 0x325   : > { %3341 = vmatmul.bf16.vlgmr.msrb.gmra.mxu0 %v19807_v11  ;;  %v12760_v11 = vld [vmem:[%s26777_s9 + $0x3f8] sm:$0xf]  ;;  %v3135_v38 = vadd.f32 %v3134_v18, %v2354_v41  ;;  %v2356_v41 = vld [vmem:[%s26789_s0 + $0x10] sm:$0x1f]  ;;  %s12012_s0 = scalar_lea.hbm %s26651_s25, %s18343_s7 }
 0x326   : > { %v12761_v19 = vor.u32 %v16859_v39, %v12760_v11  ;;  %s12016_s27 = sshll.u32 %s12012_s0, 4  ;;  %s12017_s27 = int_to_ptr.hbm [resolvable:$true] %s12016_s27 }
 0x327   : > { %3300 = vmatpush.bf16.msra.mxu3 %v12365_v47  ;;  %s18138_s9 = sshra.s32 %s12017_s27, 4  ;;  %s18139_s9 = int_to_ptr.hbm [resolvable:$true] %s18138_s9 }
 0x328   : > { %s18140_s7 = scalar_lea.hbm %s18139_s9, 1  ;;  %p18145_p0 = scmp.lt.s32.totalorder %s18139_s9, %s26651_s25 }
 0x329   : > { %v1935_v33 = vpop.f32.mrf.mxu3  ;;  %p18141_p11 = scmp.ne.s32.totalorder %s18139_s9, %s18140_s7  ;;  %p18146_p1 = scmp.lt.s32.totalorder %s18144_s5, %s18140_s7 }
 0x32a   : > { %v3175_v46 = vpop.f32.mrf.mxu2 }
 0x32b   : > { %3301 = vmatpush.bf16.msra.mxu3 %v12353_v20  ;;  %v16942_v46 = vld [vmem:[%s26790_s10 + $0x218] sm:$0xf0]  ;;  %p18142_p12 = pnand %p18141_p11, %p18360_p5  ;;  %p18147_p2 = por %p18146_p1, %p18145_p0 }
 0x32d   : > { %p18143_p13 = pneg %p18142_p12 }
 0x32e   : > { %3302 = vmatmul.bf16.vlgmr.msra.gmra.mxu3 %v19678_v52  ;;  %v12785_v52 = vor.u32 %v16865_v26, %v12784_v22 }
 0x32f   : > { %3346 = vmatpush.bf16.msrb.mxu3 %v12821_v2  ;;  %p18148_p3 = pnand %p18147_p2, %p18143_p13 }
 0x331   : > { %v3147_v60 = vpop.f32.mrf.mxu3  ;;  %v3199_v37 = vpop.f32.mrf.mxu1 }
 0x332   : > { %v3148_v47 = vadd.f32 %v3147_v60, %v3135_v38 }
 0x333   : > { %3347 = vmatpush.bf16.msrb.mxu3 %v12809_v61 }
 0x334   : > { %v3161_v49 = vadd.f32 %v3160_v45, %v3148_v47 }
 0x336   : > { %v3174_v56 = vadd.f32 %v3173_v42, %v3161_v49 }
 0x337   : > { %3348 = vmatpush.bf16.msrb.mxu3 %v12797_v40 }
 0x339   : > { %v3149_v58 = vpop.f32.mrf.mxu3  ;;  %v3201_v7 = vpop.f32.mrf.mxu1 }
 0x33a   : > { %v13076_v58 = vld [vmem:[%s26790_s10 + $0x1f8] sm:$0xf] }
 0x33b   : > { %3349 = vmatpush.bf16.msrb.mxu3 %v12785_v52  ;;  %v13364_v7 = vld [vmem:[%s26790_s10 + $0x438] sm:$0xf] }
 0x33f   : > { %3350 = vmatpush.bf16.msrb.mxu3 %v12773_v62 }
 0x342   : > { %v3212_v44 = vpop.f32.mrf.mxu2 }
 0x343   : > { %3351 = vmatpush.bf16.msrb.mxu3 %v12761_v19  ;;  %v3213_v27 = vadd.f32 %v3212_v44, %v2355_v16  ;;  %v13077_v44 = vor.u32 %v16942_v46, %v13076_v58  ;;  %v13078_v16 = vld [vmem:[%s26790_s10 + $0x21c] sm:$0xf0]  ;;  %v13220_v58 = vld [vmem:[%s26790_s10 + $0x318] sm:$0xf] }
 0x345   : > { %4794 = vmatpush.bf16.msrb.mxu1 %v13077_v44  ;;  %v13508_v44 = vld [vmem:[%s26790_s10 + $0x558] sm:$0xf] }
 0x347   : > { %3352 = vmatpush.bf16.msrb.mxu3 %v12749_v8 }
 0x34a   : > { %v3214_v50 = vpop.f32.mrf.mxu2 }
 0x34b   : > { %3353 = vmatpush.bf16.msrb.mxu3 %v12737_v55  ;;  %v17014_v50 = vld [vmem:[%s26790_s10 + $0x458] sm:$0xf0] }
 0x34e   : > { %3354 = vmatmul.bf16.vlgmr.msrb.gmra.mxu3 %v19730_v35 }
 0x351   : > { %v3186_v20 = vpop.f32.mrf.mxu3  ;;  %v3238_v0 = vpop.f32.mrf.mxu1 }
 0x352   : > { %v3187_v4 = vadd.f32 %v3186_v20, %v3174_v56  ;;  %v3370_v56 = vmul.f32 384.0, %v20345_v30  ;;  %v13652_v20 = vld [vmem:[%s26790_s10 + $0x678] sm:$0xf] }
 0x354   : > { %v20327_v9 = vadd.f32 %v3199_v37, %v3187_v4  ;;  %v3371_v55 = vsub.f32 1.0, %v3370_v56  ;;  %v17086_v4 = vld [vmem:[%s26790_s10 + $0x698] sm:$0xf0]  ;;  %v12932_v56 = vld [vmem:[%s26790_s10 + $0xd8] sm:$0xf] }
 0x356   : > { %v3362_v47 = vsel %vm3361_vm5, %v20327_v9, 0.0 }
 0x359   : > { %v3188_v1 = vpop.f32.mrf.mxu3  ;;  %v3240_v2 = vpop.f32.mrf.mxu1 }
 0x35a   : > { %v13365_v1 = vor.u32 %v17014_v50, %v13364_v7  ;;  %v16938_v2 = vld [vmem:[%s26790_s10 + $0x1fc] sm:$0xf] }
 0x35b   : > { %v16978_v7 = vld [vmem:[%s26790_s10 + $0x338] sm:$0xf0] }
 0x35c   : > { %4807 = vmatpush.bf16.msrb.mxu2 %v13365_v1  ;;  %v17050_v50 = vld [vmem:[%s26790_s10 + $0x578] sm:$0xf0]  ;;  %v12934_v1 = vld [vmem:[%s26790_s10 + $0xfc] sm:$0xf0] }
 0x362   : > { %v3251_v21 = vpop.f32.mrf.mxu2 }
 0x36a   : > { %v3253_v32 = vpop.f32.mrf.mxu2 }
 0x36b   : > { %v17005_v32 = vld [vmem:[%s26790_s10 + $0x410] sm:$0xf0] }
 0x371   : > { %v3225_v25 = vpop.f32.mrf.mxu3  ;;  %v3277_v34 = vpop.f32.mrf.mxu1 }
 0x372   : > { %v3226_v54 = vadd.f32 %v3225_v25, %v3213_v27  ;;  %v13081_v27 = vor.u32 %v16938_v2, %v13078_v16  ;;  %v16933_v25 = vld [vmem:[%s26790_s10 + $0x1d0] sm:$0xf0]  ;;  %v13221_v2 = vor.u32 %v16978_v7, %v13220_v58  ;;  %v13509_v16 = vor.u32 %v17050_v50, %v13508_v44  ;;  %v16879_v58 = vld [vmem:[%s26790_s10 + $0x20] sm:$0xf0]  ;;  %v13400_v50 = vld [vmem:[%s26790_s10 + $0x480] sm:$0xf] }
 0x373   : > { %v16951_v44 = vld [vmem:[%s26790_s10 + $0x260] sm:$0xf0] }
 0x374   : > { %v3239_v59 = vadd.f32 %v3238_v0, %v3226_v54  ;;  %v13653_v0 = vor.u32 %v17086_v4, %v13652_v20  ;;  %v13328_v54 = vld [vmem:[%s26790_s10 + $0x3f0] sm:$0xf]  ;;  %4833 = vmatpush.bf16.msra.mxu3 %v13081_v27  ;;  %v16902_v4 = vld [vmem:[%s26790_s10 + $0xdc] sm:$0xf]  ;;  %v16897_v27 = vld [vmem:[%s26790_s10 + $0xb0] sm:$0xf0] }
 0x376   : > { %v3252_v35 = vadd.f32 %v3251_v21, %v3239_v59  ;;  %v13040_v21 = vld [vmem:[%s26790_s10 + $0x1b0] sm:$0xf]  ;;  %4820 = vmatpush.bf16.msra.mxu0 %v13653_v0 }
 0x377   : > { %v13041_v59 = vor.u32 %v16933_v25, %v13040_v21  ;;  %v12896_v21 = vld [vmem:[%s26790_s10 + $0x90] sm:$0xf] }
 0x378   : > { %v13184_v25 = vld [vmem:[%s26790_s10 + $0x2d0] sm:$0xf] }
 0x379   : > { %v3227_v53 = vpop.f32.mrf.mxu3  ;;  %v3279_v61 = vpop.f32.mrf.mxu1  ;;  %4795 = vmatpush.bf16.msrb.mxu1 %v13041_v59  ;;  %v13472_v59 = vld [vmem:[%s26790_s10 + $0x510] sm:$0xf] }
 0x37a   : > { %v13616_v53 = vld [vmem:[%s26790_s10 + $0x630] sm:$0xf]  ;;  %v16929_v61 = vld [vmem:[%s26790_s10 + $0x1b4] sm:$0xf] }
 0x382   : > { %v3290_v17 = vpop.f32.mrf.mxu2 }
 0x383   : > { %v3291_v63 = vadd.f32 %v3290_v17, %v2356_v41 }
 0x38a   : > { %v3292_v40 = vpop.f32.mrf.mxu2 }
 0x38b   : > { %v16924_v40 = vld [vmem:[%s26790_s10 + $0x188] sm:$0xf0] }
 0x391   : > { %v3264_v43 = vpop.f32.mrf.mxu3 }
 0x392   : > { %v3265_v57 = vadd.f32 %v3264_v43, %v3252_v35  ;;  %v13329_v35 = vor.u32 %v17005_v32, %v13328_v54  ;;  %v13042_v43 = vld [vmem:[%s26790_s10 + $0x1d4] sm:$0xf0]  ;;  %v12937_v54 = vor.u32 %v16902_v4, %v12934_v1  ;;  %v16969_v32 = vld [vmem:[%s26790_s10 + $0x2f0] sm:$0xf0] }
 0x394   : > { %v20332_v18 = vadd.f32 %v3277_v34, %v3265_v57  ;;  %v17077_v34 = vld [vmem:[%s26790_s10 + $0x650] sm:$0xf0]  ;;  %v13004_v57 = vld [vmem:[%s26790_s10 + $0x168] sm:$0xf]  ;;  %4808 = vmatpush.bf16.msrb.mxu2 %v13329_v35 }
 0x395   : > { %v13617_v17 = vor.u32 %v17077_v34, %v13616_v53  ;;  %v17041_v35 = vld [vmem:[%s26790_s10 + $0x530] sm:$0xf0] }
 0x396   : > { %v3363_v24 = vsel %vm3361_vm5, %v20332_v18, 0.0  ;;  %v16893_v34 = vld [vmem:[%s26790_s10 + $0x94] sm:$0xf] }
 0x397   : > { %v3364_v42 = vadd.f32 %v3363_v24, %v3362_v47  ;;  %4821 = vmatpush.bf16.msra.mxu0 %v13617_v17  ;;  %v13544_v24 = vld [vmem:[%s26790_s10 + $0x5a0] sm:$0xf]  ;;  %v3372_v47 = vmul.f32 %v20345_v30, %v3371_v55  ;;  %v16906_v55 = vld [vmem:[%s26790_s10 + $0xf8] sm:$0xf0]  ;;  %v12897_v17 = vor.u32 %v16897_v27, %v12896_v21 }
 0x398   : > { %v12933_v0 = vor.u32 %v16906_v55, %v12932_v56  ;;  %v12824_v55 = vld [vmem:[%s26790_s10] sm:$0xf] }
 0x399   : > { %v3266_v45 = vpop.f32.mrf.mxu3  ;;  %v3373_v20 = vadd.f32 %v20345_v30, %v3372_v47  ;;  %v12825_v7 = vor.u32 %v16879_v58, %v12824_v55  ;;  %v13366_v27 = vld [vmem:[%s26790_s10 + $0x45c] sm:$0xf0]  ;;  %v16983_v58 = vld [vmem:[%s26790_s10 + $0x364] sm:$0xf] }
 0x39a   : > { %v13045_v45 = vor.u32 %v16929_v61, %v13042_v43  ;;  %v12898_v61 = vld [vmem:[%s26790_s10 + $0xb4] sm:$0xf0] }
 0x39b   : > { %v3316_v22 = vpop.f32.mrf.mxu1  ;;  %v20490_v53 = vsel %vm3374_vm15, %v20345_v30, %v3373_v20  ;;  %v12860_v30 = vld [vmem:[%s26790_s10 + $0x48] sm:$0xf]  ;;  %v17023_v20 = vld [vmem:[%s26790_s10 + $0x4a0] sm:$0xf0] }
 0x39c   : > { %4834 = vmatpush.bf16.msra.mxu3 %v13045_v45  ;;  %v16888_v45 = vld [vmem:[%s26790_s10 + $0x68] sm:$0xf0]  ;;  %v13401_v1 = vor.u32 %v17023_v20, %v13400_v50  ;;  %v13546_v50 = vld [vmem:[%s26790_s10 + $0x5c4] sm:$0xf0] }
 0x39d   : > { %v12976_v20 = vld [vmem:[%s26790_s10 + $0x128] sm:$0xf] }
 0x3a2   : > { %v3342_v52 = vpop.f32.mrf.mxu0 }
 0x3a3   : > { %v3318_v15 = vpop.f32.mrf.mxu1 }
 0x3a4   : > { %v17068_v15 = vld [vmem:[%s26790_s10 + $0x608] sm:$0xf0] }
 0x3a7   : > { %v3329_v33 = vpop.f32.mrf.mxu2 }
 0x3aa   : > { %v3344_v12 = vpop.f32.mrf.mxu0 }
 0x3ab   : > { %v13006_v12 = vld [vmem:[%s26790_s10 + $0x18c] sm:$0xf0] }
 0x3af   : > { %v3331_v62 = vpop.f32.mrf.mxu2 }
 0x3b1   : > { %v3303_v26 = vpop.f32.mrf.mxu3 }
 0x3b2   : > { %v3304_v11 = vadd.f32 %v3303_v26, %v3291_v63  ;;  %v16996_v26 = vld [vmem:[%s26790_s10 + $0x3c8] sm:$0xf0]  ;;  %v12968_v63 = vld [vmem:[%s26790_s10 + $0x120] sm:$0xf] }
 0x3b4   : > { %v3317_v39 = vadd.f32 %v3316_v22, %v3304_v11  ;;  %v13292_v22 = vld [vmem:[%s26790_s10 + $0x3a8] sm:$0xf]  ;;  %v16915_v11 = vld [vmem:[%s26790_s10 + $0x140] sm:$0xf0] }
 0x3b5   : > { %v13293_v41 = vor.u32 %v16996_v26, %v13292_v22  ;;  %v13148_v22 = vld [vmem:[%s26790_s10 + $0x288] sm:$0xf] }
 0x3b6   : > { %v3330_v38 = vadd.f32 %v3329_v33, %v3317_v39  ;;  %v13005_v33 = vor.u32 %v16924_v40, %v13004_v57  ;;  %v13256_v39 = vld [vmem:[%s26790_s10 + $0x360] sm:$0xf]  ;;  %v13185_v57 = vor.u32 %v16969_v32, %v13184_v25  ;;  %v13473_v40 = vor.u32 %v17041_v35, %v13472_v59  ;;  %v17082_v25 = vld [vmem:[%s26790_s10 + $0x67c] sm:$0xf] }
 0x3b7   : > { %4809 = vmatpush.bf16.msrb.mxu2 %v13293_v41  ;;  %v12862_v41 = vld [vmem:[%s26790_s10 + $0x6c] sm:$0xf0]  ;;  %v13084_v35 = vld [vmem:[%s26790_s10 + $0x200] sm:$0xf] }
 0x3b8   : > { %v3343_v19 = vadd.f32 %v3342_v52, %v3330_v38  ;;  %v13580_v52 = vld [vmem:[%s26790_s10 + $0x5e8] sm:$0xf]  ;;  %4796 = vmatpush.bf16.msrb.mxu1 %v13005_v33  ;;  %v16960_v33 = vld [vmem:[%s26790_s10 + $0x2a8] sm:$0xf0] }
 0x3b9   : > { %v3305_v48 = vpop.f32.mrf.mxu3  ;;  %v13581_v62 = vor.u32 %v17068_v15, %v13580_v52  ;;  %v12901_v52 = vor.u32 %v16893_v34, %v12898_v61  ;;  %v13436_v15 = vld [vmem:[%s26790_s10 + $0x4c8] sm:$0xf]  ;;  %v16943_v34 = vld [vmem:[%s26790_s10 + $0x220] sm:$0xf0]  ;;  %v13372_v61 = vld [vmem:[%s26790_s10 + $0x440] sm:$0xf] }
 0x3ba   : > { %v16920_v48 = vld [vmem:[%s26790_s10 + $0x16c] sm:$0xf] }
 0x3bb   : > { %v13009_v38 = vor.u32 %v16920_v48, %v13006_v12  ;;  %4822 = vmatpush.bf16.msra.mxu0 %v13581_v62  ;;  %v17032_v48 = vld [vmem:[%s26790_s10 + $0x4e8] sm:$0xf0] }
 0x3bc   : > { %v16884_v12 = vld [vmem:[%s26790_s10 + $0x4c] sm:$0xf] }
 0x3bd   : > { %4835 = vmatpush.bf16.msra.mxu3 %v13009_v38  ;;  %v13149_v38 = vor.u32 %v16960_v33, %v13148_v22  ;;  %v17073_v22 = vld [vmem:[%s26790_s10 + $0x634] sm:$0xf] }
 0x3d1   : > { %v3355_v3 = vpop.f32.mrf.mxu3 }
 0x3d2   : > { %v20339_v60 = vadd.f32 %v3355_v3, %v3343_v19  ;;  %v16987_v19 = vld [vmem:[%s26790_s10 + $0x380] sm:$0xf0] }
 0x3d3   : > { %v17059_v3 = vld [vmem:[%s26790_s10 + $0x5c0] sm:$0xf0] }
 0x3d4   : > { %v3365_v8 = vsel %vm3361_vm5, %v20339_v60, 0.0  ;;  %v13545_v13 = vor.u32 %v17059_v3, %v13544_v24 }
 0x3d5   : > { %v3366_v49 = vadd.f32 %v3365_v8, %v3364_v42  ;;  %v16911_v42 = vld [vmem:[%s26790_s10 + $0x124] sm:$0xf]  ;;  %v12970_v8 = vld [vmem:[%s26790_s10 + $0x144] sm:$0xf0] }
 0x3d6   : > { %v12973_v46 = vor.u32 %v16911_v42, %v12970_v8  ;;  %4823 = vmatpush.bf16.msra.mxu0 %v13545_v13  ;;  %v12865_v42 = vor.u32 %v16884_v12, %v12862_v41  ;;  %v17006_v12 = vld [vmem:[%s26790_s10 + $0x418] sm:$0xf0] }
 0x3d7   : > { %3367 = vadd.xlane.f32.xlu0 %v3366_v49  ;;  %v12969_v49 = vor.u32 %v16915_v11, %v12968_v63 }
 0x3d8   : > { %4836 = vmatpush.bf16.msra.mxu3 %v12973_v46  ;;  %v13112_v46 = vld [vmem:[%s26790_s10 + $0x240] sm:$0xf] }
 0x3d9   : > { %v3357_v37 = vpop.f32.mrf.mxu3  ;;  %4797 = vmatpush.bf16.msrb.mxu1 %v12969_v49  ;;  %v13113_v4 = vor.u32 %v16951_v44, %v13112_v46  ;;  %v13258_v46 = vld [vmem:[%s26790_s10 + $0x384] sm:$0xf0] }
 0x3da   : > { %v13257_v37 = vor.u32 %v16987_v19, %v13256_v39  ;;  %4824 = vmatpush.bf16.msra.mxu0 %v13509_v16  ;;  %v12861_v39 = vor.u32 %v16888_v45, %v12860_v30  ;;  %v13437_v19 = vor.u32 %v17032_v48, %v13436_v15  ;;  %v17010_v16 = vld [vmem:[%s26790_s10 + $0x43c] sm:$0xf]  ;;  %v13336_v48 = vld [vmem:[%s26790_s10 + $0x3f8] sm:$0xf]  ;;  %v13261_v44 = vor.u32 %v16983_v58, %v13258_v46 }
 0x3db   : > { %v13369_v32 = vor.u32 %v17010_v16, %v13366_v27  ;;  %v16934_v15 = vld [vmem:[%s26790_s10 + $0x1d8] sm:$0xf0]  ;;  %v16988_v16 = vld [vmem:[%s26790_s10 + $0x388] sm:$0xf0] }
 0x3dc   : > { %4810 = vmatpush.bf16.msrb.mxu2 %v13257_v37  ;;  %4837 = vmatpush.bf16.msra.mxu3 %v12937_v54  ;;  %v13654_v54 = vld [vmem:[%s26790_s10 + $0x69c] sm:$0xf0]  ;;  %v16974_v27 = vld [vmem:[%s26790_s10 + $0x31c] sm:$0xf] }
 0x3dd   : > { %4798 = vmatpush.bf16.msrb.mxu1 %v12933_v0  ;;  %v16875_v0 = vld [vmem:[%s26790_s10 + $0x4] sm:$0xf]  ;;  %v13657_v59 = vor.u32 %v17082_v25, %v13654_v54  ;;  %v13222_v25 = vld [vmem:[%s26790_s10 + $0x33c] sm:$0xf0]  ;;  %v17046_v54 = vld [vmem:[%s26790_s10 + $0x55c] sm:$0xf] }
 0x3de   : > { %4825 = vmatpush.bf16.msra.mxu0 %v13473_v40  ;;  %v13330_v40 = vld [vmem:[%s26790_s10 + $0x414] sm:$0xf0] }
 0x3e0   : > { %4811 = vmatpush.bf16.msrb.mxu2 %v13221_v2  ;;  %4838 = vmatpush.bf16.msra.mxu3 %v12901_v52  ;;  %v12826_v2 = vld [vmem:[%s26790_s10 + $0x24] sm:$0xf0]  ;;  %v13048_v52 = vld [vmem:[%s26790_s10 + $0x1b8] sm:$0xf] }
 0x3e1   : > { %4799 = vmatpush.bf16.msrb.mxu1 %v12897_v17  ;;  %v12829_v21 = vor.u32 %v16875_v0, %v12826_v2  ;;  %v13085_v17 = vor.u32 %v16943_v34, %v13084_v35  ;;  %v13049_v41 = vor.u32 %v16934_v15, %v13048_v52  ;;  %v13264_v2 = vld [vmem:[%s26790_s10 + $0x368] sm:$0xf]  ;;  %v12940_v35 = vld [vmem:[%s26790_s10 + $0xe0] sm:$0xf]  ;;  %v16907_v34 = vld [vmem:[%s26790_s10 + $0x100] sm:$0xf0] }
 0x3e2   : > { %4826 = vmatpush.bf16.msra.mxu0 %v13437_v19  ;;  %v13294_v19 = vld [vmem:[%s26790_s10 + $0x3cc] sm:$0xf0]  ;;  %v12904_v52 = vld [vmem:[%s26790_s10 + $0x98] sm:$0xf] }
 0x3e4   : > { %4812 = vmatpush.bf16.msrb.mxu2 %v13185_v57  ;;  %4839 = vmatpush.bf16.msra.mxu3 %v12865_v42  ;;  %v17001_v57 = vld [vmem:[%s26790_s10 + $0x3f4] sm:$0xf]  ;;  %v13012_v42 = vld [vmem:[%s26790_s10 + $0x170] sm:$0xf] }
 0x3e5   : > { %4800 = vmatpush.bf16.msrb.mxu1 %v12861_v39  ;;  %v13333_v45 = vor.u32 %v17001_v57, %v13330_v40  ;;  %v13337_v39 = vor.u32 %v17006_v12, %v13336_v48  ;;  %v16979_v57 = vld [vmem:[%s26790_s10 + $0x340] sm:$0xf0]  ;;  %v13192_v12 = vld [vmem:[%s26790_s10 + $0x2d8] sm:$0xf] }
 0x3e6   : > { %4827 = vmatpush.bf16.msra.mxu0 %v13401_v1 }
 0x3e8   : > { %4813 = vmatpush.bf16.msrb.mxu2 %v13149_v38  ;;  %4840 = vmatpush.bf16.msra.mxu3 %v12829_v21  ;;  %v16992_v38 = vld [vmem:[%s26790_s10 + $0x3ac] sm:$0xf]  ;;  %v13265_v21 = vor.u32 %v16988_v16, %v13264_v2  ;;  %v13120_v16 = vld [vmem:[%s26790_s10 + $0x248] sm:$0xf] }
 0x3e9   : > { %4801 = vmatpush.bf16.msrb.mxu1 %v12825_v7  ;;  %v17055_v7 = vld [vmem:[%s26790_s10 + $0x5a4] sm:$0xf]  ;;  %v16880_v2 = vld [vmem:[%s26790_s10 + $0x28] sm:$0xf0] }
 0x3ea   : > { %4872 = vmatpush.bf16.msrb.mxu0 %v13085_v17  ;;  %v13549_v1 = vor.u32 %v17055_v7, %v13546_v50  ;;  %v12941_v17 = vor.u32 %v16907_v34, %v12940_v35  ;;  %v16947_v7 = vld [vmem:[%s26790_s10 + $0x244] sm:$0xf]  ;;  %v13114_v50 = vld [vmem:[%s26790_s10 + $0x264] sm:$0xf0] }
 0x3ec   : > { %4814 = vmatpush.bf16.msrb.mxu2 %v13113_v4  ;;  %v16916_v4 = vld [vmem:[%s26790_s10 + $0x148] sm:$0xf0] }
 0x3ed   : > { %4846 = vmatpush.bf16.msra.mxu1 %v13369_v32  ;;  %v12977_v0 = vor.u32 %v16916_v4, %v12976_v20  ;;  %v13225_v32 = vor.u32 %v16974_v27, %v13222_v25  ;;  %v17019_v20 = vld [vmem:[%s26790_s10 + $0x484] sm:$0xf]  ;;  %v13402_v4 = vld [vmem:[%s26790_s10 + $0x4a4] sm:$0xf0]  ;;  %v13117_v27 = vor.u32 %v16947_v7, %v13114_v50  ;;  %v17078_v50 = vld [vmem:[%s26790_s10 + $0x658] sm:$0xf0] }
 0x3ee   : > { %4873 = vmatpush.bf16.msrb.mxu0 %v13049_v41  ;;  %v16970_v41 = vld [vmem:[%s26790_s10 + $0x2f8] sm:$0xf0]  ;;  %v13405_v25 = vor.u32 %v17019_v20, %v13402_v4 }
 0x3f0   : > { %4859 = vmatpush.bf16.msra.mxu2 %v13657_v59  ;;  %v13510_v59 = vld [vmem:[%s26790_s10 + $0x57c] sm:$0xf0] }
 0x3f1   : > { %4847 = vmatpush.bf16.msra.mxu1 %v13333_v45  ;;  %v13186_v45 = vld [vmem:[%s26790_s10 + $0x2f4] sm:$0xf0] }
 0x44a   : > { %v3368_v43 = vpop.xlane.xlu0 %3367 }
 0x44b   : > { %v3376_v26 = vmul.f32 %v20490_v53, %v3368_v43  ;;  %v17015_v43 = vld [vmem:[%s26790_s10 + $0x460] sm:$0xf0] }
 0x44c   : > { %v13373_v30 = vor.u32 %v17015_v43, %v13372_v61  ;;  %v13513_v61 = vor.u32 %v17046_v54, %v13510_v59  ;;  %v13228_v43 = vld [vmem:[%s26790_s10 + $0x320] sm:$0xf] }
 0x44d   : > { %v20524_v62 = vsub.f32 %v20327_v9, %v3376_v26  ;;  %v20527_v63 = vsub.f32 %v20332_v18, %v3376_v26  ;;  %v20530_v11 = vsub.f32 %v20339_v60, %v3376_v26  ;;  %v13618_v26 = vld [vmem:[%s26790_s10 + $0x654] sm:$0xf0]  ;;  %v13229_v40 = vor.u32 %v16979_v57, %v13228_v43  ;;  %v3360_v57 = vld [vmem:[%s26792_s28] sm:$0x7] }
 0x44e   : > { %v13621_v33 = vor.u32 %v17073_v22, %v13618_v26  ;;  %4885 = vmatpush.bf16.msrb.mxu3 %v13373_v30  ;;  %v16965_v30 = vld [vmem:[%s26790_s10 + $0x2d4] sm:$0xf]  ;;  %v13474_v26 = vld [vmem:[%s26790_s10 + $0x534] sm:$0xf0] }
 0x44f   : > { %v3380_v24 = vmul.f32 %v20524_v62, %v20524_v62  ;;  %v3381_v3 = vmul.f32 %v20527_v63, %v20527_v63  ;;  %v3382_v47 = vmul.f32 %v20530_v11, %v20530_v11  ;;  %v17037_v22 = vld [vmem:[%s26790_s10 + $0x514] sm:$0xf]  ;;  %v13189_v15 = vor.u32 %v16965_v30, %v13186_v45 }
 0x450   : > { %4860 = vmatpush.bf16.msra.mxu2 %v13621_v33  ;;  %v16898_v33 = vld [vmem:[%s26790_s10 + $0xb8] sm:$0xf0]  ;;  %v13477_v48 = vor.u32 %v17037_v22, %v13474_v26  ;;  %v3416_v26 = vperm.slane %v3360_v57, 0 }
 0x451   : > { %v3383_v8 = vsel %vm3361_vm5, %v3380_v24, 0.0  ;;  %v3384_v49 = vsel %vm3361_vm5, %v3381_v3, 0.0  ;;  %v3386_v13 = vsel %vm3361_vm5, %v3382_v47, 0.0  ;;  %v17064_v24 = vld [vmem:[%s26790_s10 + $0x5ec] sm:$0xf]  ;;  %v13297_v3 = vor.u32 %v16992_v38, %v13294_v19 }
 0x452   : > { %v3385_v37 = vadd.f32 %v3384_v49, %v3383_v8  ;;  %v13582_v47 = vld [vmem:[%s26790_s10 + $0x60c] sm:$0xf0]  ;;  %v16925_v8 = vld [vmem:[%s26790_s10 + $0x190] sm:$0xf0]  ;;  %4886 = vmatpush.bf16.msrb.mxu3 %v13337_v39  ;;  %v16956_v39 = vld [vmem:[%s26790_s10 + $0x28c] sm:$0xf]  ;;  %v12905_v19 = vor.u32 %v16898_v33, %v12904_v52 }
 0x453   : > { %v13585_v49 = vor.u32 %v17064_v24, %v13582_v47  ;;  %4848 = vmatpush.bf16.msra.mxu1 %v13297_v3  ;;  %v13150_v24 = vld [vmem:[%s26790_s10 + $0x2ac] sm:$0xf0]  ;;  %v17028_v3 = vld [vmem:[%s26790_s10 + $0x4cc] sm:$0xf]  ;;  %v3417_v52 = vperm.slane %v3360_v57, 1 }
 0x454   : > { %v3387_v56 = vadd.f32 %v3386_v13, %v3385_v37  ;;  %v13013_v37 = vor.u32 %v16925_v8, %v13012_v42  ;;  %v13300_v13 = vld [vmem:[%s26790_s10 + $0x3b0] sm:$0xf]  ;;  %v13193_v8 = vor.u32 %v16970_v41, %v13192_v12  ;;  %v13153_v58 = vor.u32 %v16956_v39, %v13150_v24  ;;  %v13660_v24 = vld [vmem:[%s26790_s10 + $0x680] sm:$0xf] }
 0x455   : > { %4861 = vmatpush.bf16.msra.mxu2 %v13585_v49  ;;  %v13438_v47 = vld [vmem:[%s26790_s10 + $0x4ec] sm:$0xf0] }
 0x456   : > { %3388 = vadd.xlane.f32.xlu0 %v3387_v56  ;;  %v16997_v56 = vld [vmem:[%s26790_s10 + $0x3d0] sm:$0xf0]  ;;  %4874 = vmatpush.bf16.msrb.mxu0 %v13013_v37  ;;  %v12868_v49 = vld [vmem:[%s26790_s10 + $0x50] sm:$0xf]  ;;  %v13441_v46 = vor.u32 %v17028_v3, %v13438_v47  ;;  %v17087_v3 = vld [vmem:[%s26790_s10 + $0x6a0] sm:$0xf0] }
 0x457   : > { %v13301_v55 = vor.u32 %v16997_v56, %v13300_v13  ;;  %4849 = vmatpush.bf16.msra.mxu1 %v13261_v44  ;;  %v16889_v37 = vld [vmem:[%s26790_s10 + $0x70] sm:$0xf0]  ;;  %v13156_v13 = vld [vmem:[%s26790_s10 + $0x290] sm:$0xf]  ;;  %v16939_v47 = vld [vmem:[%s26790_s10 + $0x204] sm:$0xf] }
 0x458   : > { %v16961_v56 = vld [vmem:[%s26790_s10 + $0x2b0] sm:$0xf0]  ;;  %v12869_v44 = vor.u32 %v16889_v37, %v12868_v49  ;;  %v13374_v49 = vld [vmem:[%s26790_s10 + $0x464] sm:$0xf0]  ;;  %v17083_v37 = vld [vmem:[%s26790_s10 + $0x684] sm:$0xf] }
 0x459   : > { %4887 = vmatpush.bf16.msrb.mxu3 %v13301_v55  ;;  %4862 = vmatpush.bf16.msra.mxu2 %v13549_v1  ;;  %v13157_v1 = vor.u32 %v16961_v56, %v13156_v13  ;;  %v13662_v13 = vld [vmem:[%s26790_s10 + $0x6a4] sm:$0xf0]  ;;  %v13661_v56 = vor.u32 %v17087_v3, %v13660_v24 }
 0x45a   : > { %4875 = vmatpush.bf16.msrb.mxu0 %v12977_v0  ;;  %v12832_v0 = vld [vmem:[%s26790_s10 + $0x8] sm:$0xf]  ;;  %v13665_v4 = vor.u32 %v17083_v37, %v13662_v13  ;;  %v17047_v13 = vld [vmem:[%s26790_s10 + $0x564] sm:$0xf] }
 0x45b   : > { %4850 = vmatpush.bf16.msra.mxu1 %v13225_v32  ;;  %v12833_v54 = vor.u32 %v16880_v2, %v12832_v0  ;;  %v13050_v0 = vld [vmem:[%s26790_s10 + $0x1dc] sm:$0xf0]  ;;  %v17002_v2 = vld [vmem:[%s26790_s10 + $0x3fc] sm:$0xf]  ;;  %v13230_v37 = vld [vmem:[%s26790_s10 + $0x344] sm:$0xf0] }
 0x45d   : > { %4888 = vmatpush.bf16.msrb.mxu3 %v13265_v21  ;;  %4863 = vmatpush.bf16.msra.mxu2 %v13513_v61  ;;  %v16952_v21 = vld [vmem:[%s26790_s10 + $0x268] sm:$0xf0] }
 0x45e   : > { %4876 = vmatpush.bf16.msrb.mxu0 %v12941_v17  ;;  %v13121_v32 = vor.u32 %v16952_v21, %v13120_v16  ;;  %v3359_v17 = vld [vmem:[%s26791_s29] sm:$0x7]  ;;  %v17074_v21 = vld [vmem:[%s26790_s10 + $0x63c] sm:$0xf]  ;;  %s770_s29 = sand.u32 1, %s18178_s2  }
 0x45f   : > { %4851 = vmatpush.bf16.msra.mxu1 %v13189_v15  ;;  %v3406_v30 = vperm.slane %v3359_v17, 0  ;;  %v3407_v45 = vperm.slane %v3359_v17, 1  ;;  %v3408_v22 = vperm.slane %v3359_v17, 2  ;;  %v3418_v15 = vperm.slane %v3360_v57, 2  ;;  %v13338_v16 = vld [vmem:[%s26790_s10 + $0x41c] sm:$0xf0] }
 0x460   : > { %v13014_v17 = vld [vmem:[%s26790_s10 + $0x194] sm:$0xf0]  ;;  %s771_s8 = scalar_lea.vmem [#allocation2], %s770_s29  ;;  %s12004_s24 = scalar_lea.sflag [#allocation3], %s770_s29 }
 0x461   : > { %4889 = vmatpush.bf16.msrb.mxu3 %v13229_v40  ;;  %4864 = vmatpush.bf16.msra.mxu2 %v13477_v48  ;;  %v13302_v57 = vld [vmem:[%s26790_s10 + $0x3d4] sm:$0xf0]  ;;  %s12014_s3 = sshll.u32 %s771_s8, 4  ;;  %s12015_s3 = int_to_ptr.vmem [resolvable:$true] %s12014_s3 }
 0x462   : > { %4877 = vmatpush.bf16.msrb.mxu0 %v12905_v19 }
 0x463   : > { %4852 = vmatpush.bf16.msra.mxu1 %v13153_v58 }
 0x465   : > { %4890 = vmatpush.bf16.msrb.mxu3 %v13193_v8  ;;  %4865 = vmatpush.bf16.msra.mxu2 %v13441_v46 }
 0x466   : > { %4878 = vmatpush.bf16.msrb.mxu0 %v12869_v44  ;;  %v13624_v44 = vld [vmem:[%s26790_s10 + $0x638] sm:$0xf] }
 0x467   : > { %4853 = vmatpush.bf16.msra.mxu1 %v13117_v27  ;;  %v13626_v27 = vld [vmem:[%s26790_s10 + $0x65c] sm:$0xf0] }
 0x469   : > { %4891 = vmatpush.bf16.msrb.mxu3 %v13157_v1  ;;  %4866 = vmatpush.bf16.msra.mxu2 %v13405_v25  ;;  %v16930_v1 = vld [vmem:[%s26790_s10 + $0x1bc] sm:$0xf]  ;;  %v13625_v25 = vor.u32 %v17078_v50, %v13624_v44  ;;  %v13480_v50 = vld [vmem:[%s26790_s10 + $0x518] sm:$0xf] }
 0x46a   : > { %4879 = vmatpush.bf16.msrb.mxu0 %v12833_v54  ;;  %v13053_v54 = vor.u32 %v16930_v1, %v13050_v0  ;;  %v16894_v0 = vld [vmem:[%s26790_s10 + $0x9c] sm:$0xf] }
 0x46d   : > { %4892 = vmatpush.bf16.msrb.mxu3 %v13121_v32  ;;  %v13588_v32 = vld [vmem:[%s26790_s10 + $0x5f0] sm:$0xf] }
 0x4c9   : > { %v3389_v38 = vpop.xlane.xlu0 %3388 }
 0x4ca   : > { %v3390_v42 = vmul.f32 %v3389_v38, %v20490_v53 }
 0x4cc   : > { %v3391_v55 = vadd.f32 1e-06, %v3390_v42 }
 0x4ce   : > { %18026 = vrsqrt.f32 %v3391_v55  ;;  %vm3398_vm8 = vweird.f32 %v3391_v55 }
 0x4d4   : > { %v18027_v59 = vpop.eup %18026 }
 0x4d5   : > { %v3393_v35 = vmul.f32 %v18027_v59, %v3391_v55  ;;  %vm3399_vm7 = vweird.f32 %v18027_v59 }
 0x4d6   : > { %vm3400_vm11 = vmor %vm3398_vm8, %vm3399_vm7 }
 0x4d7   : > { %v3394_v34 = vmul.f32 %v18027_v59, %v3393_v35  ;;  %v13341_v35 = vor.u32 %v17002_v2, %v13338_v16  ;;  %v12906_v2 = vld [vmem:[%s26790_s10 + $0xbc] sm:$0xf0]  ;;  %v16966_v16 = vld [vmem:[%s26790_s10 + $0x2dc] sm:$0xf] }
 0x4d9   : > { %v3395_v61 = vmul.f32 0.5, %v3394_v34  ;;  %v13629_v34 = vor.u32 %v17074_v21, %v13626_v27  ;;  %v13194_v21 = vld [vmem:[%s26790_s10 + $0x2fc] sm:$0xf0]  ;;  %v17038_v27 = vld [vmem:[%s26790_s10 + $0x51c] sm:$0xf] }
 0x4db   : > { %v3396_v43 = vsub.f32 1.5, %v3395_v61  ;;  %v16921_v61 = vld [vmem:[%s26790_s10 + $0x174] sm:$0xf] }
 0x4dd   : > { %v3397_v40 = vmul.f32 %v18027_v59, %v3396_v43  ;;  %v16993_v43 = vld [vmem:[%s26790_s10 + $0x3b4] sm:$0xf] }
 0x4df   : > { %v3401_v33 = vsel %vm3400_vm11, %v18027_v59, %v3397_v40  ;;  %v17069_v59 = vld [vmem:[%s26790_s10 + $0x610] sm:$0xf0] }
 0x4e0   : > { %v3402_v48 = vmul.f32 %v3401_v33, %v20524_v62  ;;  %v3403_v12 = vmul.f32 %v3401_v33, %v20527_v63  ;;  %v3404_v41 = vmul.f32 %v3401_v33, %v20530_v11  ;;  %v13086_v62 = vld [vmem:[%s26790_s10 + $0x224] sm:$0xf0]  ;;  %v17011_v63 = vld [vmem:[%s26790_s10 + $0x444] sm:$0xf]  ;;  %v17065_v40 = vld [vmem:[%s26790_s10 + $0x5f4] sm:$0xf]  ;;  %v13305_v33 = vor.u32 %v16993_v43, %v13302_v57 }
 0x4e1   : > { %v13089_v7 = vor.u32 %v16939_v47, %v13086_v62  ;;  %v13377_v20 = vor.u32 %v17011_v63, %v13374_v49  ;;  %v13516_v47 = vld [vmem:[%s26790_s10 + $0x560] sm:$0xf]  ;;  %v17051_v62 = vld [vmem:[%s26790_s10 + $0x580] sm:$0xf0]  ;;  %v12870_v43 = vld [vmem:[%s26790_s10 + $0x74] sm:$0xf0] }
 0x4e2   : > { %v3412_v39 = vmul.f32 %v3406_v30, %v3402_v48  ;;  %v3413_v38 = vmul.f32 %v3407_v45, %v3403_v12  ;;  %v3414_v19 = vmul.f32 %v3408_v22, %v3404_v41  ;;  %v13590_v30 = vld [vmem:[%s26790_s10 + $0x614] sm:$0xf0]  ;;  %v13589_v45 = vor.u32 %v17069_v59, %v13588_v32  ;;  %v16912_v48 = vld [vmem:[%s26790_s10 + $0x12c] sm:$0xf]  ;;  %v12978_v12 = vld [vmem:[%s26790_s10 + $0x14c] sm:$0xf0] }
 0x4e3   : > { %v13017_v22 = vor.u32 %v16921_v61, %v13014_v17  ;;  %v16984_v41 = vld [vmem:[%s26790_s10 + $0x36c] sm:$0xf]  ;;  %v12981_v3 = vor.u32 %v16912_v48, %v12978_v12  ;;  %v16975_v49 = vld [vmem:[%s26790_s10 + $0x324] sm:$0xf]  ;;  %v12909_v32 = vor.u32 %v16894_v0, %v12906_v2  ;;  %v13444_v59 = vld [vmem:[%s26790_s10 + $0x4d0] sm:$0xf] }
 0x4e4   : > { %v3422_v11 = vadd.f32 %v3416_v26, %v3412_v39  ;;  %v3423_v42 = vadd.f32 %v3417_v52, %v3413_v38  ;;  %v3424_v8 = vadd.f32 %v3418_v15, %v3414_v19  ;;  %v13552_v26 = vld [vmem:[%s26790_s10 + $0x5a8] sm:$0xf]  ;;  %v17060_v52 = vld [vmem:[%s26790_s10 + $0x5c8] sm:$0xf0]  ;;  %v13593_v15 = vor.u32 %v17065_v40, %v13590_v30  ;;  %v13266_v39 = vld [vmem:[%s26790_s10 + $0x38c] sm:$0xf0] }
 0x4e5   : > { %v17056_v38 = vld [vmem:[%s26790_s10 + $0x5ac] sm:$0xf]  ;;  %v13554_v19 = vld [vmem:[%s26790_s10 + $0x5cc] sm:$0xf0]  ;;  %v13553_v24 = vor.u32 %v17060_v52, %v13552_v26  ;;  %v13269_v63 = vor.u32 %v16984_v41, %v13266_v39  ;;  %v16885_v17 = vld [vmem:[%s26790_s10 + $0x54] sm:$0xf] }
 0x4e6   : > { %v20791_v55 = vpack.c.bf16 %v3422_v11, %v3422_v11  ;;  %v20793_v58 = vpack.c.bf16 %v3423_v42, %v3423_v42  ;;  %v20795_v46 = vpack.c.bf16 %v3424_v8, %v3424_v8  ;;  %v13557_v11 = vor.u32 %v17056_v38, %v13554_v19  ;;  %v16903_v42 = vld [vmem:[%s26790_s10 + $0xe4] sm:$0xf]  ;;  %v12942_v8 = vld [vmem:[%s26790_s10 + $0x104] sm:$0xf0]  ;;  %v16957_v57 = vld [vmem:[%s26790_s10 + $0x294] sm:$0xf] }
 0x4e7   : > { %v12945_v44 = vor.u32 %v16903_v42, %v12942_v8  ;;  %v13158_v40 = vld [vmem:[%s26790_s10 + $0x2b4] sm:$0xf0]  ;;  %v17029_v30 = vld [vmem:[%s26790_s10 + $0x4d4] sm:$0xf]  ;;  %v12873_v52 = vor.u32 %v16885_v17, %v12870_v43  ;;  %v12834_v48 = vld [vmem:[%s26790_s10 + $0x2c] sm:$0xf0] }
 0x4e8   : > { %4802 = vmatmul.bf16.vlgmr.msrb.gmra.mxu1 %v20791_v55  ;;  %4815 = vmatmul.bf16.vlgmr.msrb.gmra.mxu2 %v20793_v58  ;;  %v13161_v12 = vor.u32 %v16957_v57, %v13158_v40  ;;  %v16948_v39 = vld [vmem:[%s26790_s10 + $0x24c] sm:$0xf]  ;;  %v13122_v38 = vld [vmem:[%s26790_s10 + $0x26c] sm:$0xf0]  ;;  %v13344_v2 = vld [vmem:[%s26790_s10 + $0x400] sm:$0xf] }
 0x4e9   : > { %4828 = vmatmul.bf16.vlgmr.msra.gmra.mxu0 %v20795_v46  ;;  %4841 = vmatmul.bf16.vlgmr.msra.gmra.mxu3 %v20791_v55  ;;  %v17020_v19 = vld [vmem:[%s26790_s10 + $0x48c] sm:$0xf]  ;;  %v13308_v43 = vld [vmem:[%s26790_s10 + $0x3b8] sm:$0xf]  ;;  %v16998_v57 = vld [vmem:[%s26790_s10 + $0x3d8] sm:$0xf0] }
 0x4ea   : > { %4898 = vmatpush.bf16.msrb.mxu1 %v13661_v56  ;;  %4911 = vmatpush.bf16.msrb.mxu2 %v13089_v7  ;;  %v13518_v56 = vld [vmem:[%s26790_s10 + $0x584] sm:$0xf0]  ;;  %v13517_v7 = vor.u32 %v17051_v62, %v13516_v47  ;;  %v16944_v47 = vld [vmem:[%s26790_s10 + $0x228] sm:$0xf0]  ;;  %v13596_v40 = vld [vmem:[%s26790_s10 + $0x5f8] sm:$0xf] }
 0x4eb   : > { %4924 = vmatpush.bf16.msra.mxu0 %v13377_v20  ;;  %4937 = vmatpush.bf16.msra.mxu3 %v13665_v4  ;;  %v17042_v20 = vld [vmem:[%s26790_s10 + $0x538] sm:$0xf0]  ;;  %v13233_v4 = vor.u32 %v16975_v49, %v13230_v37  ;;  %v13521_v1 = vor.u32 %v17047_v13, %v13518_v56  ;;  %v13380_v62 = vld [vmem:[%s26790_s10 + $0x448] sm:$0xf]  ;;  %v17088_v49 = vld [vmem:[%s26790_s10 + $0x6a8] sm:$0xf0]  ;;  %v13125_v56 = vor.u32 %v16948_v39, %v13122_v38 }
 0x4ec   : > { %v16940_v37 = vld [vmem:[%s26790_s10 + $0x20c] sm:$0xf]  ;;  %v13094_v13 = vld [vmem:[%s26790_s10 + $0x22c] sm:$0xf0]  ;;  %v16989_v39 = vld [vmem:[%s26790_s10 + $0x390] sm:$0xf0] }
 0x4ed   : > { %v13097_v0 = vor.u32 %v16940_v37, %v13094_v13  ;;  %v13560_v38 = vld [vmem:[%s26790_s10 + $0x5b0] sm:$0xf]  ;;  %v16980_v37 = vld [vmem:[%s26790_s10 + $0x348] sm:$0xf0]  ;;  %v13524_v13 = vld [vmem:[%s26790_s10 + $0x568] sm:$0xf] }
 0x4ee   : > { %4899 = vmatpush.bf16.msrb.mxu1 %v13625_v25  ;;  %4912 = vmatpush.bf16.msrb.mxu2 %v13053_v54  ;;  %v13482_v25 = vld [vmem:[%s26790_s10 + $0x53c] sm:$0xf0]  ;;  %v13481_v54 = vor.u32 %v17042_v20, %v13480_v50 }
 0x4ef   : > { %4925 = vmatpush.bf16.msra.mxu0 %v13341_v35  ;;  %4938 = vmatpush.bf16.msra.mxu3 %v13629_v34  ;;  %v17033_v35 = vld [vmem:[%s26790_s10 + $0x4f0] sm:$0xf0]  ;;  %v13197_v34 = vor.u32 %v16966_v16, %v13194_v21  ;;  %v13485_v61 = vor.u32 %v17038_v27, %v13482_v25  ;;  %v13056_v20 = vld [vmem:[%s26790_s10 + $0x1c0] sm:$0xf]  ;;  %v17007_v16 = vld [vmem:[%s26790_s10 + $0x420] sm:$0xf0] }
 0x4f0   : > { %v13445_v26 = vor.u32 %v17033_v35, %v13444_v59  ;;  %v13632_v21 = vld [vmem:[%s26790_s10 + $0x640] sm:$0xf]  ;;  %v17079_v27 = vld [vmem:[%s26790_s10 + $0x660] sm:$0xf0]  ;;  %v13345_v59 = vor.u32 %v17007_v16, %v13344_v2  ;;  %v13020_v35 = vld [vmem:[%s26790_s10 + $0x178] sm:$0xf] }
 0x4f1   : > { %v16931_v25 = vld [vmem:[%s26790_s10 + $0x1c4] sm:$0xf]  ;;  %v13200_v16 = vld [vmem:[%s26790_s10 + $0x2e0] sm:$0xf] }
 0x4f2   : > { %4900 = vmatpush.bf16.msrb.mxu1 %v13589_v45  ;;  %4913 = vmatpush.bf16.msrb.mxu2 %v13017_v22  ;;  %v13446_v45 = vld [vmem:[%s26790_s10 + $0x4f4] sm:$0xf0]  ;;  %v13408_v22 = vld [vmem:[%s26790_s10 + $0x488] sm:$0xf] }
 0x4f3   : > { %4926 = vmatpush.bf16.msra.mxu0 %v13305_v33  ;;  %4939 = vmatpush.bf16.msra.mxu3 %v13593_v15  ;;  %v17024_v33 = vld [vmem:[%s26790_s10 + $0x4a8] sm:$0xf0]  ;;  %v13449_v41 = vor.u32 %v17029_v30, %v13446_v45  ;;  %v17070_v30 = vld [vmem:[%s26790_s10 + $0x618] sm:$0xf0] }
 0x4f4   : > { %v16876_v15 = vld [vmem:[%s26790_s10 + $0xc] sm:$0xf]  ;;  %v13409_v42 = vor.u32 %v17024_v33, %v13408_v22  ;;  %v16922_v45 = vld [vmem:[%s26790_s10 + $0x17c] sm:$0xf]  ;;  %v13022_v22 = vld [vmem:[%s26790_s10 + $0x19c] sm:$0xf0] }
 0x4f5   : > { %v12837_v8 = vor.u32 %v16876_v15, %v12834_v48  ;;  %v12984_v33 = vld [vmem:[%s26790_s10 + $0x130] sm:$0xf]  ;;  %v16917_v15 = vld [vmem:[%s26790_s10 + $0x150] sm:$0xf0]  ;;  %v13597_v48 = vor.u32 %v17070_v30, %v13596_v40  ;;  %v16962_v40 = vld [vmem:[%s26790_s10 + $0x2b8] sm:$0xf0] }
 0x4f6   : > { %4901 = vmatpush.bf16.msrb.mxu1 %v13553_v24  ;;  %4914 = vmatpush.bf16.msrb.mxu2 %v12981_v3  ;;  %v13410_v24 = vld [vmem:[%s26790_s10 + $0x4ac] sm:$0xf0]  ;;  %v13092_v3 = vld [vmem:[%s26790_s10 + $0x208] sm:$0xf]  ;;  %v13452_v30 = vld [vmem:[%s26790_s10 + $0x4d8] sm:$0xf] }
 0x4f7   : > { %4927 = vmatpush.bf16.msra.mxu0 %v13269_v63  ;;  %4940 = vmatpush.bf16.msra.mxu3 %v13557_v11  ;;  %v17016_v63 = vld [vmem:[%s26790_s10 + $0x468] sm:$0xf0]  ;;  %v13668_v11 = vld [vmem:[%s26790_s10 + $0x688] sm:$0xf] }
 0x4f8   : > { %4854 = vmatmul.bf16.vlgmr.msra.gmra.mxu1 %v20793_v58  ;;  %4867 = vmatmul.bf16.vlgmr.msra.gmra.mxu2 %v20795_v46  ;;  %v13381_v50 = vor.u32 %v17016_v63, %v13380_v62  ;;  %v12948_v63 = vld [vmem:[%s26790_s10 + $0xe8] sm:$0xf] }
 0x4f9   : > { %4880 = vmatmul.bf16.vlgmr.msrb.gmra.mxu0 %v20791_v55  ;;  %4893 = vmatmul.bf16.vlgmr.msrb.gmra.mxu3 %v20793_v58 }
 0x4fa   : > { %4902 = vmatpush.bf16.msrb.mxu1 %v13517_v7  ;;  %4915 = vmatpush.bf16.msrb.mxu2 %v12945_v44  ;;  %v13413_v7 = vor.u32 %v17020_v19, %v13410_v24  ;;  %v13093_v44 = vor.u32 %v16944_v47, %v13092_v3  ;;  %v17061_v19 = vld [vmem:[%s26790_s10 + $0x5d0] sm:$0xf0]  ;;  %v12986_v3 = vld [vmem:[%s26790_s10 + $0x154] sm:$0xf0]  ;;  %v12985_v47 = vor.u32 %v16917_v15, %v12984_v33 }
 0x4fb   : > { %4928 = vmatpush.bf16.msra.mxu0 %v13233_v4  ;;  %4941 = vmatpush.bf16.msra.mxu3 %v13521_v1  ;;  %v16935_v4 = vld [vmem:[%s26790_s10 + $0x1e0] sm:$0xf0]  ;;  %v13669_v1 = vor.u32 %v17088_v49, %v13668_v11  ;;  %v16913_v24 = vld [vmem:[%s26790_s10 + $0x134] sm:$0xf]  ;;  %v16908_v11 = vld [vmem:[%s26790_s10 + $0x108] sm:$0xf0] }
 0x4fc   : > { %v13236_v49 = vld [vmem:[%s26790_s10 + $0x328] sm:$0xf] }
 0x4fe   : > { %4903 = vmatpush.bf16.msrb.mxu1 %v13481_v54  ;;  %4916 = vmatpush.bf16.msrb.mxu2 %v12909_v32  ;;  %v13058_v54 = vld [vmem:[%s26790_s10 + $0x1e4] sm:$0xf0]  ;;  %v13057_v32 = vor.u32 %v16935_v4, %v13056_v20  ;;  %v13237_v20 = vor.u32 %v16980_v37, %v13236_v49  ;;  %v12912_v4 = vld [vmem:[%s26790_s10 + $0xa0] sm:$0xf] }
 0x4ff   : > { %4929 = vmatpush.bf16.msra.mxu0 %v13197_v34  ;;  %4942 = vmatpush.bf16.msra.mxu3 %v13485_v61  ;;  %v16926_v34 = vld [vmem:[%s26790_s10 + $0x198] sm:$0xf0]  ;;  %v13633_v61 = vor.u32 %v17079_v27, %v13632_v21  ;;  %v13061_v17 = vor.u32 %v16931_v25, %v13058_v54  ;;  %v16971_v21 = vld [vmem:[%s26790_s10 + $0x300] sm:$0xf0]  ;;  %v13488_v27 = vld [vmem:[%s26790_s10 + $0x520] sm:$0xf] }
 0x500   : > { %v17043_v25 = vld [vmem:[%s26790_s10 + $0x540] sm:$0xf0] }
 0x501   : > { %v16895_v54 = vld [vmem:[%s26790_s10 + $0xa4] sm:$0xf] }
 0x502   : > { %4904 = vmatpush.bf16.msrb.mxu1 %v13445_v26  ;;  %4917 = vmatpush.bf16.msrb.mxu2 %v12873_v52  ;;  %v13021_v26 = vor.u32 %v16926_v34, %v13020_v35  ;;  %v13309_v52 = vor.u32 %v16998_v57, %v13308_v43  ;;  %v13201_v35 = vor.u32 %v16971_v21, %v13200_v16  ;;  %v12876_v34 = vld [vmem:[%s26790_s10 + $0x58] sm:$0xf]  ;;  %v17075_v21 = vld [vmem:[%s26790_s10 + $0x644] sm:$0xf] }
 0x503   : > { %4930 = vmatpush.bf16.msra.mxu0 %v13161_v12  ;;  %4943 = vmatpush.bf16.msra.mxu3 %v13449_v41  ;;  %v13025_v12 = vor.u32 %v16922_v45, %v13022_v22  ;;  %v13272_v41 = vld [vmem:[%s26790_s10 + $0x370] sm:$0xf]  ;;  %v13164_v57 = vld [vmem:[%s26790_s10 + $0x298] sm:$0xf]  ;;  %v17034_v45 = vld [vmem:[%s26790_s10 + $0x4f8] sm:$0xf0] }
 0x504   : > { %v13273_v62 = vor.u32 %v16989_v39, %v13272_v41  ;;  %v16886_v22 = vld [vmem:[%s26790_s10 + $0x5c] sm:$0xf]  ;;  %v13165_v15 = vor.u32 %v16962_v40, %v13164_v57  ;;  %v16953_v41 = vld [vmem:[%s26790_s10 + $0x270] sm:$0xf0]  ;;  %v13453_v39 = vor.u32 %v17034_v45, %v13452_v30  ;;  %v13598_v30 = vld [vmem:[%s26790_s10 + $0x61c] sm:$0xf0] }
 0x505   : > { %v17066_v40 = vld [vmem:[%s26790_s10 + $0x5fc] sm:$0xf]  ;;  %v13028_v45 = vld [vmem:[%s26790_s10 + $0x180] sm:$0xf] }
 0x506   : > { %4905 = vmatpush.bf16.msrb.mxu1 %v13409_v42  ;;  %4918 = vmatpush.bf16.msrb.mxu2 %v12837_v8  ;;  %v13561_v42 = vor.u32 %v17061_v19, %v13560_v38  ;;  %v12989_v8 = vor.u32 %v16913_v24, %v12986_v3  ;;  %v13416_v19 = vld [vmem:[%s26790_s10 + $0x490] sm:$0xf]  ;;  %v17025_v24 = vld [vmem:[%s26790_s10 + $0x4b0] sm:$0xf0] }
 0x507   : > { %4931 = vmatpush.bf16.msra.mxu0 %v13125_v56  ;;  %4944 = vmatpush.bf16.msra.mxu3 %v13413_v7  ;;  %v17052_v56 = vld [vmem:[%s26790_s10 + $0x588] sm:$0xf0]  ;;  %v16877_v3 = vld [vmem:[%s26790_s10 + $0x14] sm:$0xf] }
 0x508   : > { %v16904_v7 = vld [vmem:[%s26790_s10 + $0xec] sm:$0xf] }
 0x509   : > { %4906 = vmatmul.bf16.vlgmr.msrb.gmra.mxu1 %v20795_v46  ;;  %4919 = vmatmul.bf16.vlgmr.msrb.gmra.mxu2 %v20791_v55 }
 0x50a   : > { %4950 = vmatpush.bf16.msra.mxu1 %v13093_v44  ;;  %4963 = vmatpush.bf16.msra.mxu2 %v13381_v50  ;;  %v12950_v44 = vld [vmem:[%s26790_s10 + $0x10c] sm:$0xf0]  ;;  %v12949_v50 = vor.u32 %v16908_v11, %v12948_v63  ;;  %v17084_v11 = vld [vmem:[%s26790_s10 + $0x68c] sm:$0xf] }
 0x50b   : > { %4976 = vmatpush.bf16.msrb.mxu0 %v13669_v1  ;;  %4989 = vmatpush.bf16.msrb.mxu3 %v13097_v0  ;;  %v16899_v1 = vld [vmem:[%s26790_s10 + $0xc0] sm:$0xf0]  ;;  %v13525_v0 = vor.u32 %v17052_v56, %v13524_v13  ;;  %v12953_v2 = vor.u32 %v16904_v7, %v12950_v44  ;;  %v13382_v63 = vld [vmem:[%s26790_s10 + $0x46c] sm:$0xf0]  ;;  %v16945_v13 = vld [vmem:[%s26790_s10 + $0x230] sm:$0xf0]  ;;  %v13417_v44 = vor.u32 %v17025_v24, %v13416_v19 }
 0x50c   : > { %4932 = vmatmul.bf16.vlgmr.msra.gmra.mxu0 %v20793_v58  ;;  %4945 = vmatmul.bf16.vlgmr.msra.gmra.mxu3 %v20795_v46  ;;  %v13388_v56 = vld [vmem:[%s26790_s10 + $0x450] sm:$0xf]  ;;  %v17017_v7 = vld [vmem:[%s26790_s10 + $0x470] sm:$0xf0]  ;;  %v13562_v19 = vld [vmem:[%s26790_s10 + $0x5d4] sm:$0xf0] }
 0x50d   : > { %v13389_v16 = vor.u32 %v17017_v7, %v13388_v56  ;;  %v12992_v24 = vld [vmem:[%s26790_s10 + $0x138] sm:$0xf]  ;;  %v13526_v56 = vld [vmem:[%s26790_s10 + $0x58c] sm:$0xf0] }
 0x50e   : > { %4951 = vmatpush.bf16.msra.mxu1 %v13057_v32  ;;  %4964 = vmatpush.bf16.msra.mxu2 %v13345_v59  ;;  %v12914_v32 = vld [vmem:[%s26790_s10 + $0xc4] sm:$0xf0]  ;;  %v12913_v59 = vor.u32 %v16899_v1, %v12912_v4  ;;  %v17003_v1 = vld [vmem:[%s26790_s10 + $0x404] sm:$0xf]  ;;  %v12956_v7 = vld [vmem:[%s26790_s10 + $0xf0] sm:$0xf] }
 0x50f   : > { %4977 = vmatpush.bf16.msrb.mxu0 %v13633_v61  ;;  %4990 = vmatpush.bf16.msrb.mxu3 %v13061_v17  ;;  %v16890_v61 = vld [vmem:[%s26790_s10 + $0x78] sm:$0xf0]  ;;  %v13489_v17 = vor.u32 %v17043_v25, %v13488_v27  ;;  %v12917_v43 = vor.u32 %v16895_v54, %v12914_v32  ;;  %v13634_v27 = vld [vmem:[%s26790_s10 + $0x664] sm:$0xf0]  ;;  %v16936_v54 = vld [vmem:[%s26790_s10 + $0x1e8] sm:$0xf0] }
 0x510   : > { %v12877_v33 = vor.u32 %v16890_v61, %v12876_v34  ;;  %v13064_v25 = vld [vmem:[%s26790_s10 + $0x1c8] sm:$0xf]  ;;  %v13637_v34 = vor.u32 %v17075_v21, %v13634_v27  ;;  %v16994_v61 = vld [vmem:[%s26790_s10 + $0x3bc] sm:$0xf]  ;;  %v17039_v27 = vld [vmem:[%s26790_s10 + $0x524] sm:$0xf] }
 0x511   : > { %v13352_v32 = vld [vmem:[%s26790_s10 + $0x408] sm:$0xf] }
 0x512   : > { %4952 = vmatpush.bf16.msra.mxu1 %v13021_v26  ;;  %4965 = vmatpush.bf16.msra.mxu2 %v13309_v52  ;;  %v12878_v26 = vld [vmem:[%s26790_s10 + $0x7c] sm:$0xf0]  ;;  %v12840_v52 = vld [vmem:[%s26790_s10 + $0x10] sm:$0xf] }
 0x513   : > { %4978 = vmatpush.bf16.msrb.mxu0 %v13597_v48  ;;  %4991 = vmatpush.bf16.msrb.mxu3 %v13025_v12  ;;  %v16881_v48 = vld [vmem:[%s26790_s10 + $0x30] sm:$0xf0]  ;;  %v13128_v12 = vld [vmem:[%s26790_s10 + $0x250] sm:$0xf]  ;;  %v12881_v38 = vor.u32 %v16886_v22, %v12878_v26  ;;  %v16927_v22 = vld [vmem:[%s26790_s10 + $0x1a0] sm:$0xf0] }
 0x514   : > { %v12841_v49 = vor.u32 %v16881_v48, %v12840_v52  ;;  %v13129_v37 = vor.u32 %v16953_v41, %v13128_v12  ;;  %v13316_v26 = vld [vmem:[%s26790_s10 + $0x3c0] sm:$0xf]  ;;  %v16999_v52 = vld [vmem:[%s26790_s10 + $0x3e0] sm:$0xf0]  ;;  %v16985_v48 = vld [vmem:[%s26790_s10 + $0x374] sm:$0xf]  ;;  %v13029_v41 = vor.u32 %v16927_v22, %v13028_v45 }
 0x515   : > { %v13274_v12 = vld [vmem:[%s26790_s10 + $0x394] sm:$0xf0]  ;;  %v13454_v45 = vld [vmem:[%s26790_s10 + $0x4fc] sm:$0xf0] }
 0x516   : > { %4953 = vmatpush.bf16.msra.mxu1 %v12985_v47  ;;  %4966 = vmatpush.bf16.msra.mxu2 %v13273_v62  ;;  %v12842_v47 = vld [vmem:[%s26790_s10 + $0x34] sm:$0xf0]  ;;  %v17012_v62 = vld [vmem:[%s26790_s10 + $0x44c] sm:$0xf]  ;;  %v12884_v22 = vld [vmem:[%s26790_s10 + $0x60] sm:$0xf] }
 0x517   : > { %4979 = vmatpush.bf16.msrb.mxu0 %v13561_v42  ;;  %4992 = vmatpush.bf16.msrb.mxu3 %v12989_v8  ;;  %v13670_v42 = vld [vmem:[%s26790_s10 + $0x6ac] sm:$0xf0] }
 0x518   : > { %v13100_v8 = vld [vmem:[%s26790_s10 + $0x210] sm:$0xf]  ;;  %v13673_v4 = vor.u32 %v17084_v11, %v13670_v42  ;;  %v16976_v42 = vld [vmem:[%s26790_s10 + $0x32c] sm:$0xf] }
 0x51a   : > { %4954 = vmatpush.bf16.msra.mxu1 %v12949_v50  ;;  %4967 = vmatpush.bf16.msra.mxu2 %v13237_v20  ;;  %v12845_v50 = vor.u32 %v16877_v3, %v12842_v47  ;;  %v13385_v20 = vor.u32 %v17012_v62, %v13382_v63  ;;  %v16918_v3 = vld [vmem:[%s26790_s10 + $0x158] sm:$0xf0]  ;;  %v13280_v47 = vld [vmem:[%s26790_s10 + $0x378] sm:$0xf]  ;;  %v13277_v63 = vor.u32 %v16985_v48, %v13274_v12 }
 0x51b   : > { %4980 = vmatpush.bf16.msrb.mxu0 %v13525_v0  ;;  %4993 = vmatpush.bf16.msrb.mxu3 %v12953_v2  ;;  %v13346_v0 = vld [vmem:[%s26790_s10 + $0x424] sm:$0xf0]  ;;  %v13101_v2 = vor.u32 %v16945_v13, %v13100_v8  ;;  %v16990_v62 = vld [vmem:[%s26790_s10 + $0x398] sm:$0xf0]  ;;  %v13238_v8 = vld [vmem:[%s26790_s10 + $0x34c] sm:$0xf0] }
 0x51c   : > { %v17048_v13 = vld [vmem:[%s26790_s10 + $0x56c] sm:$0xf] }
 0x51e   : > { %4955 = vmatpush.bf16.msra.mxu1 %v12913_v59  ;;  %4968 = vmatpush.bf16.msra.mxu2 %v13201_v35  ;;  %v17008_v59 = vld [vmem:[%s26790_s10 + $0x428] sm:$0xf0]  ;;  %v13349_v35 = vor.u32 %v17003_v1, %v13346_v0  ;;  %v13529_v1 = vor.u32 %v17048_v13, %v13526_v56  ;;  %v16967_v0 = vld [vmem:[%s26790_s10 + $0x2e4] sm:$0xf] }
 0x51f   : > { %4981 = vmatpush.bf16.msrb.mxu0 %v13489_v17  ;;  %4994 = vmatpush.bf16.msrb.mxu3 %v12917_v43  ;;  %v13310_v17 = vld [vmem:[%s26790_s10 + $0x3dc] sm:$0xf0]  ;;  %v13065_v43 = vor.u32 %v16936_v54, %v13064_v25  ;;  %v13353_v57 = vor.u32 %v17008_v59, %v13352_v32  ;;  %v13490_v25 = vld [vmem:[%s26790_s10 + $0x544] sm:$0xf0]  ;;  %v16900_v32 = vld [vmem:[%s26790_s10 + $0xc8] sm:$0xf0] }
 0x520   : > { %v12920_v54 = vld [vmem:[%s26790_s10 + $0xa8] sm:$0xf] }
 0x521   : > { %v13208_v59 = vld [vmem:[%s26790_s10 + $0x2e8] sm:$0xf] }
 0x522   : > { %4956 = vmatpush.bf16.msra.mxu1 %v12877_v33  ;;  %4969 = vmatpush.bf16.msra.mxu2 %v13165_v15  ;;  %v13313_v33 = vor.u32 %v16994_v61, %v13310_v17  ;;  %v13601_v15 = vor.u32 %v17066_v40, %v13598_v30  ;;  %v13493_v61 = vor.u32 %v17039_v27, %v13490_v25  ;;  %v16958_v17 = vld [vmem:[%s26790_s10 + $0x29c] sm:$0xf]  ;;  %v16932_v25 = vld [vmem:[%s26790_s10 + $0x1cc] sm:$0xf] }
 0x523   : > { %4982 = vmatpush.bf16.msrb.mxu0 %v13453_v39  ;;  %4995 = vmatpush.bf16.msrb.mxu3 %v12881_v38  ;;  %v13317_v39 = vor.u32 %v16999_v52, %v13316_v26  ;;  %v17057_v38 = vld [vmem:[%s26790_s10 + $0x5b4] sm:$0xf]  ;;  %v17030_v30 = vld [vmem:[%s26790_s10 + $0x4dc] sm:$0xf]  ;;  %v16891_v26 = vld [vmem:[%s26790_s10 + $0x80] sm:$0xf0] }
 0x524   : > { %v13565_v11 = vor.u32 %v17057_v38, %v13562_v19  ;;  %v13172_v52 = vld [vmem:[%s26790_s10 + $0x2a0] sm:$0xf]  ;;  %v13457_v12 = vor.u32 %v17030_v30, %v13454_v45  ;;  %v13418_v38 = vld [vmem:[%s26790_s10 + $0x4b4] sm:$0xf0]  ;;  %v12885_v19 = vor.u32 %v16891_v26, %v12884_v22  ;;  %v16923_v45 = vld [vmem:[%s26790_s10 + $0x184] sm:$0xf] }
 0x525   : > { %v13030_v22 = vld [vmem:[%s26790_s10 + $0x1a4] sm:$0xf0]  ;;  %v16995_v26 = vld [vmem:[%s26790_s10 + $0x3c4] sm:$0xf] }
 0x526   : > { %4957 = vmatpush.bf16.msra.mxu1 %v12841_v49  ;;  %4970 = vmatpush.bf16.msra.mxu2 %v13129_v37  ;;  %v12993_v49 = vor.u32 %v16918_v3, %v12992_v24  ;;  %v13281_v37 = vor.u32 %v16990_v62, %v13280_v47  ;;  %v12848_v3 = vld [vmem:[%s26790_s10 + $0x18] sm:$0xf]  ;;  %v16882_v47 = vld [vmem:[%s26790_s10 + $0x38] sm:$0xf0] }
 0x527   : > { %4983 = vmatpush.bf16.msrb.mxu0 %v13417_v44  ;;  %4996 = vmatpush.bf16.msrb.mxu3 %v12845_v50  ;;  %v16909_v44 = vld [vmem:[%s26790_s10 + $0x110] sm:$0xf0]  ;;  %v13244_v50 = vld [vmem:[%s26790_s10 + $0x330] sm:$0xf]  ;;  %v13136_v62 = vld [vmem:[%s26790_s10 + $0x258] sm:$0xf] }
 0x529   : > { %4958 = vmatmul.bf16.vlgmr.msra.gmra.mxu1 %v20791_v55  ;;  %4971 = vmatmul.bf16.vlgmr.msra.gmra.mxu2 %v20793_v58 }
 0x52a   : > { %5002 = vmatpush.bf16.msrb.mxu1 %v13385_v20  ;;  %5015 = vmatpush.bf16.msrb.mxu2 %v13673_v4  ;;  %v16981_v20 = vld [vmem:[%s26790_s10 + $0x350] sm:$0xf0]  ;;  %v13241_v4 = vor.u32 %v16976_v42, %v13238_v8 }
 0x52b   : > { %5028 = vmatpush.bf16.msra.mxu0 %v13101_v2  ;;  %5041 = vmatpush.bf16.msra.mxu3 %v13389_v16  ;;  %v13202_v2 = vld [vmem:[%s26790_s10 + $0x304] sm:$0xf0]  ;;  %v12957_v16 = vor.u32 %v16909_v44, %v12956_v7  ;;  %v13245_v21 = vor.u32 %v16981_v20, %v13244_v50  ;;  %v17089_v42 = vld [vmem:[%s26790_s10 + $0x6b0] sm:$0xf0]  ;;  %v13390_v7 = vld [vmem:[%s26790_s10 + $0x474] sm:$0xf0]  ;;  %v12849_v20 = vor.u32 %v16882_v47, %v12848_v3 }
 0x52c   : > { %4984 = vmatmul.bf16.vlgmr.msrb.gmra.mxu0 %v20795_v46  ;;  %4997 = vmatmul.bf16.vlgmr.msrb.gmra.mxu3 %v20791_v55  ;;  %v16941_v8 = vld [vmem:[%s26790_s10 + $0x214] sm:$0xf]  ;;  %v13678_v50 = vld [vmem:[%s26790_s10 + $0x6b4] sm:$0xf0]  ;;  %v12994_v3 = vld [vmem:[%s26790_s10 + $0x15c] sm:$0xf0] }
 0x52d   : > { %v17085_v44 = vld [vmem:[%s26790_s10 + $0x694] sm:$0xf]  ;;  %v16986_v47 = vld [vmem:[%s26790_s10 + $0x37c] sm:$0xf] }
 0x52e   : > { %5003 = vmatpush.bf16.msrb.mxu1 %v13349_v35  ;;  %5016 = vmatpush.bf16.msrb.mxu2 %v13637_v34  ;;  %v16972_v35 = vld [vmem:[%s26790_s10 + $0x308] sm:$0xf0]  ;;  %v13205_v34 = vor.u32 %v16967_v0, %v13202_v2  ;;  %v13640_v2 = vld [vmem:[%s26790_s10 + $0x648] sm:$0xf]  ;;  %v13681_v27 = vor.u32 %v17085_v44, %v13678_v50  ;;  %v12958_v44 = vld [vmem:[%s26790_s10 + $0x114] sm:$0xf0] }
 0x52f   : > { %5029 = vmatpush.bf16.msra.mxu0 %v13065_v43  ;;  %5042 = vmatpush.bf16.msra.mxu3 %v13353_v57  ;;  %v13166_v43 = vld [vmem:[%s26790_s10 + $0x2bc] sm:$0xf0]  ;;  %v12921_v57 = vor.u32 %v16900_v32, %v12920_v54  ;;  %v13209_v40 = vor.u32 %v16972_v35, %v13208_v59  ;;  %v13066_v54 = vld [vmem:[%s26790_s10 + $0x1ec] sm:$0xf0]  ;;  %v17004_v32 = vld [vmem:[%s26790_s10 + $0x40c] sm:$0xf] }
 0x530   : > { %v13169_v48 = vor.u32 %v16958_v17, %v13166_v43  ;;  %v13354_v59 = vld [vmem:[%s26790_s10 + $0x42c] sm:$0xf0]  ;;  %v17076_v35 = vld [vmem:[%s26790_s10 + $0x64c] sm:$0xf]  ;;  %v13069_v17 = vor.u32 %v16932_v25, %v13066_v54  ;;  %v13604_v43 = vld [vmem:[%s26790_s10 + $0x600] sm:$0xf] }
 0x531   : > { %v16977_v50 = vld [vmem:[%s26790_s10 + $0x334] sm:$0xf]  ;;  %v16896_v54 = vld [vmem:[%s26790_s10 + $0xac] sm:$0xf] }
 0x532   : > { %5004 = vmatpush.bf16.msrb.mxu1 %v13313_v33  ;;  %5017 = vmatpush.bf16.msrb.mxu2 %v13601_v15  ;;  %v16963_v33 = vld [vmem:[%s26790_s10 + $0x2c0] sm:$0xf0]  ;;  %v16949_v15 = vld [vmem:[%s26790_s10 + $0x254] sm:$0xf] }
 0x533   : > { %5030 = vmatpush.bf16.msra.mxu0 %v13029_v41  ;;  %5043 = vmatpush.bf16.msra.mxu3 %v13317_v39  ;;  %v13130_v41 = vld [vmem:[%s26790_s10 + $0x274] sm:$0xf0]  ;;  %v17021_v39 = vld [vmem:[%s26790_s10 + $0x494] sm:$0xf]  ;;  %v13173_v24 = vor.u32 %v16963_v33, %v13172_v52  ;;  %v13318_v52 = vld [vmem:[%s26790_s10 + $0x3e4] sm:$0xf0] }
 0x534   : > { %v13133_v13 = vor.u32 %v16949_v15, %v13130_v41  ;;  %v13421_v56 = vor.u32 %v17021_v39, %v13418_v38  ;;  %v17067_v33 = vld [vmem:[%s26790_s10 + $0x604] sm:$0xf]  ;;  %v13606_v15 = vld [vmem:[%s26790_s10 + $0x624] sm:$0xf0]  ;;  %v13568_v41 = vld [vmem:[%s26790_s10 + $0x5b8] sm:$0xf]  ;;  %v13321_v38 = vor.u32 %v16995_v26, %v13318_v52 }
 0x535   : > { %v17062_v39 = vld [vmem:[%s26790_s10 + $0x5d8] sm:$0xf0]  ;;  %v12886_v26 = vld [vmem:[%s26790_s10 + $0x84] sm:$0xf0]  ;;  %v16959_v52 = vld [vmem:[%s26790_s10 + $0x2a4] sm:$0xf] }
 0x536   : > { %5005 = vmatpush.bf16.msrb.mxu1 %v13277_v63  ;;  %5018 = vmatpush.bf16.msrb.mxu2 %v13565_v11  ;;  %v16954_v63 = vld [vmem:[%s26790_s10 + $0x278] sm:$0xf0]  ;;  %v13676_v11 = vld [vmem:[%s26790_s10 + $0x690] sm:$0xf] }
 0x537   : > { %5031 = vmatpush.bf16.msra.mxu0 %v12993_v49  ;;  %5044 = vmatpush.bf16.msra.mxu3 %v13281_v37  ;;  %v13102_v49 = vld [vmem:[%s26790_s10 + $0x234] sm:$0xf0]  ;;  %v17013_v37 = vld [vmem:[%s26790_s10 + $0x454] sm:$0xf] }
 0x538   : > { %v13105_v0 = vor.u32 %v16941_v8, %v13102_v49  ;;  %v13532_v49 = vld [vmem:[%s26790_s10 + $0x570] sm:$0xf] }
 0x53a   : > { %5006 = vmatpush.bf16.msrb.mxu1 %v13241_v4  ;;  %5019 = vmatpush.bf16.msrb.mxu2 %v13529_v1  ;;  %v13137_v4 = vor.u32 %v16954_v63, %v13136_v62  ;;  %v13677_v1 = vor.u32 %v17089_v42, %v13676_v11  ;;  %v13282_v62 = vld [vmem:[%s26790_s10 + $0x39c] sm:$0xf0]  ;;  %v17058_v63 = vld [vmem:[%s26790_s10 + $0x5bc] sm:$0xf]  ;;  %v13569_v42 = vor.u32 %v17062_v39, %v13568_v41  ;;  %v13424_v39 = vld [vmem:[%s26790_s10 + $0x498] sm:$0xf] }
 0x53b   : > { %5032 = vmatpush.bf16.msra.mxu0 %v12957_v16  ;;  %5045 = vmatpush.bf16.msra.mxu3 %v13245_v21  ;;  %v17080_v16 = vld [vmem:[%s26790_s10 + $0x668] sm:$0xf0]  ;;  %v13393_v21 = vor.u32 %v17013_v37, %v13390_v7  ;;  %v13570_v11 = vld [vmem:[%s26790_s10 + $0x5dc] sm:$0xf0]  ;;  %v17053_v37 = vld [vmem:[%s26790_s10 + $0x590] sm:$0xf0] }
 0x53c   : > { %v16905_v7 = vld [vmem:[%s26790_s10 + $0xf4] sm:$0xf] }
 0x53e   : > { %5007 = vmatpush.bf16.msrb.mxu1 %v13205_v34  ;;  %5020 = vmatpush.bf16.msrb.mxu2 %v13493_v61  ;;  %v13642_v34 = vld [vmem:[%s26790_s10 + $0x66c] sm:$0xf0]  ;;  %v13641_v61 = vor.u32 %v17080_v16, %v13640_v2  ;;  %v12961_v2 = vor.u32 %v16905_v7, %v12958_v44  ;;  %v13496_v16 = vld [vmem:[%s26790_s10 + $0x528] sm:$0xf]  ;;  %v13684_v44 = vld [vmem:[%s26790_s10 + $0x698] sm:$0xf] }
 0x53f   : > { %5033 = vmatpush.bf16.msra.mxu0 %v12921_v57  ;;  %5046 = vmatpush.bf16.msra.mxu3 %v13209_v40  ;;  %v17071_v57 = vld [vmem:[%s26790_s10 + $0x620] sm:$0xf0]  ;;  %v13357_v40 = vor.u32 %v17004_v32, %v13354_v59  ;;  %v13645_v30 = vor.u32 %v17076_v35, %v13642_v34  ;;  %v12922_v32 = vld [vmem:[%s26790_s10 + $0xcc] sm:$0xf0]  ;;  %v16968_v59 = vld [vmem:[%s26790_s10 + $0x2ec] sm:$0xf] }
 0x540   : > { %v13210_v35 = vld [vmem:[%s26790_s10 + $0x30c] sm:$0xf0]  ;;  %v17040_v34 = vld [vmem:[%s26790_s10 + $0x52c] sm:$0xf] }
 0x542   : > { %5008 = vmatpush.bf16.msrb.mxu1 %v13169_v48  ;;  %5021 = vmatpush.bf16.msrb.mxu2 %v13457_v12  ;;  %v13605_v48 = vor.u32 %v17071_v57, %v13604_v43  ;;  %v13033_v12 = vor.u32 %v16923_v45, %v13030_v22  ;;  %v12925_v43 = vor.u32 %v16896_v54, %v12922_v32  ;;  %v13460_v57 = vld [vmem:[%s26790_s10 + $0x4e0] sm:$0xf]  ;;  %v16887_v22 = vld [vmem:[%s26790_s10 + $0x64] sm:$0xf]  ;;  %v13648_v54 = vld [vmem:[%s26790_s10 + $0x650] sm:$0xf] }
 0x543   : > { %5034 = vmatpush.bf16.msra.mxu0 %v12885_v19  ;;  %5047 = vmatpush.bf16.msra.mxu3 %v13173_v24  ;;  %v13609_v19 = vor.u32 %v17067_v33, %v13606_v15  ;;  %v16914_v24 = vld [vmem:[%s26790_s10 + $0x13c] sm:$0xf]  ;;  %v13174_v33 = vld [vmem:[%s26790_s10 + $0x2c4] sm:$0xf0]  ;;  %v17031_v15 = vld [vmem:[%s26790_s10 + $0x4e4] sm:$0xf]  ;;  %v12889_v41 = vor.u32 %v16887_v22, %v12886_v26 }
 0x544   : > { %v12997_v8 = vor.u32 %v16914_v24, %v12994_v3  ;;  %v13177_v24 = vor.u32 %v16959_v52, %v13174_v33  ;;  %v17081_v32 = vld [vmem:[%s26790_s10 + $0x670] sm:$0xf0]  ;;  %v13000_v33 = vld [vmem:[%s26790_s10 + $0x140] sm:$0xf] }
 0x546   : > { %5009 = vmatpush.bf16.msrb.mxu1 %v13133_v13  ;;  %5022 = vmatpush.bf16.msrb.mxu2 %v13421_v56  ;;  %v13285_v13 = vor.u32 %v16986_v47, %v13282_v62  ;;  %v13573_v56 = vor.u32 %v17058_v63, %v13570_v11  ;;  %v12850_v47 = vld [vmem:[%s26790_s10 + $0x3c] sm:$0xf0]  ;;  %v16950_v62 = vld [vmem:[%s26790_s10 + $0x25c] sm:$0xf] }
 0x547   : > { %5035 = vmatpush.bf16.msra.mxu0 %v12849_v20  ;;  %5048 = vmatpush.bf16.msra.mxu3 %v13137_v4  ;;  %v13246_v20 = vld [vmem:[%s26790_s10 + $0x354] sm:$0xf0]  ;;  %v17049_v4 = vld [vmem:[%s26790_s10 + $0x574] sm:$0xf]  ;;  %v13138_v63 = vld [vmem:[%s26790_s10 + $0x27c] sm:$0xf0] }
 0x548   : > { %v17022_v11 = vld [vmem:[%s26790_s10 + $0x49c] sm:$0xf] }
 0x549   : > { %5010 = vmatmul.bf16.vlgmr.msrb.gmra.mxu1 %v20793_v58  ;;  %5023 = vmatmul.bf16.vlgmr.msrb.gmra.mxu2 %v20795_v46 }
 0x54a   : > { %5054 = vmatpush.bf16.msra.mxu1 %v13677_v1  ;;  %5067 = vmatpush.bf16.msra.mxu2 %v13105_v0  ;;  %v13534_v1 = vld [vmem:[%s26790_s10 + $0x594] sm:$0xf0]  ;;  %v13533_v0 = vor.u32 %v17053_v37, %v13532_v49  ;;  %v16946_v49 = vld [vmem:[%s26790_s10 + $0x238] sm:$0xf0] }
 0x54b   : > { %5080 = vmatpush.bf16.msrb.mxu0 %v13393_v21  ;;  %5093 = vmatpush.bf16.msrb.mxu3 %v13681_v27  ;;  %v17044_v21 = vld [vmem:[%s26790_s10 + $0x548] sm:$0xf0]  ;;  %v13249_v27 = vor.u32 %v16977_v50, %v13246_v20  ;;  %v13537_v25 = vor.u32 %v17049_v4, %v13534_v1  ;;  %v13396_v37 = vld [vmem:[%s26790_s10 + $0x458] sm:$0xf]  ;;  %v17090_v50 = vld [vmem:[%s26790_s10 + $0x6b8] sm:$0xf0]  ;;  %v13141_v20 = vor.u32 %v16950_v62, %v13138_v63 }
 0x54c   : > { %5036 = vmatmul.bf16.vlgmr.msra.gmra.mxu0 %v20791_v55  ;;  %5049 = vmatmul.bf16.vlgmr.msra.gmra.mxu3 %v20793_v58  ;;  %v16910_v63 = vld [vmem:[%s26790_s10 + $0x118] sm:$0xf0] }
 0x54e   : > { %5055 = vmatpush.bf16.msra.mxu1 %v13641_v61  ;;  %5068 = vmatpush.bf16.msra.mxu2 %v13069_v17  ;;  %v13498_v61 = vld [vmem:[%s26790_s10 + $0x54c] sm:$0xf0]  ;;  %v13497_v17 = vor.u32 %v17044_v21, %v13496_v16  ;;  %v13685_v16 = vor.u32 %v17090_v50, %v13684_v44  ;;  %v16937_v21 = vld [vmem:[%s26790_s10 + $0x1f0] sm:$0xf0] }
 0x54f   : > { %5081 = vmatpush.bf16.msrb.mxu0 %v13357_v40  ;;  %5094 = vmatpush.bf16.msrb.mxu3 %v13645_v30  ;;  %v17035_v40 = vld [vmem:[%s26790_s10 + $0x500] sm:$0xf0]  ;;  %v13213_v30 = vor.u32 %v16968_v59, %v13210_v35  ;;  %v13501_v45 = vor.u32 %v17040_v34, %v13498_v61  ;;  %v13036_v34 = vld [vmem:[%s26790_s10 + $0x188] sm:$0xf]  ;;  %v13649_v61 = vor.u32 %v17081_v32, %v13648_v54  ;;  %v12928_v50 = vld [vmem:[%s26790_s10 + $0xb0] sm:$0xf] }
 0x552   : > { %5056 = vmatpush.bf16.msra.mxu1 %v13605_v48  ;;  %5069 = vmatpush.bf16.msra.mxu2 %v13033_v12  ;;  %v13462_v48 = vld [vmem:[%s26790_s10 + $0x504] sm:$0xf0]  ;;  %v13461_v12 = vor.u32 %v17035_v40, %v13460_v57  ;;  %v17000_v57 = vld [vmem:[%s26790_s10 + $0x3e8] sm:$0xf0] }
 0x553   : > { %5082 = vmatpush.bf16.msrb.mxu0 %v13321_v38  ;;  %5095 = vmatpush.bf16.msrb.mxu3 %v13609_v19  ;;  %v17026_v38 = vld [vmem:[%s26790_s10 + $0x4b8] sm:$0xf0]  ;;  %v13465_v3 = vor.u32 %v17031_v15, %v13462_v48  ;;  %v13612_v40 = vld [vmem:[%s26790_s10 + $0x608] sm:$0xf]  ;;  %v16919_v48 = vld [vmem:[%s26790_s10 + $0x160] sm:$0xf0] }
 0x554   : > { %v16878_v19 = vld [vmem:[%s26790_s10 + $0x1c] sm:$0xf] }
 0x555   : > { %v12853_v7 = vor.u32 %v16878_v19, %v12850_v47  ;;  %v13001_v19 = vor.u32 %v16919_v48, %v13000_v33  ;;  %v13144_v48 = vld [vmem:[%s26790_s10 + $0x260] sm:$0xf] }
 0x556   : > { %5057 = vmatpush.bf16.msra.mxu1 %v13569_v42  ;;  %5070 = vmatpush.bf16.msra.mxu2 %v12997_v8  ;;  %v13426_v42 = vld [vmem:[%s26790_s10 + $0x4bc] sm:$0xf0]  ;;  %v13108_v8 = vld [vmem:[%s26790_s10 + $0x218] sm:$0xf] }
 0x557   : > { %5083 = vmatpush.bf16.msrb.mxu0 %v13285_v13  ;;  %5096 = vmatpush.bf16.msrb.mxu3 %v13573_v56  ;;  %v17018_v13 = vld [vmem:[%s26790_s10 + $0x478] sm:$0xf0]  ;;  %v13425_v56 = vor.u32 %v17026_v38, %v13424_v39  ;;  %v13429_v4 = vor.u32 %v17022_v11, %v13426_v42  ;;  %v13109_v1 = vor.u32 %v16946_v49, %v13108_v8  ;;  %v13576_v39 = vld [vmem:[%s26790_s10 + $0x5c0] sm:$0xf]  ;;  %v17063_v38 = vld [vmem:[%s26790_s10 + $0x5e0] sm:$0xf0] }
 0x558   : > { %v13577_v47 = vor.u32 %v17063_v38, %v13576_v39  ;;  %v13252_v11 = vld [vmem:[%s26790_s10 + $0x338] sm:$0xf]  ;;  %v16982_v42 = vld [vmem:[%s26790_s10 + $0x358] sm:$0xf0]  ;;  %v17027_v39 = vld [vmem:[%s26790_s10 + $0x4c0] sm:$0xf0] }
 0x559   : > { %v13540_v49 = vld [vmem:[%s26790_s10 + $0x578] sm:$0xf] }
 0x55a   : > { %5058 = vmatpush.bf16.msra.mxu1 %v13533_v0  ;;  %5071 = vmatpush.bf16.msra.mxu2 %v12961_v2  ;;  %v13397_v0 = vor.u32 %v17018_v13, %v13396_v37  ;;  %v13072_v2 = vld [vmem:[%s26790_s10 + $0x1d0] sm:$0xf]  ;;  %v17054_v37 = vld [vmem:[%s26790_s10 + $0x598] sm:$0xf0] }
 0x55b   : > { %5084 = vmatpush.bf16.msrb.mxu0 %v13249_v27  ;;  %5097 = vmatpush.bf16.msrb.mxu3 %v13537_v25  ;;  %v13360_v27 = vld [vmem:[%s26790_s10 + $0x410] sm:$0xf]  ;;  %v17009_v25 = vld [vmem:[%s26790_s10 + $0x430] sm:$0xf0]  ;;  %v13073_v59 = vor.u32 %v16937_v21, %v13072_v2 }
 0x55c   : > { %v13361_v35 = vor.u32 %v17009_v25, %v13360_v27  ;;  %v13504_v2 = vld [vmem:[%s26790_s10 + $0x530] sm:$0xf]  ;;  %v12892_v25 = vld [vmem:[%s26790_s10 + $0x68] sm:$0xf] }
 0x55e   : > { %5059 = vmatpush.bf16.msra.mxu1 %v13497_v17  ;;  %5072 = vmatpush.bf16.msra.mxu2 %v12925_v43  ;;  %v16928_v17 = vld [vmem:[%s26790_s10 + $0x1a8] sm:$0xf0]  ;;  %v13324_v43 = vld [vmem:[%s26790_s10 + $0x3c8] sm:$0xf] }
 0x55f   : > { %5085 = vmatpush.bf16.msrb.mxu0 %v13213_v30  ;;  %5098 = vmatpush.bf16.msrb.mxu3 %v13501_v45  ;;  %v17072_v30 = vld [vmem:[%s26790_s10 + $0x628] sm:$0xf0]  ;;  %v13037_v22 = vor.u32 %v16928_v17, %v13036_v34  ;;  %v13325_v26 = vor.u32 %v17000_v57, %v13324_v43  ;;  %v13468_v17 = vld [vmem:[%s26790_s10 + $0x4e8] sm:$0xf] }
 0x560   : > { %v13613_v15 = vor.u32 %v17072_v30, %v13612_v40  ;;  %v16964_v34 = vld [vmem:[%s26790_s10 + $0x2c8] sm:$0xf0] }
 0x561   : > { %v17036_v43 = vld [vmem:[%s26790_s10 + $0x508] sm:$0xf0] }
 0x562   : > { %5060 = vmatpush.bf16.msra.mxu1 %v13461_v12  ;;  %5073 = vmatpush.bf16.msra.mxu2 %v12889_v41  ;;  %v13288_v12 = vld [vmem:[%s26790_s10 + $0x380] sm:$0xf]  ;;  %v16991_v41 = vld [vmem:[%s26790_s10 + $0x3a0] sm:$0xf0]  ;;  %v13469_v33 = vor.u32 %v17036_v43, %v13468_v17 }
 0x563   : > { %5086 = vmatpush.bf16.msrb.mxu0 %v13177_v24  ;;  %5099 = vmatpush.bf16.msrb.mxu3 %v13465_v3  ;;  %v13289_v24 = vor.u32 %v16991_v41, %v13288_v12  ;;  %v12964_v3 = vld [vmem:[%s26790_s10 + $0xf8] sm:$0xf]  ;;  %v16955_v12 = vld [vmem:[%s26790_s10 + $0x280] sm:$0xf0]  ;;  %v13432_v41 = vld [vmem:[%s26790_s10 + $0x4a0] sm:$0xf] }
 0x565   : > { %v21619_v45 = vpop.f32.mrf.mxu1 }
 0x566   : > { %5061 = vmatpush.bf16.msra.mxu1 %v13425_v56  ;;  %5074 = vmatpush.bf16.msra.mxu2 %v12853_v7  ;;  %v21621_v52 = vpop.f32.mrf.mxu0  ;;  %v12965_v56 = vor.u32 %v16910_v63, %v12964_v3  ;;  %v13253_v7 = vor.u32 %v16982_v42, %v13252_v11 }
 0x567   : > { %5087 = vmatpush.bf16.msrb.mxu0 %v13141_v20  ;;  %5100 = vmatpush.bf16.msrb.mxu3 %v13429_v4  ;;  %v13541_v20 = vor.u32 %v17054_v37, %v13540_v49  ;;  %v16901_v4 = vld [vmem:[%s26790_s10 + $0xd0] sm:$0xf0] }
 0x568   : > { %v12929_v21 = vor.u32 %v16901_v4, %v12928_v50 }
 0x569   : > { %5062 = vmatmul.bf16.vlgmr.msra.gmra.mxu1 %v20795_v46  ;;  %5075 = vmatmul.bf16.vlgmr.msra.gmra.mxu2 %v20791_v55 }
 0x56a   : > { %5106 = vmatpush.bf16.msrb.mxu1 %v13109_v1  ;;  %5119 = vmatpush.bf16.msrb.mxu2 %v13397_v0  ;;  %v13216_v1 = vld [vmem:[%s26790_s10 + $0x2f0] sm:$0xf]  ;;  %v16973_v0 = vld [vmem:[%s26790_s10 + $0x310] sm:$0xf0] }
 0x56b   : > { %5132 = vmatpush.bf16.msra.mxu0 %v13685_v16  ;;  %5101 = vmatmul.bf16.vlgmr.msrb.gmra.mxu3 %v20795_v46  ;;  %v21644_v62 = vpop.f32.mrf.mxu2  ;;  %v17045_v16 = vld [vmem:[%s26790_s10 + $0x550] sm:$0xf0]  ;;  %v13217_v27 = vor.u32 %v16973_v0, %v13216_v1 }
 0x56c   : > { %5088 = vmatmul.bf16.vlgmr.msrb.gmra.mxu0 %v20793_v58  ;;  %v21655_v8 = vpop.f32.mrf.mxu3  ;;  %v13505_v54 = vor.u32 %v17045_v16, %v13504_v2 }
 0x56d   : > { %v4805_v13 = vpop.f32.mrf.mxu1 }
 0x56e   : > { %5107 = vmatpush.bf16.msrb.mxu1 %v13073_v59  ;;  %5120 = vmatpush.bf16.msrb.mxu2 %v13361_v35  ;;  %v4831_v44 = vpop.f32.mrf.mxu0  ;;  %v16892_v59 = vld [vmem:[%s26790_s10 + $0x88] sm:$0xf0]  ;;  %v13180_v35 = vld [vmem:[%s26790_s10 + $0x2a8] sm:$0xf] }
 0x56f   : > { %5133 = vmatpush.bf16.msra.mxu0 %v13649_v61  ;;  %v12893_v40 = vor.u32 %v16892_v59, %v12892_v25  ;;  %v13181_v30 = vor.u32 %v16964_v34, %v13180_v35 }
 0x572   : > { %5108 = vmatpush.bf16.msrb.mxu1 %v13037_v22  ;;  %5121 = vmatpush.bf16.msrb.mxu2 %v13325_v26  ;;  %v12856_v26 = vld [vmem:[%s26790_s10 + $0x20] sm:$0xf] }
 0x573   : > { %5134 = vmatpush.bf16.msra.mxu0 %v13613_v15  ;;  %v4818_v32 = vpop.f32.mrf.mxu2  ;;  %v16883_v15 = vld [vmem:[%s26790_s10 + $0x40] sm:$0xf0] }
 0x574   : > { %v4844_v61 = vpop.f32.mrf.mxu3  ;;  %v12857_v38 = vor.u32 %v16883_v15, %v12856_v26 }
 0x575   : > { %v21699_v57 = vpop.f32.mrf.mxu1 }
 0x576   : > { %5109 = vmatpush.bf16.msrb.mxu1 %v13001_v19  ;;  %5122 = vmatpush.bf16.msrb.mxu2 %v13289_v24  ;;  %v4881_v22 = vpop.f32.mrf.mxu0  ;;  %v13145_v19 = vor.u32 %v16955_v12, %v13144_v48  ;;  %v13433_v24 = vor.u32 %v17027_v39, %v13432_v41 }
 0x577   : > { %5135 = vmatpush.bf16.msra.mxu0 %v13577_v47 }
 0x57a   : > { %5110 = vmatpush.bf16.msrb.mxu1 %v12965_v56  ;;  %5123 = vmatpush.bf16.msrb.mxu2 %v13253_v7  ;;  %v21725_v56 = vld [vmem:[%s26637_s11] sm:$0xff] }
 0x57b   : > { %5136 = vmatpush.bf16.msra.mxu0 %v13541_v20  ;;  %v4868_v3 = vpop.f32.mrf.mxu2  ;;  %v3675_v7 = vperm.slane %v21725_v56, 3  ;;  %v3672_v50 = vperm.slane %v21725_v56, 0  ;;  %v3674_v32 = vperm.slane %v21725_v56, 2  ;;  %v3676_v17 = vperm.slane %v21725_v56, 4 }
 0x57c   : > { %v4894_v47 = vpop.f32.mrf.mxu3 }
 0x57d   : > { %v4857_v63 = vpop.f32.mrf.mxu1  ;;  %v4882_v35 = vadd.f32 %v4881_v22, %v3674_v32  ;;  %v3679_v32 = vperm.slane %v21725_v56, 7 }
 0x57e   : > { %5111 = vmatpush.bf16.msrb.mxu1 %v12929_v21  ;;  %5124 = vmatpush.bf16.msrb.mxu2 %v13217_v27  ;;  %v4883_v11 = vpop.f32.mrf.mxu0 }
 0x57f   : > { %5137 = vmatpush.bf16.msra.mxu0 %v13505_v54  ;;  %v3677_v11 = vperm.slane %v21725_v56, 5 }
 0x582   : > { %5112 = vmatpush.bf16.msrb.mxu1 %v12893_v40  ;;  %5125 = vmatpush.bf16.msrb.mxu2 %v13181_v30 }
 0x583   : > { %5138 = vmatpush.bf16.msra.mxu0 %v13469_v33  ;;  %v4870_v42 = vpop.f32.mrf.mxu2 }
 0x584   : > { %v4896_v49 = vpop.f32.mrf.mxu3 }
 0x586   : > { %5113 = vmatpush.bf16.msrb.mxu1 %v12857_v38  ;;  %5126 = vmatpush.bf16.msrb.mxu2 %v13145_v19  ;;  %v4907_v37 = vpop.f32.mrf.mxu1 }
 0x587   : > { %5139 = vmatpush.bf16.msra.mxu0 %v13433_v24 }
 0x589   : > { %5114 = vmatmul.bf16.vlgmr.msrb.gmra.mxu1 %v20791_v55  ;;  %5127 = vmatmul.bf16.vlgmr.msrb.gmra.mxu2 %v20793_v58  ;;  %v4933_v13 = vpop.f32.mrf.mxu0 }
 0x58a   : > { %5140 = vmatmul.bf16.vlgmr.msra.gmra.mxu0 %v20795_v46  ;;  %v4804_v46 = vadd.f32 %v21619_v45, %v3672_v50  ;;  %v4895_v45 = vadd.f32 %v4894_v47, %v4882_v35 }
 0x58c   : > { %v4920_v44 = vpop.f32.mrf.mxu2  ;;  %v4817_v2 = vadd.f32 %v21644_v62, %v4804_v46  ;;  %v4908_v62 = vadd.f32 %v4907_v37, %v4895_v45 }
 0x58d   : > { %v4921_v20 = vadd.f32 %v4920_v44, %v3675_v7 }
 0x58e   : > { %v4909_v4 = vpop.f32.mrf.mxu1  ;;  %v4830_v54 = vadd.f32 %v21621_v52, %v4817_v2  ;;  %v5380_v34 = vpack.c.bf16 %v4908_v62, %v4908_v62  ;;  %v3673_v52 = vperm.slane %v21725_v56, 1 }
 0x58f   : > { %v4946_v55 = vpop.f32.mrf.mxu3  ;;  %v4934_v58 = vadd.f32 %v4933_v13, %v4921_v20 }
 0x590   : > { %v5145_v59 = vpack.c.bf16 %v4830_v54, %v4830_v54  ;;  %v4843_v12 = vadd.f32 %v21655_v8, %v3673_v52 }
 0x591   : > { %v4935_v1 = vpop.f32.mrf.mxu0  ;;  %v4947_v0 = vadd.f32 %v4946_v55, %v4934_v58  ;;  %v3678_v58 = vperm.slane %v21725_v56, 6 }
 0x592   : > { %v4856_v39 = vadd.f32 %v21699_v57, %v4843_v12 }
 0x593   : > { %v5146_v16 = vpack.c.bf16 %v4947_v0, %v4947_v0  ;;  %v18191_v0 = vmov 65535  }
 0x594   : > { %v4922_v21 = vpop.f32.mrf.mxu2  ;;  %v4869_v24 = vadd.f32 %v4868_v3, %v4856_v39  ;;  %v5188_v2 = vsel %vm5186_vm4, 4294967295, %v18191_v0 }
 0x595   : > { %v5153_v27 = vsel %vm5148_vm6, %v5146_v16, 0  ;;  %5210 = vrot.lane.b32.xlu1 %v5146_v16, %s18190_s1 }
 0x596   : > { %5162 = vmatpush.bf16.xpose.msra.mxu3 %v5153_v27  ;;  %v5266_v63 = vpack.c.bf16 %v4869_v24, %v4869_v24 }
 0x597   : > { %v4948_v25 = vpop.f32.mrf.mxu3 }
 0x598   : > { %v21751_v25 = vsel %vm5187_vm13, %v5188_v2, 0 }
 0x59d   : > { %5207 = vrot.lane.b32.xlu1 %v5145_v59, %s18190_s1  ;;  %13686 = vmatmul.msk.bf16.vlgmr.msra.gmra.mxu3 %vm5148_vm6, %v5145_v59 }
 0x5a5   : > { %5435 = vrot.lane.b32.xlu1 %v5380_v34, %s18190_s1 }
 0x5a6   : > { %v4959_v61 = vpop.f32.mrf.mxu1 }
 0x5a7   : > { %v4960_v40 = vadd.f32 %v4959_v61, %v3676_v17 }
 0x5a9   : > { %v4985_v43 = vpop.f32.mrf.mxu0 }
 0x5ac   : > { %v4972_v30 = vpop.f32.mrf.mxu2 }
 0x5ad   : > { %v4973_v26 = vadd.f32 %v4972_v30, %v4960_v40 }
 0x5ae   : > { %v4961_v22 = vpop.f32.mrf.mxu1 }
 0x5af   : > { %v4998_v33 = vpop.f32.mrf.mxu3  ;;  %v4986_v48 = vadd.f32 %v4985_v43, %v4973_v26 }
 0x5b0   : > { %v4999_v49 = vadd.f32 %v4998_v33, %v3677_v11  ;;  %v17895_v33 = vld [vmem:[%s26637_s11 + $0x8] ss:$0 sm:$0xff] }
 0x5b1   : > { %v4987_v15 = vpop.f32.mrf.mxu0  ;;  %v5267_v41 = vpack.c.bf16 %v4986_v48, %v4986_v48 }
 0x5b3   : > { %5324 = vrot.lane.b32.xlu2 %v5267_v41, %s18190_s1  ;;  %v5273_v38 = vsel %vm5148_vm6, %v5267_v41, 0 }
 0x5b4   : > { %v4974_v19 = vpop.f32.mrf.mxu2  ;;  %5282 = vmatpush.bf16.xpose.msra.mxu2 %v5273_v38 }
 0x5b7   : > { %v5000_v47 = vpop.f32.mrf.mxu3 }
 0x5bb   : > { %5321 = vrot.lane.b32.xlu2 %v5266_v63, %s18190_s1  ;;  %13690 = vmatmul.msk.bf16.vlgmr.msra.gmra.mxu2 %vm5148_vm6, %v5266_v63 }
 0x5c6   : > { %v5011_v42 = vpop.f32.mrf.mxu1 }
 0x5c7   : > { %v5012_v37 = vadd.f32 %v5011_v42, %v4999_v49 }
 0x5c9   : > { %v5037_v8 = vpop.f32.mrf.mxu0 }
 0x5ca   : > { %v5038_v1 = vadd.f32 %v5037_v8, %v3678_v58 }
 0x5cc   : > { %v5024_v57 = vpop.f32.mrf.mxu2 }
 0x5cd   : > { %v5025_v13 = vadd.f32 %v5024_v57, %v5012_v37 }
 0x5ce   : > { %v5013_v44 = vpop.f32.mrf.mxu1 }
 0x5cf   : > { %v5050_v7 = vpop.f32.mrf.mxu3  ;;  %v5381_v50 = vpack.c.bf16 %v5025_v13, %v5025_v13 }
 0x5d0   : > { %v5051_v46 = vadd.f32 %v5050_v7, %v5038_v1 }
 0x5d1   : > { %v5039_v20 = vpop.f32.mrf.mxu0  ;;  %v5387_v3 = vsel %vm5148_vm6, %v5381_v50, 0  ;;  %5438 = vrot.lane.b32.xlu0 %v5381_v50, %s18190_s1 }
 0x5d2   : > { %5396 = vmatpush.bf16.xpose.msrb.mxu2 %v5387_v3 }
 0x5d4   : > { %v5026_v55 = vpop.f32.mrf.mxu2 }
 0x5d7   : > { %v5052_v4 = vpop.f32.mrf.mxu3 }
 0x5d9   : > { %13694 = vmatmul.msk.bf16.vlgmr.msrb.gmra.mxu2 %vm5148_vm6, %v5380_v34 }
 0x5e6   : > { %v5063_v16 = vpop.f32.mrf.mxu1 }
 0x5e7   : > { %v5064_v21 = vadd.f32 %v5063_v16, %v5051_v46 }
 0x5e9   : > { %v5089_v27 = vpop.f32.mrf.mxu0  ;;  %v21753_v54 = vpack.c.bf16 %v5064_v21, %v5064_v21 }
 0x5eb   : > { %v5191_v59 = vand.u32 %v21751_v25, %v21753_v54 }
 0x5ec   : > { %v5076_v35 = vpop.f32.mrf.mxu2 }
 0x5ed   : > { %5200 = vmatpush.bf16.msra.mxu1 %v5191_v59  ;;  %v5077_v45 = vadd.f32 %v5076_v35, %v3679_v32 }
 0x5ee   : > { %v5102_v62 = vpop.f32.mrf.mxu3  ;;  %v5065_v34 = vpop.f32.mrf.mxu1 }
 0x5ef   : > { %v5090_v17 = vadd.f32 %v5089_v27, %v5077_v45 }
 0x5f1   : > { %v5091_v61 = vpop.f32.mrf.mxu0  ;;  %v5103_v43 = vadd.f32 %v5102_v62, %v5090_v17 }
 0x5f3   : > { %v21758_v40 = vpack.c.bf16 %v5103_v43, %v5103_v43 }
 0x5f4   : > { %v5078_v30 = vpop.f32.mrf.mxu2 }
 0x5f5   : > { %v5305_v52 = vand.u32 %v21758_v40, %v21751_v25 }
 0x5f6   : > { %v5104_v26 = vpop.f32.mrf.mxu3 }
 0x5f7   : > { %5314 = vmatpush.bf16.msrb.mxu0 %v5305_v52 }
 0x606   : > { %v5115_v56 = vpop.f32.mrf.mxu1 }
 0x607   : > { %v5141_v22 = vpop.f32.mrf.mxu0  ;;  %v5116_v15 = vadd.f32 %v17895_v33, %v5115_v56  ;;  %v5211_v19 = vpop.permute.xlu1 %5210 }
 0x608   : > { %v5216_v47 = vsel %vm5148_vm6, %v5211_v19, 0 }
 0x609   : > { %5225 = vmatpush.bf16.xpose.msrb.mxu3 %v5216_v47 }
 0x60c   : > { %v5128_v48 = vpop.f32.mrf.mxu2 }
 0x60d   : > { %v5129_v12 = vadd.f32 %v5128_v48, %v5116_v15  ;;  %v5325_v42 = vpop.permute.xlu2 %5324 }
 0x60e   : > { %v5117_v41 = vpop.f32.mrf.mxu1  ;;  %v5330_v8 = vsel %vm5148_vm6, %v5325_v42, 0 }
 0x60f   : > { %v5142_v39 = vadd.f32 %v5141_v22, %v5129_v12  ;;  %v5143_v38 = vpop.f32.mrf.mxu0  ;;  %v5208_v49 = vpop.permute.xlu1 %5207 }
 0x610   : > { %13688 = vmatmul.msk.bf16.vlgmr.msrb.gmra.mxu3 %vm5148_vm6, %v5208_v49 }
 0x611   : > { %v21765_v24 = vpack.c.bf16 %v5142_v39, %v5142_v39  ;;  %5339 = vmatpush.bf16.xpose.msra.mxu3 %v5330_v8 }
 0x613   : > { %v5419_v63 = vand.u32 %v21765_v24, %v21751_v25 }
 0x614   : > { %v5130_v11 = vpop.f32.mrf.mxu2 }
 0x615   : > { %5428 = vmatpush.bf16.msra.mxu0 %v5419_v63  ;;  %v5322_v37 = vpop.permute.xlu2 %5321 }
 0x617   : > { %v5436_v4 = vpop.permute.xlu1 %5435 }
 0x620   : > { %v5164_v57 = vpop.f32.mrf.mxu3  ;;  %13692 = vmatmul.msk.bf16.vlgmr.msra.gmra.mxu3 %vm5148_vm6, %v5322_v37 }
 0x621   : > { %v5168_v13 = vmul.f32 0.125, %v5164_v57 }
 0x623   : > { %v5170_v7 = vsel %vm5169_vm1, %v5168_v13, -inf }
 0x624   : > { %5171 = vmax.xlane.f32.xlu2 %v5170_v7 }
 0x628   : > { %v5166_v44 = vpop.f32.mrf.mxu3 }
 0x63e   : > { %v5284_v50 = vpop.f32.mrf.mxu2 }
 0x63f   : > { %v5288_v52 = vmul.f32 0.125, %v5284_v50 }
 0x641   : > { %v5289_v56 = vsel %vm5169_vm1, %v5288_v52, -inf }
 0x643   : > { %v5439_v20 = vpop.permute.xlu0 %5438 }
 0x644   : > { %v5444_v3 = vsel %vm5148_vm6, %v5439_v20, 0 }
 0x645   : > { %5453 = vmatpush.bf16.xpose.msrb.mxu3 %v5444_v3 }
 0x646   : > { %v5286_v55 = vpop.f32.mrf.mxu2 }
 0x64c   : > { %13696 = vmatmul.msk.bf16.vlgmr.msrb.gmra.mxu3 %vm5148_vm6, %v5436_v4 }
 0x65c   : > { %v5398_v58 = vpop.f32.mrf.mxu2 }
 0x65d   : > { %v5402_v33 = vmul.f32 0.125, %v5398_v58 }
 0x65f   : > { %v5403_v22 = vsel %vm5169_vm1, %v5402_v33, -inf }
 0x664   : > { %v5400_v1 = vpop.f32.mrf.mxu2 }
 0x693   : > { %v5227_v46 = vpop.f32.mrf.mxu3 }
 0x694   : > { %v5231_v0 = vmul.f32 0.125, %v5227_v46 }
 0x696   : > { %v5232_v2 = vsel %vm5169_vm1, %v5231_v0, -inf }
 0x697   : > { %v5172_v16 = vpop.xlane.xlu2 %5171  ;;  %5233 = vmax.xlane.f32.xlu1 %v5232_v2 }
 0x698   : > { %v5173_v21 = vsub.f32 %v5168_v13, %v5172_v16 }
 0x69a   : > { %v5174_v27 = vmul.f32 1.442695, %v5173_v21 }
 0x69b   : > { %v5229_v32 = vpop.f32.mrf.mxu3 }
 0x69c   : > { %18028 = vpow2.f32 %v5174_v27 }
 0x6a2   : > { %v18029_v59 = vpop.eup %18028 }
 0x6a3   : > { %v5341_v35 = vpop.f32.mrf.mxu3  ;;  %v5176_v45 = vsel %vm5169_vm1, %v18029_v59, 0.0 }
 0x6a4   : > { %v5345_v62 = vmul.f32 0.125, %v5341_v35  ;;  %5177 = vadd.xlane.f32.xlu2 %v5176_v45 }
 0x6a6   : > { %v5346_v34 = vsel %vm5169_vm1, %v5345_v62, -inf }
 0x6a7   : > { %5347 = vmax.xlane.f32.xlu0 %v5346_v34 }
 0x6ab   : > { %v5343_v61 = vpop.f32.mrf.mxu3 }
 0x6cf   : > { %v5455_v17 = vpop.f32.mrf.mxu3 }
 0x6d0   : > { %v5459_v43 = vmul.f32 0.125, %v5455_v17 }
 0x6d2   : > { %v5460_v30 = vsel %vm5169_vm1, %v5459_v43, -inf }
 0x6d3   : > { %5461 = vmax.xlane.f32.xlu2 %v5460_v30 }
 0x6d7   : > { %v5457_v26 = vpop.f32.mrf.mxu3 }
 0x6db   : > { %5290 = vmax.xlane.f32.xlu2 %v5289_v56 }
 0x6e3   : > { %5404 = vmax.xlane.f32.xlu2 %v5403_v22 }
 0x70a   : > { %v5234_v15 = vpop.xlane.xlu1 %5233 }
 0x70b   : > { %v5235_v48 = vsub.f32 %v5231_v0, %v5234_v15 }
 0x70d   : > { %v5236_v12 = vmul.f32 1.442695, %v5235_v48 }
 0x70f   : > { %18030 = vpow2.f32 %v5236_v12 }
 0x715   : > { %v18031_v41 = vpop.eup %18030 }
 0x716   : > { %v5238_v39 = vsel %vm5169_vm1, %v18031_v41, 0.0 }
 0x717   : > { %v5178_v38 = vpop.xlane.xlu2 %5177  ;;  %5239 = vadd.xlane.f32.xlu1 %v5238_v39 }
 0x718   : > { %18032 = vrcp.f32 %v5178_v38 }
 0x71a   : > { %v5348_v19 = vpop.xlane.xlu0 %5347 }
 0x71b   : > { %v5349_v47 = vsub.f32 %v5345_v62, %v5348_v19 }
 0x71d   : > { %v5350_v63 = vmul.f32 1.442695, %v5349_v47 }
 0x71e   : > { %v18033_v11 = vpop.eup %18032 }
 0x71f   : > { %v5180_v42 = vmul.f32 %v18033_v11, %v18029_v59  ;;  %18034 = vpow2.f32 %v5350_v63 }
 0x721   : > { %v5181_v8 = vpack.c.bf16 %v5180_v42, %v5180_v42 }
 0x723   : > { %13687 = vmatmul.msk.bf16.vlgmr.msra.gmra.mxu1 %vm5182_vm14, %v5181_v8  ;;  %v13784_v8 = vld [vmem:[%s26638_s12 + $0xa8] sm:$0xf] }
 0x725   : > { %v18035_v49 = vpop.eup %18034 }
 0x726   : > { %v5352_v37 = vsel %vm5169_vm1, %v18035_v49, 0.0 }
 0x727   : > { %5353 = vadd.xlane.f32.xlu0 %v5352_v37  ;;  %v17112_v37 = vld [vmem:[%s26638_s12 + $0xac] sm:$0xf] }
 0x730   : > { %5245 = vrot.lane.b32.xlu1 %v21753_v54, %s18190_s1 }
 0x73b   : > { %5359 = vrot.lane.b32.xlu0 %v21758_v40, %s18190_s1 }
 0x746   : > { %v5462_v57 = vpop.xlane.xlu2 %5461 }
 0x747   : > { %v5463_v13 = vsub.f32 %v5459_v43, %v5462_v57 }
 0x749   : > { %v5464_v7 = vmul.f32 1.442695, %v5463_v13  ;;  %v13786_v13 = vld [vmem:[%s26638_s12 + $0xb4] sm:$0xf0] }
 0x74b   : > { %18036 = vpow2.f32 %v5464_v7  ;;  %v13789_v7 = vor.u32 %v17112_v37, %v13786_v13  ;;  %v17137_v37 = vld [vmem:[%s26638_s12 + $0x170] sm:$0xf0] }
 0x74e   : > { %v5291_v44 = vpop.xlane.xlu2 %5290 }
 0x74f   : > { %v5292_v50 = vsub.f32 %v5288_v52, %v5291_v44  ;;  %v13772_v44 = vld [vmem:[%s26638_s12 + $0x90] sm:$0xf] }
 0x751   : > { %v18037_v20 = vpop.eup %18036  ;;  %v5293_v3 = vmul.f32 1.442695, %v5292_v50  ;;  %v17110_v50 = vld [vmem:[%s26638_s12 + $0x98] sm:$0xf0] }
 0x752   : > { %v5466_v55 = vsel %vm5169_vm1, %v18037_v20, 0.0 }
 0x753   : > { %5467 = vadd.xlane.f32.xlu2 %v5466_v55  ;;  %18038 = vpow2.f32 %v5293_v3  ;;  %v13773_v3 = vor.u32 %v17110_v50, %v13772_v44  ;;  %v13774_v55 = vld [vmem:[%s26638_s12 + $0x9c] sm:$0xf0]  ;;  %v17091_v44 = vld [vmem:[%s26638_s12 + $0x4] sm:$0xf]  ;;  %v13702_v50 = vld [vmem:[%s26638_s12 + $0xc] sm:$0xf0] }
 0x756   : > { %v5405_v4 = vpop.xlane.xlu2 %5404 }
 0x757   : > { %v5406_v58 = vsub.f32 %v5402_v33, %v5405_v4  ;;  %v13760_v4 = vld [vmem:[%s26638_s12 + $0x78] sm:$0xf] }
 0x759   : > { %v18039_v1 = vpop.eup %18038  ;;  %v5407_v46 = vmul.f32 1.442695, %v5406_v58  ;;  %v17107_v58 = vld [vmem:[%s26638_s12 + $0x80] sm:$0xf0] }
 0x75a   : > { %v5295_v54 = vsel %vm5169_vm1, %v18039_v1, 0.0 }
 0x75b   : > { %5296 = vadd.xlane.f32.xlu1 %v5295_v54  ;;  %18040 = vpow2.f32 %v5407_v46  ;;  %v17106_v46 = vld [vmem:[%s26638_s12 + $0x7c] sm:$0xf]  ;;  %v13762_v54 = vld [vmem:[%s26638_s12 + $0x84] sm:$0xf0] }
 0x761   : > { %v18041_v40 = vpop.eup %18040 }
 0x762   : > { %v5409_v0 = vsel %vm5169_vm1, %v18041_v40, 0.0 }
 0x765   : > { %5410 = vadd.xlane.f32.xlu0 %v5409_v0  ;;  %v13765_v0 = vor.u32 %v17106_v46, %v13762_v54  ;;  %v17134_v46 = vld [vmem:[%s26638_s12 + $0x158] sm:$0xf0]  ;;  %v13964_v54 = vld [vmem:[%s26638_s12 + $0x210] sm:$0xf] }
 0x76b   : > { %5473 = vrot.lane.b32.xlu2 %v21765_v24, %s18190_s1 }
 0x78a   : > { %v5240_v2 = vpop.xlane.xlu1 %5239 }
 0x78b   : > { %18042 = vrcp.f32 %v5240_v2 }
 0x791   : > { %v18043_v16 = vpop.eup %18042 }
 0x792   : > { %v5242_v27 = vmul.f32 %v18043_v16, %v18031_v41 }
 0x794   : > { %v5243_v45 = vpack.c.bf16 %v5242_v27, %v5242_v27  ;;  %v13748_v27 = vld [vmem:[%s26638_s12 + $0x60] sm:$0xf] }
 0x79a   : > { %v5354_v35 = vpop.xlane.xlu0 %5353 }
 0x79b   : > { %18044 = vrcp.f32 %v5354_v35 }
 0x7a0   : > { %v21794_v21 = vpop.f32.mrf.mxu1 }
 0x7a1   : > { %v18045_v24 = vpop.eup %18044 }
 0x7a2   : > { %v5246_v32 = vpop.permute.xlu1 %5245  ;;  %v5356_v17 = vmul.f32 %v18045_v24, %v18035_v49  ;;  %v17113_v49 = vld [vmem:[%s26638_s12 + $0xb0] sm:$0xf0]  ;;  %v17100_v24 = vld [vmem:[%s26638_s12 + $0x4c] sm:$0xf] }
 0x7a3   : > { %v5251_v59 = vand.u32 %v5246_v32, %v21751_v25  ;;  %v13785_v57 = vor.u32 %v17113_v49, %v13784_v8  ;;  %v17104_v32 = vld [vmem:[%s26638_s12 + $0x68] sm:$0xf0]  ;;  %v13880_v49 = vld [vmem:[%s26638_s12 + $0x168] sm:$0xf] }
 0x7a4   : > { %v5357_v43 = vpack.c.bf16 %v5356_v17, %v5356_v17  ;;  %v13749_v35 = vor.u32 %v17104_v32, %v13748_v27  ;;  %v13738_v17 = vld [vmem:[%s26638_s12 + $0x54] sm:$0xf0]  ;;  %v13881_v13 = vor.u32 %v17137_v37, %v13880_v49  ;;  %v17133_v27 = vld [vmem:[%s26638_s12 + $0x154] sm:$0xf]  ;;  %v13870_v32 = vld [vmem:[%s26638_s12 + $0x15c] sm:$0xf0] }
 0x7a5   : > { %5260 = vmatpush.bf16.msrb.mxu1 %v5251_v59  ;;  %5992 = vmatpush.bf16.msra.mxu2 %v13785_v57  ;;  %v17103_v59 = vld [vmem:[%s26638_s12 + $0x64] sm:$0xf]  ;;  %v13976_v57 = vld [vmem:[%s26638_s12 + $0x228] sm:$0xf] }
 0x7a6   : > { %v13928_v37 = vld [vmem:[%s26638_s12 + $0x1c8] sm:$0xf] }
 0x7a8   : > { %v5204_v62 = vpop.f32.mrf.mxu1  ;;  %13689 = vmatmul.msk.bf16.vlgmr.msrb.gmra.mxu1 %vm5182_vm14, %v5243_v45  ;;  %v13750_v45 = vld [vmem:[%s26638_s12 + $0x6c] sm:$0xf0] }
 0x7a9   : > { %5993 = vmatpush.bf16.msra.mxu2 %v13773_v3  ;;  %v13736_v62 = vld [vmem:[%s26638_s12 + $0x48] sm:$0xf]  ;;  %v13705_v3 = vor.u32 %v17091_v44, %v13702_v50  ;;  %v13864_v44 = vld [vmem:[%s26638_s12 + $0x140] sm:$0xf]  ;;  %v17132_v50 = vld [vmem:[%s26638_s12 + $0x148] sm:$0xf0] }
 0x7ad   : > { %v5360_v34 = vpop.permute.xlu0 %5359 }
 0x7ae   : > { %v5365_v61 = vand.u32 %v5360_v34, %v21751_v25  ;;  %v17101_v34 = vld [vmem:[%s26638_s12 + $0x50] sm:$0xf0] }
 0x7b0   : > { %5374 = vmatpush.bf16.msra.mxu1 %v5365_v61  ;;  %v13753_v61 = vor.u32 %v17103_v59, %v13750_v45  ;;  %v13856_v59 = vld [vmem:[%s26638_s12 + $0x138] sm:$0xf]  ;;  %v17131_v45 = vld [vmem:[%s26638_s12 + $0x140] sm:$0xf0] }
 0x7b8   : > { %13693 = vmatmul.msk.bf16.vlgmr.msra.gmra.mxu1 %vm5182_vm14, %v5357_v43  ;;  %v13737_v43 = vor.u32 %v17101_v34, %v13736_v62  ;;  %v13952_v62 = vld [vmem:[%s26638_s12 + $0x1f8] sm:$0xf]  ;;  %v17155_v34 = vld [vmem:[%s26638_s12 + $0x200] sm:$0xf0] }
 0x7c6   : > { %v5468_v30 = vpop.xlane.xlu2 %5467 }
 0x7c7   : > { %18046 = vrcp.f32 %v5468_v30  ;;  %v13741_v30 = vor.u32 %v17100_v24, %v13738_v17  ;;  %v13858_v24 = vld [vmem:[%s26638_s12 + $0x144] sm:$0xf0]  ;;  %v13857_v17 = vor.u32 %v17131_v45, %v13856_v59  ;;  %v17119_v45 = vld [vmem:[%s26638_s12 + $0xe0] sm:$0xf0] }
 0x7cd   : > { %v18047_v52 = vpop.eup %18046 }
 0x7ce   : > { %v5470_v26 = vmul.f32 %v18047_v52, %v18037_v20  ;;  %v5474_v56 = vpop.permute.xlu2 %5473  ;;  %v5297_v22 = vpop.xlane.xlu1 %5296  ;;  %v17109_v20 = vld [vmem:[%s26638_s12 + $0x94] sm:$0xf]  ;;  %v13724_v52 = vld [vmem:[%s26638_s12 + $0x30] sm:$0xf] }
 0x7cf   : > { %v5479_v33 = vand.u32 %v5474_v56, %v21751_v25  ;;  %18048 = vrcp.f32 %v5297_v22  ;;  %v17097_v56 = vld [vmem:[%s26638_s12 + $0x34] sm:$0xf] }
 0x7d0   : > { %v5471_v15 = vpack.c.bf16 %v5470_v26, %v5470_v26  ;;  %v17098_v26 = vld [vmem:[%s26638_s12 + $0x38] sm:$0xf0] }
 0x7d1   : > { %5488 = vmatpush.bf16.msrb.mxu1 %v5479_v33  ;;  %v13726_v33 = vld [vmem:[%s26638_s12 + $0x3c] sm:$0xf0] }
 0x7d4   : > { %13697 = vmatmul.msk.bf16.vlgmr.msrb.gmra.mxu1 %vm5182_vm14, %v5471_v15  ;;  %v13725_v15 = vor.u32 %v17098_v26, %v13724_v52  ;;  %v17128_v52 = vld [vmem:[%s26638_s12 + $0x128] sm:$0xf0]  ;;  %v13888_v26 = vld [vmem:[%s26638_s12 + $0x170] sm:$0xf] }
 0x7d5   : > { %v18049_v48 = vpop.eup %18048  ;;  %6031 = vmatpush.bf16.msra.mxu1 %v13789_v7  ;;  %v17161_v7 = vld [vmem:[%s26638_s12 + $0x230] sm:$0xf0] }
 0x7d6   : > { %v5299_v12 = vmul.f32 %v18049_v48, %v18039_v1  ;;  %v13777_v1 = vor.u32 %v17109_v20, %v13774_v55  ;;  %v13977_v20 = vor.u32 %v17161_v7, %v13976_v57  ;;  %v17136_v55 = vld [vmem:[%s26638_s12 + $0x16c] sm:$0xf]  ;;  %v17149_v57 = vld [vmem:[%s26638_s12 + $0x1d0] sm:$0xf0]  ;;  %v13834_v7 = vld [vmem:[%s26638_s12 + $0x114] sm:$0xf0] }
 0x7d8   : > { %v5300_v41 = vpack.c.bf16 %v5299_v12, %v5299_v12  ;;  %v5411_v39 = vpop.xlane.xlu0 %5410  ;;  %v13729_v12 = vor.u32 %v17097_v56, %v13726_v33  ;;  %6018 = vmatpush.bf16.msra.mxu3 %v13977_v20  ;;  %v13940_v33 = vld [vmem:[%s26638_s12 + $0x1e0] sm:$0xf] }
 0x7d9   : > { %18050 = vrcp.f32 %v5411_v39  ;;  %6032 = vmatpush.bf16.msra.mxu1 %v13777_v1  ;;  %v17095_v39 = vld [vmem:[%s26638_s12 + $0x20] sm:$0xf0] }
 0x7da   : > { %13691 = vmatmul.msk.bf16.vlgmr.msrb.gmra.mxu0 %vm5182_vm14, %v5300_v41  ;;  %v13712_v41 = vld [vmem:[%s26638_s12 + $0x18] sm:$0xf] }
 0x7db   : > { %6005 = vmatpush.bf16.msrb.mxu0 %v13881_v13  ;;  %v17124_v13 = vld [vmem:[%s26638_s12 + $0x10c] sm:$0xf] }
 0x7dd   : > { %6033 = vmatpush.bf16.msra.mxu1 %v13765_v0 }
 0x7df   : > { %v18051_v38 = vpop.eup %18050 }
 0x7e0   : > { %v5413_v19 = vmul.f32 %v18051_v38, %v18041_v40  ;;  %v13761_v40 = vor.u32 %v17107_v58, %v13760_v4  ;;  %v17094_v38 = vld [vmem:[%s26638_s12 + $0x1c] sm:$0xf]  ;;  %v13882_v4 = vld [vmem:[%s26638_s12 + $0x174] sm:$0xf0]  ;;  %v13868_v58 = vld [vmem:[%s26638_s12 + $0x150] sm:$0xf] }
 0x7e1   : > { %6034 = vmatpush.bf16.msra.mxu1 %v13753_v61  ;;  %v13885_v1 = vor.u32 %v17136_v55, %v13882_v4  ;;  %v17130_v61 = vld [vmem:[%s26638_s12 + $0x13c] sm:$0xf]  ;;  %v13820_v55 = vld [vmem:[%s26638_s12 + $0xf0] sm:$0xf] }
 0x7e2   : > { %v5414_v47 = vpack.c.bf16 %v5413_v19, %v5413_v19  ;;  %5994 = vmatpush.bf16.msra.mxu2 %v13761_v40  ;;  %v13714_v19 = vld [vmem:[%s26638_s12 + $0x24] sm:$0xf0]  ;;  %v17158_v40 = vld [vmem:[%s26638_s12 + $0x218] sm:$0xf0]  ;;  %v13861_v56 = vor.u32 %v17130_v61, %v13858_v24  ;;  %v17143_v24 = vld [vmem:[%s26638_s12 + $0x1a0] sm:$0xf0] }
 0x7e3   : > { %v17122_v4 = vld [vmem:[%s26638_s12 + $0xf8] sm:$0xf0] }
 0x7e5   : > { %6035 = vmatpush.bf16.msra.mxu1 %v13741_v30  ;;  %v13844_v30 = vld [vmem:[%s26638_s12 + $0x120] sm:$0xf] }
 0x7e6   : > { %5995 = vmatpush.bf16.msra.mxu2 %v13749_v35  ;;  %v13873_v35 = vor.u32 %v17133_v27, %v13870_v32  ;;  %v13822_v27 = vld [vmem:[%s26638_s12 + $0xfc] sm:$0xf0]  ;;  %v13821_v32 = vor.u32 %v17122_v4, %v13820_v55  ;;  %v13780_v4 = vld [vmem:[%s26638_s12 + $0x98] sm:$0xf] }
 0x7e9   : > { %6036 = vmatpush.bf16.msra.mxu1 %v13729_v12  ;;  %v17127_v12 = vld [vmem:[%s26638_s12 + $0x124] sm:$0xf] }
 0x7ea   : > { %13695 = vmatmul.msk.bf16.vlgmr.msra.gmra.mxu0 %vm5182_vm14, %v5414_v47  ;;  %5996 = vmatpush.bf16.msra.mxu2 %v13737_v43  ;;  %v13713_v47 = vor.u32 %v17095_v39, %v13712_v41  ;;  %v13953_v43 = vor.u32 %v17155_v34, %v13952_v62  ;;  %v13846_v41 = vld [vmem:[%s26638_s12 + $0x12c] sm:$0xf0]  ;;  %v13904_v62 = vld [vmem:[%s26638_s12 + $0x198] sm:$0xf]  ;;  %vm10929_vm14 = vcmask 1040384  }
 0x7eb   : > { %v13849_v49 = vor.u32 %v17127_v12, %v13846_v41  ;;  %v17140_v12 = vld [vmem:[%s26638_s12 + $0x188] sm:$0xf0] }
 0x7ee   : > { %5997 = vmatpush.bf16.msra.mxu2 %v13725_v15  ;;  %v17138_v15 = vld [vmem:[%s26638_s12 + $0x178] sm:$0xf0] }
 0x7ef   : > { %v13889_v39 = vor.u32 %v17138_v15, %v13888_v26  ;;  %v13892_v15 = vld [vmem:[%s26638_s12 + $0x180] sm:$0xf] }
 0x7f2   : > { %5998 = vmatpush.bf16.msra.mxu2 %v13713_v47  ;;  %v17135_v47 = vld [vmem:[%s26638_s12 + $0x160] sm:$0xf0] }
 0x825   : > { %v5262_v63 = vpop.f32.mrf.mxu1 }
 0x826   : > { %5495 = vrot.lane.b32.xlu2 %v5262_v63, %s18190_s1  ;;  %v13717_v63 = vor.u32 %v17094_v38, %v13714_v19  ;;  %v13845_v38 = vor.u32 %v17128_v52, %v13844_v30  ;;  %v13876_v19 = vld [vmem:[%s26638_s12 + $0x158] sm:$0xf]  ;;  %v17118_v30 = vld [vmem:[%s26638_s12 + $0xdc] sm:$0xf]  ;;  %v13810_v52 = vld [vmem:[%s26638_s12 + $0xe4] sm:$0xf0] }
 0x828   : > { %6037 = vmatpush.bf16.msra.mxu1 %v13717_v63 }
 0x82c   : > { %6038 = vmatpush.bf16.msra.mxu1 %v13705_v3  ;;  %v13929_v3 = vor.u32 %v17149_v57, %v13928_v37  ;;  %v17162_v57 = vld [vmem:[%s26638_s12 + $0x238] sm:$0xf0] }
 0x82d   : > { %v5264_v25 = vpop.f32.mrf.mxu1 }
 0x82e   : > { %v13700_v25 = vld [vmem:[%s26638_s12] sm:$0xf] }
 0x830   : > { %6083 = vmatpush.bf16.msrb.mxu1 %v13889_v39  ;;  %v13813_v39 = vor.u32 %v17118_v30, %v13810_v52  ;;  %v17156_v30 = vld [vmem:[%s26638_s12 + $0x208] sm:$0xf0] }
 0x835   : > { %v5376_v11 = vpop.f32.mrf.mxu1 }
 0x83d   : > { %v5378_v42 = vpop.f32.mrf.mxu1 }
 0x851   : > { %v5490_v2 = vpop.f32.mrf.mxu1 }
 0x852   : > { %v17889_v16 = vpack.i.bf16 %v5376_v11, %v5490_v2  ;;  %v17092_v11 = vld [vmem:[%s26638_s12 + $0x8] sm:$0xf0]  ;;  %v13869_v2 = vor.u32 %v17134_v46, %v13868_v58  ;;  %v13916_v58 = vld [vmem:[%s26638_s12 + $0x1b0] sm:$0xf]  ;;  %v13837_v46 = vor.u32 %v17124_v13, %v13834_v7  ;;  %v13828_v13 = vld [vmem:[%s26638_s12 + $0xf8] sm:$0xf] }
 0x853   : > { %v13701_v42 = vor.u32 %v17092_v11, %v13700_v25  ;;  %v13832_v11 = vld [vmem:[%s26638_s12 + $0x108] sm:$0xf]  ;;  %v17123_v7 = vld [vmem:[%s26638_s12 + $0x100] sm:$0xf0] }
 0x854   : > { %17890 = vrot.lane.b32.xlu2 %v17889_v16, %s18190_s1  ;;  %v13965_v16 = vor.u32 %v17158_v40, %v13964_v54  ;;  %6006 = vmatpush.bf16.msrb.mxu0 %v13869_v2  ;;  %v17146_v54 = vld [vmem:[%s26638_s12 + $0x1b8] sm:$0xf0]  ;;  %v13852_v40 = vld [vmem:[%s26638_s12 + $0x128] sm:$0xf]  ;;  %v17129_v2 = vld [vmem:[%s26638_s12 + $0x130] sm:$0xf0] }
 0x855   : > { %5999 = vmatpush.bf16.msra.mxu2 %v13701_v42  ;;  %v17125_v42 = vld [vmem:[%s26638_s12 + $0x110] sm:$0xf0]  ;;  %v13917_v59 = vor.u32 %v17146_v54, %v13916_v58  ;;  %v13853_v34 = vor.u32 %v17129_v2, %v13852_v40  ;;  %v17111_v58 = vld [vmem:[%s26638_s12 + $0xa0] sm:$0xf0]  ;;  %v13829_v54 = vor.u32 %v17123_v7, %v13828_v13  ;;  %v13972_v40 = vld [vmem:[%s26638_s12 + $0x218] sm:$0xf] }
 0x856   : > { %6019 = vmatpush.bf16.msra.mxu3 %v13965_v16  ;;  %v13833_v20 = vor.u32 %v17125_v42, %v13832_v11  ;;  %v17121_v16 = vld [vmem:[%s26638_s12 + $0xf4] sm:$0xf]  ;;  %v17114_v11 = vld [vmem:[%s26638_s12 + $0xb8] sm:$0xf0] }
 0x857   : > { %v21878_v48 = vpop.f32.mrf.mxu0  ;;  %v13825_v61 = vor.u32 %v17121_v16, %v13822_v27  ;;  %v17159_v27 = vld [vmem:[%s26638_s12 + $0x220] sm:$0xf0]  ;;  %v17150_v13 = vld [vmem:[%s26638_s12 + $0x1d8] sm:$0xf0] }
 0x858   : > { %6007 = vmatpush.bf16.msrb.mxu0 %v13857_v17  ;;  %v13840_v17 = vld [vmem:[%s26638_s12 + $0x110] sm:$0xf] }
 0x859   : > { %v5492_v22 = vpop.f32.mrf.mxu1  ;;  %6044 = vmatpush.bf16.msrb.mxu2 %v13885_v1  ;;  %v13865_v1 = vor.u32 %v17132_v50, %v13864_v44 }
 0x85a   : > { %v17152_v22 = vld [vmem:[%s26638_s12 + $0x1e8] sm:$0xf0]  ;;  %6020 = vmatpush.bf16.msra.mxu3 %v13953_v43  ;;  %v17126_v43 = vld [vmem:[%s26638_s12 + $0x118] sm:$0xf0] }
 0x85b   : > { %v13941_v25 = vor.u32 %v17152_v22, %v13940_v33  ;;  %v13905_v33 = vor.u32 %v17143_v24, %v13904_v62  ;;  %v17116_v22 = vld [vmem:[%s26638_s12 + $0xc8] sm:$0xf0]  ;;  %v13841_v41 = vor.u32 %v17126_v43, %v13840_v17  ;;  %v13768_v62 = vld [vmem:[%s26638_s12 + $0x80] sm:$0xf] }
 0x85c   : > { %6008 = vmatpush.bf16.msrb.mxu0 %v13845_v38  ;;  %v17115_v38 = vld [vmem:[%s26638_s12 + $0xc4] sm:$0xf]  ;;  %v13960_v43 = vld [vmem:[%s26638_s12 + $0x200] sm:$0xf] }
 0x85d   : > { %6045 = vmatpush.bf16.msrb.mxu2 %v13873_v35  ;;  %v13808_v35 = vld [vmem:[%s26638_s12 + $0xd8] sm:$0xf] }
 0x85e   : > { %6021 = vmatpush.bf16.msra.mxu3 %v13941_v25  ;;  %v13809_v26 = vor.u32 %v17119_v45, %v13808_v35  ;;  %v13792_v25 = vld [vmem:[%s26638_s12 + $0xb0] sm:$0xf]  ;;  %v17154_v35 = vld [vmem:[%s26638_s12 + $0x1fc] sm:$0xf]  ;;  %v13954_v45 = vld [vmem:[%s26638_s12 + $0x204] sm:$0xf0] }
 0x85f   : > { %v5318_v8 = vpop.f32.mrf.mxu0  ;;  %v13793_v50 = vor.u32 %v17114_v11, %v13792_v25  ;;  %v13957_v17 = vor.u32 %v17154_v35, %v13954_v45  ;;  %v17148_v11 = vld [vmem:[%s26638_s12 + $0x1cc] sm:$0xf] }
 0x860   : > { %v13877_v8 = vor.u32 %v17135_v47, %v13876_v19  ;;  %6009 = vmatpush.bf16.msrb.mxu0 %v13833_v20  ;;  %v17160_v19 = vld [vmem:[%s26638_s12 + $0x22c] sm:$0xf]  ;;  %v13978_v47 = vld [vmem:[%s26638_s12 + $0x234] sm:$0xf0]  ;;  %v17157_v20 = vld [vmem:[%s26638_s12 + $0x214] sm:$0xf] }
 0x861   : > { %6046 = vmatpush.bf16.msrb.mxu2 %v13861_v56  ;;  %v13796_v56 = vld [vmem:[%s26638_s12 + $0xc0] sm:$0xf]  ;;  %v13981_v37 = vor.u32 %v17160_v19, %v13978_v47  ;;  %v13948_v47 = vld [vmem:[%s26638_s12 + $0x1e8] sm:$0xf] }
 0x862   : > { %6084 = vmatpush.bf16.msrb.mxu1 %v13877_v8  ;;  %6022 = vmatpush.bf16.msra.mxu3 %v13929_v3  ;;  %v13797_v42 = vor.u32 %v17116_v22, %v13796_v56  ;;  %v13984_v8 = vld [vmem:[%s26638_s12 + $0x230] sm:$0xf]  ;;  %v13966_v3 = vld [vmem:[%s26638_s12 + $0x21c] sm:$0xf0]  ;;  %v17151_v56 = vld [vmem:[%s26638_s12 + $0x1e4] sm:$0xf] }
 0x863   : > { %v13969_v16 = vor.u32 %v17157_v20, %v13966_v3  ;;  %v13756_v22 = vld [vmem:[%s26638_s12 + $0x68] sm:$0xf]  ;;  %v13918_v20 = vld [vmem:[%s26638_s12 + $0x1bc] sm:$0xf0]  ;;  %v13732_v3 = vld [vmem:[%s26638_s12 + $0x38] sm:$0xf] }
 0x864   : > { %6010 = vmatpush.bf16.msrb.mxu0 %v13821_v32  ;;  %v17120_v32 = vld [vmem:[%s26638_s12 + $0xe8] sm:$0xf0] }
 0x865   : > { %6047 = vmatpush.bf16.msrb.mxu2 %v13849_v49  ;;  %v13893_v49 = vor.u32 %v17140_v12, %v13892_v15  ;;  %v17105_v12 = vld [vmem:[%s26638_s12 + $0x70] sm:$0xf0] }
 0x866   : > { %6085 = vmatpush.bf16.msrb.mxu1 %v13865_v1  ;;  %6023 = vmatpush.bf16.msra.mxu3 %v13917_v59  ;;  %v13781_v59 = vor.u32 %v17111_v58, %v13780_v4  ;;  %v13924_v4 = vld [vmem:[%s26638_s12 + $0x1b8] sm:$0xf]  ;;  %v17147_v58 = vld [vmem:[%s26638_s12 + $0x1c0] sm:$0xf0] }
 0x867   : > { %v21934_v0 = vpop.f32.mrf.mxu0 }
 0x868   : > { %6011 = vmatpush.bf16.msrb.mxu0 %v13809_v26  ;;  %v13961_v26 = vor.u32 %v17156_v30, %v13960_v43  ;;  %v13900_v43 = vld [vmem:[%s26638_s12 + $0x188] sm:$0xf]  ;;  %v17141_v30 = vld [vmem:[%s26638_s12 + $0x190] sm:$0xf0] }
 0x869   : > { %6048 = vmatpush.bf16.msrb.mxu2 %v13837_v46  ;;  %v13985_v46 = vor.u32 %v17162_v57, %v13984_v8  ;;  %v13744_v8 = vld [vmem:[%s26638_s12 + $0x50] sm:$0xf] }
 0x86a   : > { %6086 = vmatpush.bf16.msrb.mxu1 %v13853_v34  ;;  %6024 = vmatpush.bf16.msra.mxu3 %v13905_v33  ;;  %v17108_v34 = vld [vmem:[%s26638_s12 + $0x88] sm:$0xf0]  ;;  %v13942_v33 = vld [vmem:[%s26638_s12 + $0x1ec] sm:$0xf0] }
 0x86b   : > { %v13769_v52 = vor.u32 %v17108_v34, %v13768_v62  ;;  %v13945_v15 = vor.u32 %v17151_v56, %v13942_v33  ;;  %v13936_v57 = vld [vmem:[%s26638_s12 + $0x1d0] sm:$0xf]  ;;  %v17139_v62 = vld [vmem:[%s26638_s12 + $0x184] sm:$0xf]  ;;  %v13901_v56 = vor.u32 %v17141_v30, %v13900_v43  ;;  %v14708_v43 = vld [vmem:[%s26642_s16 + $0x5a0] sm:$0xf] }
 0x86c   : > { %6012 = vmatpush.bf16.msrb.mxu0 %v13797_v42  ;;  %v13930_v42 = vld [vmem:[%s26638_s12 + $0x1d4] sm:$0xf0]  ;;  %v13894_v34 = vld [vmem:[%s26638_s12 + $0x18c] sm:$0xf0] }
 0x86d   : > { %6049 = vmatpush.bf16.msrb.mxu2 %v13825_v61  ;;  %v13973_v61 = vor.u32 %v17159_v27, %v13972_v40  ;;  %v13906_v40 = vld [vmem:[%s26638_s12 + $0x1a4] sm:$0xf0]  ;;  %v13720_v27 = vld [vmem:[%s26638_s12 + $0x20] sm:$0xf] }
 0x86e   : > { %6087 = vmatpush.bf16.msrb.mxu1 %v13841_v41  ;;  %6025 = vmatpush.bf16.msra.mxu3 %v13893_v49  ;;  %v13804_v41 = vld [vmem:[%s26638_s12 + $0xc8] sm:$0xf]  ;;  %v13933_v49 = vor.u32 %v17148_v11, %v13930_v42 }
 0x86f   : > { %v5432_v63 = vpop.f32.mrf.mxu0 }
 0x870   : > { %v13798_v63 = vld [vmem:[%s26638_s12 + $0xcc] sm:$0xf0]  ;;  %6057 = vmatpush.bf16.msra.mxu0 %v13981_v37  ;;  %v17102_v37 = vld [vmem:[%s26638_s12 + $0x58] sm:$0xf0] }
 0x871   : > { %6050 = vmatpush.bf16.msrb.mxu2 %v13813_v39  ;;  %v13801_v44 = vor.u32 %v17115_v38, %v13798_v63  ;;  %v17117_v39 = vld [vmem:[%s26638_s12 + $0xd0] sm:$0xf0]  ;;  %v13757_v38 = vor.u32 %v17105_v12, %v13756_v22  ;;  %v13745_v7 = vor.u32 %v17102_v37, %v13744_v8 }
 0x872   : > { %6070 = vmatpush.bf16.msrb.mxu3 %v13793_v50  ;;  %6088 = vmatpush.bf16.msrb.mxu1 %v13829_v54  ;;  %v13805_v19 = vor.u32 %v17117_v39, %v13804_v41  ;;  %v17153_v63 = vld [vmem:[%s26638_s12 + $0x1f0] sm:$0xf0]  ;;  %v17142_v54 = vld [vmem:[%s26638_s12 + $0x19c] sm:$0xf] }
 0x873   : > { %v13949_v25 = vor.u32 %v17153_v63, %v13948_v47  ;;  %v17145_v50 = vld [vmem:[%s26638_s12 + $0x1b4] sm:$0xf]  ;;  %v13909_v35 = vor.u32 %v17142_v54, %v13906_v40 }
 0x874   : > { %6058 = vmatpush.bf16.msra.mxu0 %v13969_v16  ;;  %v13925_v16 = vor.u32 %v17147_v58, %v13924_v4 }
 0x875   : > { %6051 = vmatpush.bf16.msrb.mxu2 %v13801_v44  ;;  %v13937_v44 = vor.u32 %v17150_v13, %v13936_v57 }
 0x876   : > { %6071 = vmatpush.bf16.msrb.mxu3 %v13781_v59  ;;  %v17144_v59 = vld [vmem:[%s26638_s12 + $0x1a8] sm:$0xf0] }
 0x878   : > { %6059 = vmatpush.bf16.msra.mxu0 %v13957_v17  ;;  %v17093_v17 = vld [vmem:[%s26638_s12 + $0x10] sm:$0xf0] }
 0x87a   : > { %6072 = vmatpush.bf16.msrb.mxu3 %v13769_v52  ;;  %v13897_v52 = vor.u32 %v17139_v62, %v13894_v34 }
 0x87c   : > { %6060 = vmatpush.bf16.msra.mxu0 %v13945_v15 }
 0x87e   : > { %6073 = vmatpush.bf16.msrb.mxu3 %v13757_v38 }
 0x880   : > { %v5496_v55 = vpop.permute.xlu2 %5495  ;;  %6061 = vmatpush.bf16.msra.mxu0 %v13933_v49 }
 0x881   : > { %v5506_v1 = vsel %vm5148_vm6, %v21794_v21, %v5496_v55  ;;  %v13816_v21 = vld [vmem:[%s26638_s12 + $0xe0] sm:$0xf]  ;;  %v17099_v55 = vld [vmem:[%s26638_s12 + $0x40] sm:$0xf0] }
 0x882   : > { %v22121_v2 = vpack.c.bf16 %v5506_v1, %v5506_v1  ;;  %v13817_v24 = vor.u32 %v17120_v32, %v13816_v21  ;;  %v13921_v1 = vor.u32 %v17145_v50, %v13918_v20  ;;  %6074 = vmatpush.bf16.msrb.mxu3 %v13745_v7  ;;  %v17096_v21 = vld [vmem:[%s26638_s12 + $0x28] sm:$0xf0]  ;;  %v13912_v32 = vld [vmem:[%s26638_s12 + $0x1a0] sm:$0xf] }
 0x883   : > { %v13721_v45 = vor.u32 %v17096_v21, %v13720_v27 }
 0x884   : > { %6000 = vmatmul.bf16.vlgmr.msra.gmra.mxu2 %v22121_v2  ;;  %6039 = vmatmul.bf16.vlgmr.msra.gmra.mxu1 %v22121_v2 }
 0x885   : > { %6096 = vmatpush.bf16.msra.mxu2 %v13985_v46  ;;  %6089 = vmatpush.bf16.msrb.mxu1 %v13817_v24  ;;  %v13733_v46 = vor.u32 %v17099_v55, %v13732_v3  ;;  %v13708_v24 = vld [vmem:[%s26638_s12 + $0x8] sm:$0xf] }
 0x886   : > { %6062 = vmatpush.bf16.msra.mxu0 %v13921_v1 }
 0x887   : > { %6075 = vmatpush.bf16.msrb.mxu3 %v13733_v46 }
 0x889   : > { %6097 = vmatpush.bf16.msra.mxu2 %v13973_v61  ;;  %6090 = vmatpush.bf16.msrb.mxu1 %v13805_v19  ;;  %v13913_v61 = vor.u32 %v17144_v59, %v13912_v32 }
 0x88a   : > { %6063 = vmatpush.bf16.msra.mxu0 %v13909_v35 }
 0x88b   : > { %6076 = vmatpush.bf16.msrb.mxu3 %v13721_v45 }
 0x88d   : > { %6098 = vmatpush.bf16.msra.mxu2 %v13961_v26  ;;  %v13709_v26 = vor.u32 %v17093_v17, %v13708_v24  ;;  %v17253_v17 = vld [vmem:[%s26642_s16 + $0x2cc] sm:$0xf0] }
 0x88e   : > { %6064 = vmatpush.bf16.msra.mxu0 %v13897_v52  ;;  %v17349_v52 = vld [vmem:[%s26642_s16 + $0x5cc] sm:$0xf0] }
 0x88f   : > { %6077 = vmatpush.bf16.msrb.mxu3 %v13709_v26  ;;  %v15092_v26 = vld [vmem:[%s26642_s16 + $0x8a0] sm:$0xf] }
 0x891   : > { %6099 = vmatpush.bf16.msra.mxu2 %v13949_v25 }
 0x895   : > { %6100 = vmatpush.bf16.msra.mxu2 %v13937_v44 }
 0x899   : > { %6101 = vmatpush.bf16.msra.mxu2 %v13925_v16 }
 0x89d   : > { %6102 = vmatpush.bf16.msra.mxu2 %v13913_v61 }
 0x8a1   : > { %6103 = vmatpush.bf16.msra.mxu2 %v13901_v56  ;;  %v17445_v56 = vld [vmem:[%s26642_s16 + $0x8cc] sm:$0xf0] }
 0x8ae   : > { %v17891_v33 = vpop.permute.xlu2 %17890 }
 0x8af   : > { %v17893_v22 = vunpack.i.h.bf16 %v17891_v33  ;;  %v17892_v15 = vunpack.i.l.bf16 %v17891_v33  ;;  %v14709_v33 = vor.u32 %v17349_v52, %v14708_v43  ;;  %v14900_v43 = vld [vmem:[%s26642_s16 + $0x720] sm:$0xf]  ;;  %v17199_v52 = vld [vmem:[%s26642_s16 + $0x124] sm:$0xf] }
 0x8b1   : > { %v5507_v12 = vsel %vm5148_vm6, %v21878_v48, %v17893_v22  ;;  %v5508_v41 = vsel %vm5148_vm6, %v21934_v0, %v17892_v15  ;;  %v15093_v22 = vor.u32 %v17445_v56, %v15092_v26  ;;  %v17247_v15 = vld [vmem:[%s26642_s16 + $0x2a4] sm:$0xf]  ;;  %v14134_v26 = vld [vmem:[%s26642_s16 + $0x150] sm:$0xf0] }
 0x8b2   : > { %v5510_v39 = vpack.c.bf16 %v5507_v12, %v5507_v12  ;;  %v5511_v38 = vpack.c.bf16 %v5508_v41, %v5508_v41  ;;  %v14326_v12 = vld [vmem:[%s26642_s16 + $0x2d0] sm:$0xf0]  ;;  %v14276_v41 = vld [vmem:[%s26642_s16 + $0x240] sm:$0xf] }
 0x8b3   : > { %7966 = vmatpush.bf16.msra.mxu1 %v15093_v22 }
 0x8b4   : > { %6013 = vmatmul.bf16.vlgmr.msrb.gmra.mxu0 %v5510_v39  ;;  %6026 = vmatmul.bf16.vlgmr.msra.gmra.mxu3 %v5511_v38 }
 0x8b5   : > { %6052 = vmatmul.bf16.vlgmr.msrb.gmra.mxu2 %v5510_v39  ;;  %6091 = vmatmul.bf16.vlgmr.msrb.gmra.mxu1 %v5510_v39  ;;  %v14329_v39 = vor.u32 %v17247_v15, %v14326_v12  ;;  %v14084_v15 = vld [vmem:[%s26642_s16 + $0xc0] sm:$0xf]  ;;  %v17193_v12 = vld [vmem:[%s26642_s16 + $0xec] sm:$0xf0] }
 0x8b6   : > { %7953 = vmatpush.bf16.msra.mxu3 %v14709_v33 }
 0x8b7   : > { %7979 = vmatpush.bf16.msrb.mxu2 %v14329_v39  ;;  %v14137_v39 = vor.u32 %v17199_v52, %v14134_v26 }
 0x8c4   : > { %6065 = vmatmul.bf16.vlgmr.msra.gmra.mxu0 %v5511_v38  ;;  %6078 = vmatmul.bf16.vlgmr.msrb.gmra.mxu3 %v22121_v2  ;;  %v6112_v2 = vld [vmem:[%s26639_s13] sm:$0x7] }
 0x8c5   : > { %6104 = vmatmul.bf16.vlgmr.msra.gmra.mxu2 %v5511_v38  ;;  %v6115_v55 = vperm.slane %v6112_v2, 1  ;;  %v6114_v58 = vperm.slane %v6112_v2, 0  ;;  %v6116_v32 = vperm.slane %v6112_v2, 2  ;;  %v17241_v38 = vld [vmem:[%s26642_s16 + $0x26c] sm:$0xf0] }
 0x8c6   : > { %v17223_v2 = vld [vmem:[%s26642_s16 + $0x1e4] sm:$0xf] }
 0x901   : > { %v6040_v19 = vpop.f32.mrf.mxu1 }
 0x907   : > { %v6001_v47 = vpop.f32.mrf.mxu2 }
 0x909   : > { %v6042_v63 = vpop.f32.mrf.mxu1 }
 0x90a   : > { %v14277_v63 = vor.u32 %v17241_v38, %v14276_v41  ;;  %v14468_v41 = vld [vmem:[%s26642_s16 + $0x3c0] sm:$0xf]  ;;  %v17289_v38 = vld [vmem:[%s26642_s16 + $0x3ec] sm:$0xf0] }
 0x90f   : > { %v6003_v25 = vpop.f32.mrf.mxu2 }
 0x931   : > { %v6014_v11 = vpop.f32.mrf.mxu0 }
 0x932   : > { %v6092_v42 = vpop.f32.mrf.mxu1  ;;  %v6015_v57 = vadd.f32 %v6014_v11, %v6001_v47  ;;  %v17337_v47 = vld [vmem:[%s26642_s16 + $0x56c] sm:$0xf0]  ;;  %v15044_v11 = vld [vmem:[%s26642_s16 + $0x840] sm:$0xf] }
 0x937   : > { %v6027_v48 = vpop.f32.mrf.mxu3 }
 0x938   : > { %v6053_v8 = vpop.f32.mrf.mxu2  ;;  %v6028_v50 = vadd.f32 %v6027_v48, %v6015_v57  ;;  %v17235_v48 = vld [vmem:[%s26642_s16 + $0x244] sm:$0xf] }
 0x939   : > { %v6016_v49 = vpop.f32.mrf.mxu0  ;;  %v6054_v13 = vadd.f32 %v6053_v8, %v6040_v19  ;;  %v14660_v19 = vld [vmem:[%s26642_s16 + $0x540] sm:$0xf] }
 0x93a   : > { %v6094_v0 = vpop.f32.mrf.mxu1  ;;  %v6109_v4 = vadd.f32 %v6028_v50, %v20327_v9  ;;  %v14661_v25 = vor.u32 %v17337_v47, %v14660_v19  ;;  %v14278_v49 = vld [vmem:[%s26642_s16 + $0x270] sm:$0xf0]  ;;  %v14852_v19 = vld [vmem:[%s26642_s16 + $0x6c0] sm:$0xf]  ;;  %v17385_v47 = vld [vmem:[%s26642_s16 + $0x6ec] sm:$0xf0] }
 0x93b   : > { %v14228_v0 = vld [vmem:[%s26642_s16 + $0x1e0] sm:$0xf]  ;;  %v14281_v57 = vor.u32 %v17235_v48, %v14278_v49  ;;  %v14469_v48 = vor.u32 %v17289_v38, %v14468_v41  ;;  %v17439_v41 = vld [vmem:[%s26642_s16 + $0x8a4] sm:$0xf] }
 0x93c   : > { %v22260_v27 = vadd.f32 %v6114_v58, %v6109_v4  ;;  %7954 = vmatpush.bf16.msra.mxu3 %v14661_v25  ;;  %v14180_v58 = vld [vmem:[%s26642_s16 + $0x180] sm:$0xf]  ;;  %v14086_v25 = vld [vmem:[%s26642_s16 + $0xf0] sm:$0xf0] }
 0x93d   : > { %7980 = vmatpush.bf16.msrb.mxu2 %v14281_v57  ;;  %v14036_v49 = vld [vmem:[%s26642_s16 + $0x60] sm:$0xf] }
 0x93e   : > { %v6125_v9 = vsel %vm3361_vm5, %v22260_v27, 0.0 }
 0x93f   : > { %v6029_v37 = vpop.f32.mrf.mxu3 }
 0x940   : > { %v6055_v7 = vpop.f32.mrf.mxu2  ;;  %v17229_v37 = vld [vmem:[%s26642_s16 + $0x20c] sm:$0xf0] }
 0x941   : > { %v6066_v44 = vpop.f32.mrf.mxu0  ;;  %v17325_v7 = vld [vmem:[%s26642_s16 + $0x50c] sm:$0xf0]  ;;  %v14229_v50 = vor.u32 %v17229_v37, %v14228_v0  ;;  %v14420_v37 = vld [vmem:[%s26642_s16 + $0x360] sm:$0xf] }
 0x942   : > { %v6067_v20 = vadd.f32 %v6066_v44, %v6054_v13  ;;  %v14612_v13 = vld [vmem:[%s26642_s16 + $0x4e0] sm:$0xf]  ;;  %v17181_v0 = vld [vmem:[%s26642_s16 + $0x8c] sm:$0xf0] }
 0x943   : > { %v14996_v44 = vld [vmem:[%s26642_s16 + $0x7e0] sm:$0xf] }
 0x944   : > { %v6110_v3 = vadd.f32 %v6067_v20, %v20332_v18  ;;  %v17421_v20 = vld [vmem:[%s26642_s16 + $0x80c] sm:$0xf0] }
 0x945   : > { %v14997_v4 = vor.u32 %v17421_v20, %v14996_v44  ;;  %v14804_v44 = vld [vmem:[%s26642_s16 + $0x660] sm:$0xf]  ;;  %v17175_v20 = vld [vmem:[%s26642_s16 + $0x64] sm:$0xf] }
 0x946   : > { %v22258_v46 = vadd.f32 %v6115_v55, %v6110_v3  ;;  %v14230_v3 = vld [vmem:[%s26642_s16 + $0x210] sm:$0xf0]  ;;  %v14613_v55 = vor.u32 %v17325_v7, %v14612_v13  ;;  %v17277_v7 = vld [vmem:[%s26642_s16 + $0x38c] sm:$0xf0] }
 0x947   : > { %v6079_v1 = vpop.f32.mrf.mxu3 }
 0x948   : > { %v6093_v54 = vadd.f32 %v6092_v42, %v6079_v1  ;;  %v6105_v40 = vpop.f32.mrf.mxu2  ;;  %v6126_v35 = vsel %vm3361_vm5, %v22258_v46, 0.0  ;;  %v17433_v42 = vld [vmem:[%s26642_s16 + $0x86c] sm:$0xf0]  ;;  %7955 = vmatpush.bf16.msra.mxu3 %v14613_v55 }
 0x949   : > { %v6068_v16 = vpop.f32.mrf.mxu0  ;;  %v6127_v62 = vadd.f32 %v6126_v35, %v6125_v9  ;;  %v15045_v8 = vor.u32 %v17433_v42, %v15044_v11  ;;  %v17217_v1 = vld [vmem:[%s26642_s16 + $0x1ac] sm:$0xf0]  ;;  %v14182_v35 = vld [vmem:[%s26642_s16 + $0x1b0] sm:$0xf0]  ;;  %v14085_v11 = vor.u32 %v17193_v12, %v14084_v15 }
 0x94a   : > { %v6106_v21 = vadd.f32 %v6105_v40, %v6093_v54  ;;  %v14564_v54 = vld [vmem:[%s26642_s16 + $0x480] sm:$0xf]  ;;  %v14233_v40 = vor.u32 %v17223_v2, %v14230_v3  ;;  %v17313_v16 = vld [vmem:[%s26642_s16 + $0x4ac] sm:$0xf0]  ;;  %v14181_v9 = vor.u32 %v17217_v1, %v14180_v58  ;;  %v14038_v2 = vld [vmem:[%s26642_s16 + $0x90] sm:$0xf0]  ;;  %v14037_v58 = vor.u32 %v17181_v0, %v14036_v49 }
 0x94b   : > { %7967 = vmatpush.bf16.msra.mxu1 %v15045_v8  ;;  %v14853_v8 = vor.u32 %v17385_v47, %v14852_v19  ;;  %v14421_v1 = vor.u32 %v17277_v7, %v14420_v37  ;;  %v14710_v12 = vld [vmem:[%s26642_s16 + $0x5d0] sm:$0xf0]  ;;  %v14332_v47 = vld [vmem:[%s26642_s16 + $0x2a8] sm:$0xf]  ;;  %v17427_v37 = vld [vmem:[%s26642_s16 + $0x844] sm:$0xf] }
 0x94c   : > { %v6111_v59 = vadd.f32 %v6106_v21, %v20339_v60  ;;  %v14324_v60 = vld [vmem:[%s26642_s16 + $0x2a0] sm:$0xf]  ;;  %7981 = vmatpush.bf16.msrb.mxu2 %v14233_v40 }
 0x94d   : > { %v14325_v30 = vor.u32 %v17253_v17, %v14324_v60  ;;  %v14948_v21 = vld [vmem:[%s26642_s16 + $0x780] sm:$0xf]  ;;  %v17301_v17 = vld [vmem:[%s26642_s16 + $0x44c] sm:$0xf0] }
 0x94e   : > { %v22265_v18 = vadd.f32 %v6116_v32, %v6111_v59  ;;  %v17409_v32 = vld [vmem:[%s26642_s16 + $0x7ac] sm:$0xf0]  ;;  %v17211_v59 = vld [vmem:[%s26642_s16 + $0x184] sm:$0xf] }
 0x94f   : > { %v6081_v45 = vpop.f32.mrf.mxu3  ;;  %7940 = vmatpush.bf16.msrb.mxu0 %v14325_v30  ;;  %7968 = vmatpush.bf16.msra.mxu1 %v14997_v4  ;;  %v14185_v60 = vor.u32 %v17211_v59, %v14182_v35  ;;  %v17397_v30 = vld [vmem:[%s26642_s16 + $0x74c] sm:$0xf0] }
 0x950   : > { %v6107_v34 = vpop.f32.mrf.mxu2  ;;  %v6128_v61 = vsel %vm3361_vm5, %v22265_v18, 0.0  ;;  %v14565_v45 = vor.u32 %v17313_v16, %v14564_v54  ;;  %v14901_v22 = vor.u32 %v17397_v30, %v14900_v43  ;;  %v14756_v43 = vld [vmem:[%s26642_s16 + $0x600] sm:$0xf]  ;;  %v17361_v30 = vld [vmem:[%s26642_s16 + $0x62c] sm:$0xf0] }
 0x951   : > { %v6129_v24 = vadd.f32 %v6128_v61, %v6127_v62  ;;  %v14949_v62 = vor.u32 %v17409_v32, %v14948_v21  ;;  %v14132_v34 = vld [vmem:[%s26642_s16 + $0x120] sm:$0xf]  ;;  %v17205_v61 = vld [vmem:[%s26642_s16 + $0x14c] sm:$0xf0]  ;;  %7982 = vmatpush.bf16.msrb.mxu2 %v14185_v60  ;;  %v14041_v32 = vor.u32 %v17175_v20, %v14038_v2  ;;  %v14757_v26 = vor.u32 %v17361_v30, %v14756_v43  ;;  %v17338_v20 = vld [vmem:[%s26642_s16 + $0x574] sm:$0xf0] }
 0x952   : > { %v14133_v56 = vor.u32 %v17205_v61, %v14132_v34  ;;  %7956 = vmatpush.bf16.msra.mxu3 %v14565_v45  ;;  %v13988_v34 = vld [vmem:[%s26642_s16] sm:$0xf]  ;;  %v17169_v61 = vld [vmem:[%s26642_s16 + $0x2c] sm:$0xf0]  ;;  %v14950_v43 = vld [vmem:[%s26642_s16 + $0x7b0] sm:$0xf0] }
 0x953   : > { %6130 = vadd.xlane.f32.xlu2 %v6129_v24  ;;  %7941 = vmatpush.bf16.msrb.mxu0 %v14277_v63  ;;  %v14516_v24 = vld [vmem:[%s26642_s16 + $0x420] sm:$0xf]  ;;  %v17187_v63 = vld [vmem:[%s26642_s16 + $0xc4] sm:$0xf]  ;;  %v13989_v60 = vor.u32 %v17169_v61, %v13988_v34  ;;  %v14188_v30 = vld [vmem:[%s26642_s16 + $0x188] sm:$0xf] }
 0x954   : > { %7969 = vmatpush.bf16.msra.mxu1 %v14949_v62  ;;  %v14517_v33 = vor.u32 %v17301_v17, %v14516_v24  ;;  %v14089_v13 = vor.u32 %v17187_v63, %v14086_v25  ;;  %v14372_v24 = vld [vmem:[%s26642_s16 + $0x300] sm:$0xf]  ;;  %v17265_v17 = vld [vmem:[%s26642_s16 + $0x32c] sm:$0xf0]  ;;  %v17254_v63 = vld [vmem:[%s26642_s16 + $0x2d4] sm:$0xf0] }
 0x955   : > { %7983 = vmatpush.bf16.msrb.mxu2 %v14137_v39  ;;  %v14373_v52 = vor.u32 %v17265_v17, %v14372_v24  ;;  %v15094_v39 = vld [vmem:[%s26642_s16 + $0x8d0] sm:$0xf0]  ;;  %v14716_v25 = vld [vmem:[%s26642_s16 + $0x5a8] sm:$0xf]  ;;  %v17307_v61 = vld [vmem:[%s26642_s16 + $0x484] sm:$0xf] }
 0x956   : > { %7957 = vmatpush.bf16.msra.mxu3 %v14517_v33  ;;  %v13990_v33 = vld [vmem:[%s26642_s16 + $0x30] sm:$0xf0]  ;;  %v15097_v19 = vor.u32 %v17439_v41, %v15094_v39  ;;  %v17391_v39 = vld [vmem:[%s26642_s16 + $0x724] sm:$0xf] }
 0x957   : > { %7942 = vmatpush.bf16.msrb.mxu0 %v14229_v50  ;;  %v17373_v50 = vld [vmem:[%s26642_s16 + $0x68c] sm:$0xf0]  ;;  %v14566_v24 = vld [vmem:[%s26642_s16 + $0x4b0] sm:$0xf0] }
 0x958   : > { %7970 = vmatpush.bf16.msra.mxu1 %v14901_v22  ;;  %v14805_v54 = vor.u32 %v17373_v50, %v14804_v44  ;;  %v17343_v22 = vld [vmem:[%s26642_s16 + $0x5a4] sm:$0xf]  ;;  %v17242_v44 = vld [vmem:[%s26642_s16 + $0x274] sm:$0xf0]  ;;  %v14668_v50 = vld [vmem:[%s26642_s16 + $0x548] sm:$0xf]  ;;  %v14569_v17 = vor.u32 %v17307_v61, %v14566_v24 }
 0x959   : > { %7984 = vmatpush.bf16.msrb.mxu2 %v14089_v13  ;;  %v14713_v38 = vor.u32 %v17343_v22, %v14710_v12  ;;  %v14284_v13 = vld [vmem:[%s26642_s16 + $0x248] sm:$0xf]  ;;  %v17314_v22 = vld [vmem:[%s26642_s16 + $0x4b4] sm:$0xf0]  ;;  %v17295_v12 = vld [vmem:[%s26642_s16 + $0x424] sm:$0xf] }
 0x95a   : > { %7958 = vmatpush.bf16.msra.mxu3 %v14469_v48  ;;  %v17331_v48 = vld [vmem:[%s26642_s16 + $0x544] sm:$0xf]  ;;  %v14285_v2 = vor.u32 %v17242_v44, %v14284_v13  ;;  %v14518_v41 = vld [vmem:[%s26642_s16 + $0x450] sm:$0xf0]  ;;  %v17194_v44 = vld [vmem:[%s26642_s16 + $0xf4] sm:$0xf0] }
 0x95b   : > { %7943 = vmatpush.bf16.msrb.mxu0 %v14181_v9  ;;  %v14854_v13 = vld [vmem:[%s26642_s16 + $0x6f0] sm:$0xf0]  ;;  %v17259_v61 = vld [vmem:[%s26642_s16 + $0x304] sm:$0xf] }
 0x95c   : > { %7971 = vmatpush.bf16.msra.mxu1 %v14853_v8  ;;  %v14662_v8 = vld [vmem:[%s26642_s16 + $0x570] sm:$0xf0] }
 0x95d   : > { %7985 = vmatpush.bf16.msrb.mxu2 %v14041_v32  ;;  %v14665_v0 = vor.u32 %v17331_v48, %v14662_v8  ;;  %v14236_v32 = vld [vmem:[%s26642_s16 + $0x1e8] sm:$0xf]  ;;  %v17302_v48 = vld [vmem:[%s26642_s16 + $0x454] sm:$0xf0] }
 0x95e   : > { %7959 = vmatpush.bf16.msra.mxu3 %v14421_v1  ;;  %v17319_v1 = vld [vmem:[%s26642_s16 + $0x4e4] sm:$0xf] }
 0x95f   : > { %7944 = vmatpush.bf16.msrb.mxu0 %v14133_v56  ;;  %v17163_v56 = vld [vmem:[%s26642_s16 + $0x4] sm:$0xf] }
 0x960   : > { %7972 = vmatpush.bf16.msra.mxu1 %v14805_v54  ;;  %v13993_v15 = vor.u32 %v17163_v56, %v13990_v33  ;;  %v14614_v54 = vld [vmem:[%s26642_s16 + $0x510] sm:$0xf0]  ;;  %v14572_v33 = vld [vmem:[%s26642_s16 + $0x488] sm:$0xf] }
 0x962   : > { %7960 = vmatpush.bf16.msra.mxu3 %v14373_v52  ;;  %7986 = vmatpush.bf16.msrb.mxu2 %v13993_v15  ;;  %v17218_v52 = vld [vmem:[%s26642_s16 + $0x1b4] sm:$0xf0]  ;;  %v14573_v15 = vor.u32 %v17314_v22, %v14572_v33  ;;  %v14380_v33 = vld [vmem:[%s26642_s16 + $0x308] sm:$0xf] }
 0x963   : > { %7945 = vmatpush.bf16.msrb.mxu0 %v14085_v11  ;;  %v14333_v11 = vor.u32 %v17254_v63, %v14332_v47  ;;  %v14189_v56 = vor.u32 %v17218_v52, %v14188_v30  ;;  %v14140_v47 = vld [vmem:[%s26642_s16 + $0x128] sm:$0xf]  ;;  %v17206_v63 = vld [vmem:[%s26642_s16 + $0x154] sm:$0xf0]  ;;  %v14758_v30 = vld [vmem:[%s26642_s16 + $0x630] sm:$0xf0] }
 0x964   : > { %7973 = vmatpush.bf16.msra.mxu1 %v14757_v26 }
 0x966   : > { %8005 = vmatpush.bf16.msrb.mxu3 %v15097_v19  ;;  %v14902_v19 = vld [vmem:[%s26642_s16 + $0x750] sm:$0xf0] }
 0x967   : > { %7946 = vmatpush.bf16.msrb.mxu0 %v14037_v58  ;;  %v14669_v58 = vor.u32 %v17338_v20, %v14668_v50 }
 0x968   : > { %8018 = vmatpush.bf16.msrb.mxu1 %v14333_v11  ;;  %v14141_v11 = vor.u32 %v17206_v63, %v14140_v47 }
 0x96b   : > { %7947 = vmatpush.bf16.msrb.mxu0 %v13989_v60  ;;  %v17403_v60 = vld [vmem:[%s26642_s16 + $0x784] sm:$0xf] }
 0x96c   : > { %8019 = vmatpush.bf16.msrb.mxu1 %v14285_v2  ;;  %v14953_v26 = vor.u32 %v17403_v60, %v14950_v43  ;;  %v14476_v2 = vld [vmem:[%s26642_s16 + $0x3c8] sm:$0xf]  ;;  %v17355_v43 = vld [vmem:[%s26642_s16 + $0x604] sm:$0xf] }
 0x96f   : > { %7992 = vmatpush.bf16.msra.mxu0 %v14713_v38  ;;  %v14521_v38 = vor.u32 %v17295_v12, %v14518_v41  ;;  %v17266_v12 = vld [vmem:[%s26642_s16 + $0x334] sm:$0xf0] }
 0x973   : > { %7993 = vmatpush.bf16.msra.mxu0 %v14665_v0  ;;  %v14470_v0 = vld [vmem:[%s26642_s16 + $0x3f0] sm:$0xf0] }
 0x9c6   : > { %v6131_v42 = vpop.xlane.xlu2 %6130 }
 0x9c7   : > { %v6132_v57 = vmul.f32 %v6131_v42, %v20490_v53  ;;  %v17350_v42 = vld [vmem:[%s26642_s16 + $0x5d4] sm:$0xf0] }
 0x9c8   : > { %v14717_v49 = vor.u32 %v17350_v42, %v14716_v25  ;;  %v14905_v25 = vor.u32 %v17391_v39, %v14902_v19  ;;  %v14524_v42 = vld [vmem:[%s26642_s16 + $0x428] sm:$0xf] }
 0x9c9   : > { %v22441_v3 = vsub.f32 %v22260_v27, %v6132_v57  ;;  %v22444_v55 = vsub.f32 %v22258_v46, %v6132_v57  ;;  %v22447_v4 = vsub.f32 %v22265_v18, %v6132_v57  ;;  %v15046_v57 = vld [vmem:[%s26642_s16 + $0x870] sm:$0xf0]  ;;  %v14525_v8 = vor.u32 %v17302_v48, %v14524_v42  ;;  %v6124_v48 = vld [vmem:[%s26641_s15] sm:$0x7] }
 0x9ca   : > { %v15049_v7 = vor.u32 %v17427_v37, %v15046_v57  ;;  %8031 = vmatpush.bf16.msra.mxu2 %v14717_v49  ;;  %v17283_v49 = vld [vmem:[%s26642_s16 + $0x3c4] sm:$0xf] }
 0x9cb   : > { %v6136_v40 = vmul.f32 %v22441_v3, %v22441_v3  ;;  %v6137_v16 = vmul.f32 %v22444_v55, %v22444_v55  ;;  %v6138_v21 = vmul.f32 %v22447_v4, %v22447_v4  ;;  %v17379_v37 = vld [vmem:[%s26642_s16 + $0x6c4] sm:$0xf]  ;;  %v14473_v57 = vor.u32 %v17283_v49, %v14470_v0 }
 0x9cc   : > { %8006 = vmatpush.bf16.msrb.mxu3 %v15049_v7  ;;  %v14092_v7 = vld [vmem:[%s26642_s16 + $0xc8] sm:$0xf]  ;;  %v14857_v50 = vor.u32 %v17379_v37, %v14854_v13  ;;  %v6173_v13 = vperm.slane %v6124_v48, 1 }
 0x9cd   : > { %v6139_v59 = vsel %vm3361_vm5, %v6136_v40, 0.0  ;;  %v6140_v35 = vsel %vm3361_vm5, %v6137_v16, 0.0  ;;  %v6142_v45 = vsel %vm3361_vm5, %v6138_v21, 0.0  ;;  %v17415_v40 = vld [vmem:[%s26642_s16 + $0x7e4] sm:$0xf]  ;;  %v14617_v16 = vor.u32 %v17319_v1, %v14614_v54 }
 0x9ce   : > { %v6141_v9 = vadd.f32 %v6140_v35, %v6139_v59  ;;  %v14998_v21 = vld [vmem:[%s26642_s16 + $0x810] sm:$0xf0]  ;;  %v17230_v59 = vld [vmem:[%s26642_s16 + $0x214] sm:$0xf0]  ;;  %8032 = vmatpush.bf16.msra.mxu2 %v14669_v58  ;;  %v14093_v20 = vor.u32 %v17194_v44, %v14092_v7  ;;  %v17271_v54 = vld [vmem:[%s26642_s16 + $0x364] sm:$0xf] }
 0x9cf   : > { %v15001_v35 = vor.u32 %v17415_v40, %v14998_v21  ;;  %7994 = vmatpush.bf16.msra.mxu0 %v14617_v16  ;;  %v17290_v58 = vld [vmem:[%s26642_s16 + $0x3f4] sm:$0xf0]  ;;  %v14422_v40 = vld [vmem:[%s26642_s16 + $0x390] sm:$0xf0]  ;;  %v17367_v16 = vld [vmem:[%s26642_s16 + $0x664] sm:$0xf] }
 0x9d0   : > { %v6143_v62 = vadd.f32 %v6142_v45, %v6141_v9  ;;  %v14237_v9 = vor.u32 %v17230_v59, %v14236_v32  ;;  %v14620_v45 = vld [vmem:[%s26642_s16 + $0x4e8] sm:$0xf]  ;;  %v14477_v1 = vor.u32 %v17290_v58, %v14476_v2  ;;  %v14425_v21 = vor.u32 %v17271_v54, %v14422_v40  ;;  %v14806_v32 = vld [vmem:[%s26642_s16 + $0x690] sm:$0xf0] }
 0x9d1   : > { %8007 = vmatpush.bf16.msrb.mxu3 %v15001_v35  ;;  %v14044_v59 = vld [vmem:[%s26642_s16 + $0x68] sm:$0xf]  ;;  %v17182_v35 = vld [vmem:[%s26642_s16 + $0x94] sm:$0xf0]  ;;  %v6174_v44 = vperm.slane %v6124_v48, 2 }
 0x9d2   : > { %6144 = vadd.xlane.f32.xlu1 %v6143_v62  ;;  %v17326_v62 = vld [vmem:[%s26642_s16 + $0x514] sm:$0xf0]  ;;  %8020 = vmatpush.bf16.msrb.mxu1 %v14237_v9  ;;  %v14809_v9 = vor.u32 %v17367_v16, %v14806_v32  ;;  %v15100_v40 = vld [vmem:[%s26642_s16 + $0x8a8] sm:$0xf] }
 0x9d3   : > { %v14621_v34 = vor.u32 %v17326_v62, %v14620_v45  ;;  %7995 = vmatpush.bf16.msra.mxu0 %v14569_v17  ;;  %v14045_v45 = vor.u32 %v17182_v35, %v14044_v59  ;;  %v14428_v62 = vld [vmem:[%s26642_s16 + $0x368] sm:$0xf]  ;;  %v14374_v17 = vld [vmem:[%s26642_s16 + $0x330] sm:$0xf0]  ;;  %v17446_v16 = vld [vmem:[%s26642_s16 + $0x8d4] sm:$0xf0] }
 0x9d4   : > { %v14377_v22 = vor.u32 %v17259_v61, %v14374_v17  ;;  %v14718_v35 = vld [vmem:[%s26642_s16 + $0x5d8] sm:$0xf0]  ;;  %v15052_v17 = vld [vmem:[%s26642_s16 + $0x848] sm:$0xf] }
 0x9d5   : > { %8033 = vmatpush.bf16.msra.mxu2 %v14621_v34  ;;  %8008 = vmatpush.bf16.msrb.mxu3 %v14953_v26  ;;  %v17278_v34 = vld [vmem:[%s26642_s16 + $0x394] sm:$0xf0]  ;;  %v13996_v26 = vld [vmem:[%s26642_s16 + $0x8] sm:$0xf] }
 0x9d6   : > { %8021 = vmatpush.bf16.msrb.mxu1 %v14189_v56  ;;  %v14429_v60 = vor.u32 %v17278_v34, %v14428_v62  ;;  %v17170_v56 = vld [vmem:[%s26642_s16 + $0x34] sm:$0xf0]  ;;  %v15101_v62 = vor.u32 %v17446_v16, %v15100_v40 }
 0x9d7   : > { %7996 = vmatpush.bf16.msra.mxu0 %v14521_v38  ;;  %v13997_v39 = vor.u32 %v17170_v56, %v13996_v26  ;;  %v14381_v38 = vor.u32 %v17266_v12, %v14380_v33  ;;  %v17236_v26 = vld [vmem:[%s26642_s16 + $0x24c] sm:$0xf]  ;;  %v14286_v56 = vld [vmem:[%s26642_s16 + $0x278] sm:$0xf0] }
 0x9d8   : > { %v17332_v33 = vld [vmem:[%s26642_s16 + $0x54c] sm:$0xf]  ;;  %v15054_v12 = vld [vmem:[%s26642_s16 + $0x878] sm:$0xf0] }
 0x9d9   : > { %8034 = vmatpush.bf16.msra.mxu2 %v14573_v15  ;;  %8009 = vmatpush.bf16.msrb.mxu3 %v14905_v25  ;;  %v14761_v15 = vor.u32 %v17355_v43, %v14758_v30  ;;  %v17434_v43 = vld [vmem:[%s26642_s16 + $0x874] sm:$0xf0] }
 0x9da   : > { %8022 = vmatpush.bf16.msrb.mxu1 %v14141_v11  ;;  %v6123_v11 = vld [vmem:[%s26640_s14] sm:$0x7] }
 0x9db   : > { %7997 = vmatpush.bf16.msra.mxu0 %v14473_v57  ;;  %v6162_v49 = vperm.slane %v6123_v11, 0  ;;  %v6163_v0 = vperm.slane %v6123_v11, 1  ;;  %v6164_v37 = vperm.slane %v6123_v11, 2  ;;  %v6172_v57 = vperm.slane %v6124_v48, 0  ;;  %v14238_v11 = vld [vmem:[%s26642_s16 + $0x218] sm:$0xf0] }
 0x9dc   : > { %v14622_v48 = vld [vmem:[%s26642_s16 + $0x518] sm:$0xf0] }
 0x9dd   : > { %8035 = vmatpush.bf16.msra.mxu2 %v14525_v8  ;;  %8010 = vmatpush.bf16.msrb.mxu3 %v14857_v50 }
 0x9de   : > { %8023 = vmatpush.bf16.msrb.mxu1 %v14093_v20 }
 0x9df   : > { %7998 = vmatpush.bf16.msra.mxu0 %v14425_v21  ;;  %v17248_v21 = vld [vmem:[%s26642_s16 + $0x2ac] sm:$0xf] }
 0x9e1   : > { %8036 = vmatpush.bf16.msra.mxu2 %v14477_v1  ;;  %8011 = vmatpush.bf16.msrb.mxu3 %v14809_v9  ;;  %v17440_v9 = vld [vmem:[%s26642_s16 + $0x8ac] sm:$0xf] }
 0x9e2   : > { %8024 = vmatpush.bf16.msrb.mxu1 %v14045_v45  ;;  %v15102_v45 = vld [vmem:[%s26642_s16 + $0x8d8] sm:$0xf0] }
 0x9e3   : > { %7999 = vmatpush.bf16.msra.mxu0 %v14377_v22  ;;  %v14670_v22 = vld [vmem:[%s26642_s16 + $0x578] sm:$0xf0] }
 0x9e5   : > { %8037 = vmatpush.bf16.msra.mxu2 %v14429_v60  ;;  %8012 = vmatpush.bf16.msrb.mxu3 %v14761_v15  ;;  %v17428_v15 = vld [vmem:[%s26642_s16 + $0x84c] sm:$0xf] }
 0x9e6   : > { %8025 = vmatpush.bf16.msrb.mxu1 %v13997_v39  ;;  %v14289_v39 = vor.u32 %v17236_v26, %v14286_v56  ;;  %v17188_v56 = vld [vmem:[%s26642_s16 + $0xcc] sm:$0xf] }
 0x9e9   : > { %8038 = vmatpush.bf16.msra.mxu2 %v14381_v38  ;;  %v15004_v38 = vld [vmem:[%s26642_s16 + $0x7e8] sm:$0xf] }
 0xa45   : > { %v6145_v24 = vpop.xlane.xlu1 %6144 }
 0xa46   : > { %v6146_v52 = vmul.f32 %v6145_v24, %v20490_v53 }
 0xa48   : > { %v6147_v41 = vadd.f32 1e-06, %v6146_v52  ;;  %v15105_v52 = vor.u32 %v17440_v9, %v15102_v45  ;;  %v14526_v9 = vld [vmem:[%s26642_s16 + $0x458] sm:$0xf0]  ;;  %v17392_v45 = vld [vmem:[%s26642_s16 + $0x72c] sm:$0xf] }
 0xa4a   : > { %18052 = vrsqrt.f32 %v6147_v41  ;;  %vm6154_vm0 = vweird.f32 %v6147_v41 }
 0xa50   : > { %v18053_v19 = vpop.eup %18052 }
 0xa51   : > { %v6149_v47 = vmul.f32 %v18053_v19, %v6147_v41  ;;  %vm6155_vm2 = vweird.f32 %v18053_v19  ;;  %v15053_v41 = vor.u32 %v17434_v43, %v15052_v17  ;;  %v14860_v43 = vld [vmem:[%s26642_s16 + $0x6c8] sm:$0xf] }
 0xa52   : > { %vm6156_vm9 = vmor %vm6154_vm0, %vm6155_vm2 }
 0xa53   : > { %v6150_v63 = vmul.f32 %v18053_v19, %v6149_v47  ;;  %v14673_v47 = vor.u32 %v17332_v33, %v14670_v22  ;;  %v14094_v33 = vld [vmem:[%s26642_s16 + $0xf8] sm:$0xf0]  ;;  %v17284_v22 = vld [vmem:[%s26642_s16 + $0x3cc] sm:$0xf] }
 0xa55   : > { %v6151_v25 = vmul.f32 0.5, %v6150_v63  ;;  %v15057_v63 = vor.u32 %v17428_v15, %v15054_v12  ;;  %v14478_v15 = vld [vmem:[%s26642_s16 + $0x3f8] sm:$0xf0]  ;;  %v17380_v12 = vld [vmem:[%s26642_s16 + $0x6cc] sm:$0xf] }
 0xa57   : > { %v6152_v42 = vsub.f32 1.5, %v6151_v25  ;;  %v17224_v25 = vld [vmem:[%s26642_s16 + $0x1ec] sm:$0xf] }
 0xa59   : > { %v6153_v8 = vmul.f32 %v18053_v19, %v6152_v42  ;;  %v17320_v42 = vld [vmem:[%s26642_s16 + $0x4ec] sm:$0xf] }
 0xa5b   : > { %v6157_v7 = vsel %vm6156_vm9, %v18053_v19, %v6153_v8  ;;  %v17422_v19 = vld [vmem:[%s26642_s16 + $0x814] sm:$0xf0]  ;;  %v17416_v8 = vld [vmem:[%s26642_s16 + $0x7ec] sm:$0xf] }
 0xa5c   : > { %v6158_v50 = vmul.f32 %v6157_v7, %v22441_v3  ;;  %v6159_v20 = vmul.f32 %v6157_v7, %v22444_v55  ;;  %v6160_v2 = vmul.f32 %v6157_v7, %v22447_v4  ;;  %v14334_v3 = vld [vmem:[%s26642_s16 + $0x2d8] sm:$0xf0]  ;;  %v17344_v55 = vld [vmem:[%s26642_s16 + $0x5ac] sm:$0xf]  ;;  %v14625_v7 = vor.u32 %v17320_v42, %v14622_v48 }
 0xa5d   : > { %v14337_v60 = vor.u32 %v17248_v21, %v14334_v3  ;;  %v14721_v30 = vor.u32 %v17344_v55, %v14718_v35  ;;  %v14908_v21 = vld [vmem:[%s26642_s16 + $0x728] sm:$0xf]  ;;  %v17398_v3 = vld [vmem:[%s26642_s16 + $0x754] sm:$0xf0]  ;;  %v17296_v35 = vld [vmem:[%s26642_s16 + $0x42c] sm:$0xf] }
 0xa5e   : > { %v6168_v58 = vmul.f32 %v6162_v49, %v6158_v50  ;;  %v6169_v1 = vmul.f32 %v6163_v0, %v6159_v20  ;;  %v6170_v54 = vmul.f32 %v6164_v37, %v6160_v2  ;;  %v15006_v49 = vld [vmem:[%s26642_s16 + $0x818] sm:$0xf0]  ;;  %v15005_v0 = vor.u32 %v17422_v19, %v15004_v38  ;;  %v17212_v50 = vld [vmem:[%s26642_s16 + $0x18c] sm:$0xf]  ;;  %v14812_v19 = vld [vmem:[%s26642_s16 + $0x668] sm:$0xf] }
 0xa5f   : > { %v14241_v37 = vor.u32 %v17224_v25, %v14238_v11  ;;  %v14190_v20 = vld [vmem:[%s26642_s16 + $0x1b8] sm:$0xf0]  ;;  %v17308_v2 = vld [vmem:[%s26642_s16 + $0x48c] sm:$0xf]  ;;  %v14097_v38 = vor.u32 %v17188_v56, %v14094_v33  ;;  %v14676_v33 = vld [vmem:[%s26642_s16 + $0x550] sm:$0xf] }
 0xa60   : > { %v6178_v4 = vadd.f32 %v6172_v57, %v6168_v58  ;;  %v6179_v32 = vadd.f32 %v6173_v13, %v6169_v1  ;;  %v6180_v59 = vadd.f32 %v6174_v44, %v6170_v54  ;;  %v14956_v57 = vld [vmem:[%s26642_s16 + $0x788] sm:$0xf]  ;;  %v17410_v13 = vld [vmem:[%s26642_s16 + $0x7b4] sm:$0xf0]  ;;  %v15009_v44 = vor.u32 %v17416_v8, %v15006_v49  ;;  %v14574_v58 = vld [vmem:[%s26642_s16 + $0x4b8] sm:$0xf0] }
 0xa61   : > { %v17404_v1 = vld [vmem:[%s26642_s16 + $0x78c] sm:$0xf]  ;;  %v14958_v54 = vld [vmem:[%s26642_s16 + $0x7b8] sm:$0xf0]  ;;  %v14957_v40 = vor.u32 %v17410_v13, %v14956_v57  ;;  %v14193_v16 = vor.u32 %v17212_v50, %v14190_v20  ;;  %v14577_v55 = vor.u32 %v17308_v2, %v14574_v58 }
 0xa62   : > { %v22708_v34 = vpack.c.bf16 %v6178_v4, %v6178_v4  ;;  %v22710_v61 = vpack.c.bf16 %v6179_v32, %v6179_v32  ;;  %v22712_v24 = vpack.c.bf16 %v6180_v59, %v6180_v59  ;;  %v14961_v4 = vor.u32 %v17404_v1, %v14958_v54  ;;  %v17200_v32 = vld [vmem:[%s26642_s16 + $0x12c] sm:$0xf]  ;;  %v14142_v59 = vld [vmem:[%s26642_s16 + $0x158] sm:$0xf0] }
 0xa63   : > { %v14145_v17 = vor.u32 %v17200_v32, %v14142_v59  ;;  %v17176_v11 = vld [vmem:[%s26642_s16 + $0x6c] sm:$0xf]  ;;  %v14046_v42 = vld [vmem:[%s26642_s16 + $0x98] sm:$0xf0] }
 0xa64   : > { %7948 = vmatmul.bf16.vlgmr.msrb.gmra.mxu0 %v22708_v34  ;;  %7961 = vmatmul.bf16.vlgmr.msra.gmra.mxu3 %v22710_v61  ;;  %v17272_v48 = vld [vmem:[%s26642_s16 + $0x36c] sm:$0xf]  ;;  %v14430_v8 = vld [vmem:[%s26642_s16 + $0x398] sm:$0xf0]  ;;  %v14049_v13 = vor.u32 %v17176_v11, %v14046_v42  ;;  %v14628_v42 = vld [vmem:[%s26642_s16 + $0x4f0] sm:$0xf] }
 0xa65   : > { %7974 = vmatmul.bf16.vlgmr.msra.gmra.mxu1 %v22712_v24  ;;  %7987 = vmatmul.bf16.vlgmr.msrb.gmra.mxu2 %v22708_v34  ;;  %v17368_v49 = vld [vmem:[%s26642_s16 + $0x66c] sm:$0xf]  ;;  %v13998_v50 = vld [vmem:[%s26642_s16 + $0x38] sm:$0xf0]  ;;  %v14433_v20 = vor.u32 %v17272_v48, %v14430_v8  ;;  %v17327_v48 = vld [vmem:[%s26642_s16 + $0x51c] sm:$0xf0] }
 0xa66   : > { %8044 = vmatpush.bf16.msrb.mxu0 %v15101_v62  ;;  %8057 = vmatpush.bf16.msra.mxu3 %v14337_v60  ;;  %v14910_v62 = vld [vmem:[%s26642_s16 + $0x758] sm:$0xf0]  ;;  %v14909_v60 = vor.u32 %v17398_v3, %v14908_v21  ;;  %v17260_v58 = vld [vmem:[%s26642_s16 + $0x30c] sm:$0xf]  ;;  %v17255_v21 = vld [vmem:[%s26642_s16 + $0x2dc] sm:$0xf0] }
 0xa67   : > { %8070 = vmatpush.bf16.msra.mxu1 %v14721_v30  ;;  %8083 = vmatpush.bf16.msrb.mxu2 %v15105_v52  ;;  %v17386_v30 = vld [vmem:[%s26642_s16 + $0x6f4] sm:$0xf0]  ;;  %v14529_v52 = vor.u32 %v17296_v35, %v14526_v9  ;;  %v14913_v26 = vor.u32 %v17392_v45, %v14910_v62  ;;  %v14382_v1 = vld [vmem:[%s26642_s16 + $0x338] sm:$0xf0]  ;;  %v17356_v54 = vld [vmem:[%s26642_s16 + $0x60c] sm:$0xf] }
 0xa68   : > { %v14724_v3 = vld [vmem:[%s26642_s16 + $0x5b0] sm:$0xf]  ;;  %v17447_v35 = vld [vmem:[%s26642_s16 + $0x8dc] sm:$0xf0]  ;;  %v17249_v9 = vld [vmem:[%s26642_s16 + $0x2b4] sm:$0xf]  ;;  %v14385_v62 = vor.u32 %v17260_v58, %v14382_v1 }
 0xa69   : > { %v14342_v45 = vld [vmem:[%s26642_s16 + $0x2e0] sm:$0xf0]  ;;  %v15012_v8 = vld [vmem:[%s26642_s16 + $0x7f0] sm:$0xf]  ;;  %v17315_v58 = vld [vmem:[%s26642_s16 + $0x4bc] sm:$0xf0] }
 0xa6a   : > { %8045 = vmatpush.bf16.msrb.mxu0 %v15053_v41  ;;  %8058 = vmatpush.bf16.msra.mxu3 %v14289_v39  ;;  %v14862_v41 = vld [vmem:[%s26642_s16 + $0x6f8] sm:$0xf0]  ;;  %v14861_v39 = vor.u32 %v17386_v30, %v14860_v43  ;;  %v14292_v30 = vld [vmem:[%s26642_s16 + $0x250] sm:$0xf]  ;;  %v14345_v56 = vor.u32 %v17249_v9, %v14342_v45  ;;  %v17303_v9 = vld [vmem:[%s26642_s16 + $0x45c] sm:$0xf0] }
 0xa6b   : > { %8071 = vmatpush.bf16.msra.mxu1 %v14673_v47  ;;  %8084 = vmatpush.bf16.msrb.mxu2 %v15057_v63  ;;  %v17374_v47 = vld [vmem:[%s26642_s16 + $0x694] sm:$0xf0]  ;;  %v14481_v63 = vor.u32 %v17284_v22, %v14478_v15  ;;  %v14865_v25 = vor.u32 %v17380_v12, %v14862_v41  ;;  %v17339_v22 = vld [vmem:[%s26642_s16 + $0x57c] sm:$0xf0]  ;;  %v15060_v15 = vld [vmem:[%s26642_s16 + $0x850] sm:$0xf] }
 0xa6c   : > { %v14813_v57 = vor.u32 %v17374_v47, %v14812_v19  ;;  %v17435_v12 = vld [vmem:[%s26642_s16 + $0x87c] sm:$0xf0]  ;;  %v17237_v41 = vld [vmem:[%s26642_s16 + $0x254] sm:$0xf]  ;;  %v14677_v19 = vor.u32 %v17339_v22, %v14676_v33  ;;  %v14244_v47 = vld [vmem:[%s26642_s16 + $0x1f0] sm:$0xf] }
 0xa6d   : > { %v14964_v1 = vld [vmem:[%s26642_s16 + $0x790] sm:$0xf] }
 0xa6e   : > { %8046 = vmatpush.bf16.msrb.mxu0 %v15005_v0  ;;  %8059 = vmatpush.bf16.msra.mxu3 %v14241_v37  ;;  %v14814_v0 = vld [vmem:[%s26642_s16 + $0x698] sm:$0xf0]  ;;  %v14764_v37 = vld [vmem:[%s26642_s16 + $0x608] sm:$0xf]  ;;  %v14916_v45 = vld [vmem:[%s26642_s16 + $0x730] sm:$0xf] }
 0xa6f   : > { %8072 = vmatpush.bf16.msra.mxu1 %v14625_v7  ;;  %8085 = vmatpush.bf16.msrb.mxu2 %v15009_v44  ;;  %v17362_v7 = vld [vmem:[%s26642_s16 + $0x634] sm:$0xf0]  ;;  %v17164_v44 = vld [vmem:[%s26642_s16 + $0xc] sm:$0xf]  ;;  %v14817_v2 = vor.u32 %v17368_v49, %v14814_v0  ;;  %v17423_v49 = vld [vmem:[%s26642_s16 + $0x81c] sm:$0xf0] }
 0xa70   : > { %v14765_v32 = vor.u32 %v17362_v7, %v14764_v37  ;;  %v14001_v59 = vor.u32 %v17164_v44, %v13998_v50  ;;  %v17225_v0 = vld [vmem:[%s26642_s16 + $0x1f4] sm:$0xf]  ;;  %v14246_v37 = vld [vmem:[%s26642_s16 + $0x220] sm:$0xf0]  ;;  %v14196_v7 = vld [vmem:[%s26642_s16 + $0x190] sm:$0xf]  ;;  %v15013_v50 = vor.u32 %v17423_v49, %v15012_v8 }
 0xa71   : > { %v17219_v44 = vld [vmem:[%s26642_s16 + $0x1bc] sm:$0xf0]  ;;  %v14484_v22 = vld [vmem:[%s26642_s16 + $0x3d0] sm:$0xf] }
 0xa72   : > { %8047 = vmatpush.bf16.msrb.mxu0 %v14957_v40  ;;  %8060 = vmatpush.bf16.msra.mxu3 %v14193_v16  ;;  %v14766_v40 = vld [vmem:[%s26642_s16 + $0x638] sm:$0xf0]  ;;  %v14340_v16 = vld [vmem:[%s26642_s16 + $0x2b0] sm:$0xf]  ;;  %v17279_v8 = vld [vmem:[%s26642_s16 + $0x39c] sm:$0xf0] }
 0xa73   : > { %8073 = vmatpush.bf16.msra.mxu1 %v14577_v55  ;;  %8086 = vmatpush.bf16.msrb.mxu2 %v14961_v4  ;;  %v17351_v55 = vld [vmem:[%s26642_s16 + $0x5dc] sm:$0xf0]  ;;  %v15108_v4 = vld [vmem:[%s26642_s16 + $0x8b0] sm:$0xf] }
 0xa74   : > { %8000 = vmatmul.bf16.vlgmr.msra.gmra.mxu0 %v22710_v61  ;;  %8013 = vmatmul.bf16.vlgmr.msrb.gmra.mxu3 %v22712_v24  ;;  %v14725_v43 = vor.u32 %v17351_v55, %v14724_v3  ;;  %v14148_v55 = vld [vmem:[%s26642_s16 + $0x130] sm:$0xf] }
 0xa75   : > { %8026 = vmatmul.bf16.vlgmr.msrb.gmra.mxu1 %v22708_v34  ;;  %8039 = vmatmul.bf16.vlgmr.msra.gmra.mxu2 %v22710_v61  ;;  %v14820_v49 = vld [vmem:[%s26642_s16 + $0x670] sm:$0xf] }
 0xa76   : > { %8048 = vmatpush.bf16.msrb.mxu0 %v14909_v60  ;;  %8061 = vmatpush.bf16.msra.mxu3 %v14145_v17  ;;  %v14769_v60 = vor.u32 %v17356_v54, %v14766_v40  ;;  %v14341_v17 = vor.u32 %v17255_v21, %v14340_v16  ;;  %v17411_v54 = vld [vmem:[%s26642_s16 + $0x7bc] sm:$0xf0]  ;;  %v17213_v40 = vld [vmem:[%s26642_s16 + $0x194] sm:$0xf]  ;;  %v14198_v16 = vld [vmem:[%s26642_s16 + $0x1c0] sm:$0xf0]  ;;  %v14197_v21 = vor.u32 %v17219_v44, %v14196_v7 }
 0xa77   : > { %8074 = vmatpush.bf16.msra.mxu1 %v14529_v52  ;;  %8087 = vmatpush.bf16.msrb.mxu2 %v14913_v26  ;;  %v17243_v52 = vld [vmem:[%s26642_s16 + $0x27c] sm:$0xf0]  ;;  %v15109_v26 = vor.u32 %v17447_v35, %v15108_v4  ;;  %v14532_v35 = vld [vmem:[%s26642_s16 + $0x430] sm:$0xf] }
 0xa78   : > { %v17207_v4 = vld [vmem:[%s26642_s16 + $0x15c] sm:$0xf0] }
 0xa7a   : > { %8049 = vmatpush.bf16.msrb.mxu0 %v14861_v39  ;;  %8062 = vmatpush.bf16.msra.mxu3 %v14097_v38  ;;  %v14294_v39 = vld [vmem:[%s26642_s16 + $0x280] sm:$0xf0]  ;;  %v14293_v38 = vor.u32 %v17243_v52, %v14292_v30  ;;  %v14533_v30 = vor.u32 %v17303_v9, %v14532_v35  ;;  %v14100_v52 = vld [vmem:[%s26642_s16 + $0xd0] sm:$0xf] }
 0xa7b   : > { %8075 = vmatpush.bf16.msra.mxu1 %v14481_v63  ;;  %8088 = vmatpush.bf16.msrb.mxu2 %v14865_v25  ;;  %v17231_v63 = vld [vmem:[%s26642_s16 + $0x21c] sm:$0xf0]  ;;  %v15061_v25 = vor.u32 %v17435_v12, %v15060_v15  ;;  %v14297_v11 = vor.u32 %v17237_v41, %v14294_v39  ;;  %v14868_v12 = vld [vmem:[%s26642_s16 + $0x6d0] sm:$0xf]  ;;  %v17189_v39 = vld [vmem:[%s26642_s16 + $0xd4] sm:$0xf] }
 0xa7c   : > { %v17291_v15 = vld [vmem:[%s26642_s16 + $0x3fc] sm:$0xf0] }
 0xa7d   : > { %v17387_v41 = vld [vmem:[%s26642_s16 + $0x6fc] sm:$0xf0] }
 0xa7e   : > { %8050 = vmatpush.bf16.msrb.mxu0 %v14813_v57  ;;  %8063 = vmatpush.bf16.msra.mxu3 %v14049_v13  ;;  %v14245_v57 = vor.u32 %v17231_v63, %v14244_v47  ;;  %v14629_v13 = vor.u32 %v17327_v48, %v14628_v42  ;;  %v14485_v47 = vor.u32 %v17291_v15, %v14484_v22  ;;  %v14052_v63 = vld [vmem:[%s26642_s16 + $0x70] sm:$0xf]  ;;  %v17429_v15 = vld [vmem:[%s26642_s16 + $0x854] sm:$0xf] }
 0xa7f   : > { %8076 = vmatpush.bf16.msra.mxu1 %v14433_v20  ;;  %8089 = vmatpush.bf16.msrb.mxu2 %v14817_v2  ;;  %v14249_v20 = vor.u32 %v17225_v0, %v14246_v37  ;;  %v14580_v2 = vld [vmem:[%s26642_s16 + $0x490] sm:$0xf]  ;;  %v17375_v0 = vld [vmem:[%s26642_s16 + $0x69c] sm:$0xf0]  ;;  %v17177_v37 = vld [vmem:[%s26642_s16 + $0x74] sm:$0xf] }
 0xa80   : > { %v14581_v3 = vor.u32 %v17315_v58, %v14580_v2  ;;  %v14436_v48 = vld [vmem:[%s26642_s16 + $0x370] sm:$0xf]  ;;  %v17267_v2 = vld [vmem:[%s26642_s16 + $0x33c] sm:$0xf0]  ;;  %v14821_v58 = vor.u32 %v17375_v0, %v14820_v49  ;;  %v15014_v49 = vld [vmem:[%s26642_s16 + $0x820] sm:$0xf0] }
 0xa81   : > { %v14437_v44 = vor.u32 %v17279_v8, %v14436_v48  ;;  %v17417_v8 = vld [vmem:[%s26642_s16 + $0x7f4] sm:$0xf]  ;;  %v14252_v0 = vld [vmem:[%s26642_s16 + $0x1f8] sm:$0xf] }
 0xa82   : > { %8051 = vmatpush.bf16.msrb.mxu0 %v14765_v32  ;;  %8064 = vmatpush.bf16.msra.mxu3 %v14001_v59  ;;  %v14965_v32 = vor.u32 %v17411_v54, %v14964_v1  ;;  %v14201_v59 = vor.u32 %v17213_v40, %v14198_v16  ;;  %v14772_v54 = vld [vmem:[%s26642_s16 + $0x610] sm:$0xf]  ;;  %v17363_v40 = vld [vmem:[%s26642_s16 + $0x63c] sm:$0xf0]  ;;  %v17165_v16 = vld [vmem:[%s26642_s16 + $0x14] sm:$0xf] }
 0xa83   : > { %8077 = vmatpush.bf16.msra.mxu1 %v14385_v62  ;;  %8090 = vmatpush.bf16.msrb.mxu2 %v14769_v60  ;;  %v17399_v62 = vld [vmem:[%s26642_s16 + $0x75c] sm:$0xf0]  ;;  %v17201_v60 = vld [vmem:[%s26642_s16 + $0x134] sm:$0xf] }
 0xa85   : > { %8052 = vmatmul.bf16.vlgmr.msrb.gmra.mxu0 %v22712_v24  ;;  %8065 = vmatmul.bf16.vlgmr.msra.gmra.mxu3 %v22708_v34 }
 0xa86   : > { %8096 = vmatpush.bf16.msra.mxu0 %v14341_v17  ;;  %8109 = vmatpush.bf16.msrb.mxu3 %v14725_v43  ;;  %v14150_v17 = vld [vmem:[%s26642_s16 + $0x160] sm:$0xf0]  ;;  %v14149_v43 = vor.u32 %v17207_v4, %v14148_v55  ;;  %v17441_v4 = vld [vmem:[%s26642_s16 + $0x8b4] sm:$0xf] }
 0xa87   : > { %8122 = vmatpush.bf16.msrb.mxu1 %v15109_v26  ;;  %8135 = vmatpush.bf16.msra.mxu2 %v14345_v56  ;;  %v17195_v26 = vld [vmem:[%s26642_s16 + $0xfc] sm:$0xf0]  ;;  %v14917_v56 = vor.u32 %v17399_v62, %v14916_v45  ;;  %v14153_v33 = vor.u32 %v17201_v60, %v14150_v17  ;;  %v14726_v55 = vld [vmem:[%s26642_s16 + $0x5e0] sm:$0xf0]  ;;  %v17256_v45 = vld [vmem:[%s26642_s16 + $0x2e4] sm:$0xf0]  ;;  %v14773_v17 = vor.u32 %v17363_v40, %v14772_v54 }
 0xa88   : > { %8078 = vmatmul.bf16.vlgmr.msra.gmra.mxu1 %v22710_v61  ;;  %8091 = vmatmul.bf16.vlgmr.msrb.gmra.mxu2 %v22712_v24  ;;  %v14732_v62 = vld [vmem:[%s26642_s16 + $0x5b8] sm:$0xf]  ;;  %v17352_v60 = vld [vmem:[%s26642_s16 + $0x5e4] sm:$0xf0]  ;;  %v14966_v54 = vld [vmem:[%s26642_s16 + $0x7c0] sm:$0xf0] }
 0xa89   : > { %v14733_v22 = vor.u32 %v17352_v60, %v14732_v62  ;;  %v14204_v40 = vld [vmem:[%s26642_s16 + $0x198] sm:$0xf]  ;;  %v14918_v62 = vld [vmem:[%s26642_s16 + $0x760] sm:$0xf0] }
 0xa8a   : > { %8097 = vmatpush.bf16.msra.mxu0 %v14293_v38  ;;  %8110 = vmatpush.bf16.msrb.mxu3 %v14677_v19  ;;  %v14102_v38 = vld [vmem:[%s26642_s16 + $0x100] sm:$0xf0]  ;;  %v14101_v19 = vor.u32 %v17195_v26, %v14100_v52  ;;  %v17333_v26 = vld [vmem:[%s26642_s16 + $0x554] sm:$0xf]  ;;  %v14156_v60 = vld [vmem:[%s26642_s16 + $0x138] sm:$0xf] }
 0xa8b   : > { %8123 = vmatpush.bf16.msrb.mxu1 %v15061_v25  ;;  %8136 = vmatpush.bf16.msra.mxu2 %v14297_v11  ;;  %v17183_v25 = vld [vmem:[%s26642_s16 + $0x9c] sm:$0xf0]  ;;  %v14869_v11 = vor.u32 %v17387_v41, %v14868_v12  ;;  %v14105_v42 = vor.u32 %v17189_v39, %v14102_v38  ;;  %v15062_v12 = vld [vmem:[%s26642_s16 + $0x880] sm:$0xf0]  ;;  %v14300_v41 = vld [vmem:[%s26642_s16 + $0x258] sm:$0xf] }
 0xa8c   : > { %v14053_v7 = vor.u32 %v17183_v25, %v14052_v63  ;;  %v17244_v39 = vld [vmem:[%s26642_s16 + $0x284] sm:$0xf0]  ;;  %v14684_v38 = vld [vmem:[%s26642_s16 + $0x558] sm:$0xf]  ;;  %v15065_v63 = vor.u32 %v17429_v15, %v15062_v12  ;;  %v17321_v25 = vld [vmem:[%s26642_s16 + $0x4f4] sm:$0xf] }
 0xa8d   : > { %v17381_v12 = vld [vmem:[%s26642_s16 + $0x6d4] sm:$0xf] }
 0xa8e   : > { %8098 = vmatpush.bf16.msra.mxu0 %v14245_v57  ;;  %8111 = vmatpush.bf16.msrb.mxu3 %v14629_v13  ;;  %v14054_v57 = vld [vmem:[%s26642_s16 + $0xa0] sm:$0xf0]  ;;  %v14004_v13 = vld [vmem:[%s26642_s16 + $0x10] sm:$0xf] }
 0xa8f   : > { %8124 = vmatpush.bf16.msrb.mxu1 %v15013_v50  ;;  %8137 = vmatpush.bf16.msra.mxu2 %v14249_v20  ;;  %v17171_v50 = vld [vmem:[%s26642_s16 + $0x3c] sm:$0xf0]  ;;  %v14388_v20 = vld [vmem:[%s26642_s16 + $0x310] sm:$0xf]  ;;  %v14057_v1 = vor.u32 %v17177_v37, %v14054_v57  ;;  %v17232_v37 = vld [vmem:[%s26642_s16 + $0x224] sm:$0xf0] }
 0xa90   : > { %v14005_v35 = vor.u32 %v17171_v50, %v14004_v13  ;;  %v14389_v9 = vor.u32 %v17267_v2, %v14388_v20  ;;  %v14636_v57 = vld [vmem:[%s26642_s16 + $0x4f8] sm:$0xf]  ;;  %v17328_v13 = vld [vmem:[%s26642_s16 + $0x524] sm:$0xf0]  ;;  %v17309_v50 = vld [vmem:[%s26642_s16 + $0x494] sm:$0xf]  ;;  %v14253_v2 = vor.u32 %v17232_v37, %v14252_v0 }
 0xa91   : > { %v14582_v20 = vld [vmem:[%s26642_s16 + $0x4c0] sm:$0xf0]  ;;  %v14060_v37 = vld [vmem:[%s26642_s16 + $0x78] sm:$0xf] }
 0xa92   : > { %8099 = vmatpush.bf16.msra.mxu0 %v14197_v21  ;;  %8112 = vmatpush.bf16.msrb.mxu3 %v14581_v3  ;;  %v14006_v21 = vld [vmem:[%s26642_s16 + $0x40] sm:$0xf0]  ;;  %v17345_v3 = vld [vmem:[%s26642_s16 + $0x5b4] sm:$0xf] }
 0xa93   : > { %8125 = vmatpush.bf16.msrb.mxu1 %v14965_v32  ;;  %8138 = vmatpush.bf16.msra.mxu2 %v14201_v59  ;;  %v15110_v32 = vld [vmem:[%s26642_s16 + $0x8e0] sm:$0xf0]  ;;  %v14348_v59 = vld [vmem:[%s26642_s16 + $0x2b8] sm:$0xf] }
 0xa94   : > { %v15113_v52 = vor.u32 %v17441_v4, %v15110_v32  ;;  %v17297_v32 = vld [vmem:[%s26642_s16 + $0x434] sm:$0xf]  ;;  %v14822_v0 = vld [vmem:[%s26642_s16 + $0x6a0] sm:$0xf0] }
 0xa96   : > { %8100 = vmatpush.bf16.msra.mxu0 %v14149_v43  ;;  %8113 = vmatpush.bf16.msrb.mxu3 %v14533_v30  ;;  %v14009_v43 = vor.u32 %v17165_v16, %v14006_v21  ;;  %v14729_v30 = vor.u32 %v17345_v3, %v14726_v55  ;;  %v17220_v16 = vld [vmem:[%s26642_s16 + $0x1c4] sm:$0xf0]  ;;  %v14588_v21 = vld [vmem:[%s26642_s16 + $0x498] sm:$0xf]  ;;  %v14585_v55 = vor.u32 %v17309_v50, %v14582_v20 }
 0xa97   : > { %8126 = vmatpush.bf16.msrb.mxu1 %v14917_v56  ;;  %8139 = vmatpush.bf16.msra.mxu2 %v14153_v33  ;;  %v14678_v56 = vld [vmem:[%s26642_s16 + $0x580] sm:$0xf0]  ;;  %v14349_v33 = vor.u32 %v17256_v45, %v14348_v59  ;;  %v17316_v3 = vld [vmem:[%s26642_s16 + $0x4c4] sm:$0xf0]  ;;  %v17393_v45 = vld [vmem:[%s26642_s16 + $0x734] sm:$0xf] }
 0xa98   : > { %v14534_v59 = vld [vmem:[%s26642_s16 + $0x460] sm:$0xf0] }
 0xa9a   : > { %8101 = vmatpush.bf16.msra.mxu0 %v14101_v19  ;;  %8114 = vmatpush.bf16.msrb.mxu3 %v14485_v47  ;;  %v17340_v19 = vld [vmem:[%s26642_s16 + $0x584] sm:$0xf0]  ;;  %v14681_v47 = vor.u32 %v17333_v26, %v14678_v56  ;;  %v14921_v26 = vor.u32 %v17393_v45, %v14918_v62  ;;  %v17285_v56 = vld [vmem:[%s26642_s16 + $0x3d4] sm:$0xf] }
 0xa9b   : > { %8127 = vmatpush.bf16.msrb.mxu1 %v14869_v11  ;;  %8140 = vmatpush.bf16.msra.mxu2 %v14105_v42  ;;  %v14630_v11 = vld [vmem:[%s26642_s16 + $0x520] sm:$0xf0]  ;;  %v14301_v42 = vor.u32 %v17244_v39, %v14300_v41  ;;  %v14685_v48 = vor.u32 %v17340_v19, %v14684_v38  ;;  %v14108_v39 = vld [vmem:[%s26642_s16 + $0xd8] sm:$0xf]  ;;  %v17196_v38 = vld [vmem:[%s26642_s16 + $0x104] sm:$0xf0] }
 0xa9c   : > { %v14870_v41 = vld [vmem:[%s26642_s16 + $0x700] sm:$0xf0]  ;;  %v14492_v19 = vld [vmem:[%s26642_s16 + $0x3d8] sm:$0xf] }
 0xa9e   : > { %8102 = vmatpush.bf16.msra.mxu0 %v14053_v7  ;;  %8115 = vmatpush.bf16.msrb.mxu3 %v14437_v44  ;;  %v14633_v7 = vor.u32 %v17321_v25, %v14630_v11  ;;  %v15017_v44 = vor.u32 %v17417_v8, %v15014_v49  ;;  %v14873_v25 = vor.u32 %v17381_v12, %v14870_v41  ;;  %v17273_v11 = vld [vmem:[%s26642_s16 + $0x374] sm:$0xf]  ;;  %v17238_v41 = vld [vmem:[%s26642_s16 + $0x25c] sm:$0xf] }
 0xa9f   : > { %8128 = vmatpush.bf16.msrb.mxu1 %v14821_v58  ;;  %8141 = vmatpush.bf16.msra.mxu2 %v14057_v1  ;;  %v14637_v58 = vor.u32 %v17328_v13, %v14636_v57  ;;  %v17405_v1 = vld [vmem:[%s26642_s16 + $0x794] sm:$0xf]  ;;  %v17184_v57 = vld [vmem:[%s26642_s16 + $0xa4] sm:$0xf0]  ;;  %v14444_v13 = vld [vmem:[%s26642_s16 + $0x378] sm:$0xf] }
 0xaa0   : > { %v14969_v4 = vor.u32 %v17405_v1, %v14966_v54  ;;  %v17369_v49 = vld [vmem:[%s26642_s16 + $0x674] sm:$0xf]  ;;  %v14774_v1 = vld [vmem:[%s26642_s16 + $0x640] sm:$0xf0]  ;;  %v14061_v54 = vor.u32 %v17184_v57, %v14060_v37  ;;  %v14254_v37 = vld [vmem:[%s26642_s16 + $0x228] sm:$0xf0] }
 0xaa1   : > { %v14825_v20 = vor.u32 %v17369_v49, %v14822_v0  ;;  %v17226_v0 = vld [vmem:[%s26642_s16 + $0x1fc] sm:$0xf] }
 0xaa2   : > { %8103 = vmatpush.bf16.msra.mxu0 %v14005_v35  ;;  %8116 = vmatpush.bf16.msrb.mxu3 %v14389_v9  ;;  %v14205_v35 = vor.u32 %v17220_v16, %v14204_v40  ;;  %v14589_v9 = vor.u32 %v17316_v3, %v14588_v21  ;;  %v14012_v16 = vld [vmem:[%s26642_s16 + $0x18] sm:$0xf]  ;;  %v17172_v21 = vld [vmem:[%s26642_s16 + $0x44] sm:$0xf0]  ;;  %v17322_v57 = vld [vmem:[%s26642_s16 + $0x4fc] sm:$0xf] }
 0xaa3   : > { %8129 = vmatpush.bf16.msrb.mxu1 %v14773_v17  ;;  %8142 = vmatpush.bf16.msra.mxu2 %v14009_v43  ;;  %v17208_v17 = vld [vmem:[%s26642_s16 + $0x164] sm:$0xf0]  ;;  %v14540_v43 = vld [vmem:[%s26642_s16 + $0x438] sm:$0xf] }
 0xaa4   : > { %v14396_v3 = vld [vmem:[%s26642_s16 + $0x318] sm:$0xf] }
 0xaa5   : > { %8104 = vmatmul.bf16.vlgmr.msra.gmra.mxu0 %v22708_v34  ;;  %8117 = vmatmul.bf16.vlgmr.msrb.gmra.mxu3 %v22710_v61 }
 0xaa6   : > { %8148 = vmatpush.bf16.msrb.mxu0 %v14729_v30  ;;  %8161 = vmatpush.bf16.msra.mxu3 %v15113_v52  ;;  %v17304_v30 = vld [vmem:[%s26642_s16 + $0x464] sm:$0xf0]  ;;  %v14537_v52 = vor.u32 %v17297_v32, %v14534_v59  ;;  %v17250_v59 = vld [vmem:[%s26642_s16 + $0x2bc] sm:$0xf] }
 0xaa7   : > { %8174 = vmatpush.bf16.msra.mxu1 %v14349_v33  ;;  %8187 = vmatpush.bf16.msrb.mxu2 %v14733_v22  ;;  %v14486_v33 = vld [vmem:[%s26642_s16 + $0x400] sm:$0xf0]  ;;  %v14157_v22 = vor.u32 %v17208_v17, %v14156_v60  ;;  %v14541_v15 = vor.u32 %v17304_v30, %v14540_v43  ;;  %v17448_v32 = vld [vmem:[%s26642_s16 + $0x8e4] sm:$0xf0]  ;;  %v14734_v60 = vld [vmem:[%s26642_s16 + $0x5e8] sm:$0xf0]  ;;  %v14013_v30 = vor.u32 %v17172_v21, %v14012_v16 }
 0xaa8   : > { %8130 = vmatmul.bf16.vlgmr.msrb.gmra.mxu1 %v22712_v24  ;;  %8143 = vmatmul.bf16.vlgmr.msra.gmra.mxu2 %v22708_v34  ;;  %v17442_v17 = vld [vmem:[%s26642_s16 + $0x8bc] sm:$0xf]  ;;  %v15118_v43 = vld [vmem:[%s26642_s16 + $0x8e8] sm:$0xf0] }
 0xaa9   : > { %v15121_v12 = vor.u32 %v17442_v17, %v15118_v43  ;;  %v14206_v16 = vld [vmem:[%s26642_s16 + $0x1c8] sm:$0xf0]  ;;  %v17310_v21 = vld [vmem:[%s26642_s16 + $0x49c] sm:$0xf] }
 0xaaa   : > { %8149 = vmatpush.bf16.msrb.mxu0 %v14681_v47  ;;  %8162 = vmatpush.bf16.msra.mxu3 %v15065_v63  ;;  %v17292_v47 = vld [vmem:[%s26642_s16 + $0x404] sm:$0xf0]  ;;  %v14489_v63 = vor.u32 %v17285_v56, %v14486_v33  ;;  %v15068_v33 = vld [vmem:[%s26642_s16 + $0x858] sm:$0xf]  ;;  %v14158_v17 = vld [vmem:[%s26642_s16 + $0x168] sm:$0xf0] }
 0xaab   : > { %8175 = vmatpush.bf16.msra.mxu1 %v14301_v42  ;;  %8188 = vmatpush.bf16.msrb.mxu2 %v14685_v48  ;;  %v14438_v42 = vld [vmem:[%s26642_s16 + $0x3a0] sm:$0xf0]  ;;  %v14109_v48 = vor.u32 %v17196_v38, %v14108_v39  ;;  %v14493_v8 = vor.u32 %v17292_v47, %v14492_v19  ;;  %v14302_v39 = vld [vmem:[%s26642_s16 + $0x288] sm:$0xf0]  ;;  %v17334_v38 = vld [vmem:[%s26642_s16 + $0x55c] sm:$0xf] }
 0xaac   : > { %v14441_v50 = vor.u32 %v17273_v11, %v14438_v42  ;;  %v14686_v19 = vld [vmem:[%s26642_s16 + $0x588] sm:$0xf0]  ;;  %v17430_v47 = vld [vmem:[%s26642_s16 + $0x85c] sm:$0xf]  ;;  %v14305_v11 = vor.u32 %v17238_v41, %v14302_v39  ;;  %v15020_v42 = vld [vmem:[%s26642_s16 + $0x7f8] sm:$0xf] }
 0xaad   : > { %v17298_v43 = vld [vmem:[%s26642_s16 + $0x43c] sm:$0xf] }
 0xaae   : > { %8150 = vmatpush.bf16.msrb.mxu0 %v14633_v7  ;;  %8163 = vmatpush.bf16.msra.mxu3 %v15017_v44  ;;  %v17280_v7 = vld [vmem:[%s26642_s16 + $0x3a4] sm:$0xf0]  ;;  %v17261_v44 = vld [vmem:[%s26642_s16 + $0x314] sm:$0xf]  ;;  %v17190_v39 = vld [vmem:[%s26642_s16 + $0xdc] sm:$0xf] }
 0xaaf   : > { %8176 = vmatpush.bf16.msra.mxu1 %v14253_v2  ;;  %8189 = vmatpush.bf16.msrb.mxu2 %v14637_v58  ;;  %v14390_v2 = vld [vmem:[%s26642_s16 + $0x340] sm:$0xf0]  ;;  %v17357_v58 = vld [vmem:[%s26642_s16 + $0x614] sm:$0xf]  ;;  %v14445_v40 = vor.u32 %v17280_v7, %v14444_v13  ;;  %v14638_v13 = vld [vmem:[%s26642_s16 + $0x528] sm:$0xf0] }
 0xab0   : > { %v14393_v45 = vor.u32 %v17261_v44, %v14390_v2  ;;  %v14777_v62 = vor.u32 %v17357_v58, %v14774_v1  ;;  %v17418_v7 = vld [vmem:[%s26642_s16 + $0x7fc] sm:$0xf]  ;;  %v15022_v44 = vld [vmem:[%s26642_s16 + $0x828] sm:$0xf0]  ;;  %v14972_v2 = vld [vmem:[%s26642_s16 + $0x798] sm:$0xf]  ;;  %v14641_v1 = vor.u32 %v17322_v57, %v14638_v13 }
 0xab1   : > { %v17412_v58 = vld [vmem:[%s26642_s16 + $0x7c4] sm:$0xf0]  ;;  %v14062_v57 = vld [vmem:[%s26642_s16 + $0xa8] sm:$0xf0]  ;;  %v17274_v13 = vld [vmem:[%s26642_s16 + $0x37c] sm:$0xf] }
 0xab2   : > { %8151 = vmatpush.bf16.msrb.mxu0 %v14585_v55  ;;  %8164 = vmatpush.bf16.msra.mxu3 %v14969_v4  ;;  %v17268_v55 = vld [vmem:[%s26642_s16 + $0x344] sm:$0xf0]  ;;  %v15116_v4 = vld [vmem:[%s26642_s16 + $0x8b8] sm:$0xf] }
 0xab3   : > { %8177 = vmatpush.bf16.msra.mxu1 %v14205_v35  ;;  %8190 = vmatpush.bf16.msrb.mxu2 %v14589_v9  ;;  %v14350_v35 = vld [vmem:[%s26642_s16 + $0x2e8] sm:$0xf0]  ;;  %v17346_v9 = vld [vmem:[%s26642_s16 + $0x5bc] sm:$0xf] }
 0xab4   : > { %v14353_v56 = vor.u32 %v17250_v59, %v14350_v35  ;;  %v14924_v35 = vld [vmem:[%s26642_s16 + $0x738] sm:$0xf] }
 0xab6   : > { %8152 = vmatpush.bf16.msrb.mxu0 %v14537_v52  ;;  %8165 = vmatpush.bf16.msra.mxu3 %v14921_v26  ;;  %v14397_v52 = vor.u32 %v17268_v55, %v14396_v3  ;;  %v15117_v26 = vor.u32 %v17448_v32, %v15116_v4  ;;  %v14590_v3 = vld [vmem:[%s26642_s16 + $0x4c8] sm:$0xf0]  ;;  %v17406_v55 = vld [vmem:[%s26642_s16 + $0x79c] sm:$0xf]  ;;  %v14973_v32 = vor.u32 %v17412_v58, %v14972_v2 }
 0xab7   : > { %8178 = vmatpush.bf16.msra.mxu1 %v14157_v22  ;;  %8191 = vmatpush.bf16.msrb.mxu2 %v14541_v15  ;;  %v17436_v22 = vld [vmem:[%s26642_s16 + $0x884] sm:$0xf0]  ;;  %v14737_v15 = vor.u32 %v17346_v9, %v14734_v60  ;;  %v14974_v4 = vld [vmem:[%s26642_s16 + $0x7c8] sm:$0xf0]  ;;  %v17202_v60 = vld [vmem:[%s26642_s16 + $0x13c] sm:$0xf] }
 0xab8   : > { %v17400_v9 = vld [vmem:[%s26642_s16 + $0x764] sm:$0xf0] }
 0xaba   : > { %8153 = vmatpush.bf16.msrb.mxu0 %v14489_v63  ;;  %8166 = vmatpush.bf16.msra.mxu3 %v14873_v25  ;;  %v15070_v63 = vld [vmem:[%s26642_s16 + $0x888] sm:$0xf0]  ;;  %v15069_v25 = vor.u32 %v17436_v22, %v15068_v33  ;;  %v14161_v33 = vor.u32 %v17202_v60, %v14158_v17  ;;  %v14876_v22 = vld [vmem:[%s26642_s16 + $0x6d8] sm:$0xf] }
 0xabb   : > { %8179 = vmatpush.bf16.msra.mxu1 %v14109_v48  ;;  %8192 = vmatpush.bf16.msrb.mxu2 %v14493_v8  ;;  %v17424_v48 = vld [vmem:[%s26642_s16 + $0x824] sm:$0xf0]  ;;  %v14689_v8 = vor.u32 %v17334_v38, %v14686_v19  ;;  %v15073_v49 = vor.u32 %v17430_v47, %v15070_v63  ;;  %v14110_v38 = vld [vmem:[%s26642_s16 + $0x108] sm:$0xf0]  ;;  %v17286_v19 = vld [vmem:[%s26642_s16 + $0x3dc] sm:$0xf] }
 0xabc   : > { %v14494_v47 = vld [vmem:[%s26642_s16 + $0x408] sm:$0xf0]  ;;  %v17382_v63 = vld [vmem:[%s26642_s16 + $0x6dc] sm:$0xf] }
 0xabe   : > { %8154 = vmatpush.bf16.msrb.mxu0 %v14441_v50  ;;  %8167 = vmatpush.bf16.msra.mxu3 %v14825_v20  ;;  %v15021_v50 = vor.u32 %v17424_v48, %v15020_v42  ;;  %v14257_v20 = vor.u32 %v17226_v0, %v14254_v37  ;;  %v14113_v42 = vor.u32 %v17190_v39, %v14110_v38  ;;  %v14828_v48 = vld [vmem:[%s26642_s16 + $0x678] sm:$0xf]  ;;  %v17178_v37 = vld [vmem:[%s26642_s16 + $0x7c] sm:$0xf]  ;;  %v14692_v38 = vld [vmem:[%s26642_s16 + $0x560] sm:$0xf] }
 0xabf   : > { %8180 = vmatpush.bf16.msra.mxu1 %v14061_v54  ;;  %8193 = vmatpush.bf16.msrb.mxu2 %v14445_v40  ;;  %v15025_v54 = vor.u32 %v17418_v7, %v15022_v44  ;;  %v17214_v40 = vld [vmem:[%s26642_s16 + $0x19c] sm:$0xf]  ;;  %v14446_v7 = vld [vmem:[%s26642_s16 + $0x3a8] sm:$0xf0]  ;;  %v14065_v58 = vor.u32 %v17178_v37, %v14062_v57 }
 0xac0   : > { %v14209_v59 = vor.u32 %v17214_v40, %v14206_v16  ;;  %v17370_v44 = vld [vmem:[%s26642_s16 + $0x67c] sm:$0xf]  ;;  %v14014_v40 = vld [vmem:[%s26642_s16 + $0x48] sm:$0xf0]  ;;  %v14449_v16 = vor.u32 %v17274_v13, %v14446_v7  ;;  %v17329_v13 = vld [vmem:[%s26642_s16 + $0x52c] sm:$0xf0] }
 0xac1   : > { %v15028_v7 = vld [vmem:[%s26642_s16 + $0x800] sm:$0xf] }
 0xac2   : > { %8155 = vmatpush.bf16.msrb.mxu0 %v14393_v45  ;;  %8168 = vmatpush.bf16.msra.mxu3 %v14777_v62  ;;  %v14593_v45 = vor.u32 %v17310_v21, %v14590_v3  ;;  %v14977_v62 = vor.u32 %v17406_v55, %v14974_v4  ;;  %v17262_v3 = vld [vmem:[%s26642_s16 + $0x31c] sm:$0xf]  ;;  %v14398_v55 = vld [vmem:[%s26642_s16 + $0x348] sm:$0xf0] }
 0xac3   : > { %8181 = vmatpush.bf16.msra.mxu1 %v14013_v30  ;;  %8194 = vmatpush.bf16.msrb.mxu2 %v14397_v52  ;;  %v14542_v30 = vld [vmem:[%s26642_s16 + $0x468] sm:$0xf0]  ;;  %v17394_v52 = vld [vmem:[%s26642_s16 + $0x73c] sm:$0xf] }
 0xac4   : > { %v17358_v4 = vld [vmem:[%s26642_s16 + $0x61c] sm:$0xf] }
 0xac5   : > { %8156 = vmatmul.bf16.vlgmr.msrb.gmra.mxu0 %v22710_v61  ;;  %8169 = vmatmul.bf16.vlgmr.msra.gmra.mxu3 %v22712_v24 }
 0xac6   : > { %8200 = vmatpush.bf16.msra.mxu0 %v15117_v26  ;;  %8213 = vmatpush.bf16.msrb.mxu3 %v14353_v56  ;;  %v14926_v26 = vld [vmem:[%s26642_s16 + $0x768] sm:$0xf0]  ;;  %v14925_v56 = vor.u32 %v17400_v9, %v14924_v35  ;;  %v17257_v35 = vld [vmem:[%s26642_s16 + $0x2ec] sm:$0xf0]  ;;  %v14740_v9 = vld [vmem:[%s26642_s16 + $0x5c0] sm:$0xf] }
 0xac7   : > { %8226 = vmatpush.bf16.msrb.mxu1 %v14737_v15  ;;  %8239 = vmatpush.bf16.msra.mxu2 %v15121_v12  ;;  %v17388_v15 = vld [vmem:[%s26642_s16 + $0x704] sm:$0xf0]  ;;  %v14545_v12 = vor.u32 %v17298_v43, %v14542_v30  ;;  %v14929_v41 = vor.u32 %v17394_v52, %v14926_v26  ;;  %v17449_v43 = vld [vmem:[%s26642_s16 + $0x8ec] sm:$0xf0]  ;;  %v17251_v30 = vld [vmem:[%s26642_s16 + $0x2c4] sm:$0xf]  ;;  %v14401_v26 = vor.u32 %v17262_v3, %v14398_v55 }
 0xac8   : > { %8182 = vmatmul.bf16.vlgmr.msra.gmra.mxu1 %v22708_v34  ;;  %8195 = vmatmul.bf16.vlgmr.msrb.gmra.mxu2 %v22710_v61  ;;  %v14358_v52 = vld [vmem:[%s26642_s16 + $0x2f0] sm:$0xf0]  ;;  %v17221_v3 = vld [vmem:[%s26642_s16 + $0x1cc] sm:$0xf0] }
 0xac9   : > { %v14361_v39 = vor.u32 %v17251_v30, %v14358_v52  ;;  %v14164_v30 = vld [vmem:[%s26642_s16 + $0x140] sm:$0xf]  ;;  %v17209_v52 = vld [vmem:[%s26642_s16 + $0x16c] sm:$0xf0] }
 0xaca   : > { %8201 = vmatpush.bf16.msra.mxu0 %v15069_v25  ;;  %8214 = vmatpush.bf16.msrb.mxu3 %v14305_v11  ;;  %v14878_v25 = vld [vmem:[%s26642_s16 + $0x708] sm:$0xf0]  ;;  %v14877_v11 = vor.u32 %v17388_v15, %v14876_v22  ;;  %v14308_v15 = vld [vmem:[%s26642_s16 + $0x260] sm:$0xf] }
 0xacb   : > { %8227 = vmatpush.bf16.msrb.mxu1 %v14689_v8  ;;  %8240 = vmatpush.bf16.msra.mxu2 %v15073_v49  ;;  %v17376_v8 = vld [vmem:[%s26642_s16 + $0x6a4] sm:$0xf0]  ;;  %v14497_v49 = vor.u32 %v17286_v19, %v14494_v47  ;;  %v14881_v0 = vor.u32 %v17382_v63, %v14878_v25  ;;  %v17341_v19 = vld [vmem:[%s26642_s16 + $0x58c] sm:$0xf0]  ;;  %v15076_v47 = vld [vmem:[%s26642_s16 + $0x860] sm:$0xf] }
 0xacc   : > { %v14829_v2 = vor.u32 %v17376_v8, %v14828_v48  ;;  %v17437_v63 = vld [vmem:[%s26642_s16 + $0x88c] sm:$0xf0]  ;;  %v17239_v25 = vld [vmem:[%s26642_s16 + $0x264] sm:$0xf]  ;;  %v14693_v48 = vor.u32 %v17341_v19, %v14692_v38  ;;  %v14260_v8 = vld [vmem:[%s26642_s16 + $0x200] sm:$0xf] }
 0xacd   : > { %v15077_v37 = vor.u32 %v17437_v63, %v15076_v47  ;;  %v17401_v38 = vld [vmem:[%s26642_s16 + $0x76c] sm:$0xf0]  ;;  %v17203_v19 = vld [vmem:[%s26642_s16 + $0x144] sm:$0xf]  ;;  %v14166_v47 = vld [vmem:[%s26642_s16 + $0x170] sm:$0xf0] }
 0xace   : > { %8202 = vmatpush.bf16.msra.mxu0 %v15021_v50  ;;  %8215 = vmatpush.bf16.msrb.mxu3 %v14257_v20  ;;  %v14830_v50 = vld [vmem:[%s26642_s16 + $0x6a8] sm:$0xf0]  ;;  %v14780_v20 = vld [vmem:[%s26642_s16 + $0x618] sm:$0xf] }
 0xacf   : > { %8228 = vmatpush.bf16.msrb.mxu1 %v14641_v1  ;;  %8241 = vmatpush.bf16.msra.mxu2 %v15025_v54  ;;  %v17364_v1 = vld [vmem:[%s26642_s16 + $0x644] sm:$0xf0]  ;;  %v17166_v54 = vld [vmem:[%s26642_s16 + $0x1c] sm:$0xf]  ;;  %v14833_v21 = vor.u32 %v17370_v44, %v14830_v50  ;;  %v23544_v44 = vld [vmem:[%s26643_s17] sm:$0xff] }
 0xad0   : > { %v14781_v60 = vor.u32 %v17364_v1, %v14780_v20  ;;  %v14017_v17 = vor.u32 %v17166_v54, %v14014_v40  ;;  %v17425_v50 = vld [vmem:[%s26642_s16 + $0x82c] sm:$0xf0]  ;;  %v17227_v20 = vld [vmem:[%s26642_s16 + $0x204] sm:$0xf]  ;;  %v6476_v40 = vperm.slane %v23544_v44, 0 }
 0xad1   : > { %v15029_v55 = vor.u32 %v17425_v50, %v15028_v7  ;;  %v17293_v7 = vld [vmem:[%s26642_s16 + $0x40c] sm:$0xf0]  ;;  %v14884_v50 = vld [vmem:[%s26642_s16 + $0x6e0] sm:$0xf] }
 0xad2   : > { %8203 = vmatpush.bf16.msra.mxu0 %v14973_v32  ;;  %8216 = vmatpush.bf16.msrb.mxu3 %v14209_v59  ;;  %v14782_v32 = vld [vmem:[%s26642_s16 + $0x648] sm:$0xf0]  ;;  %v14356_v59 = vld [vmem:[%s26642_s16 + $0x2c0] sm:$0xf] }
 0xad3   : > { %8229 = vmatpush.bf16.msrb.mxu1 %v14593_v45  ;;  %8242 = vmatpush.bf16.msra.mxu2 %v14977_v62  ;;  %v17353_v45 = vld [vmem:[%s26642_s16 + $0x5ec] sm:$0xf0]  ;;  %v15124_v62 = vld [vmem:[%s26642_s16 + $0x8c0] sm:$0xf] }
 0xad4   : > { %v14741_v22 = vor.u32 %v17353_v45, %v14740_v9  ;;  %v17413_v9 = vld [vmem:[%s26642_s16 + $0x7cc] sm:$0xf0]  ;;  %v17215_v45 = vld [vmem:[%s26642_s16 + $0x1a4] sm:$0xf] }
 0xad6   : > { %8204 = vmatpush.bf16.msra.mxu0 %v14925_v56  ;;  %8217 = vmatpush.bf16.msrb.mxu3 %v14161_v33  ;;  %v14785_v56 = vor.u32 %v17358_v4, %v14782_v32  ;;  %v14357_v33 = vor.u32 %v17257_v35, %v14356_v59  ;;  %v14596_v32 = vld [vmem:[%s26642_s16 + $0x4a0] sm:$0xf]  ;;  %v17317_v59 = vld [vmem:[%s26642_s16 + $0x4cc] sm:$0xf0] }
 0xad7   : > { %8230 = vmatpush.bf16.msrb.mxu1 %v14545_v12  ;;  %8243 = vmatpush.bf16.msra.mxu2 %v14929_v41  ;;  %v17245_v12 = vld [vmem:[%s26642_s16 + $0x28c] sm:$0xf0]  ;;  %v15125_v41 = vor.u32 %v17449_v43, %v15124_v62  ;;  %v14980_v35 = vld [vmem:[%s26642_s16 + $0x7a0] sm:$0xf]  ;;  %v14214_v62 = vld [vmem:[%s26642_s16 + $0x1d0] sm:$0xf0]  ;;  %v14597_v43 = vor.u32 %v17317_v59, %v14596_v32 }
 0xad8   : > { %v17281_v32 = vld [vmem:[%s26642_s16 + $0x3ac] sm:$0xf0]  ;;  %v14836_v59 = vld [vmem:[%s26642_s16 + $0x680] sm:$0xf] }
 0xada   : > { %8205 = vmatpush.bf16.msra.mxu0 %v14877_v11  ;;  %8218 = vmatpush.bf16.msrb.mxu3 %v14113_v42  ;;  %v14310_v11 = vld [vmem:[%s26642_s16 + $0x290] sm:$0xf0]  ;;  %v14309_v42 = vor.u32 %v17245_v12, %v14308_v15  ;;  %v17305_v15 = vld [vmem:[%s26642_s16 + $0x46c] sm:$0xf0]  ;;  %v14932_v12 = vld [vmem:[%s26642_s16 + $0x740] sm:$0xf] }
 0xadb   : > { %8231 = vmatpush.bf16.msrb.mxu1 %v14497_v49  ;;  %8244 = vmatpush.bf16.msra.mxu2 %v14881_v0  ;;  %v17233_v49 = vld [vmem:[%s26642_s16 + $0x22c] sm:$0xf0]  ;;  %v14644_v0 = vld [vmem:[%s26642_s16 + $0x500] sm:$0xf]  ;;  %v14313_v57 = vor.u32 %v17239_v25, %v14310_v11  ;;  %v6477_v11 = vperm.slane %v23544_v44, 1 }
 0xadc   : > { %v14261_v1 = vor.u32 %v17233_v49, %v14260_v8  ;;  %v14645_v54 = vor.u32 %v17329_v13, %v14644_v0  ;;  %v14116_v49 = vld [vmem:[%s26642_s16 + $0xe0] sm:$0xf]  ;;  %v17197_v0 = vld [vmem:[%s26642_s16 + $0x10c] sm:$0xf0] }
 0xadd   : > { %v14500_v13 = vld [vmem:[%s26642_s16 + $0x3e0] sm:$0xf] }
 0xade   : > { %8206 = vmatpush.bf16.msra.mxu0 %v14829_v2  ;;  %8219 = vmatpush.bf16.msrb.mxu3 %v14065_v58  ;;  %v14262_v2 = vld [vmem:[%s26642_s16 + $0x230] sm:$0xf0] }
 0xadf   : > { %8232 = vmatpush.bf16.msrb.mxu1 %v14449_v16  ;;  %8245 = vmatpush.bf16.msra.mxu2 %v14833_v21  ;;  %v14212_v21 = vld [vmem:[%s26642_s16 + $0x1a0] sm:$0xf]  ;;  %v14265_v4 = vor.u32 %v17227_v20, %v14262_v2  ;;  %v17389_v20 = vld [vmem:[%s26642_s16 + $0x70c] sm:$0xf0]  ;;  %v17191_v2 = vld [vmem:[%s26642_s16 + $0xe4] sm:$0xf] }
 0xae1   : > { %v7949_v58 = vpop.f32.mrf.mxu0 }
 0xae2   : > { %8207 = vmatpush.bf16.msra.mxu0 %v14781_v60  ;;  %8220 = vmatpush.bf16.msrb.mxu3 %v14017_v17  ;;  %v7975_v16 = vpop.f32.mrf.mxu1  ;;  %v7950_v60 = vadd.f32 %v7949_v58, %v6476_v40  ;;  %v14213_v17 = vor.u32 %v17221_v3, %v14212_v21  ;;  %v14118_v58 = vld [vmem:[%s26642_s16 + $0x110] sm:$0xf0]  ;;  %v14068_v40 = vld [vmem:[%s26642_s16 + $0x80] sm:$0xf]  ;;  %v14885_v21 = vor.u32 %v17389_v20, %v14884_v50 }
 0xae3   : > { %8233 = vmatpush.bf16.msrb.mxu1 %v14401_v26  ;;  %8246 = vmatpush.bf16.msra.mxu2 %v14785_v56  ;;  %v14981_v26 = vor.u32 %v17413_v9, %v14980_v35  ;;  %v14217_v56 = vor.u32 %v17215_v45, %v14214_v62  ;;  %v14121_v3 = vor.u32 %v17191_v2, %v14118_v58  ;;  %v17377_v45 = vld [vmem:[%s26642_s16 + $0x6ac] sm:$0xf0]  ;;  %v17179_v62 = vld [vmem:[%s26642_s16 + $0x84] sm:$0xf] }
 0xae5   : > { %8208 = vmatmul.bf16.vlgmr.msra.gmra.mxu0 %v22712_v24  ;;  %8221 = vmatmul.bf16.vlgmr.msrb.gmra.mxu3 %v22708_v34 }
 0xae6   : > { %8252 = vmatpush.bf16.msrb.mxu0 %v14357_v33  ;;  %8265 = vmatpush.bf16.msra.mxu3 %v14741_v22  ;;  %v14548_v22 = vld [vmem:[%s26642_s16 + $0x440] sm:$0xf] }
 0xae7   : > { %8278 = vmatpush.bf16.msra.mxu1 %v15125_v41  ;;  %8291 = vmatpush.bf16.msrb.mxu2 %v14361_v39  ;;  %v7962_v33 = vpop.f32.mrf.mxu3 }
 0xae8   : > { %8234 = vmatmul.bf16.vlgmr.msrb.gmra.mxu1 %v22710_v61  ;;  %8247 = vmatmul.bf16.vlgmr.msra.gmra.mxu2 %v22712_v24  ;;  %v7963_v41 = vadd.f32 %v7962_v33, %v7950_v60  ;;  %v7988_v39 = vpop.f32.mrf.mxu2  ;;  %v14070_v60 = vld [vmem:[%s26642_s16 + $0xb0] sm:$0xf0] }
 0xae9   : > { %v7951_v63 = vpop.f32.mrf.mxu0  ;;  %v7989_v35 = vadd.f32 %v7988_v39, %v6477_v11  ;;  %v14073_v39 = vor.u32 %v17179_v62, %v14070_v60  ;;  %v17347_v11 = vld [vmem:[%s26642_s16 + $0x5c4] sm:$0xf]  ;;  %v17246_v60 = vld [vmem:[%s26642_s16 + $0x294] sm:$0xf0] }
 0xaea   : > { %8253 = vmatpush.bf16.msrb.mxu0 %v14309_v42  ;;  %8266 = vmatpush.bf16.msra.mxu3 %v14693_v48  ;;  %v23608_v25 = vadd.f32 %v7975_v16, %v7963_v41  ;;  %v14165_v42 = vor.u32 %v17209_v52, %v14164_v30  ;;  %v14549_v48 = vor.u32 %v17305_v15, %v14548_v22  ;;  %v7977_v8 = vpop.f32.mrf.mxu1  ;;  %v17185_v16 = vld [vmem:[%s26642_s16 + $0xac] sm:$0xf0]  ;;  %v14020_v30 = vld [vmem:[%s26642_s16 + $0x20] sm:$0xf]  ;;  %v14022_v63 = vld [vmem:[%s26642_s16 + $0x50] sm:$0xf0] }
 0xaeb   : > { %8279 = vmatpush.bf16.msra.mxu1 %v15077_v37  ;;  %8292 = vmatpush.bf16.msrb.mxu2 %v14313_v57  ;;  %v14933_v37 = vor.u32 %v17401_v38, %v14932_v12  ;;  %v14169_v57 = vor.u32 %v17203_v19, %v14166_v47  ;;  %v14069_v52 = vor.u32 %v17185_v16, %v14068_v40  ;;  %v17173_v22 = vld [vmem:[%s26642_s16 + $0x4c] sm:$0xf0]  ;;  %v14404_v15 = vld [vmem:[%s26642_s16 + $0x320] sm:$0xf]  ;;  %v17167_v47 = vld [vmem:[%s26642_s16 + $0x24] sm:$0xf] }
 0xaec   : > { %v17269_v12 = vld [vmem:[%s26642_s16 + $0x34c] sm:$0xf0]  ;;  %v14837_v41 = vor.u32 %v17377_v45, %v14836_v59  ;;  %v14788_v38 = vld [vmem:[%s26642_s16 + $0x620] sm:$0xf]  ;;  %v15126_v8 = vld [vmem:[%s26642_s16 + $0x8f0] sm:$0xf0]  ;;  %v14025_v2 = vor.u32 %v17167_v47, %v14022_v63 }
 0xaed   : > { %v17365_v19 = vld [vmem:[%s26642_s16 + $0x64c] sm:$0xf0]  ;;  %v14316_v45 = vld [vmem:[%s26642_s16 + $0x268] sm:$0xf] }
 0xaee   : > { %8254 = vmatpush.bf16.msrb.mxu0 %v14261_v1  ;;  %8267 = vmatpush.bf16.msra.mxu3 %v14645_v54  ;;  %v14117_v1 = vor.u32 %v17197_v0, %v14116_v49  ;;  %v14501_v54 = vor.u32 %v17293_v7, %v14500_v13  ;;  %v14364_v49 = vld [vmem:[%s26642_s16 + $0x2c8] sm:$0xf]  ;;  %v14021_v0 = vor.u32 %v17173_v22, %v14020_v30  ;;  %v17354_v7 = vld [vmem:[%s26642_s16 + $0x5f4] sm:$0xf0] }
 0xaef   : > { %8280 = vmatpush.bf16.msra.mxu1 %v15029_v55  ;;  %8293 = vmatpush.bf16.msrb.mxu2 %v14265_v4  ;;  %v7964_v55 = vpop.f32.mrf.mxu3  ;;  %v14452_v4 = vld [vmem:[%s26642_s16 + $0x380] sm:$0xf]  ;;  %v14748_v13 = vld [vmem:[%s26642_s16 + $0x5c8] sm:$0xf]  ;;  %v14789_v20 = vor.u32 %v17365_v19, %v14788_v38  ;;  %v17330_v19 = vld [vmem:[%s26642_s16 + $0x534] sm:$0xf0] }
 0xaf0   : > { %v7990_v9 = vpop.f32.mrf.mxu2  ;;  %v14652_v38 = vld [vmem:[%s26642_s16 + $0x508] sm:$0xf] }
 0xaf1   : > { %v15078_v9 = vld [vmem:[%s26642_s16 + $0x890] sm:$0xf0] }
 0xaf2   : > { %8255 = vmatpush.bf16.msrb.mxu0 %v14213_v17  ;;  %8268 = vmatpush.bf16.msra.mxu3 %v14597_v43  ;;  %v8001_v17 = vpop.f32.mrf.mxu0  ;;  %v6478_v43 = vperm.slane %v23544_v44, 2  ;;  %v8027_v33 = vpop.f32.mrf.mxu1 }
 0xaf3   : > { %8281 = vmatpush.bf16.msra.mxu1 %v14981_v26  ;;  %8294 = vmatpush.bf16.msrb.mxu2 %v14217_v56  ;;  %v14453_v26 = vor.u32 %v17281_v32, %v14452_v4  ;;  %v8002_v56 = vadd.f32 %v8001_v17, %v7989_v35  ;;  %v14749_v4 = vor.u32 %v17354_v7, %v14748_v13  ;;  %v17431_v35 = vld [vmem:[%s26642_s16 + $0x864] sm:$0xf]  ;;  %v14700_v17 = vld [vmem:[%s26642_s16 + $0x568] sm:$0xf]  ;;  %v17222_v7 = vld [vmem:[%s26642_s16 + $0x1d4] sm:$0xf0] }
 0xaf4   : > { %v8028_v50 = vadd.f32 %v8027_v33, %v6478_v43  ;;  %v17342_v43 = vld [vmem:[%s26642_s16 + $0x594] sm:$0xf0]  ;;  %v14317_v33 = vor.u32 %v17246_v60, %v14316_v45  ;;  %v14220_v13 = vld [vmem:[%s26642_s16 + $0x1a8] sm:$0xf] }
 0xaf5   : > { %v14701_v22 = vor.u32 %v17342_v43, %v14700_v17  ;;  %v14556_v45 = vld [vmem:[%s26642_s16 + $0x448] sm:$0xf]  ;;  %v17287_v43 = vld [vmem:[%s26642_s16 + $0x3e4] sm:$0xf] }
 0xaf6   : > { %8256 = vmatpush.bf16.msrb.mxu0 %v14165_v42  ;;  %8269 = vmatpush.bf16.msra.mxu3 %v14549_v48  ;;  %v14742_v42 = vld [vmem:[%s26642_s16 + $0x5f0] sm:$0xf0]  ;;  %v17443_v48 = vld [vmem:[%s26642_s16 + $0x8c4] sm:$0xf] }
 0xaf7   : > { %8282 = vmatpush.bf16.msra.mxu1 %v14933_v37  ;;  %8295 = vmatpush.bf16.msrb.mxu2 %v14169_v57  ;;  %v14405_v37 = vor.u32 %v17269_v12, %v14404_v15  ;;  %v17258_v57 = vld [vmem:[%s26642_s16 + $0x2f4] sm:$0xf0]  ;;  %v8014_v58 = vpop.f32.mrf.mxu3  ;;  %v17419_v15 = vld [vmem:[%s26642_s16 + $0x804] sm:$0xf]  ;;  %v15030_v12 = vld [vmem:[%s26642_s16 + $0x830] sm:$0xf0] }
 0xaf8   : > { %v23708_v40 = vadd.f32 %v8014_v58, %v8002_v56  ;;  %v8040_v16 = vpop.f32.mrf.mxu2  ;;  %v14365_v55 = vor.u32 %v17258_v57, %v14364_v49  ;;  %v14646_v56 = vld [vmem:[%s26642_s16 + $0x530] sm:$0xf0] }
 0xaf9   : > { %v23716_v32 = vadd.f32 %v8040_v16, %v8028_v50  ;;  %v14982_v57 = vld [vmem:[%s26642_s16 + $0x7d0] sm:$0xf0]  ;;  %v14604_v50 = vld [vmem:[%s26642_s16 + $0x4a8] sm:$0xf]  ;;  %v17299_v16 = vld [vmem:[%s26642_s16 + $0x444] sm:$0xf] }
 0xafa   : > { %8257 = vmatpush.bf16.msrb.mxu0 %v14117_v1  ;;  %8270 = vmatpush.bf16.msra.mxu3 %v14501_v54  ;;  %v14745_v1 = vor.u32 %v17347_v11, %v14742_v42  ;;  %v15129_v54 = vor.u32 %v17443_v48, %v15126_v8  ;;  %v8003_v59 = vpop.f32.mrf.mxu0  ;;  %v8029_v62 = vpop.f32.mrf.mxu1  ;;  %v15033_v11 = vor.u32 %v17419_v15, %v15030_v12  ;;  %v17311_v48 = vld [vmem:[%s26642_s16 + $0x4a4] sm:$0xf]  ;;  %v14598_v8 = vld [vmem:[%s26642_s16 + $0x4d0] sm:$0xf0]  ;;  %v14124_v15 = vld [vmem:[%s26642_s16 + $0xe8] sm:$0xf] }
 0xafb   : > { %8283 = vmatpush.bf16.msra.mxu1 %v14885_v21  ;;  %8296 = vmatpush.bf16.msrb.mxu2 %v14121_v3  ;;  %v17335_v21 = vld [vmem:[%s26642_s16 + $0x564] sm:$0xf]  ;;  %v14694_v3 = vld [vmem:[%s26642_s16 + $0x590] sm:$0xf0]  ;;  %v17306_v62 = vld [vmem:[%s26642_s16 + $0x474] sm:$0xf0] }
 0xafc   : > { %v14697_v30 = vor.u32 %v17335_v21, %v14694_v3  ;;  %v14550_v21 = vld [vmem:[%s26642_s16 + $0x470] sm:$0xf0]  ;;  %v14221_v3 = vor.u32 %v17222_v7, %v14220_v13  ;;  %v17186_v13 = vld [vmem:[%s26642_s16 + $0xb4] sm:$0xf0]  ;;  %v14460_v7 = vld [vmem:[%s26642_s16 + $0x388] sm:$0xf] }
 0xafd   : > { %v14934_v59 = vld [vmem:[%s26642_s16 + $0x770] sm:$0xf0]  ;;  %v14553_v60 = vor.u32 %v17299_v16, %v14550_v21  ;;  %v17359_v21 = vld [vmem:[%s26642_s16 + $0x624] sm:$0xf] }
 0xafe   : > { %8258 = vmatpush.bf16.msrb.mxu0 %v14069_v52  ;;  %8271 = vmatpush.bf16.msra.mxu3 %v14453_v26  ;;  %v15081_v52 = vor.u32 %v17431_v35, %v15078_v9  ;;  %v17323_v26 = vld [vmem:[%s26642_s16 + $0x504] sm:$0xf]  ;;  %v14172_v35 = vld [vmem:[%s26642_s16 + $0x148] sm:$0xf]  ;;  %v17210_v9 = vld [vmem:[%s26642_s16 + $0x174] sm:$0xf0] }
 0xaff   : > { %8284 = vmatpush.bf16.msra.mxu1 %v14837_v41  ;;  %8297 = vmatpush.bf16.msrb.mxu2 %v14073_v39  ;;  %v14268_v41 = vld [vmem:[%s26642_s16 + $0x208] sm:$0xf]  ;;  %v17234_v39 = vld [vmem:[%s26642_s16 + $0x234] sm:$0xf0]  ;;  %v8016_v47 = vpop.f32.mrf.mxu3  ;;  %v14649_v63 = vor.u32 %v17323_v26, %v14646_v56  ;;  %v14557_v26 = vor.u32 %v17306_v62, %v14556_v45  ;;  %v14406_v16 = vld [vmem:[%s26642_s16 + $0x350] sm:$0xf0] }
 0xb00   : > { %v8042_v42 = vpop.f32.mrf.mxu2  ;;  %v14269_v49 = vor.u32 %v17234_v39, %v14268_v41  ;;  %v17198_v41 = vld [vmem:[%s26642_s16 + $0x114] sm:$0xf0]  ;;  %v14508_v39 = vld [vmem:[%s26642_s16 + $0x3e8] sm:$0xf] }
 0xb01   : > { %v17275_v42 = vld [vmem:[%s26642_s16 + $0x384] sm:$0xf]  ;;  %v14412_v45 = vld [vmem:[%s26642_s16 + $0x328] sm:$0xf] }
 0xb02   : > { %8259 = vmatpush.bf16.msrb.mxu0 %v14021_v0  ;;  %8272 = vmatpush.bf16.msra.mxu3 %v14405_v37  ;;  %v14653_v0 = vor.u32 %v17330_v19, %v14652_v38  ;;  %v17407_v37 = vld [vmem:[%s26642_s16 + $0x7a4] sm:$0xf]  ;;  %v17294_v38 = vld [vmem:[%s26642_s16 + $0x414] sm:$0xf0] }
 0xb03   : > { %8285 = vmatpush.bf16.msra.mxu1 %v14789_v20  ;;  %8298 = vmatpush.bf16.msrb.mxu2 %v14025_v2  ;;  %v17318_v20 = vld [vmem:[%s26642_s16 + $0x4d4] sm:$0xf0]  ;;  %v23788_v2 = vpop.f32.mrf.mxu0 }
 0xb05   : > { %8260 = vmatmul.bf16.vlgmr.msrb.gmra.mxu0 %v22708_v34  ;;  %8273 = vmatmul.bf16.vlgmr.msra.gmra.mxu3 %v22710_v61  ;;  %v23790_v58 = vpop.f32.mrf.mxu1 }
 0xb06   : > { %8304 = vmatpush.bf16.msra.mxu0 %v14745_v1  ;;  %8317 = vmatpush.bf16.msrb.mxu3 %v15129_v54  ;;  %v14601_v1 = vor.u32 %v17311_v48, %v14598_v8  ;;  %v14985_v54 = vor.u32 %v17407_v37, %v14982_v57  ;;  %v14454_v48 = vld [vmem:[%s26642_s16 + $0x3b0] sm:$0xf0]  ;;  %v14125_v8 = vor.u32 %v17198_v41, %v14124_v15  ;;  %v14076_v57 = vld [vmem:[%s26642_s16 + $0x88] sm:$0xf]  ;;  %v14750_v15 = vld [vmem:[%s26642_s16 + $0x5f8] sm:$0xf0] }
 0xb07   : > { %8330 = vmatpush.bf16.msrb.mxu1 %v14365_v55  ;;  %8343 = vmatpush.bf16.msra.mxu2 %v14749_v4  ;;  %v14605_v55 = vor.u32 %v17318_v20, %v14604_v50  ;;  %v17395_v4 = vld [vmem:[%s26642_s16 + $0x744] sm:$0xf]  ;;  %v14838_v37 = vld [vmem:[%s26642_s16 + $0x6b0] sm:$0xf0]  ;;  %v17282_v50 = vld [vmem:[%s26642_s16 + $0x3b4] sm:$0xf0] }
 0xb08   : > { %8286 = vmatmul.bf16.vlgmr.msra.gmra.mxu1 %v22712_v24  ;;  %8299 = vmatmul.bf16.vlgmr.msrb.gmra.mxu2 %v22708_v34  ;;  %v14937_v17 = vor.u32 %v17395_v4, %v14934_v59  ;;  %v23822_v56 = vpop.f32.mrf.mxu3  ;;  %v17263_v20 = vld [vmem:[%s26642_s16 + $0x324] sm:$0xf]  ;;  %v14461_v4 = vor.u32 %v17282_v50, %v14460_v7  ;;  %v17444_v41 = vld [vmem:[%s26642_s16 + $0x8cc] sm:$0xf]  ;;  %v15086_v50 = vld [vmem:[%s26642_s16 + $0x898] sm:$0xf0] }
 0xb09   : > { %v17432_v7 = vld [vmem:[%s26642_s16 + $0x86c] sm:$0xf] }
 0xb0a   : > { %8305 = vmatpush.bf16.msra.mxu0 %v14697_v30  ;;  %8318 = vmatpush.bf16.msrb.mxu3 %v15081_v52  ;;  %v14502_v30 = vld [vmem:[%s26642_s16 + $0x410] sm:$0xf0]  ;;  %v14173_v52 = vor.u32 %v17210_v9, %v14172_v35  ;;  %v14028_v35 = vld [vmem:[%s26642_s16 + $0x28] sm:$0xf]  ;;  %v17174_v9 = vld [vmem:[%s26642_s16 + $0x54] sm:$0xf0] }
 0xb0b   : > { %8331 = vmatpush.bf16.msrb.mxu1 %v14317_v33  ;;  %8344 = vmatpush.bf16.msra.mxu2 %v14701_v22  ;;  %v17383_v33 = vld [vmem:[%s26642_s16 + $0x6e4] sm:$0xf]  ;;  %v14886_v22 = vld [vmem:[%s26642_s16 + $0x710] sm:$0xf0]  ;;  %v23833_v12 = vpop.f32.mrf.mxu2  ;;  %v8055_v19 = vpop.f32.mrf.mxu0 }
 0xb0c   : > { %v14029_v19 = vor.u32 %v17174_v9, %v14028_v35  ;;  %v14654_v35 = vld [vmem:[%s26642_s16 + $0x538] sm:$0xf0]  ;;  %v17420_v9 = vld [vmem:[%s26642_s16 + $0x80c] sm:$0xf] }
 0xb0d   : > { %v8081_v47 = vpop.f32.mrf.mxu1 }
 0xb0e   : > { %8306 = vmatpush.bf16.msra.mxu0 %v14649_v63  ;;  %8319 = vmatpush.bf16.msrb.mxu3 %v15033_v11  ;;  %v14505_v63 = vor.u32 %v17287_v43, %v14502_v30  ;;  %v14889_v11 = vor.u32 %v17383_v33, %v14886_v22  ;;  %v17450_v43 = vld [vmem:[%s26642_s16 + $0x8f4] sm:$0xf0]  ;;  %v17252_v30 = vld [vmem:[%s26642_s16 + $0x2cc] sm:$0xf]  ;;  %v14409_v33 = vor.u32 %v17263_v20, %v14406_v16  ;;  %v15036_v16 = vld [vmem:[%s26642_s16 + $0x808] sm:$0xf] }
 0xb0f   : > { %8332 = vmatpush.bf16.msrb.mxu1 %v14269_v49  ;;  %8345 = vmatpush.bf16.msra.mxu2 %v14653_v0  ;;  %v14509_v49 = vor.u32 %v17294_v38, %v14508_v39  ;;  %v17371_v0 = vld [vmem:[%s26642_s16 + $0x684] sm:$0xf]  ;;  %v15134_v39 = vld [vmem:[%s26642_s16 + $0x8f8] sm:$0xf0]  ;;  %v6479_v38 = vperm.slane %v23544_v44, 3 }
 0xb10   : > { %v8068_v59 = vpop.f32.mrf.mxu3 }
 0xb11   : > { %v8067_v20 = vadd.f32 %v23822_v56, %v6479_v38  ;;  %v17228_v56 = vld [vmem:[%s26642_s16 + $0x20c] sm:$0xf]  ;;  %v8408_v38 = vmul.f32 %v23608_v25, %v23608_v25 }
 0xb12   : > { %8307 = vmatpush.bf16.msra.mxu0 %v14601_v1  ;;  %8320 = vmatpush.bf16.msrb.mxu3 %v14985_v54  ;;  %v14457_v1 = vor.u32 %v17275_v42, %v14454_v48  ;;  %v14841_v54 = vor.u32 %v17371_v0, %v14838_v37  ;;  %v15084_v42 = vld [vmem:[%s26642_s16 + $0x868] sm:$0xf]  ;;  %v17438_v48 = vld [vmem:[%s26642_s16 + $0x894] sm:$0xf0]  ;;  %v17240_v0 = vld [vmem:[%s26642_s16 + $0x26c] sm:$0xf] }
 0xb13   : > { %8333 = vmatpush.bf16.msrb.mxu1 %v14221_v3  ;;  %8346 = vmatpush.bf16.msra.mxu2 %v14605_v55  ;;  %v14790_v3 = vld [vmem:[%s26642_s16 + $0x650] sm:$0xf0]  ;;  %v14077_v55 = vor.u32 %v17186_v13, %v14076_v57  ;;  %v8094_v62 = vpop.f32.mrf.mxu2  ;;  %v14318_v37 = vld [vmem:[%s26642_s16 + $0x298] sm:$0xf0]  ;;  %v17336_v57 = vld [vmem:[%s26642_s16 + $0x56c] sm:$0xf] }
 0xb14   : > { %v14793_v22 = vor.u32 %v17359_v21, %v14790_v3  ;;  %v14702_v13 = vld [vmem:[%s26642_s16 + $0x598] sm:$0xf0]  ;;  %v17426_v21 = vld [vmem:[%s26642_s16 + $0x834] sm:$0xf0]  ;;  %v17324_v59 = vld [vmem:[%s26642_s16 + $0x50c] sm:$0xf]  ;;  %v8080_v62 = vadd.f32 %v23790_v58, %v8067_v20  ;;  %v8420_v20 = vmul.f32 %v8408_v38, %v23608_v25 }
 0xb15   : > { %v14705_v3 = vor.u32 %v17336_v57, %v14702_v13  ;;  %v17300_v57 = vld [vmem:[%s26642_s16 + $0x44c] sm:$0xf]  ;;  %v14558_v13 = vld [vmem:[%s26642_s16 + $0x478] sm:$0xf0]  ;;  %v14844_v38 = vld [vmem:[%s26642_s16 + $0x688] sm:$0xf] }
 0xb16   : > { %8308 = vmatpush.bf16.msra.mxu0 %v14553_v60  ;;  %8321 = vmatpush.bf16.msrb.mxu3 %v14937_v17  ;;  %v17270_v60 = vld [vmem:[%s26642_s16 + $0x354] sm:$0xf0]  ;;  %v15132_v17 = vld [vmem:[%s26642_s16 + $0x8c8] sm:$0xf] }
 0xb17   : > { %8334 = vmatpush.bf16.msrb.mxu1 %v14173_v52  ;;  %8347 = vmatpush.bf16.msra.mxu2 %v14557_v26  ;;  %v14366_v52 = vld [vmem:[%s26642_s16 + $0x2f8] sm:$0xf0]  ;;  %v17348_v26 = vld [vmem:[%s26642_s16 + $0x5cc] sm:$0xf]  ;;  %v14413_v47 = vor.u32 %v17270_v60, %v14412_v45  ;;  %v15037_v60 = vor.u32 %v17426_v21, %v15036_v16 }
 0xb18   : > { %v15038_v45 = vld [vmem:[%s26642_s16 + $0x838] sm:$0xf0] }
 0xb19   : > { %v15041_v58 = vor.u32 %v17420_v9, %v15038_v45  ;;  %v17192_v9 = vld [vmem:[%s26642_s16 + $0xec] sm:$0xf]  ;;  %v14126_v45 = vld [vmem:[%s26642_s16 + $0x118] sm:$0xf0] }
 0xb1a   : > { %8309 = vmatpush.bf16.msra.mxu0 %v14505_v63  ;;  %8322 = vmatpush.bf16.msrb.mxu3 %v14889_v11  ;;  %v15133_v63 = vor.u32 %v17450_v43, %v15132_v17  ;;  %v14369_v11 = vor.u32 %v17252_v30, %v14366_v52  ;;  %v14988_v43 = vld [vmem:[%s26642_s16 + $0x7a8] sm:$0xf]  ;;  %v17414_v30 = vld [vmem:[%s26642_s16 + $0x7d4] sm:$0xf0]  ;;  %v14657_v52 = vor.u32 %v17324_v59, %v14654_v35 }
 0xb1b   : > { %8335 = vmatpush.bf16.msrb.mxu1 %v14125_v8  ;;  %8348 = vmatpush.bf16.msra.mxu2 %v14509_v49  ;;  %v14753_v8 = vor.u32 %v17348_v26, %v14750_v15  ;;  %v15137_v49 = vor.u32 %v17444_v41, %v15134_v39  ;;  %v17216_v26 = vld [vmem:[%s26642_s16 + $0x1ac] sm:$0xf]  ;;  %v14606_v15 = vld [vmem:[%s26642_s16 + $0x4d8] sm:$0xf0] }
 0xb1c   : > { %v17408_v41 = vld [vmem:[%s26642_s16 + $0x7ac] sm:$0xf]  ;;  %v14990_v39 = vld [vmem:[%s26642_s16 + $0x7d8] sm:$0xf0] }
 0xb1e   : > { %8310 = vmatpush.bf16.msra.mxu0 %v14457_v1  ;;  %8323 = vmatpush.bf16.msrb.mxu3 %v14841_v54  ;;  %v15085_v1 = vor.u32 %v17438_v48, %v15084_v42  ;;  %v14321_v54 = vor.u32 %v17240_v0, %v14318_v37  ;;  %v14989_v48 = vor.u32 %v17414_v30, %v14988_v43  ;;  %v17204_v0 = vld [vmem:[%s26642_s16 + $0x14c] sm:$0xf]  ;;  %v14174_v37 = vld [vmem:[%s26642_s16 + $0x178] sm:$0xf0] }
 0xb1f   : > { %8336 = vmatpush.bf16.msrb.mxu1 %v14077_v55  ;;  %8349 = vmatpush.bf16.msra.mxu2 %v14461_v4  ;;  %v15089_v55 = vor.u32 %v17432_v7, %v15086_v50  ;;  %v14270_v4 = vld [vmem:[%s26642_s16 + $0x238] sm:$0xf0]  ;;  %v17396_v7 = vld [vmem:[%s26642_s16 + $0x74c] sm:$0xf] }
 0xb20   : > { %v14273_v17 = vor.u32 %v17228_v56, %v14270_v4  ;;  %v14942_v50 = vld [vmem:[%s26642_s16 + $0x778] sm:$0xf0]  ;;  %v17390_v56 = vld [vmem:[%s26642_s16 + $0x714] sm:$0xf0]  ;;  %v14561_v4 = vor.u32 %v17300_v57, %v14558_v13  ;;  %v17384_v43 = vld [vmem:[%s26642_s16 + $0x6ec] sm:$0xf] }
 0xb21   : > { %v14945_v59 = vor.u32 %v17396_v7, %v14942_v50  ;;  %v14894_v30 = vld [vmem:[%s26642_s16 + $0x718] sm:$0xf0]  ;;  %v14796_v7 = vld [vmem:[%s26642_s16 + $0x628] sm:$0xf] }
 0xb22   : > { %8311 = vmatpush.bf16.msra.mxu0 %v14409_v33  ;;  %8324 = vmatpush.bf16.msrb.mxu3 %v14793_v22  ;;  %v14222_v33 = vld [vmem:[%s26642_s16 + $0x1d8] sm:$0xf0]  ;;  %v17312_v22 = vld [vmem:[%s26642_s16 + $0x4ac] sm:$0xf] }
 0xb23   : > { %8337 = vmatpush.bf16.msrb.mxu1 %v14029_v19  ;;  %8350 = vmatpush.bf16.msra.mxu2 %v14413_v47  ;;  %v23999_v19 = vadd.f32 %v23788_v2, %v23716_v32  ;;  %v24002_v47 = vadd.f32 %v23833_v12, %v8080_v62  ;;  %v17402_v32 = vld [vmem:[%s26642_s16 + $0x774] sm:$0xf0]  ;;  %v14609_v2 = vor.u32 %v17312_v22, %v14606_v15  ;;  %v17288_v62 = vld [vmem:[%s26642_s16 + $0x3ec] sm:$0xf] }
 0xb24   : > { %v14993_v12 = vor.u32 %v17408_v41, %v14990_v39  ;;  %v14129_v39 = vor.u32 %v17192_v9, %v14126_v45  ;;  %v14798_v45 = vld [vmem:[%s26642_s16 + $0x658] sm:$0xf0] }
 0xb25   : > { %8312 = vmatmul.bf16.vlgmr.msra.gmra.mxu0 %v22710_v61  ;;  %8325 = vmatmul.bf16.vlgmr.msrb.gmra.mxu3 %v22712_v24  ;;  %v24008_v42 = vpop.f32.mrf.mxu1 }
 0xb26   : > { %8356 = vmatpush.bf16.msrb.mxu0 %v15133_v63  ;;  %8369 = vmatpush.bf16.msra.mxu3 %v14369_v11  ;;  %v24004_v63 = vpop.f32.mrf.mxu0  ;;  %v8409_v11 = vmul.f32 %v23708_v40, %v23708_v40 }
 0xb27   : > { %8382 = vmatpush.bf16.msra.mxu1 %v14753_v8  ;;  %8395 = vmatpush.bf16.msrb.mxu2 %v15137_v49  ;;  %v14225_v8 = vor.u32 %v17216_v26, %v14222_v33  ;;  %v14940_v49 = vld [vmem:[%s26642_s16 + $0x748] sm:$0xf] }
 0xb28   : > { %8338 = vmatmul.bf16.vlgmr.msrb.gmra.mxu1 %v22708_v34  ;;  %8351 = vmatmul.bf16.vlgmr.msra.gmra.mxu2 %v22710_v61  ;;  %v8421_v16 = vmul.f32 %v8409_v11, %v23708_v40  ;;  %v14941_v21 = vor.u32 %v17402_v32, %v14940_v49  ;;  %v24046_v35 = vpop.f32.mrf.mxu3  ;;  %v17378_v11 = vld [vmem:[%s26642_s16 + $0x6b4] sm:$0xf0]  ;;  %v17180_v49 = vld [vmem:[%s26642_s16 + $0x8c] sm:$0xf]  ;;  %v14078_v32 = vld [vmem:[%s26642_s16 + $0xb8] sm:$0xf0] }
 0xb29   : > { %v14845_v50 = vor.u32 %v17378_v11, %v14844_v38  ;;  %v17545_v38 = vld [vmem:[%s26644_s18 + $0x2f0] sm:$0xf0] }
 0xb2a   : > { %8357 = vmatpush.bf16.msrb.mxu0 %v15085_v1  ;;  %8370 = vmatpush.bf16.msra.mxu3 %v14321_v54  ;;  %v8410_v1 = vmul.f32 %v23999_v19, %v23999_v19  ;;  %v8411_v54 = vmul.f32 %v24002_v47, %v24002_v47  ;;  %v8433_v22 = vmul.f32 0.044715, %v8421_v16  ;;  %v14030_v16 = vld [vmem:[%s26642_s16 + $0x58] sm:$0xf0] }
 0xb2b   : > { %8383 = vmatpush.bf16.msra.mxu1 %v14705_v3  ;;  %8396 = vmatpush.bf16.msrb.mxu2 %v15089_v55  ;;  %v14177_v3 = vor.u32 %v17204_v0, %v14174_v37  ;;  %v14892_v55 = vld [vmem:[%s26642_s16 + $0x6e8] sm:$0xf]  ;;  %v17372_v0 = vld [vmem:[%s26642_s16 + $0x68c] sm:$0xf]  ;;  %v14846_v37 = vld [vmem:[%s26642_s16 + $0x6b8] sm:$0xf0] }
 0xb2c   : > { %v8423_v26 = vmul.f32 %v8411_v54, %v24002_v47  ;;  %v14893_v41 = vor.u32 %v17390_v56, %v14892_v55  ;;  %v17168_v54 = vld [vmem:[%s26642_s16 + $0x2c] sm:$0xf] }
 0xb2d   : > { %v8133_v15 = vpop.f32.mrf.mxu1  ;;  %v17264_v56 = vld [vmem:[%s26642_s16 + $0x32c] sm:$0xf] }
 0xb2e   : > { %8358 = vmatpush.bf16.msrb.mxu0 %v15037_v60  ;;  %8371 = vmatpush.bf16.msra.mxu3 %v14273_v17  ;;  %v24057_v60 = vpop.f32.mrf.mxu2  ;;  %v14510_v17 = vld [vmem:[%s26642_s16 + $0x418] sm:$0xf0]  ;;  %v8107_v33 = vpop.f32.mrf.mxu0  ;;  %v8435_v13 = vmul.f32 0.044715, %v8423_v26  ;;  %v15416_v26 = vld [vmem:[%s26644_s18 + $0x228] sm:$0xf] }
 0xb2f   : > { %8384 = vmatpush.bf16.msra.mxu1 %v14657_v52  ;;  %8397 = vmatpush.bf16.msrb.mxu2 %v15041_v58  ;;  %v8432_v52 = vmul.f32 0.044715, %v8420_v20  ;;  %v8422_v58 = vmul.f32 %v8410_v1, %v23999_v19  ;;  %v14081_v20 = vor.u32 %v17180_v49, %v14078_v32  ;;  %v17366_v1 = vld [vmem:[%s26642_s16 + $0x654] sm:$0xf0]  ;;  %v8445_v33 = vadd.f32 %v8433_v22, %v23708_v40 }
 0xb30   : > { %v8120_v55 = vpop.f32.mrf.mxu3  ;;  %v14797_v15 = vor.u32 %v17366_v1, %v14796_v7  ;;  %v6480_v49 = vperm.slane %v23544_v44, 4  ;;  %v15308_v7 = vld [vmem:[%s26644_s18 + $0x150] sm:$0xf] }
 0xb31   : > { %v8434_v57 = vmul.f32 0.044715, %v8422_v58  ;;  %v17497_v58 = vld [vmem:[%s26644_s18 + $0x170] sm:$0xf0]  ;;  %v15500_v1 = vld [vmem:[%s26644_s18 + $0x2d0] sm:$0xf] }
 0xb32   : > { %8359 = vmatpush.bf16.msrb.mxu0 %v14989_v48  ;;  %8372 = vmatpush.bf16.msra.mxu3 %v14225_v8  ;;  %v14513_v48 = vor.u32 %v17288_v62, %v14510_v17  ;;  %v14897_v8 = vor.u32 %v17384_v43, %v14894_v30  ;;  %v15224_v62 = vld [vmem:[%s26644_s18 + $0xa8] sm:$0xf]  ;;  %v17473_v17 = vld [vmem:[%s26644_s18 + $0xb0] sm:$0xf0]  ;;  %v8444_v43 = vadd.f32 %v8432_v52, %v23608_v25 }
 0xb33   : > { %8385 = vmatpush.bf16.msra.mxu1 %v14609_v2  ;;  %8398 = vmatpush.bf16.msrb.mxu2 %v14993_v12  ;;  %v17276_v2 = vld [vmem:[%s26642_s16 + $0x38c] sm:$0xf]  ;;  %v14462_v12 = vld [vmem:[%s26642_s16 + $0x3b8] sm:$0xf0]  ;;  %v15320_v30 = vld [vmem:[%s26644_s18 + $0x168] sm:$0xf]  ;;  %v8446_v11 = vadd.f32 %v8434_v57, %v23999_v19  ;;  %v15225_v32 = vor.u32 %v17473_v17, %v15224_v62 }
 0xb34   : > { %v17521_v52 = vld [vmem:[%s26644_s18 + $0x230] sm:$0xf0] }
 0xb36   : > { %8360 = vmatpush.bf16.msrb.mxu0 %v14941_v21  ;;  %8373 = vmatpush.bf16.msra.mxu3 %v14177_v3  ;;  %v14465_v21 = vor.u32 %v17276_v2, %v14462_v12  ;;  %v14849_v3 = vor.u32 %v17372_v0, %v14846_v37  ;;  %v8146_v9 = vpop.f32.mrf.mxu2  ;;  %v15321_v2 = vor.u32 %v17497_v58, %v15320_v30  ;;  %v15212_v12 = vld [vmem:[%s26644_s18 + $0x90] sm:$0xf]  ;;  %v17470_v0 = vld [vmem:[%s26644_s18 + $0x98] sm:$0xf0]  ;;  %v17491_v30 = vld [vmem:[%s26644_s18 + $0x140] sm:$0xf0] }
 0xb37   : > { %8386 = vmatpush.bf16.msra.mxu1 %v14561_v4  ;;  %8399 = vmatpush.bf16.msrb.mxu2 %v14945_v59  ;;  %v14414_v4 = vld [vmem:[%s26642_s16 + $0x358] sm:$0xf0]  ;;  %v17360_v59 = vld [vmem:[%s26642_s16 + $0x62c] sm:$0xf]  ;;  %v15417_v37 = vor.u32 %v17521_v52, %v15416_v26  ;;  %v17467_v9 = vld [vmem:[%s26644_s18 + $0x80] sm:$0xf0] }
 0xb38   : > { %v14417_v22 = vor.u32 %v17264_v56, %v14414_v4  ;;  %v15213_v56 = vor.u32 %v17470_v0, %v15212_v12  ;;  %v15392_v58 = vld [vmem:[%s26644_s18 + $0x1f8] sm:$0xf] }
 0xb39   : > { %v15488_v26 = vld [vmem:[%s26644_s18 + $0x2b8] sm:$0xf] }
 0xb3a   : > { %8361 = vmatpush.bf16.msrb.mxu0 %v14893_v41  ;;  %8374 = vmatpush.bf16.msra.mxu3 %v14129_v39  ;;  %v14033_v41 = vor.u32 %v17168_v54, %v14030_v16  ;;  %v15512_v39 = vld [vmem:[%s26644_s18 + $0x2e8] sm:$0xf]  ;;  %v17542_v54 = vld [vmem:[%s26644_s18 + $0x2d8] sm:$0xf0]  ;;  %v8456_v16 = vmul.f32 0.7978846, %v8444_v43 }
 0xb3b   : > { %8387 = vmatpush.bf16.msra.mxu1 %v14513_v48  ;;  %8400 = vmatpush.bf16.msrb.mxu2 %v14897_v8  ;;  %v14801_v48 = vor.u32 %v17360_v59, %v14798_v45  ;;  %v8447_v8 = vadd.f32 %v8435_v13, %v24002_v47  ;;  %v15513_v57 = vor.u32 %v17545_v38, %v15512_v39  ;;  %v17494_v13 = vld [vmem:[%s26644_s18 + $0x158] sm:$0xf0]  ;;  %v15200_v59 = vld [vmem:[%s26644_s18 + $0x78] sm:$0xf]  ;;  %v15188_v39 = vld [vmem:[%s26644_s18 + $0x60] sm:$0xf] }
 0xb3c   : > { %v15309_v4 = vor.u32 %v17494_v13, %v15308_v7  ;;  %v8106_v45 = vadd.f32 %v24004_v63, %v6480_v49  ;;  %v15501_v17 = vor.u32 %v17542_v54, %v15500_v1  ;;  %v15296_v43 = vld [vmem:[%s26644_s18 + $0x138] sm:$0xf]  ;;  %v17515_v63 = vld [vmem:[%s26644_s18 + $0x200] sm:$0xf0]  ;;  %18054 = vtanh.f32 %v8456_v16  ;;  %v17464_v38 = vld [vmem:[%s26644_s18 + $0x68] sm:$0xf0] }
 0xb3d   : > { %v8459_v55 = vmul.f32 0.7978846, %v8447_v8  ;;  %v15297_v52 = vor.u32 %v17491_v30, %v15296_v43  ;;  %v17536_v8 = vld [vmem:[%s26644_s18 + $0x2a8] sm:$0xf0]  ;;  %v15189_v12 = vor.u32 %v17464_v38, %v15188_v39  ;;  %v15368_v1 = vld [vmem:[%s26644_s18 + $0x1c8] sm:$0xf] }
 0xb3e   : > { %8362 = vmatpush.bf16.msrb.mxu0 %v14845_v50  ;;  %8375 = vmatpush.bf16.msra.mxu3 %v14081_v20  ;;  %v15404_v50 = vld [vmem:[%s26644_s18 + $0x210] sm:$0xf]  ;;  %v17518_v20 = vld [vmem:[%s26644_s18 + $0x218] sm:$0xf0] }
 0xb3f   : > { %8388 = vmatpush.bf16.msra.mxu1 %v14465_v21  ;;  %8401 = vmatpush.bf16.msrb.mxu2 %v14849_v3  ;;  %v8457_v21 = vmul.f32 0.7978846, %v8445_v33  ;;  %v8458_v3 = vmul.f32 0.7978846, %v8446_v11  ;;  %v15405_v62 = vor.u32 %v17518_v20, %v15404_v50  ;;  %v17539_v33 = vld [vmem:[%s26644_s18 + $0x2c0] sm:$0xf0] }
 0xb40   : > { %v15380_v11 = vld [vmem:[%s26644_s18 + $0x1e0] sm:$0xf]  ;;  %v15272_v50 = vld [vmem:[%s26644_s18 + $0x108] sm:$0xf]  ;;  %v17485_v20 = vld [vmem:[%s26644_s18 + $0x110] sm:$0xf0] }
 0xb41   : > { %18056 = vtanh.f32 %v8457_v21  ;;  %v17509_v21 = vld [vmem:[%s26644_s18 + $0x1d0] sm:$0xf0]  ;;  %v17458_v43 = vld [vmem:[%s26644_s18 + $0x38] sm:$0xf0]  ;;  %v15452_v39 = vld [vmem:[%s26644_s18 + $0x270] sm:$0xf] }
 0xb42   : > { %8363 = vmatpush.bf16.msrb.mxu0 %v14797_v15  ;;  %8376 = vmatpush.bf16.msra.mxu3 %v14033_v41  ;;  %v8119_v15 = vadd.f32 %v24046_v35, %v8106_v45  ;;  %v15201_v41 = vor.u32 %v17467_v9, %v15200_v59  ;;  %18058 = vtanh.f32 %v8458_v3  ;;  %v17488_v35 = vld [vmem:[%s26644_s18 + $0x128] sm:$0xf0]  ;;  %v18055_v7 = vpop.eup %18054  ;;  %v15464_v3 = vld [vmem:[%s26644_s18 + $0x288] sm:$0xf]  ;;  %v15369_v30 = vor.u32 %v17509_v21, %v15368_v1  ;;  %v17530_v38 = vld [vmem:[%s26644_s18 + $0x278] sm:$0xf0] }
 0xb43   : > { %8389 = vmatpush.bf16.msra.mxu1 %v14417_v22  ;;  %8402 = vmatpush.bf16.msrb.mxu2 %v14801_v48  ;;  %18060 = vtanh.f32 %v8459_v55  ;;  %v17512_v22 = vld [vmem:[%s26644_s18 + $0x1e8] sm:$0xf0]  ;;  %v15476_v48 = vld [vmem:[%s26644_s18 + $0x2a0] sm:$0xf]  ;;  %v17533_v55 = vld [vmem:[%s26644_s18 + $0x290] sm:$0xf0] }
 0xb44   : > { %v24227_v49 = vadd.f32 %v24008_v42, %v8119_v15  ;;  %v15381_v42 = vor.u32 %v17512_v22, %v15380_v11  ;;  %v15477_v13 = vor.u32 %v17536_v8, %v15476_v48  ;;  %v8480_v9 = vadd.f32 1.0, %v18055_v7  ;;  %v15356_v15 = vld [vmem:[%s26644_s18 + $0x1b0] sm:$0xf]  ;;  %v15248_v7 = vld [vmem:[%s26644_s18 + $0xd8] sm:$0xf] }
 0xb45   : > { %8364 = vmatmul.bf16.vlgmr.msrb.gmra.mxu0 %v22712_v24  ;;  %8377 = vmatmul.bf16.vlgmr.msra.gmra.mxu3 %v22708_v34  ;;  %v6481_v34 = vperm.slane %v23544_v44, 5  ;;  %v15284_v44 = vld [vmem:[%s26644_s18 + $0x120] sm:$0xf]  ;;  %v15440_v1 = vld [vmem:[%s26644_s18 + $0x258] sm:$0xf] }
 0xb46   : > { %10456 = vmatpush.bf16.msra.mxu0 %v15225_v32  ;;  %10469 = vmatpush.bf16.msrb.mxu3 %v15321_v2  ;;  %v8157_v32 = vpop.f32.mrf.mxu0  ;;  %v24229_v2 = vpop.f32.mrf.mxu1  ;;  %v15285_v0 = vor.u32 %v17488_v35, %v15284_v44  ;;  %v8492_v22 = vmul.f32 0.5, %v8480_v9  ;;  %v17452_v9 = vld [vmem:[%s26644_s18 + $0x8] sm:$0xf0] }
 0xb47   : > { %10482 = vmatpush.bf16.msrb.mxu1 %v15417_v37  ;;  %10495 = vmatpush.bf16.msra.mxu2 %v15513_v57  ;;  %v15176_v37 = vld [vmem:[%s26644_s18 + $0x48] sm:$0xf]  ;;  %v17461_v57 = vld [vmem:[%s26644_s18 + $0x50] sm:$0xf0]  ;;  %v18057_v54 = vpop.eup %18056  ;;  %v8145_v16 = vadd.f32 %v24057_v60, %v6481_v34 }
 0xb48   : > { %8390 = vmatmul.bf16.vlgmr.msra.gmra.mxu1 %v22710_v61  ;;  %8403 = vmatmul.bf16.vlgmr.msrb.gmra.mxu2 %v22712_v24  ;;  %v15393_v61 = vor.u32 %v17515_v63, %v15392_v58  ;;  %v15489_v24 = vor.u32 %v17539_v33, %v15488_v26  ;;  %v15177_v60 = vor.u32 %v17461_v57, %v15176_v37  ;;  %v8170_v63 = vpop.f32.mrf.mxu3  ;;  %v15260_v26 = vld [vmem:[%s26644_s18 + $0xf0] sm:$0xf]  ;;  %v17482_v33 = vld [vmem:[%s26644_s18 + $0xf8] sm:$0xf0] }
 0xb49   : > { %v8158_v45 = vadd.f32 %v8157_v32, %v8145_v16  ;;  %v15465_v58 = vor.u32 %v17533_v55, %v15464_v3  ;;  %v15261_v32 = vor.u32 %v17482_v33, %v15260_v26  ;;  %v15453_v57 = vor.u32 %v17530_v38, %v15452_v39  ;;  %v15428_v33 = vld [vmem:[%s26644_s18 + $0x240] sm:$0xf] }
 0xb4a   : > { %10457 = vmatpush.bf16.msra.mxu0 %v15213_v56  ;;  %10470 = vmatpush.bf16.msrb.mxu3 %v15309_v4  ;;  %v18059_v56 = vpop.eup %18058  ;;  %v8412_v4 = vmul.f32 %v24227_v49, %v24227_v49  ;;  %v8504_v39 = vmul.f32 %v8492_v22, %v23608_v25 }
 0xb4b   : > { %10483 = vmatpush.bf16.msrb.mxu1 %v15405_v62  ;;  %10496 = vmatpush.bf16.msra.mxu2 %v15501_v17  ;;  %v18061_v59 = vpop.eup %18060  ;;  %v15273_v62 = vor.u32 %v17485_v20, %v15272_v50  ;;  %v15164_v17 = vld [vmem:[%s26644_s18 + $0x30] sm:$0xf]  ;;  %v24273_v34 = vadd.f32 %v8170_v63, %v8158_v45  ;;  %v17503_v20 = vld [vmem:[%s26644_s18 + $0x1a0] sm:$0xf0]  ;;  %v15236_v45 = vld [vmem:[%s26644_s18 + $0xc0] sm:$0xf] }
 0xb4c   : > { %v8483_v44 = vadd.f32 1.0, %v18061_v59  ;;  %v8424_v35 = vmul.f32 %v8412_v4, %v24227_v49  ;;  %v15165_v8 = vor.u32 %v17458_v43, %v15164_v17  ;;  %v15140_v59 = vld [vmem:[%s26644_s18] sm:$0xf]  ;;  %v17476_v43 = vld [vmem:[%s26644_s18 + $0xc8] sm:$0xf0] }
 0xb4d   : > { %v8413_v50 = vmul.f32 %v24273_v34, %v24273_v34  ;;  %v15141_v25 = vor.u32 %v17452_v9, %v15140_v59  ;;  %v15788_v59 = vld [vmem:[%s26644_s18 + $0x510] sm:$0xf] }
 0xb4e   : > { %10458 = vmatpush.bf16.msra.mxu0 %v15201_v41  ;;  %10471 = vmatpush.bf16.msrb.mxu3 %v15297_v52  ;;  %v24275_v41 = vpop.f32.mrf.mxu2  ;;  %v17506_v52 = vld [vmem:[%s26644_s18 + $0x1b8] sm:$0xf0]  ;;  %v8159_v11 = vpop.f32.mrf.mxu0  ;;  %v8495_v3 = vmul.f32 0.5, %v8483_v44  ;;  %v8436_v55 = vmul.f32 0.044715, %v8424_v35 }
 0xb4f   : > { %10484 = vmatpush.bf16.msrb.mxu1 %v15393_v61  ;;  %10497 = vmatpush.bf16.msra.mxu2 %v15489_v24  ;;  %v8481_v61 = vadd.f32 1.0, %v18057_v54  ;;  %v8482_v24 = vadd.f32 1.0, %v18059_v56  ;;  %v8185_v48 = vpop.f32.mrf.mxu1  ;;  %v15357_v37 = vor.u32 %v17506_v52, %v15356_v15  ;;  %v17527_v54 = vld [vmem:[%s26644_s18 + $0x260] sm:$0xf0]  ;;  %v8425_v63 = vmul.f32 %v8413_v50, %v24273_v34  ;;  %v17524_v15 = vld [vmem:[%s26644_s18 + $0x248] sm:$0xf0] }
 0xb50   : > { %v8172_v17 = vpop.f32.mrf.mxu3  ;;  %v15608_v52 = vld [vmem:[%s26644_s18 + $0x3a8] sm:$0xf]  ;;  %v17593_v35 = vld [vmem:[%s26644_s18 + $0x470] sm:$0xf0]  ;;  %v8507_v11 = vmul.f32 %v8495_v3, %v24002_v47  ;;  %v15429_v48 = vor.u32 %v17524_v15, %v15428_v33  ;;  %v17590_v50 = vld [vmem:[%s26644_s18 + $0x458] sm:$0xf0] }
 0xb51   : > { %v8493_v16 = vmul.f32 0.5, %v8481_v61  ;;  %v8494_v21 = vmul.f32 0.5, %v8482_v24  ;;  %v17569_v24 = vld [vmem:[%s26644_s18 + $0x3b0] sm:$0xf0]  ;;  %v15704_v44 = vld [vmem:[%s26644_s18 + $0x468] sm:$0xf] }
 0xb52   : > { %10459 = vmatpush.bf16.msra.mxu0 %v15189_v12  ;;  %10472 = vmatpush.bf16.msrb.mxu3 %v15285_v0  ;;  %v15152_v12 = vld [vmem:[%s26644_s18 + $0x18] sm:$0xf]  ;;  %v17455_v0 = vld [vmem:[%s26644_s18 + $0x20] sm:$0xf0]  ;;  %v17617_v47 = vld [vmem:[%s26644_s18 + $0x530] sm:$0xf0]  ;;  %v24391_v3 = vpack.c.bf16 %v8507_v11, %v8507_v11 }
 0xb53   : > { %10485 = vmatpush.bf16.msrb.mxu1 %v15381_v42  ;;  %10498 = vmatpush.bf16.msra.mxu2 %v15477_v13  ;;  %v17479_v42 = vld [vmem:[%s26644_s18 + $0xe0] sm:$0xf0]  ;;  %v15344_v13 = vld [vmem:[%s26644_s18 + $0x198] sm:$0xf]  ;;  %v15153_v56 = vor.u32 %v17455_v0, %v15152_v12  ;;  %v8505_v38 = vmul.f32 %v8493_v16, %v23708_v40  ;;  %v8506_v61 = vmul.f32 %v8494_v21, %v23999_v19  ;;  %v8437_v12 = vmul.f32 0.044715, %v8425_v63 }
 0xb54   : > { %v15249_v4 = vor.u32 %v17479_v42, %v15248_v7  ;;  %v15237_v40 = vor.u32 %v17476_v43, %v15236_v45  ;;  %v8448_v19 = vadd.f32 %v8436_v55, %v24227_v49  ;;  %v15609_v0 = vor.u32 %v17569_v24, %v15608_v52  ;;  %v17641_v7 = vld [vmem:[%s26644_s18 + $0x5f0] sm:$0xf0]  ;;  %v17566_v42 = vld [vmem:[%s26644_s18 + $0x398] sm:$0xf0]  ;;  %v24388_v16 = vld [vmem:[%s26643_s17] sm:$0xff] }
 0xb55   : > { %v6482_v21 = vperm.slane %v24388_v16, 6  ;;  %v8449_v45 = vadd.f32 %v8437_v12, %v24273_v34  ;;  %v17614_v17 = vld [vmem:[%s26644_s18 + $0x518] sm:$0xf0]  ;;  %v15884_v43 = vld [vmem:[%s26644_s18 + $0x5d0] sm:$0xf] }
 0xb56   : > { %10460 = vmatpush.bf16.msra.mxu0 %v15177_v60  ;;  %10473 = vmatpush.bf16.msrb.mxu3 %v15273_v62  ;;  %v15345_v60 = vor.u32 %v17503_v20, %v15344_v13  ;;  %v15441_v62 = vor.u32 %v17527_v54, %v15440_v1  ;;  %v8198_v26 = vpop.f32.mrf.mxu2  ;;  %v15692_v13 = vld [vmem:[%s26644_s18 + $0x450] sm:$0xf]  ;;  %v24379_v20 = vpack.c.bf16 %v8504_v39, %v8504_v39  ;;  %v8460_v55 = vmul.f32 0.7978846, %v8448_v19  ;;  %v15680_v63 = vld [vmem:[%s26644_s18 + $0x438] sm:$0xf] }
 0xb57   : > { %10486 = vmatpush.bf16.msrb.mxu1 %v15369_v30  ;;  %10499 = vmatpush.bf16.msra.mxu2 %v15465_v58  ;;  %v15332_v30 = vld [vmem:[%s26644_s18 + $0x180] sm:$0xf]  ;;  %v17500_v58 = vld [vmem:[%s26644_s18 + $0x188] sm:$0xf0]  ;;  %v24381_v1 = vpack.c.bf16 %v8505_v38, %v8505_v38  ;;  %v24383_v54 = vpack.c.bf16 %v8506_v61, %v8506_v61  ;;  %v17587_v26 = vld [vmem:[%s26644_s18 + $0x440] sm:$0xf0]  ;;  %v15789_v15 = vor.u32 %v17614_v17, %v15788_v59 }
 0xb58   : > { %v15333_v22 = vor.u32 %v17500_v58, %v15332_v30  ;;  %v17638_v30 = vld [vmem:[%s26644_s18 + $0x5d8] sm:$0xf0]  ;;  %v17563_v58 = vld [vmem:[%s26644_s18 + $0x380] sm:$0xf0]  ;;  %v15572_v33 = vld [vmem:[%s26644_s18 + $0x360] sm:$0xf]  ;;  %v8184_v61 = vadd.f32 %v24229_v2, %v6482_v21  ;;  %18062 = vtanh.f32 %v8460_v55 }
 0xb59   : > { %v15776_v52 = vld [vmem:[%s26644_s18 + $0x4f8] sm:$0xf]  ;;  %v17611_v39 = vld [vmem:[%s26644_s18 + $0x500] sm:$0xf0]  ;;  %v15885_v38 = vor.u32 %v17638_v30, %v15884_v43  ;;  %v8461_v24 = vmul.f32 0.7978846, %v8449_v45 }
 0xb5a   : > { %10461 = vmatpush.bf16.msra.mxu0 %v15165_v8  ;;  %10474 = vmatpush.bf16.msrb.mxu3 %v15261_v32  ;;  %v15596_v8 = vld [vmem:[%s26644_s18 + $0x390] sm:$0xf]  ;;  %v15800_v32 = vld [vmem:[%s26644_s18 + $0x528] sm:$0xf]  ;;  %v15872_v11 = vld [vmem:[%s26644_s18 + $0x5b8] sm:$0xf] }
 0xb5b   : > { %10487 = vmatpush.bf16.msrb.mxu1 %v15357_v37  ;;  %10500 = vmatpush.bf16.msra.mxu2 %v15453_v57  ;;  %v15705_v37 = vor.u32 %v17593_v35, %v15704_v44  ;;  %v15896_v57 = vld [vmem:[%s26644_s18 + $0x5e8] sm:$0xf]  ;;  %v15681_v35 = vor.u32 %v17587_v26, %v15680_v63  ;;  %v15668_v2 = vld [vmem:[%s26644_s18 + $0x420] sm:$0xf]  ;;  %v17584_v19 = vld [vmem:[%s26644_s18 + $0x428] sm:$0xf0]  ;;  %18064 = vtanh.f32 %v8461_v24 }
 0xb5c   : > { %v15897_v9 = vor.u32 %v17641_v7, %v15896_v57  ;;  %v15669_v57 = vor.u32 %v17584_v19, %v15668_v2  ;;  %v17608_v7 = vld [vmem:[%s26644_s18 + $0x4e8] sm:$0xf0]  ;;  %v15656_v21 = vld [vmem:[%s26644_s18 + $0x408] sm:$0xf]  ;;  %v17581_v55 = vld [vmem:[%s26644_s18 + $0x410] sm:$0xf0] }
 0xb5d   : > { %v17554_v45 = vld [vmem:[%s26644_s18 + $0x338] sm:$0xf0]  ;;  %v15657_v30 = vor.u32 %v17581_v55, %v15656_v21  ;;  %v15848_v63 = vld [vmem:[%s26644_s18 + $0x588] sm:$0xf]  ;;  %v17629_v26 = vld [vmem:[%s26644_s18 + $0x590] sm:$0xf0] }
 0xb5e   : > { %10462 = vmatpush.bf16.msra.mxu0 %v15153_v56  ;;  %10475 = vmatpush.bf16.msrb.mxu3 %v15249_v4  ;;  %v15584_v56 = vld [vmem:[%s26644_s18 + $0x378] sm:$0xf]  ;;  %v15801_v4 = vor.u32 %v17617_v47, %v15800_v32  ;;  %v15777_v32 = vor.u32 %v17611_v39, %v15776_v52  ;;  %v15764_v47 = vld [vmem:[%s26644_s18 + $0x4e0] sm:$0xf]  ;;  %v18063_v59 = vpop.eup %18062  ;;  %v17578_v52 = vld [vmem:[%s26644_s18 + $0x3f8] sm:$0xf0] }
 0xb5f   : > { %10488 = vmatpush.bf16.msrb.mxu1 %v15345_v60  ;;  %10501 = vmatpush.bf16.msra.mxu2 %v15441_v62  ;;  %v15597_v60 = vor.u32 %v17566_v42, %v15596_v8  ;;  %v15693_v62 = vor.u32 %v17590_v50, %v15692_v13  ;;  %v15585_v44 = vor.u32 %v17563_v58, %v15584_v56  ;;  %v15560_v8 = vld [vmem:[%s26644_s18 + $0x348] sm:$0xf]  ;;  %v15860_v42 = vld [vmem:[%s26644_s18 + $0x5a0] sm:$0xf]  ;;  %v17632_v13 = vld [vmem:[%s26644_s18 + $0x5a8] sm:$0xf0] }
 0xb60   : > { %v17557_v50 = vld [vmem:[%s26644_s18 + $0x350] sm:$0xf0]  ;;  %v15861_v17 = vor.u32 %v17632_v13, %v15860_v42  ;;  %v15740_v19 = vld [vmem:[%s26644_s18 + $0x4b0] sm:$0xf]  ;;  %v15632_v42 = vld [vmem:[%s26644_s18 + $0x3d8] sm:$0xf] }
 0xb61   : > { %v17605_v58 = vld [vmem:[%s26644_s18 + $0x4d0] sm:$0xf0]  ;;  %v18065_v39 = vpop.eup %18064  ;;  %v15524_v55 = vld [vmem:[%s26644_s18 + $0x300] sm:$0xf] }
 0xb62   : > { %10463 = vmatpush.bf16.msra.mxu0 %v15141_v25  ;;  %10476 = vmatpush.bf16.msrb.mxu3 %v15237_v40  ;;  %v17635_v25 = vld [vmem:[%s26644_s18 + $0x5c0] sm:$0xf0]  ;;  %v17560_v40 = vld [vmem:[%s26644_s18 + $0x368] sm:$0xf0] }
 0xb63   : > { %10489 = vmatpush.bf16.msrb.mxu1 %v15333_v22  ;;  %10502 = vmatpush.bf16.msra.mxu2 %v15429_v48  ;;  %v8197_v22 = vadd.f32 %v24275_v41, %v8184_v61  ;;  %v8209_v48 = vpop.f32.mrf.mxu0  ;;  %v15873_v12 = vor.u32 %v17635_v25, %v15872_v11  ;;  %v15573_v41 = vor.u32 %v17560_v40, %v15572_v33  ;;  %v15536_v25 = vld [vmem:[%s26644_s18 + $0x318] sm:$0xf]  ;;  %v17551_v40 = vld [vmem:[%s26644_s18 + $0x320] sm:$0xf0] }
 0xb65   : > { %10464 = vmatmul.bf16.vlgmr.msra.gmra.mxu0 %v24379_v20  ;;  %10477 = vmatmul.bf16.vlgmr.msrb.gmra.mxu3 %v24381_v1 }
 0xb66   : > { %10508 = vmatpush.bf16.msrb.mxu0 %v15609_v0  ;;  %10521 = vmatpush.bf16.msra.mxu3 %v15705_v37  ;;  %v24454_v0 = vadd.f32 %v8209_v48, %v8197_v22  ;;  %v8235_v37 = vpop.f32.mrf.mxu1  ;;  %v15849_v22 = vor.u32 %v17629_v26, %v15848_v63  ;;  %v17572_v26 = vld [vmem:[%s26644_s18 + $0x3c8] sm:$0xf0] }
 0xb67   : > { %10490 = vmatmul.bf16.vlgmr.msrb.gmra.mxu1 %v24383_v54  ;;  %10503 = vmatmul.bf16.vlgmr.msra.gmra.mxu2 %v24391_v3 }
 0xb68   : > { %10534 = vmatpush.bf16.msra.mxu1 %v15801_v4  ;;  %10547 = vmatpush.bf16.msrb.mxu2 %v15897_v9  ;;  %v8414_v56 = vmul.f32 %v24454_v0, %v24454_v0  ;;  %v6483_v4 = vperm.slane %v24388_v16, 7  ;;  %v15548_v9 = vld [vmem:[%s26644_s18 + $0x330] sm:$0xf]  ;;  %v15561_v16 = vor.u32 %v17557_v50, %v15560_v8  ;;  %v8222_v33 = vpop.f32.mrf.mxu3 }
 0xb69   : > { %v15549_v11 = vor.u32 %v17554_v45, %v15548_v9  ;;  %v15728_v9 = vld [vmem:[%s26644_s18 + $0x498] sm:$0xf] }
 0xb6a   : > { %10509 = vmatpush.bf16.msrb.mxu0 %v15597_v60  ;;  %10522 = vmatpush.bf16.msra.mxu3 %v15693_v62  ;;  %v15765_v60 = vor.u32 %v17608_v7, %v15764_v47  ;;  %v15752_v62 = vld [vmem:[%s26644_s18 + $0x4c8] sm:$0xf]  ;;  %v8426_v43 = vmul.f32 %v8414_v56, %v24454_v0  ;;  %v8223_v24 = vadd.f32 %v8222_v33, %v6483_v4  ;;  %v8485_v7 = vadd.f32 1.0, %v18065_v39  ;;  %v17548_v56 = vld [vmem:[%s26644_s18 + $0x308] sm:$0xf0] }
 0xb6b   : > { %v15753_v2 = vor.u32 %v17605_v58, %v15752_v62  ;;  %v15620_v4 = vld [vmem:[%s26644_s18 + $0x3c0] sm:$0xf]  ;;  %v15537_v62 = vor.u32 %v17551_v40, %v15536_v25  ;;  %v15992_v33 = vld [vmem:[%s26644_s18 + $0x6a8] sm:$0xf]  ;;  %v17665_v39 = vld [vmem:[%s26644_s18 + $0x6b0] sm:$0xf0]  ;;  %v15525_v25 = vor.u32 %v17548_v56, %v15524_v55 }
 0xb6c   : > { %10535 = vmatpush.bf16.msra.mxu1 %v15789_v15  ;;  %10548 = vmatpush.bf16.msrb.mxu2 %v15885_v38  ;;  %v15644_v15 = vld [vmem:[%s26644_s18 + $0x3f0] sm:$0xf]  ;;  %v8484_v38 = vadd.f32 1.0, %v18063_v59  ;;  %v8438_v61 = vmul.f32 0.044715, %v8426_v43  ;;  %v8236_v8 = vadd.f32 %v8235_v37, %v8223_v24  ;;  %v8497_v58 = vmul.f32 0.5, %v8485_v7 }
 0xb6d   : > { %v15645_v47 = vor.u32 %v17578_v52, %v15644_v15  ;;  %v17575_v37 = vld [vmem:[%s26644_s18 + $0x3e0] sm:$0xf0]  ;;  %v15621_v40 = vor.u32 %v17572_v26, %v15620_v4  ;;  %v17686_v7 = vld [vmem:[%s26644_s18 + $0x758] sm:$0xf0]  ;;  %v17713_v26 = vld [vmem:[%s26644_s18 + $0x830] sm:$0xf0] }
 0xb6e   : > { %10510 = vmatpush.bf16.msrb.mxu0 %v15585_v44  ;;  %10523 = vmatpush.bf16.msra.mxu3 %v15681_v35  ;;  %v8248_v44 = vpop.f32.mrf.mxu2  ;;  %v8211_v35 = vpop.f32.mrf.mxu0  ;;  %v8450_v48 = vadd.f32 %v8438_v61, %v24454_v0  ;;  %v8496_v13 = vmul.f32 0.5, %v8484_v38  ;;  %v17599_v43 = vld [vmem:[%s26644_s18 + $0x4a0] sm:$0xf0]  ;;  %v16088_v38 = vld [vmem:[%s26644_s18 + $0x768] sm:$0xf] }
 0xb6f   : > { %v24527_v21 = vadd.f32 %v8248_v44, %v8236_v8  ;;  %v17689_v61 = vld [vmem:[%s26644_s18 + $0x770] sm:$0xf0]  ;;  %v15729_v24 = vor.u32 %v17599_v43, %v15728_v9  ;;  %v15968_v9 = vld [vmem:[%s26644_s18 + $0x678] sm:$0xf] }
 0xb70   : > { %10536 = vmatpush.bf16.msra.mxu1 %v15777_v32  ;;  %10549 = vmatpush.bf16.msrb.mxu2 %v15873_v12  ;;  %v8237_v32 = vpop.f32.mrf.mxu1  ;;  %v17602_v12 = vld [vmem:[%s26644_s18 + $0x4b8] sm:$0xf0]  ;;  %v8462_v50 = vmul.f32 0.7978846, %v8450_v48  ;;  %v8224_v63 = vpop.f32.mrf.mxu3  ;;  %v8508_v35 = vmul.f32 %v8496_v13, %v24227_v49  ;;  %v15993_v48 = vor.u32 %v17665_v39, %v15992_v33  ;;  %v17596_v49 = vld [vmem:[%s26644_s18 + $0x488] sm:$0xf0]  ;;  %v16089_v8 = vor.u32 %v17689_v61, %v16088_v38 }
 0xb71   : > { %v15741_v59 = vor.u32 %v17602_v12, %v15740_v19  ;;  %v15716_v19 = vld [vmem:[%s26644_s18 + $0x480] sm:$0xf]  ;;  %v17656_v33 = vld [vmem:[%s26644_s18 + $0x668] sm:$0xf0]  ;;  %v24638_v38 = vld [vmem:[%s26643_s17 + $0x8] sm:$0xf] }
 0xb72   : > { %10511 = vmatpush.bf16.msrb.mxu0 %v15573_v41  ;;  %10524 = vmatpush.bf16.msra.mxu3 %v15669_v57  ;;  %v15836_v41 = vld [vmem:[%s26644_s18 + $0x570] sm:$0xf]  ;;  %v17626_v57 = vld [vmem:[%s26644_s18 + $0x578] sm:$0xf0]  ;;  %18066 = vtanh.f32 %v8462_v50  ;;  %v15812_v32 = vld [vmem:[%s26644_s18 + $0x540] sm:$0xf]  ;;  %v15717_v50 = vor.u32 %v17596_v49, %v15716_v19 }
 0xb73   : > { %v15837_v45 = vor.u32 %v17626_v57, %v15836_v41  ;;  %v16076_v57 = vld [vmem:[%s26644_s18 + $0x750] sm:$0xf] }
 0xb74   : > { %10537 = vmatpush.bf16.msra.mxu1 %v15765_v60  ;;  %10550 = vmatpush.bf16.msrb.mxu2 %v15861_v17  ;;  %v8415_v60 = vmul.f32 %v24527_v21, %v24527_v21  ;;  %v15633_v17 = vor.u32 %v17575_v37, %v15632_v42  ;;  %v24595_v37 = vpack.c.bf16 %v8508_v35, %v8508_v35 }
 0xb76   : > { %10512 = vmatpush.bf16.msrb.mxu0 %v15561_v16  ;;  %10525 = vmatpush.bf16.msra.mxu3 %v15657_v30  ;;  %v15824_v16 = vld [vmem:[%s26644_s18 + $0x558] sm:$0xf]  ;;  %v17623_v30 = vld [vmem:[%s26644_s18 + $0x560] sm:$0xf0]  ;;  %v8427_v15 = vmul.f32 %v8415_v60, %v24527_v21  ;;  %v8250_v52 = vpop.f32.mrf.mxu2 }
 0xb77   : > { %v15825_v44 = vor.u32 %v17623_v30, %v15824_v16  ;;  %v17659_v60 = vld [vmem:[%s26644_s18 + $0x680] sm:$0xf0]  ;;  %v17680_v52 = vld [vmem:[%s26644_s18 + $0x728] sm:$0xf0] }
 0xb78   : > { %10538 = vmatpush.bf16.msra.mxu1 %v15753_v2  ;;  %10551 = vmatpush.bf16.msrb.mxu2 %v15849_v22  ;;  %v15980_v2 = vld [vmem:[%s26644_s18 + $0x690] sm:$0xf]  ;;  %v8509_v22 = vmul.f32 %v8497_v58, %v24273_v34  ;;  %v18067_v12 = vpop.eup %18066  ;;  %v17662_v34 = vld [vmem:[%s26644_s18 + $0x698] sm:$0xf0]  ;;  %v15969_v30 = vor.u32 %v17659_v60, %v15968_v9  ;;  %v15956_v58 = vld [vmem:[%s26644_s18 + $0x660] sm:$0xf] }
 0xb79   : > { %v8486_v42 = vadd.f32 1.0, %v18067_v12  ;;  %v15957_v35 = vor.u32 %v17656_v33, %v15956_v58  ;;  %v17674_v9 = vld [vmem:[%s26644_s18 + $0x6f8] sm:$0xf0]  ;;  %v17737_v60 = vld [vmem:[%s26644_s18 + $0x8f0] sm:$0xf0] }
 0xb7a   : > { %10513 = vmatpush.bf16.msrb.mxu0 %v15549_v11  ;;  %10526 = vmatpush.bf16.msra.mxu3 %v15645_v47  ;;  %v8439_v11 = vmul.f32 0.044715, %v8427_v15  ;;  %v17620_v47 = vld [vmem:[%s26644_s18 + $0x548] sm:$0xf0]  ;;  %v24597_v56 = vpack.c.bf16 %v8509_v22, %v8509_v22  ;;  %v16052_v15 = vld [vmem:[%s26644_s18 + $0x720] sm:$0xf] }
 0xb7b   : > { %v15813_v55 = vor.u32 %v17620_v47, %v15812_v32  ;;  %v8498_v4 = vmul.f32 0.5, %v8486_v42  ;;  %v15944_v22 = vld [vmem:[%s26644_s18 + $0x648] sm:$0xf]  ;;  %v17677_v47 = vld [vmem:[%s26644_s18 + $0x710] sm:$0xf0] }
 0xb7c   : > { %10539 = vmatpush.bf16.msra.mxu1 %v15741_v59  ;;  %10552 = vmatpush.bf16.msrb.mxu2 %v15837_v45  ;;  %v8451_v41 = vadd.f32 %v8439_v11, %v24527_v21  ;;  %v15981_v59 = vor.u32 %v17662_v34, %v15980_v2  ;;  %v16077_v45 = vor.u32 %v17686_v7, %v16076_v57  ;;  %v6484_v2 = vperm.slane %v24638_v38, 0  ;;  %v16040_v32 = vld [vmem:[%s26644_s18 + $0x708] sm:$0xf]  ;;  %v16160_v34 = vld [vmem:[%s26644_s18 + $0x7f8] sm:$0xf] }
 0xb7d   : > { %v8510_v43 = vmul.f32 %v8498_v4, %v24454_v0  ;;  %v16184_v0 = vld [vmem:[%s26644_s18 + $0x828] sm:$0xf]  ;;  %v16053_v11 = vor.u32 %v17680_v52, %v16052_v15  ;;  %v17707_v57 = vld [vmem:[%s26644_s18 + $0x800] sm:$0xf0]  ;;  %v15932_v42 = vld [vmem:[%s26644_s18 + $0x630] sm:$0xf] }
 0xb7e   : > { %10514 = vmatpush.bf16.msrb.mxu0 %v15537_v62  ;;  %10527 = vmatpush.bf16.msra.mxu3 %v15633_v17  ;;  %v8463_v13 = vmul.f32 0.7978846, %v8451_v41  ;;  %v16064_v62 = vld [vmem:[%s26644_s18 + $0x738] sm:$0xf]  ;;  %v17683_v17 = vld [vmem:[%s26644_s18 + $0x740] sm:$0xf0]  ;;  %v16185_v39 = vor.u32 %v17713_v26, %v16184_v0 }
 0xb7f   : > { %v24614_v16 = vpack.c.bf16 %v8510_v43, %v8510_v43  ;;  %v16065_v63 = vor.u32 %v17683_v17, %v16064_v62  ;;  %v17704_v0 = vld [vmem:[%s26644_s18 + $0x7e8] sm:$0xf0]  ;;  %v15920_v15 = vld [vmem:[%s26644_s18 + $0x618] sm:$0xf]  ;;  %v17647_v52 = vld [vmem:[%s26644_s18 + $0x620] sm:$0xf0] }
 0xb80   : > { %10540 = vmatpush.bf16.msra.mxu1 %v15729_v24  ;;  %10553 = vmatpush.bf16.msrb.mxu2 %v15825_v44  ;;  %18068 = vtanh.f32 %v8463_v13  ;;  %v16041_v13 = vor.u32 %v17677_v47, %v16040_v32  ;;  %v17472_v32 = vld [vmem:[%s26644_s18 + $0xac] sm:$0xf]  ;;  %v15226_v47 = vld [vmem:[%s26644_s18 + $0xb4] sm:$0xf0] }
 0xb82   : > { %10515 = vmatpush.bf16.msrb.mxu0 %v15525_v25  ;;  %10528 = vmatpush.bf16.msra.mxu3 %v15621_v40  ;;  %v8261_v44 = vpop.f32.mrf.mxu0  ;;  %v16172_v25 = vld [vmem:[%s26644_s18 + $0x810] sm:$0xf]  ;;  %v17710_v40 = vld [vmem:[%s26644_s18 + $0x818] sm:$0xf0] }
 0xb83   : > { %v16173_v49 = vor.u32 %v17710_v40, %v16172_v25  ;;  %v8262_v7 = vadd.f32 %v8261_v44, %v6484_v2  ;;  %v17671_v44 = vld [vmem:[%s26644_s18 + $0x6e0] sm:$0xf0]  ;;  %v15908_v40 = vld [vmem:[%s26644_s18 + $0x600] sm:$0xf] }
 0xb84   : > { %10541 = vmatpush.bf16.msra.mxu1 %v15717_v50  ;;  %10554 = vmatpush.bf16.msrb.mxu2 %v15813_v55  ;;  %v16028_v50 = vld [vmem:[%s26644_s18 + $0x6f0] sm:$0xf]  ;;  %v16161_v55 = vor.u32 %v17707_v57, %v16160_v34 }
 0xb85   : > { %10516 = vmatmul.bf16.vlgmr.msrb.gmra.mxu0 %v24595_v37  ;;  %10529 = vmatmul.bf16.vlgmr.msra.gmra.mxu3 %v24597_v56  ;;  %v8287_v19 = vpop.f32.mrf.mxu1 }
 0xb86   : > { %10560 = vmatpush.bf16.msra.mxu0 %v15993_v48  ;;  %10573 = vmatpush.bf16.msrb.mxu3 %v16089_v8  ;;  %v18069_v61 = vpop.eup %18068  ;;  %v17653_v48 = vld [vmem:[%s26644_s18 + $0x650] sm:$0xf0] }
 0xb87   : > { %10542 = vmatmul.bf16.vlgmr.msra.gmra.mxu1 %v24614_v16  ;;  %v8487_v24 = vadd.f32 1.0, %v18069_v61  ;;  %v15945_v41 = vor.u32 %v17653_v48, %v15944_v22  ;;  %v16016_v61 = vld [vmem:[%s26644_s18 + $0x6d8] sm:$0xf]  ;;  %v17644_v22 = vld [vmem:[%s26644_s18 + $0x608] sm:$0xf0] }
 0xb88   : > { %10586 = vmatpush.bf16.msrb.mxu1 %v16185_v39  ;;  %v16029_v39 = vor.u32 %v17674_v9, %v16028_v50  ;;  %v16136_v48 = vld [vmem:[%s26644_s18 + $0x7c8] sm:$0xf] }
 0xb89   : > { %v8499_v8 = vmul.f32 0.5, %v8487_v24 }
 0xb8a   : > { %10561 = vmatpush.bf16.msra.mxu0 %v15981_v59  ;;  %10574 = vmatpush.bf16.msrb.mxu3 %v16077_v45  ;;  %v8274_v59 = vpop.f32.mrf.mxu3  ;;  %v16280_v45 = vld [vmem:[%s26644_s18 + $0x8e8] sm:$0xf] }
 0xb8b   : > { %v8511_v12 = vmul.f32 %v8499_v8, %v24527_v21  ;;  %v17650_v21 = vld [vmem:[%s26644_s18 + $0x638] sm:$0xf0]  ;;  %v8275_v62 = vadd.f32 %v8274_v59, %v8262_v7  ;;  %v24686_v17 = vpop.f32.mrf.mxu2  ;;  %v16281_v43 = vor.u32 %v17737_v60, %v16280_v45  ;;  %v17668_v7 = vld [vmem:[%s26644_s18 + $0x6c8] sm:$0xf0]  ;;  %v15322_v59 = vld [vmem:[%s26644_s18 + $0x174] sm:$0xf0]  ;;  %v15909_v45 = vor.u32 %v17644_v22, %v15908_v40 }
 0xb8c   : > { %10587 = vmatpush.bf16.msrb.mxu1 %v16173_v49  ;;  %v15933_v58 = vor.u32 %v17650_v21, %v15932_v42  ;;  %v17701_v49 = vld [vmem:[%s26644_s18 + $0x7d0] sm:$0xf0]  ;;  %v16256_v42 = vld [vmem:[%s26644_s18 + $0x8b8] sm:$0xf]  ;;  %v17731_v21 = vld [vmem:[%s26644_s18 + $0x8c0] sm:$0xf0] }
 0xb8d   : > { %v24675_v4 = vpack.c.bf16 %v8511_v12, %v8511_v12  ;;  %v24695_v26 = vadd.f32 %v8287_v19, %v8275_v62  ;;  %v8289_v33 = vpop.f32.mrf.mxu1  ;;  %10599 = vmatpush.bf16.msra.mxu2 %v16281_v43  ;;  %v15921_v19 = vor.u32 %v17647_v52, %v15920_v15  ;;  %v16017_v12 = vor.u32 %v17671_v44, %v16016_v61  ;;  %v17469_v43 = vld [vmem:[%s26644_s18 + $0x94] sm:$0xf]  ;;  %v16244_v52 = vld [vmem:[%s26644_s18 + $0x8a0] sm:$0xf]  ;;  %v15202_v22 = vld [vmem:[%s26644_s18 + $0x84] sm:$0xf0] }
 0xb8e   : > { %10562 = vmatpush.bf16.msra.mxu0 %v15969_v30  ;;  %10575 = vmatpush.bf16.msrb.mxu3 %v16065_v63  ;;  %v8263_v30 = vpop.f32.mrf.mxu0  ;;  %v16148_v63 = vld [vmem:[%s26644_s18 + $0x7e0] sm:$0xf]  ;;  %v16137_v34 = vor.u32 %v17701_v49, %v16136_v48  ;;  %v16257_v9 = vor.u32 %v17731_v21, %v16256_v42  ;;  %v15229_v62 = vor.u32 %v17472_v32, %v15226_v47  ;;  %v16232_v49 = vld [vmem:[%s26644_s18 + $0x888] sm:$0xf]  ;;  %v17490_v32 = vld [vmem:[%s26644_s18 + $0x13c] sm:$0xf] }
 0xb8f   : > { %10555 = vmatmul.bf16.vlgmr.msrb.gmra.mxu2 %v24675_v4  ;;  %v16149_v24 = vor.u32 %v17704_v0, %v16148_v63  ;;  %v8416_v25 = vmul.f32 %v24695_v26, %v24695_v26  ;;  %v17698_v63 = vld [vmem:[%s26644_s18 + $0x7b8] sm:$0xf0]  ;;  %v15214_v0 = vld [vmem:[%s26644_s18 + $0x9c] sm:$0xf0]  ;;  %v15298_v47 = vld [vmem:[%s26644_s18 + $0x144] sm:$0xf0] }
 0xb90   : > { %10588 = vmatpush.bf16.msrb.mxu1 %v16161_v55  ;;  %v17496_v55 = vld [vmem:[%s26644_s18 + $0x16c] sm:$0xf]  ;;  %v15310_v44 = vld [vmem:[%s26644_s18 + $0x15c] sm:$0xf0]  ;;  %v15217_v40 = vor.u32 %v17469_v43, %v15214_v0  ;;  %v15286_v43 = vld [vmem:[%s26644_s18 + $0x12c] sm:$0xf0] }
 0xb91   : > { %v8428_v8 = vmul.f32 %v8416_v25, %v24695_v26  ;;  %v15325_v33 = vor.u32 %v17496_v55, %v15322_v59  ;;  %v17695_v25 = vld [vmem:[%s26644_s18 + $0x7a0] sm:$0xf0]  ;;  %v17520_v21 = vld [vmem:[%s26644_s18 + $0x22c] sm:$0xf]  ;;  %v15301_v55 = vor.u32 %v17490_v32, %v15298_v47  ;;  %v15166_v47 = vld [vmem:[%s26644_s18 + $0x3c] sm:$0xf0] }
 0xb92   : > { %10563 = vmatpush.bf16.msra.mxu0 %v15957_v35  ;;  %10576 = vmatpush.bf16.msrb.mxu3 %v16053_v11  ;;  %v16268_v35 = vld [vmem:[%s26644_s18 + $0x8d0] sm:$0xf]  ;;  %v17734_v11 = vld [vmem:[%s26644_s18 + $0x8d8] sm:$0xf0]  ;;  %v8276_v57 = vpop.f32.mrf.mxu3  ;;  %v17460_v0 = vld [vmem:[%s26644_s18 + $0x4c] sm:$0xf] }
 0xb93   : > { %v16269_v2 = vor.u32 %v17734_v11, %v16268_v35  ;;  %v8302_v50 = vpop.f32.mrf.mxu2  ;;  %v16112_v11 = vld [vmem:[%s26644_s18 + $0x798] sm:$0xf] }
 0xb94   : > { %10589 = vmatpush.bf16.msrb.mxu1 %v16149_v24  ;;  %v17493_v24 = vld [vmem:[%s26644_s18 + $0x154] sm:$0xf]  ;;  %v15190_v50 = vld [vmem:[%s26644_s18 + $0x6c] sm:$0xf0] }
 0xb95   : > { %10600 = vmatpush.bf16.msra.mxu2 %v16269_v2  ;;  %v17466_v2 = vld [vmem:[%s26644_s18 + $0x7c] sm:$0xf]  ;;  %v15313_v48 = vor.u32 %v17493_v24, %v15310_v44 }
 0xb96   : > { %10564 = vmatpush.bf16.msra.mxu0 %v15945_v41  ;;  %10577 = vmatpush.bf16.msrb.mxu3 %v16041_v13  ;;  %v16004_v41 = vld [vmem:[%s26644_s18 + $0x6c0] sm:$0xf]  ;;  %v8440_v13 = vmul.f32 0.044715, %v8428_v8  ;;  %v17725_v8 = vld [vmem:[%s26644_s18 + $0x890] sm:$0xf0]  ;;  %v15205_v57 = vor.u32 %v17466_v2, %v15202_v22 }
 0xb97   : > { %v16005_v30 = vor.u32 %v17668_v7, %v16004_v41  ;;  %v16100_v41 = vld [vmem:[%s26644_s18 + $0x780] sm:$0xf]  ;;  %v17463_v7 = vld [vmem:[%s26644_s18 + $0x64] sm:$0xf]  ;;  %v17484_v2 = vld [vmem:[%s26644_s18 + $0x10c] sm:$0xf] }
 0xb98   : > { %10590 = vmatpush.bf16.msrb.mxu1 %v16137_v34  ;;  %v8452_v60 = vadd.f32 %v8440_v13, %v24695_v26  ;;  %v17692_v34 = vld [vmem:[%s26644_s18 + $0x788] sm:$0xf0]  ;;  %v15418_v13 = vld [vmem:[%s26644_s18 + $0x234] sm:$0xf0] }
 0xb99   : > { %10601 = vmatpush.bf16.msra.mxu2 %v16257_v9  ;;  %v16101_v42 = vor.u32 %v17692_v34, %v16100_v41  ;;  %v15421_v59 = vor.u32 %v17520_v21, %v15418_v13  ;;  %v16220_v9 = vld [vmem:[%s26644_s18 + $0x870] sm:$0xf]  ;;  %v15262_v13 = vld [vmem:[%s26644_s18 + $0xfc] sm:$0xf0] }
 0xb9a   : > { %10565 = vmatpush.bf16.msra.mxu0 %v15933_v58  ;;  %10578 = vmatpush.bf16.msrb.mxu3 %v16029_v39  ;;  %v16124_v58 = vld [vmem:[%s26644_s18 + $0x7b0] sm:$0xf]  ;;  %v17728_v39 = vld [vmem:[%s26644_s18 + $0x8a8] sm:$0xf0]  ;;  %v8464_v61 = vmul.f32 0.7978846, %v8452_v60 }
 0xb9b   : > { %v16125_v15 = vor.u32 %v17698_v63, %v16124_v58  ;;  %v16245_v35 = vor.u32 %v17728_v39, %v16244_v52  ;;  %v6485_v63 = vperm.slane %v24638_v38, 1  ;;  %v17517_v52 = vld [vmem:[%s26644_s18 + $0x214] sm:$0xf]  ;;  %v15406_v39 = vld [vmem:[%s26644_s18 + $0x21c] sm:$0xf0] }
 0xb9c   : > { %18070 = vtanh.f32 %v8464_v61 }
 0xb9d   : > { %10591 = vmatpush.bf16.msrb.mxu1 %v16125_v15  ;;  %10602 = vmatpush.bf16.msra.mxu2 %v16245_v35  ;;  %v15178_v15 = vld [vmem:[%s26644_s18 + $0x54] sm:$0xf0]  ;;  %v15409_v35 = vor.u32 %v17517_v52, %v15406_v39  ;;  %v17478_v52 = vld [vmem:[%s26644_s18 + $0xdc] sm:$0xf] }
 0xb9e   : > { %10566 = vmatpush.bf16.msra.mxu0 %v15921_v19  ;;  %10579 = vmatpush.bf16.msrb.mxu3 %v16017_v12  ;;  %v16113_v19 = vor.u32 %v17695_v25, %v16112_v11  ;;  %v16233_v12 = vor.u32 %v17725_v8, %v16232_v49  ;;  %v16208_v11 = vld [vmem:[%s26644_s18 + $0x858] sm:$0xf]  ;;  %v17719_v25 = vld [vmem:[%s26644_s18 + $0x860] sm:$0xf0]  ;;  %v17457_v49 = vld [vmem:[%s26644_s18 + $0x34] sm:$0xf]  ;;  %v8301_v8 = vadd.f32 %v24686_v17, %v6485_v63 }
 0xb9f   : > { %v16209_v22 = vor.u32 %v17719_v25, %v16208_v11  ;;  %v15181_v32 = vor.u32 %v17460_v0, %v15178_v15  ;;  %v17481_v17 = vld [vmem:[%s26644_s18 + $0xf4] sm:$0xf]  ;;  %v17454_v0 = vld [vmem:[%s26644_s18 + $0x1c] sm:$0xf]  ;;  %v15502_v11 = vld [vmem:[%s26644_s18 + $0x2dc] sm:$0xf0] }
 0xba0   : > { %v15265_v15 = vor.u32 %v17481_v17, %v15262_v13  ;;  %v17451_v25 = vld [vmem:[%s26644_s18 + $0x4] sm:$0xf] }
 0xba1   : > { %10592 = vmatpush.bf16.msrb.mxu1 %v16113_v19  ;;  %10603 = vmatpush.bf16.msra.mxu2 %v16233_v12  ;;  %v15274_v19 = vld [vmem:[%s26644_s18 + $0x114] sm:$0xf0]  ;;  %v17514_v12 = vld [vmem:[%s26644_s18 + $0x1fc] sm:$0xf] }
 0xba2   : > { %10567 = vmatpush.bf16.msra.mxu0 %v15909_v45  ;;  %10580 = vmatpush.bf16.msrb.mxu3 %v16005_v30  ;;  %v17722_v45 = vld [vmem:[%s26644_s18 + $0x878] sm:$0xf0]  ;;  %v18071_v60 = vpop.eup %18070  ;;  %v8313_v24 = vpop.f32.mrf.mxu0  ;;  %v15277_v34 = vor.u32 %v17484_v2, %v15274_v19  ;;  %v15142_v2 = vld [vmem:[%s26644_s18 + $0xc] sm:$0xf0] }
 0xba3   : > { %v16221_v30 = vor.u32 %v17722_v45, %v16220_v9  ;;  %v8488_v58 = vadd.f32 1.0, %v18071_v60  ;;  %v8314_v21 = vadd.f32 %v8313_v24, %v8301_v8  ;;  %v17508_v8 = vld [vmem:[%s26644_s18 + $0x1cc] sm:$0xf] }
 0xba5   : > { %10593 = vmatpush.bf16.msrb.mxu1 %v16101_v42  ;;  %v8500_v61 = vmul.f32 0.5, %v8488_v58  ;;  %10604 = vmatpush.bf16.msra.mxu2 %v16221_v30  ;;  %v17716_v42 = vld [vmem:[%s26644_s18 + $0x848] sm:$0xf0]  ;;  %v17511_v30 = vld [vmem:[%s26644_s18 + $0x1e4] sm:$0xf] }
 0xba6   : > { %10612 = vmatpush.bf16.msrb.mxu0 %v15229_v62  ;;  %10625 = vmatpush.bf16.msra.mxu3 %v15325_v33  ;;  %v17487_v62 = vld [vmem:[%s26644_s18 + $0x124] sm:$0xf]  ;;  %v15193_v33 = vor.u32 %v17463_v7, %v15190_v50  ;;  %v16196_v7 = vld [vmem:[%s26644_s18 + $0x840] sm:$0xf]  ;;  %v15382_v58 = vld [vmem:[%s26644_s18 + $0x1ec] sm:$0xf0] }
 0xba7   : > { %v15289_v44 = vor.u32 %v17487_v62, %v15286_v43  ;;  %v16197_v50 = vor.u32 %v17716_v42, %v16196_v7  ;;  %v15169_v43 = vor.u32 %v17457_v49, %v15166_v47  ;;  %v15385_v39 = vor.u32 %v17511_v30, %v15382_v58  ;;  %v17568_v49 = vld [vmem:[%s26644_s18 + $0x3ac] sm:$0xf]  ;;  %v15610_v47 = vld [vmem:[%s26644_s18 + $0x3b4] sm:$0xf0]  ;;  %v17538_v7 = vld [vmem:[%s26644_s18 + $0x2bc] sm:$0xf] }
 0xba8   : > { %v8326_v9 = vpop.f32.mrf.mxu3  ;;  %v15490_v42 = vld [vmem:[%s26644_s18 + $0x2c4] sm:$0xf0]  ;;  %v17505_v58 = vld [vmem:[%s26644_s18 + $0x1b4] sm:$0xf] }
 0xba9   : > { %10638 = vmatpush.bf16.msra.mxu1 %v15421_v59  ;;  %10605 = vmatpush.bf16.msra.mxu2 %v16209_v22  ;;  %v15514_v59 = vld [vmem:[%s26644_s18 + $0x2f4] sm:$0xf0]  ;;  %v24895_v60 = vadd.f32 %v8326_v9, %v8314_v21  ;;  %v15493_v13 = vor.u32 %v17538_v7, %v15490_v42  ;;  %v17565_v9 = vld [vmem:[%s26644_s18 + $0x394] sm:$0xf] }
 0xbaa   : > { %10613 = vmatpush.bf16.msrb.mxu0 %v15217_v40  ;;  %10626 = vmatpush.bf16.msra.mxu3 %v15313_v48  ;;  %v24852_v40 = vpop.f32.mrf.mxu1  ;;  %v8512_v48 = vmul.f32 %v8500_v61, %v24695_v26  ;;  %v15394_v26 = vld [vmem:[%s26644_s18 + $0x204] sm:$0xf0]  ;;  %v8315_v63 = vpop.f32.mrf.mxu0 }
 0xbab   : > { %v24897_v62 = vpop.f32.mrf.mxu2  ;;  %v8417_v61 = vmul.f32 %v24895_v60, %v24895_v60  ;;  %v15358_v63 = vld [vmem:[%s26644_s18 + $0x1bc] sm:$0xf0] }
 0xbac   : > { %v24874_v41 = vpack.c.bf16 %v8512_v48, %v8512_v48 }
 0xbad   : > { %10639 = vmatpush.bf16.msra.mxu1 %v15409_v35  ;;  %10606 = vmatpush.bf16.msra.mxu2 %v16197_v50  ;;  %v17541_v35 = vld [vmem:[%s26644_s18 + $0x2d4] sm:$0xf]  ;;  %v8429_v22 = vmul.f32 %v8417_v61, %v24895_v60  ;;  %v17502_v61 = vld [vmem:[%s26644_s18 + $0x19c] sm:$0xf] }
 0xbae   : > { %10614 = vmatpush.bf16.msrb.mxu0 %v15205_v57  ;;  %10627 = vmatpush.bf16.msra.mxu3 %v15301_v55  ;;  %v15397_v57 = vor.u32 %v17514_v12, %v15394_v26  ;;  %v17544_v55 = vld [vmem:[%s26644_s18 + $0x2ec] sm:$0xf]  ;;  %v15505_v19 = vor.u32 %v17541_v35, %v15502_v11  ;;  %v17475_v26 = vld [vmem:[%s26644_s18 + $0xc4] sm:$0xf]  ;;  %v17562_v35 = vld [vmem:[%s26644_s18 + $0x37c] sm:$0xf] }
 0xbaf   : > { %10568 = vmatmul.bf16.vlgmr.msra.gmra.mxu0 %v24874_v41  ;;  %v15517_v45 = vor.u32 %v17544_v55, %v15514_v59  ;;  %v15145_v59 = vor.u32 %v17451_v25, %v15142_v2  ;;  %v15586_v25 = vld [vmem:[%s26644_s18 + $0x384] sm:$0xf0]  ;;  %v17532_v2 = vld [vmem:[%s26644_s18 + $0x28c] sm:$0xf] }
 0xbb0   : > { %v8328_v21 = vpop.f32.mrf.mxu3 }
 0xbb1   : > { %10640 = vmatpush.bf16.msra.mxu1 %v15397_v57  ;;  %10651 = vmatpush.bf16.msrb.mxu2 %v15517_v45  ;;  %v8441_v57 = vmul.f32 0.044715, %v8429_v22  ;;  %v15613_v45 = vor.u32 %v17568_v49, %v15610_v47  ;;  %v17499_v49 = vld [vmem:[%s26644_s18 + $0x184] sm:$0xf] }
 0xbb2   : > { %10615 = vmatpush.bf16.msrb.mxu0 %v15193_v33  ;;  %10628 = vmatpush.bf16.msra.mxu3 %v15289_v44  ;;  %v15154_v33 = vld [vmem:[%s26644_s18 + $0x24] sm:$0xf0]  ;;  %v8341_v24 = vpop.f32.mrf.mxu1  ;;  %v17559_v47 = vld [vmem:[%s26644_s18 + $0x364] sm:$0xf] }
 0xbb3   : > { %v15250_v44 = vld [vmem:[%s26644_s18 + $0xe4] sm:$0xf0]  ;;  %v15157_v48 = vor.u32 %v17454_v0, %v15154_v33  ;;  %v8453_v50 = vadd.f32 %v8441_v57, %v24895_v60  ;;  %v8354_v55 = vpop.f32.mrf.mxu2  ;;  %v15361_v33 = vor.u32 %v17505_v58, %v15358_v63  ;;  %v15454_v57 = vld [vmem:[%s26644_s18 + $0x27c] sm:$0xf0] }
 0xbb4   : > { %v15253_v12 = vor.u32 %v17478_v52, %v15250_v44  ;;  %v15478_v52 = vld [vmem:[%s26644_s18 + $0x2ac] sm:$0xf0]  ;;  %v15346_v24 = vld [vmem:[%s26644_s18 + $0x1a4] sm:$0xf0] }
 0xbb5   : > { %10641 = vmatpush.bf16.msra.mxu1 %v15385_v39  ;;  %10652 = vmatpush.bf16.msrb.mxu2 %v15505_v19  ;;  %v8465_v0 = vmul.f32 0.7978846, %v8453_v50  ;;  %v15349_v11 = vor.u32 %v17502_v61, %v15346_v24  ;;  %v15466_v19 = vld [vmem:[%s26644_s18 + $0x294] sm:$0xf0]  ;;  %v17553_v24 = vld [vmem:[%s26644_s18 + $0x334] sm:$0xf] }
 0xbb6   : > { %10616 = vmatpush.bf16.msrb.mxu0 %v15181_v32  ;;  %10629 = vmatpush.bf16.msra.mxu3 %v15277_v34  ;;  %v15370_v32 = vld [vmem:[%s26644_s18 + $0x1d4] sm:$0xf0]  ;;  %v15238_v34 = vld [vmem:[%s26644_s18 + $0xcc] sm:$0xf0]  ;;  %v15469_v22 = vor.u32 %v17532_v2, %v15466_v19 }
 0xbb7   : > { %v15373_v17 = vor.u32 %v17508_v8, %v15370_v32  ;;  %v15241_v30 = vor.u32 %v17475_v26, %v15238_v34  ;;  %18072 = vtanh.f32 %v8465_v0  ;;  %v15334_v8 = vld [vmem:[%s26644_s18 + $0x18c] sm:$0xf0]  ;;  %v15589_v32 = vor.u32 %v17562_v35, %v15586_v25 }
 0xbb8   : > { %v15574_v34 = vld [vmem:[%s26644_s18 + $0x36c] sm:$0xf0] }
 0xbb9   : > { %10642 = vmatpush.bf16.msra.mxu1 %v15373_v17  ;;  %10653 = vmatpush.bf16.msrb.mxu2 %v15493_v13  ;;  %v17529_v17 = vld [vmem:[%s26644_s18 + $0x274] sm:$0xf]  ;;  %v17556_v13 = vld [vmem:[%s26644_s18 + $0x34c] sm:$0xf]  ;;  %v15577_v55 = vor.u32 %v17559_v47, %v15574_v34  ;;  %v15430_v25 = vld [vmem:[%s26644_s18 + $0x24c] sm:$0xf0] }
 0xbba   : > { %10617 = vmatpush.bf16.msrb.mxu0 %v15169_v43  ;;  %10630 = vmatpush.bf16.msra.mxu3 %v15265_v15  ;;  %v15598_v43 = vld [vmem:[%s26644_s18 + $0x39c] sm:$0xf0]  ;;  %v17535_v15 = vld [vmem:[%s26644_s18 + $0x2a4] sm:$0xf]  ;;  %v15457_v42 = vor.u32 %v17529_v17, %v15454_v57  ;;  %v17550_v34 = vld [vmem:[%s26644_s18 + $0x31c] sm:$0xf] }
 0xbbb   : > { %v15481_v39 = vor.u32 %v17535_v15, %v15478_v52  ;;  %v15601_v44 = vor.u32 %v17565_v9, %v15598_v43  ;;  %v15706_v9 = vld [vmem:[%s26644_s18 + $0x474] sm:$0xf0]  ;;  %v17526_v43 = vld [vmem:[%s26644_s18 + $0x25c] sm:$0xf]  ;;  %v6487_v52 = vperm.slane %v24638_v38, 3 }
 0xbbc   : > { %v15538_v17 = vld [vmem:[%s26644_s18 + $0x324] sm:$0xf0] }
 0xbbd   : > { %10643 = vmatpush.bf16.msra.mxu1 %v15361_v33  ;;  %10654 = vmatpush.bf16.msrb.mxu2 %v15481_v39  ;;  %v18073_v26 = vpop.eup %18072 }
 0xbbe   : > { %10618 = vmatpush.bf16.msrb.mxu0 %v15157_v48  ;;  %10631 = vmatpush.bf16.msra.mxu3 %v15253_v12  ;;  %v6486_v48 = vperm.slane %v24638_v38, 2  ;;  %v15337_v12 = vor.u32 %v17499_v49, %v15334_v8  ;;  %v8489_v7 = vadd.f32 1.0, %v18073_v26  ;;  %v15550_v38 = vld [vmem:[%s26644_s18 + $0x33c] sm:$0xf0]  ;;  %v17586_v8 = vld [vmem:[%s26644_s18 + $0x43c] sm:$0xf] }
 0xbbf   : > { %v15553_v49 = vor.u32 %v17553_v24, %v15550_v38  ;;  %v15982_v38 = vld [vmem:[%s26644_s18 + $0x69c] sm:$0xf0] }
 0xbc0   : > { %v8340_v21 = vadd.f32 %v24852_v40, %v6486_v48  ;;  %v8501_v50 = vmul.f32 0.5, %v8489_v7  ;;  %v15562_v40 = vld [vmem:[%s26644_s18 + $0x354] sm:$0xf0] }
 0xbc1   : > { %10644 = vmatpush.bf16.msra.mxu1 %v15349_v11  ;;  %10655 = vmatpush.bf16.msrb.mxu2 %v15469_v22  ;;  %v15565_v61 = vor.u32 %v17556_v13, %v15562_v40  ;;  %v17523_v11 = vld [vmem:[%s26644_s18 + $0x244] sm:$0xf] }
 0xbc2   : > { %10619 = vmatpush.bf16.msrb.mxu0 %v15145_v59  ;;  %10632 = vmatpush.bf16.msra.mxu3 %v15241_v30  ;;  %v17592_v59 = vld [vmem:[%s26644_s18 + $0x46c] sm:$0xf]  ;;  %v15442_v30 = vld [vmem:[%s26644_s18 + $0x264] sm:$0xf0]  ;;  %v8513_v58 = vmul.f32 %v8501_v50, %v24895_v60  ;;  %v8365_v63 = vpop.f32.mrf.mxu0  ;;  %v17589_v60 = vld [vmem:[%s26644_s18 + $0x454] sm:$0xf]  ;;  %v15433_v2 = vor.u32 %v17523_v11, %v15430_v25  ;;  %v15541_v50 = vor.u32 %v17550_v34, %v15538_v17 }
 0xbc3   : > { %v15445_v0 = vor.u32 %v17526_v43, %v15442_v30  ;;  %v15709_v15 = vor.u32 %v17592_v59, %v15706_v9  ;;  %v15670_v59 = vld [vmem:[%s26644_s18 + $0x42c] sm:$0xf0]  ;;  %v17547_v40 = vld [vmem:[%s26644_s18 + $0x304] sm:$0xf]  ;;  %v17664_v30 = vld [vmem:[%s26644_s18 + $0x6ac] sm:$0xf] }
 0xbc4   : > { %v25037_v39 = vpack.c.bf16 %v8513_v58, %v8513_v58  ;;  %v15526_v43 = vld [vmem:[%s26644_s18 + $0x30c] sm:$0xf0]  ;;  %v15994_v58 = vld [vmem:[%s26644_s18 + $0x6b4] sm:$0xf0]  ;;  %v17616_v34 = vld [vmem:[%s26644_s18 + $0x52c] sm:$0xf] }
 0xbc5   : > { %10620 = vmatmul.bf16.vlgmr.msrb.gmra.mxu0 %v24379_v20  ;;  %10645 = vmatpush.bf16.msra.mxu1 %v15337_v12  ;;  %v15802_v17 = vld [vmem:[%s26644_s18 + $0x534] sm:$0xf0] }
 0xbc6   : > { %10664 = vmatpush.bf16.msra.mxu0 %v15613_v45  ;;  %v8353_v45 = vadd.f32 %v24897_v62, %v8340_v21  ;;  %10656 = vmatpush.bf16.msrb.mxu2 %v15457_v42  ;;  %v8391_v62 = vpop.f32.mrf.mxu1 }
 0xbc7   : > { %10581 = vmatmul.bf16.vlgmr.msrb.gmra.mxu3 %v25037_v39 }
 0xbc8   : > { %v25034_v33 = vadd.f32 %v8365_v63, %v8353_v45  ;;  %10677 = vmatpush.bf16.msrb.mxu3 %v15709_v15  ;;  %v8378_v48 = vpop.f32.mrf.mxu3  ;;  %v15529_v15 = vor.u32 %v17547_v40, %v15526_v43  ;;  %v17613_v40 = vld [vmem:[%s26644_s18 + $0x514] sm:$0xf] }
 0xbc9   : > { %v8379_v12 = vadd.f32 %v8378_v48, %v6487_v52  ;;  %v17580_v52 = vld [vmem:[%s26644_s18 + $0x40c] sm:$0xf] }
 0xbca   : > { %10665 = vmatpush.bf16.msra.mxu0 %v15601_v44  ;;  %v15694_v44 = vld [vmem:[%s26644_s18 + $0x45c] sm:$0xf0]  ;;  %v8418_v35 = vmul.f32 %v25034_v33, %v25034_v33  ;;  %10657 = vmatpush.bf16.msrb.mxu2 %v15445_v0  ;;  %v8367_v57 = vpop.f32.mrf.mxu0 }
 0xbcb   : > { %v15697_v22 = vor.u32 %v17589_v60, %v15694_v44  ;;  %v8404_v26 = vpop.f32.mrf.mxu2  ;;  %v8392_v42 = vadd.f32 %v8391_v62, %v8379_v12  ;;  %v15997_v44 = vor.u32 %v17664_v30, %v15994_v58  ;;  %v17571_v30 = vld [vmem:[%s26644_s18 + $0x3c4] sm:$0xf]  ;;  %v15622_v58 = vld [vmem:[%s26644_s18 + $0x3cc] sm:$0xf0] }
 0xbcc   : > { %v8430_v19 = vmul.f32 %v8418_v35, %v25034_v33  ;;  %v17661_v35 = vld [vmem:[%s26644_s18 + $0x694] sm:$0xf] }
 0xbcd   : > { %10678 = vmatpush.bf16.msrb.mxu3 %v15697_v22  ;;  %v25080_v45 = vadd.f32 %v8404_v26, %v8392_v42  ;;  %v15634_v42 = vld [vmem:[%s26644_s18 + $0x3e4] sm:$0xf0] }
 0xbce   : > { %10666 = vmatpush.bf16.msra.mxu0 %v15589_v32  ;;  %v15682_v32 = vld [vmem:[%s26644_s18 + $0x444] sm:$0xf0]  ;;  %v8442_v47 = vmul.f32 0.044715, %v8430_v19  ;;  %10658 = vmatpush.bf16.msrb.mxu2 %v15433_v2  ;;  %v8393_v21 = vpop.f32.mrf.mxu1  ;;  %v17577_v2 = vld [vmem:[%s26644_s18 + $0x3f4] sm:$0xf] }
 0xbcf   : > { %v15685_v13 = vor.u32 %v17586_v8, %v15682_v32  ;;  %v8419_v63 = vmul.f32 %v25080_v45, %v25080_v45  ;;  %v15646_v19 = vld [vmem:[%s26644_s18 + $0x3fc] sm:$0xf0]  ;;  %v17658_v32 = vld [vmem:[%s26644_s18 + $0x67c] sm:$0xf] }
 0xbd0   : > { %v8454_v7 = vadd.f32 %v8442_v47, %v25034_v33  ;;  %v8380_v62 = vpop.f32.mrf.mxu3  ;;  %v15970_v47 = vld [vmem:[%s26644_s18 + $0x684] sm:$0xf0]  ;;  %v15649_v26 = vor.u32 %v17577_v2, %v15646_v19 }
 0xbd1   : > { %10679 = vmatpush.bf16.msrb.mxu3 %v15685_v13  ;;  %v8431_v24 = vmul.f32 %v8419_v63, %v25080_v45  ;;  %v15973_v21 = vor.u32 %v17658_v32, %v15970_v47  ;;  %v8912_v63 = vld [vmem:[%s26645_s19] sm:$0x7]  ;;  %v17688_v62 = vld [vmem:[%s26644_s18 + $0x76c] sm:$0xf]  ;;  %v17685_v32 = vld [vmem:[%s26644_s18 + $0x754] sm:$0xf] }
 0xbd2   : > { %10667 = vmatpush.bf16.msra.mxu0 %v15577_v55  ;;  %v17583_v55 = vld [vmem:[%s26644_s18 + $0x424] sm:$0xf]  ;;  %v8466_v9 = vmul.f32 0.7978846, %v8454_v7  ;;  %v17574_v7 = vld [vmem:[%s26644_s18 + $0x3dc] sm:$0xf] }
 0xbd3   : > { %v15673_v0 = vor.u32 %v17583_v55, %v15670_v59  ;;  %v8406_v60 = vpop.f32.mrf.mxu2  ;;  %v8443_v11 = vmul.f32 0.044715, %v8431_v24  ;;  %v15958_v55 = vld [vmem:[%s26644_s18 + $0x66c] sm:$0xf0]  ;;  %v15805_v59 = vor.u32 %v17616_v34, %v15802_v17  ;;  %v16078_v47 = vld [vmem:[%s26644_s18 + $0x75c] sm:$0xf0] }
 0xbd4   : > { %18074 = vtanh.f32 %v8466_v9  ;;  %v15637_v9 = vor.u32 %v17574_v7, %v15634_v42  ;;  %v15934_v34 = vld [vmem:[%s26644_s18 + $0x63c] sm:$0xf0]  ;;  %v16081_v42 = vor.u32 %v17685_v32, %v16078_v47  ;;  %v15232_v47 = vld [vmem:[%s26644_s18 + $0xb0] sm:$0xf] }
 0xbd5   : > { %10680 = vmatpush.bf16.msrb.mxu3 %v15673_v0  ;;  %v8455_v48 = vadd.f32 %v8443_v11, %v25080_v45 }
 0xbd6   : > { %10668 = vmatpush.bf16.msra.mxu0 %v15565_v61  ;;  %v15658_v61 = vld [vmem:[%s26644_s18 + $0x414] sm:$0xf0] }
 0xbd7   : > { %v15661_v25 = vor.u32 %v17580_v52, %v15658_v61  ;;  %10633 = vmatmul.bf16.vlgmr.msra.gmra.mxu3 %v24381_v1  ;;  %v8467_v12 = vmul.f32 0.7978846, %v8455_v48  ;;  %v17652_v52 = vld [vmem:[%s26644_s18 + $0x64c] sm:$0xf]  ;;  %v15946_v61 = vld [vmem:[%s26644_s18 + $0x654] sm:$0xf0] }
 0xbd8   : > { %v17640_v48 = vld [vmem:[%s26644_s18 + $0x5ec] sm:$0xf] }
 0xbd9   : > { %10681 = vmatpush.bf16.msrb.mxu3 %v15661_v25  ;;  %18076 = vtanh.f32 %v8467_v12  ;;  %v8914_v25 = vperm.slane %v8912_v63, 0  ;;  %v15886_v63 = vld [vmem:[%s26644_s18 + $0x5dc] sm:$0xf0] }
 0xbda   : > { %10669 = vmatpush.bf16.msra.mxu0 %v15553_v49  ;;  %v18075_v22 = vpop.eup %18074  ;;  %v15985_v49 = vor.u32 %v17661_v35, %v15982_v38  ;;  %v15625_v35 = vor.u32 %v17571_v30, %v15622_v58  ;;  %v17610_v38 = vld [vmem:[%s26644_s18 + $0x4fc] sm:$0xf] }
 0xbdb   : > { %v8490_v8 = vadd.f32 1.0, %v18075_v22  ;;  %v15778_v22 = vld [vmem:[%s26644_s18 + $0x504] sm:$0xf0] }
 0xbdc   : > { %v15781_v17 = vor.u32 %v17610_v38, %v15778_v22 }
 0xbdd   : > { %v8502_v57 = vmul.f32 0.5, %v8490_v8  ;;  %10682 = vmatpush.bf16.msrb.mxu3 %v15649_v26  ;;  %v15898_v8 = vld [vmem:[%s26644_s18 + $0x5f4] sm:$0xf0]  ;;  %v17649_v26 = vld [vmem:[%s26644_s18 + $0x634] sm:$0xf] }
 0xbde   : > { %10670 = vmatpush.bf16.msra.mxu0 %v15541_v50  ;;  %v17655_v50 = vld [vmem:[%s26644_s18 + $0x664] sm:$0xf] }
 0xbdf   : > { %v8514_v13 = vmul.f32 %v8502_v57, %v25034_v33  ;;  %v15790_v33 = vld [vmem:[%s26644_s18 + $0x51c] sm:$0xf0]  ;;  %v15961_v0 = vor.u32 %v17655_v50, %v15958_v55  ;;  %v18077_v24 = vpop.eup %18076  ;;  %v15901_v55 = vor.u32 %v17640_v48, %v15898_v8  ;;  %v15874_v48 = vld [vmem:[%s26644_s18 + $0x5c4] sm:$0xf0]  ;;  %v15910_v8 = vld [vmem:[%s26644_s18 + $0x60c] sm:$0xf0] }
 0xbe0   : > { %v8491_v11 = vadd.f32 1.0, %v18077_v24 }
 0xbe1   : > { %v25146_v43 = vpack.c.bf16 %v8514_v13, %v8514_v13  ;;  %10683 = vmatpush.bf16.msrb.mxu3 %v15637_v9  ;;  %v15766_v13 = vld [vmem:[%s26644_s18 + $0x4ec] sm:$0xf0]  ;;  %v17637_v9 = vld [vmem:[%s26644_s18 + $0x5d4] sm:$0xf] }
 0xbe2   : > { %10671 = vmatpush.bf16.msra.mxu0 %v15529_v15  ;;  %v16090_v15 = vld [vmem:[%s26644_s18 + $0x774] sm:$0xf0]  ;;  %v10465_v60 = vpop.f32.mrf.mxu0  ;;  %v8503_v12 = vmul.f32 0.5, %v8491_v11  ;;  %v15889_v38 = vor.u32 %v17637_v9, %v15886_v63  ;;  %v15862_v9 = vld [vmem:[%s26644_s18 + $0x5ac] sm:$0xf0] }
 0xbe3   : > { %10594 = vmatmul.bf16.vlgmr.msrb.gmra.mxu1 %v25146_v43  ;;  %v16093_v19 = vor.u32 %v17688_v62, %v16090_v15  ;;  %v10466_v7 = vadd.f32 %v10465_v60, %v8914_v25  ;;  %v15922_v62 = vld [vmem:[%s26644_s18 + $0x624] sm:$0xf0]  ;;  %v17634_v25 = vld [vmem:[%s26644_s18 + $0x5bc] sm:$0xf] }
 0xbe4   : > { %10690 = vmatpush.bf16.msrb.mxu1 %v15805_v59  ;;  %v10491_v2 = vpop.f32.mrf.mxu1  ;;  %v8515_v57 = vmul.f32 %v8503_v12, %v25080_v45  ;;  %v15937_v59 = vor.u32 %v17649_v26, %v15934_v34  ;;  %v17682_v45 = vld [vmem:[%s26644_s18 + $0x73c] sm:$0xf]  ;;  %v17601_v34 = vld [vmem:[%s26644_s18 + $0x4b4] sm:$0xf] }
 0xbe5   : > { %10672 = vmatmul.bf16.vlgmr.msra.gmra.mxu0 %v24595_v37  ;;  %10684 = vmatpush.bf16.msrb.mxu3 %v15625_v35  ;;  %v15754_v35 = vld [vmem:[%s26644_s18 + $0x4d4] sm:$0xf0]  ;;  %v17474_v12 = vld [vmem:[%s26644_s18 + $0xb8] sm:$0xf0] }
 0xbe6   : > { %10716 = vmatpush.bf16.msrb.mxu0 %v15997_v44  ;;  %v15793_v44 = vor.u32 %v17613_v40, %v15790_v33  ;;  %v16066_v40 = vld [vmem:[%s26644_s18 + $0x744] sm:$0xf0]  ;;  %v25213_v33 = vpack.c.bf16 %v8515_v57, %v8515_v57  ;;  %v17598_v63 = vld [vmem:[%s26644_s18 + $0x49c] sm:$0xf] }
 0xbe7   : > { %v16069_v60 = vor.u32 %v17682_v45, %v16066_v40  ;;  %v15220_v40 = vld [vmem:[%s26644_s18 + $0x98] sm:$0xf] }
 0xbe8   : > { %10691 = vmatpush.bf16.msrb.mxu1 %v15793_v44  ;;  %v10478_v50 = vpop.f32.mrf.mxu3  ;;  %10685 = vmatmul.bf16.vlgmr.msrb.gmra.mxu3 %v24597_v56  ;;  %v17604_v44 = vld [vmem:[%s26644_s18 + $0x4cc] sm:$0xf] }
 0xbe9   : > { %10729 = vmatpush.bf16.msra.mxu3 %v16093_v19  ;;  %v10479_v30 = vadd.f32 %v10478_v50, %v10466_v7  ;;  %10607 = vmatmul.bf16.vlgmr.msra.gmra.mxu2 %v25213_v33  ;;  %v16054_v19 = vld [vmem:[%s26644_s18 + $0x72c] sm:$0xf0]  ;;  %v15757_v32 = vor.u32 %v17604_v44, %v15754_v35  ;;  %v15877_v7 = vor.u32 %v17634_v25, %v15874_v48  ;;  %v15208_v35 = vld [vmem:[%s26644_s18 + $0x80] sm:$0xf]  ;;  %v17595_v25 = vld [vmem:[%s26644_s18 + $0x484] sm:$0xf] }
 0xbea   : > { %10717 = vmatpush.bf16.msrb.mxu0 %v15985_v49  ;;  %v15949_v49 = vor.u32 %v17652_v52, %v15946_v61  ;;  %v10504_v58 = vpop.f32.mrf.mxu2  ;;  %v10467_v15 = vpop.f32.mrf.mxu0  ;;  %10703 = vmatpush.bf16.msra.mxu2 %v15901_v55  ;;  %v15233_v55 = vor.u32 %v17474_v12, %v15232_v47  ;;  %v17625_v12 = vld [vmem:[%s26644_s18 + $0x574] sm:$0xf] }
 0xbeb   : > { %v10492_v61 = vadd.f32 %v10491_v2, %v10479_v30  ;;  %v17679_v2 = vld [vmem:[%s26644_s18 + $0x724] sm:$0xf]  ;;  %v17673_v15 = vld [vmem:[%s26644_s18 + $0x6f4] sm:$0xf] }
 0xbec   : > { %10692 = vmatpush.bf16.msrb.mxu1 %v15781_v17  ;;  %v10493_v24 = vpop.f32.mrf.mxu1  ;;  %v16057_v26 = vor.u32 %v17679_v2, %v16054_v19  ;;  %v15742_v17 = vld [vmem:[%s26644_s18 + $0x4bc] sm:$0xf0]  ;;  %v17471_v30 = vld [vmem:[%s26644_s18 + $0xa0] sm:$0xf0]  ;;  %v15718_v2 = vld [vmem:[%s26644_s18 + $0x48c] sm:$0xf0] }
 0xbed   : > { %10730 = vmatpush.bf16.msra.mxu3 %v16081_v42  ;;  %v25241_v22 = vadd.f32 %v10504_v58, %v10492_v61  ;;  %v15745_v45 = vor.u32 %v17601_v34, %v15742_v17  ;;  %v15221_v61 = vor.u32 %v17471_v30, %v15220_v40  ;;  %v17628_v24 = vld [vmem:[%s26644_s18 + $0x58c] sm:$0xf]  ;;  %v15721_v34 = vor.u32 %v17595_v25, %v15718_v2  ;;  %v15196_v17 = vld [vmem:[%s26644_s18 + $0x68] sm:$0xf]  ;;  %v15328_v30 = vld [vmem:[%s26644_s18 + $0x170] sm:$0xf] }
 0xbee   : > { %10718 = vmatpush.bf16.msrb.mxu0 %v15973_v21  ;;  %v17607_v21 = vld [vmem:[%s26644_s18 + $0x4e4] sm:$0xf]  ;;  %10704 = vmatpush.bf16.msra.mxu2 %v15889_v38  ;;  %v17468_v38 = vld [vmem:[%s26644_s18 + $0x88] sm:$0xf0]  ;;  %v15826_v40 = vld [vmem:[%s26644_s18 + $0x564] sm:$0xf0] }
 0xbef   : > { %v15769_v52 = vor.u32 %v17607_v21, %v15766_v13  ;;  %v17676_v21 = vld [vmem:[%s26644_s18 + $0x70c] sm:$0xf]  ;;  %v16042_v13 = vld [vmem:[%s26644_s18 + $0x714] sm:$0xf0]  ;;  %v15209_v47 = vor.u32 %v17468_v38, %v15208_v35  ;;  %v17619_v35 = vld [vmem:[%s26644_s18 + $0x544] sm:$0xf] }
 0xbf0   : > { %v10480_v57 = vpop.f32.mrf.mxu3  ;;  %v16045_v58 = vor.u32 %v17676_v21, %v16042_v13  ;;  %v17712_v19 = vld [vmem:[%s26644_s18 + $0x82c] sm:$0xf]  ;;  %v17709_v21 = vld [vmem:[%s26644_s18 + $0x814] sm:$0xf]  ;;  %v16174_v13 = vld [vmem:[%s26644_s18 + $0x81c] sm:$0xf0] }
 0xbf1   : > { %10693 = vmatpush.bf16.msrb.mxu1 %v15769_v52  ;;  %10731 = vmatpush.bf16.msra.mxu3 %v16069_v60  ;;  %v16030_v52 = vld [vmem:[%s26644_s18 + $0x6fc] sm:$0xf0]  ;;  %v15850_v60 = vld [vmem:[%s26644_s18 + $0x594] sm:$0xf0]  ;;  %v17465_v57 = vld [vmem:[%s26644_s18 + $0x70] sm:$0xf0] }
 0xbf2   : > { %10719 = vmatpush.bf16.msrb.mxu0 %v15961_v0  ;;  %v17646_v0 = vld [vmem:[%s26644_s18 + $0x61c] sm:$0xf]  ;;  %v10506_v50 = vpop.f32.mrf.mxu2  ;;  %10705 = vmatpush.bf16.msra.mxu2 %v15877_v7  ;;  %v15853_v48 = vor.u32 %v17628_v24, %v15850_v60  ;;  %v15814_v38 = vld [vmem:[%s26644_s18 + $0x54c] sm:$0xf0]  ;;  %v17736_v2 = vld [vmem:[%s26644_s18 + $0x8ec] sm:$0xf] }
 0xbf3   : > { %v15925_v11 = vor.u32 %v17646_v0, %v15922_v62  ;;  %10646 = vmatmul.bf16.vlgmr.msra.gmra.mxu1 %v24383_v54  ;;  %v15730_v0 = vld [vmem:[%s26644_s18 + $0x4a4] sm:$0xf0] }
 0xbf4   : > { %v15733_v44 = vor.u32 %v17598_v63, %v15730_v0  ;;  %v15184_v63 = vld [vmem:[%s26644_s18 + $0x50] sm:$0xf]  ;;  %v17462_v0 = vld [vmem:[%s26644_s18 + $0x58] sm:$0xf0] }
 0xbf5   : > { %10694 = vmatpush.bf16.msrb.mxu1 %v15757_v32  ;;  %10732 = vmatpush.bf16.msra.mxu3 %v16057_v26  ;;  %v16018_v32 = vld [vmem:[%s26644_s18 + $0x6e4] sm:$0xf0]  ;;  %v15838_v26 = vld [vmem:[%s26644_s18 + $0x57c] sm:$0xf0]  ;;  %v15185_v25 = vor.u32 %v17462_v0, %v15184_v63  ;;  %v17700_v63 = vld [vmem:[%s26644_s18 + $0x7cc] sm:$0xf] }
 0xbf6   : > { %10720 = vmatpush.bf16.msrb.mxu0 %v15949_v49  ;;  %v17643_v49 = vld [vmem:[%s26644_s18 + $0x604] sm:$0xf]  ;;  %v15841_v50 = vor.u32 %v17625_v12, %v15838_v26  ;;  %v15817_v12 = vor.u32 %v17619_v35, %v15814_v38  ;;  %v16138_v0 = vld [vmem:[%s26644_s18 + $0x7d4] sm:$0xf0]  ;;  %v15148_v35 = vld [vmem:[%s26644_s18 + $0x8] sm:$0xf] }
 0xbf7   : > { %v15913_v42 = vor.u32 %v17643_v49, %v15910_v8  ;;  %v16186_v49 = vld [vmem:[%s26644_s18 + $0x834] sm:$0xf0]  ;;  %v17670_v8 = vld [vmem:[%s26644_s18 + $0x6dc] sm:$0xf]  ;;  %v17453_v38 = vld [vmem:[%s26644_s18 + $0x10] sm:$0xf0] }
 0xbf8   : > { %v16189_v7 = vor.u32 %v17712_v19, %v16186_v49  ;;  %v15316_v19 = vld [vmem:[%s26644_s18 + $0x158] sm:$0xf] }
 0xbf9   : > { %10695 = vmatpush.bf16.msrb.mxu1 %v15745_v45  ;;  %10733 = vmatpush.bf16.msra.mxu3 %v16045_v58  ;;  %v15197_v45 = vor.u32 %v17465_v57, %v15196_v17  ;;  %v17498_v58 = vld [vmem:[%s26644_s18 + $0x178] sm:$0xf0]  ;;  %v15172_v49 = vld [vmem:[%s26644_s18 + $0x38] sm:$0xf]  ;;  %v16150_v17 = vld [vmem:[%s26644_s18 + $0x7ec] sm:$0xf0] }
 0xbfa   : > { %10721 = vmatpush.bf16.msrb.mxu0 %v15937_v59  ;;  %v17631_v59 = vld [vmem:[%s26644_s18 + $0x5a4] sm:$0xf]  ;;  %10659 = vmatmul.bf16.vlgmr.msrb.gmra.mxu2 %v24391_v3  ;;  %v15329_v60 = vor.u32 %v17498_v58, %v15328_v30 }
 0xbfb   : > { %v15865_v62 = vor.u32 %v17631_v59, %v15862_v9  ;;  %v17667_v59 = vld [vmem:[%s26644_s18 + $0x6c4] sm:$0xf]  ;;  %v16006_v9 = vld [vmem:[%s26644_s18 + $0x6cc] sm:$0xf0] }
 0xbfd   : > { %10706 = vmatpush.bf16.msra.mxu2 %v15865_v62  ;;  %10696 = vmatpush.bf16.msrb.mxu1 %v15733_v44  ;;  %v16177_v62 = vor.u32 %v17709_v21, %v16174_v13  ;;  %v16162_v44 = vld [vmem:[%s26644_s18 + $0x804] sm:$0xf0]  ;;  %v15304_v21 = vld [vmem:[%s26644_s18 + $0x140] sm:$0xf]  ;;  %v17492_v13 = vld [vmem:[%s26644_s18 + $0x148] sm:$0xf0] }
 0xbfe   : > { %10722 = vmatpush.bf16.msrb.mxu0 %v15925_v11  ;;  %v16033_v11 = vor.u32 %v17673_v15, %v16030_v52  ;;  %v16009_v15 = vor.u32 %v17667_v59, %v16006_v9  ;;  %v17706_v52 = vld [vmem:[%s26644_s18 + $0x7fc] sm:$0xf]  ;;  %v15160_v59 = vld [vmem:[%s26644_s18 + $0x20] sm:$0xf]  ;;  %v17456_v9 = vld [vmem:[%s26644_s18 + $0x28] sm:$0xf0]  ;;  %v15305_v58 = vor.u32 %v17492_v13, %v15304_v21 }
 0xbff   : > { %v17567_v21 = vld [vmem:[%s26644_s18 + $0x3a0] sm:$0xf0] }
 0xc00   : > { %10734 = vmatpush.bf16.msra.mxu3 %v16033_v11 }
 0xc01   : > { %10707 = vmatpush.bf16.msra.mxu2 %v15853_v48  ;;  %10697 = vmatpush.bf16.msrb.mxu1 %v15721_v34  ;;  %v17495_v48 = vld [vmem:[%s26644_s18 + $0x160] sm:$0xf0] }
 0xc02   : > { %10723 = vmatpush.bf16.msrb.mxu0 %v15913_v42  ;;  %v16021_v42 = vor.u32 %v17670_v8, %v16018_v32  ;;  %v17459_v8 = vld [vmem:[%s26644_s18 + $0x40] sm:$0xf0]  ;;  %v16165_v32 = vor.u32 %v17706_v52, %v16162_v44  ;;  %v15317_v26 = vor.u32 %v17495_v48, %v15316_v19  ;;  %v15161_v52 = vor.u32 %v17456_v9, %v15160_v59  ;;  %v16258_v44 = vld [vmem:[%s26644_s18 + $0x8c4] sm:$0xf0]  ;;  %v15268_v9 = vld [vmem:[%s26644_s18 + $0xf8] sm:$0xf] }
 0xc03   : > { %v17703_v34 = vld [vmem:[%s26644_s18 + $0x7e4] sm:$0xf] }
 0xc04   : > { %10735 = vmatpush.bf16.msra.mxu3 %v16021_v42  ;;  %10698 = vmatmul.bf16.vlgmr.msrb.gmra.mxu1 %v24614_v16  ;;  %v17733_v42 = vld [vmem:[%s26644_s18 + $0x8d4] sm:$0xf] }
 0xc05   : > { %10724 = vmatmul.bf16.vlgmr.msrb.gmra.mxu0 %v24874_v41  ;;  %10742 = vmatpush.bf16.msra.mxu1 %v16189_v7  ;;  %v15173_v7 = vor.u32 %v17459_v8, %v15172_v49  ;;  %v16126_v49 = vld [vmem:[%s26644_s18 + $0x7bc] sm:$0xf0] }
 0xc06   : > { %10768 = vmatpush.bf16.msra.mxu0 %v15233_v55  ;;  %v17622_v55 = vld [vmem:[%s26644_s18 + $0x55c] sm:$0xf]  ;;  %10708 = vmatpush.bf16.msra.mxu2 %v15841_v50 }
 0xc07   : > { %v15829_v24 = vor.u32 %v17622_v55, %v15826_v40  ;;  %v16270_v55 = vld [vmem:[%s26644_s18 + $0x8dc] sm:$0xf0]  ;;  %v16153_v40 = vor.u32 %v17703_v34, %v16150_v17  ;;  %v17727_v17 = vld [vmem:[%s26644_s18 + $0x8a4] sm:$0xf] }
 0xc08   : > { %10736 = vmatpush.bf16.msra.mxu3 %v16009_v15  ;;  %v10530_v50 = vpop.f32.mrf.mxu3  ;;  %v16273_v15 = vor.u32 %v17733_v42, %v16270_v55  ;;  %v15604_v42 = vld [vmem:[%s26644_s18 + $0x398] sm:$0xf]  ;;  %v16114_v55 = vld [vmem:[%s26644_s18 + $0x7a4] sm:$0xf0] }
 0xc09   : > { %10743 = vmatpush.bf16.msra.mxu1 %v16177_v62 }
 0xc0a   : > { %10769 = vmatpush.bf16.msra.mxu0 %v15221_v61  ;;  %v10517_v61 = vpop.f32.mrf.mxu0  ;;  %10709 = vmatpush.bf16.msra.mxu2 %v15829_v24  ;;  %v15292_v24 = vld [vmem:[%s26644_s18 + $0x128] sm:$0xf] }
 0xc0b   : > { %v10518_v11 = vadd.f32 %v10517_v61, %v25241_v22  ;;  %v16282_v22 = vld [vmem:[%s26644_s18 + $0x8f4] sm:$0xf0]  ;;  %10737 = vmatmul.bf16.vlgmr.msra.gmra.mxu3 %v25037_v39  ;;  %v17730_v61 = vld [vmem:[%s26644_s18 + $0x8bc] sm:$0xf] }
 0xc0c   : > { %10781 = vmatpush.bf16.msrb.mxu3 %v15329_v60  ;;  %v16285_v57 = vor.u32 %v17736_v2, %v16282_v22  ;;  %v17489_v60 = vld [vmem:[%s26644_s18 + $0x130] sm:$0xf0]  ;;  %v17570_v2 = vld [vmem:[%s26644_s18 + $0x3b8] sm:$0xf0]  ;;  %v16261_v8 = vor.u32 %v17730_v61, %v16258_v44  ;;  %v15424_v44 = vld [vmem:[%s26644_s18 + $0x230] sm:$0xf] }
 0xc0d   : > { %10744 = vmatpush.bf16.msra.mxu1 %v16165_v32  ;;  %v15293_v48 = vor.u32 %v17489_v60, %v15292_v24  ;;  %v17697_v22 = vld [vmem:[%s26644_s18 + $0x7b4] sm:$0xf]  ;;  %v15149_v32 = vor.u32 %v17453_v38, %v15148_v35  ;;  %v17691_v24 = vld [vmem:[%s26644_s18 + $0x784] sm:$0xf]  ;;  %v16102_v60 = vld [vmem:[%s26644_s18 + $0x78c] sm:$0xf0] }
 0xc0e   : > { %10770 = vmatpush.bf16.msra.mxu0 %v15209_v47  ;;  %v10543_v47 = vpop.f32.mrf.mxu1  ;;  %10710 = vmatpush.bf16.msra.mxu2 %v15817_v12  ;;  %v17486_v12 = vld [vmem:[%s26644_s18 + $0x118] sm:$0xf0] }
 0xc10   : > { %10782 = vmatpush.bf16.msrb.mxu3 %v15317_v26  ;;  %v10532_v26 = vpop.f32.mrf.mxu3 }
 0xc11   : > { %10745 = vmatpush.bf16.msra.mxu1 %v16153_v40  ;;  %10711 = vmatmul.bf16.vlgmr.msra.gmra.mxu2 %v24675_v4  ;;  %v15605_v40 = vor.u32 %v17567_v21, %v15604_v42  ;;  %v16210_v42 = vld [vmem:[%s26644_s18 + $0x864] sm:$0xf0]  ;;  %v15712_v21 = vld [vmem:[%s26644_s18 + $0x470] sm:$0xf] }
 0xc12   : > { %10771 = vmatpush.bf16.msra.mxu0 %v15197_v45  ;;  %v10531_v45 = vadd.f32 %v10530_v50, %v10518_v11  ;;  %v10519_v30 = vpop.f32.mrf.mxu0  ;;  %10755 = vmatpush.bf16.msrb.mxu2 %v16285_v57  ;;  %v16141_v11 = vor.u32 %v17700_v63, %v16138_v0  ;;  %v16246_v57 = vld [vmem:[%s26644_s18 + $0x8ac] sm:$0xf0]  ;;  %v17694_v50 = vld [vmem:[%s26644_s18 + $0x79c] sm:$0xf]  ;;  %v15592_v0 = vld [vmem:[%s26644_s18 + $0x380] sm:$0xf] }
 0xc13   : > { %v16249_v59 = vor.u32 %v17727_v17, %v16246_v57  ;;  %v17724_v30 = vld [vmem:[%s26644_s18 + $0x88c] sm:$0xf]  ;;  %v16117_v63 = vor.u32 %v17694_v50, %v16114_v55  ;;  %v15244_v17 = vld [vmem:[%s26644_s18 + $0xc8] sm:$0xf]  ;;  %v17477_v57 = vld [vmem:[%s26644_s18 + $0xd0] sm:$0xf0] }
 0xc14   : > { %v10544_v62 = vadd.f32 %v10543_v47, %v10531_v45  ;;  %10783 = vmatpush.bf16.msrb.mxu3 %v15305_v58  ;;  %v15280_v47 = vld [vmem:[%s26644_s18 + $0x110] sm:$0xf]  ;;  %v17483_v45 = vld [vmem:[%s26644_s18 + $0x100] sm:$0xf0]  ;;  %v16234_v58 = vld [vmem:[%s26644_s18 + $0x894] sm:$0xf0] }
 0xc15   : > { %10746 = vmatpush.bf16.msra.mxu1 %v16141_v11  ;;  %v15281_v13 = vor.u32 %v17486_v12, %v15280_v47  ;;  %v15269_v61 = vor.u32 %v17483_v45, %v15268_v9  ;;  %v16237_v38 = vor.u32 %v17724_v30, %v16234_v58  ;;  %v15256_v11 = vld [vmem:[%s26644_s18 + $0xe0] sm:$0xf]  ;;  %v15412_v47 = vld [vmem:[%s26644_s18 + $0x218] sm:$0xf]  ;;  %v17519_v12 = vld [vmem:[%s26644_s18 + $0x220] sm:$0xf0]  ;;  %v15245_v45 = vor.u32 %v17477_v57, %v15244_v17 }
 0xc16   : > { %10772 = vmatpush.bf16.msra.mxu0 %v15185_v25  ;;  %v15616_v25 = vld [vmem:[%s26644_s18 + $0x3b0] sm:$0xf]  ;;  %v10545_v19 = vpop.f32.mrf.mxu1  ;;  %10756 = vmatpush.bf16.msrb.mxu2 %v16273_v15  ;;  %v17564_v15 = vld [vmem:[%s26644_s18 + $0x388] sm:$0xf0]  ;;  %v17558_v55 = vld [vmem:[%s26644_s18 + $0x358] sm:$0xf0]  ;;  %v15413_v9 = vor.u32 %v17519_v12, %v15412_v47 }
 0xc17   : > { %v15617_v34 = vor.u32 %v17570_v2, %v15616_v25  ;;  %v17480_v25 = vld [vmem:[%s26644_s18 + $0xe8] sm:$0xf0]  ;;  %v15593_v2 = vor.u32 %v17564_v15, %v15592_v0  ;;  %v16222_v19 = vld [vmem:[%s26644_s18 + $0x87c] sm:$0xf0]  ;;  %v15568_v50 = vld [vmem:[%s26644_s18 + $0x350] sm:$0xf] }
 0xc18   : > { %10784 = vmatpush.bf16.msrb.mxu3 %v15293_v48  ;;  %v16105_v48 = vor.u32 %v17691_v24, %v16102_v60  ;;  %v17715_v0 = vld [vmem:[%s26644_s18 + $0x844] sm:$0xf]  ;;  %v16198_v15 = vld [vmem:[%s26644_s18 + $0x84c] sm:$0xf0]  ;;  %v15700_v24 = vld [vmem:[%s26644_s18 + $0x458] sm:$0xf] }
 0xc19   : > { %v17591_v60 = vld [vmem:[%s26644_s18 + $0x460] sm:$0xf0]  ;;  %v15544_v12 = vld [vmem:[%s26644_s18 + $0x320] sm:$0xf]  ;;  %v17510_v57 = vld [vmem:[%s26644_s18 + $0x1d8] sm:$0xf0] }
 0xc1a   : > { %10773 = vmatpush.bf16.msra.mxu0 %v15173_v7  ;;  %v16129_v7 = vor.u32 %v17697_v22, %v16126_v49  ;;  %10757 = vmatpush.bf16.msrb.mxu2 %v16261_v8  ;;  %v15580_v22 = vld [vmem:[%s26644_s18 + $0x368] sm:$0xf]  ;;  %v17561_v49 = vld [vmem:[%s26644_s18 + $0x370] sm:$0xf0]  ;;  %v17543_v47 = vld [vmem:[%s26644_s18 + $0x2e0] sm:$0xf0] }
 0xc1c   : > { %10747 = vmatpush.bf16.msra.mxu1 %v16129_v7  ;;  %10785 = vmatpush.bf16.msrb.mxu3 %v15281_v13  ;;  %v15581_v7 = vor.u32 %v17561_v49, %v15580_v22  ;;  %v17594_v13 = vld [vmem:[%s26644_s18 + $0x478] sm:$0xf0]  ;;  %v15508_v49 = vld [vmem:[%s26644_s18 + $0x2d8] sm:$0xf] }
 0xc1d   : > { %v15713_v58 = vor.u32 %v17594_v13, %v15712_v21  ;;  %v15496_v21 = vld [vmem:[%s26644_s18 + $0x2c0] sm:$0xf]  ;;  %v15676_v13 = vld [vmem:[%s26644_s18 + $0x428] sm:$0xf] }
 0xc1e   : > { %10774 = vmatpush.bf16.msra.mxu0 %v15161_v52  ;;  %v10556_v52 = vpop.f32.mrf.mxu2  ;;  %10758 = vmatpush.bf16.msrb.mxu2 %v16249_v59 }
 0xc1f   : > { %v25515_v35 = vadd.f32 %v10556_v52, %v10544_v62  ;;  %v17721_v62 = vld [vmem:[%s26644_s18 + $0x874] sm:$0xf]  ;;  %v15569_v52 = vor.u32 %v17558_v55, %v15568_v50  ;;  %v17540_v55 = vld [vmem:[%s26644_s18 + $0x2c8] sm:$0xf0] }
 0xc20   : > { %10748 = vmatpush.bf16.msra.mxu1 %v16117_v63  ;;  %10786 = vmatpush.bf16.msrb.mxu3 %v15269_v61  ;;  %v16225_v26 = vor.u32 %v17721_v62, %v16222_v19  ;;  %v17516_v63 = vld [vmem:[%s26644_s18 + $0x208] sm:$0xf0]  ;;  %v15520_v61 = vld [vmem:[%s26644_s18 + $0x2f0] sm:$0xf]  ;;  %v15388_v62 = vld [vmem:[%s26644_s18 + $0x1e8] sm:$0xf] }
 0xc21   : > { %v17513_v19 = vld [vmem:[%s26644_s18 + $0x1f0] sm:$0xf0] }
 0xc22   : > { %10775 = vmatpush.bf16.msra.mxu0 %v15149_v32  ;;  %v15257_v32 = vor.u32 %v17480_v25, %v15256_v11  ;;  %10759 = vmatpush.bf16.msrb.mxu2 %v16237_v38  ;;  %v15556_v38 = vld [vmem:[%s26644_s18 + $0x338] sm:$0xf]  ;;  %v16201_v25 = vor.u32 %v17715_v0, %v16198_v15  ;;  %v17585_v50 = vld [vmem:[%s26644_s18 + $0x430] sm:$0xf0]  ;;  %v17507_v0 = vld [vmem:[%s26644_s18 + $0x1c0] sm:$0xf0] }
 0xc24   : > { %10749 = vmatpush.bf16.msra.mxu1 %v16105_v48  ;;  %10787 = vmatpush.bf16.msrb.mxu3 %v15257_v32  ;;  %v17588_v32 = vld [vmem:[%s26644_s18 + $0x448] sm:$0xf0] }
 0xc25   : > { %10776 = vmatmul.bf16.vlgmr.msra.gmra.mxu0 %v24379_v20  ;;  %v17522_v20 = vld [vmem:[%s26644_s18 + $0x238] sm:$0xf0] }
 0xc26   : > { %10820 = vmatpush.bf16.msrb.mxu0 %v15617_v34  ;;  %v15425_v8 = vor.u32 %v17522_v20, %v15424_v44  ;;  %v17718_v34 = vld [vmem:[%s26644_s18 + $0x85c] sm:$0xf]  ;;  %v10558_v59 = vpop.f32.mrf.mxu2  ;;  %10760 = vmatpush.bf16.msrb.mxu2 %v16225_v26  ;;  %v17555_v20 = vld [vmem:[%s26644_s18 + $0x340] sm:$0xf0]  ;;  %v17552_v26 = vld [vmem:[%s26644_s18 + $0x328] sm:$0xf0] }
 0xc27   : > { %v16213_v30 = vor.u32 %v17718_v34, %v16210_v42  ;;  %10750 = vmatmul.bf16.vlgmr.msra.gmra.mxu1 %v25146_v43  ;;  %v17546_v44 = vld [vmem:[%s26644_s18 + $0x2f8] sm:$0xf0]  ;;  %v15557_v22 = vor.u32 %v17555_v20, %v15556_v38  ;;  %v15389_v34 = vor.u32 %v17513_v19, %v15388_v62  ;;  %v15545_v42 = vor.u32 %v17552_v26, %v15544_v12  ;;  %v15532_v59 = vld [vmem:[%s26644_s18 + $0x308] sm:$0xf]  ;;  %v15352_v19 = vld [vmem:[%s26644_s18 + $0x1a0] sm:$0xf] }
 0xc28   : > { %10794 = vmatpush.bf16.msrb.mxu1 %v15425_v8  ;;  %10788 = vmatpush.bf16.msrb.mxu3 %v15245_v45  ;;  %v15521_v48 = vor.u32 %v17546_v44, %v15520_v61  ;;  %v15688_v8 = vld [vmem:[%s26644_s18 + $0x440] sm:$0xf]  ;;  %v15484_v20 = vld [vmem:[%s26644_s18 + $0x2a8] sm:$0xf]  ;;  %v17534_v12 = vld [vmem:[%s26644_s18 + $0x298] sm:$0xf0] }
 0xc29   : > { %v15689_v17 = vor.u32 %v17588_v32, %v15688_v8  ;;  %v17579_v8 = vld [vmem:[%s26644_s18 + $0x400] sm:$0xf0] }
 0xc2a   : > { %10821 = vmatpush.bf16.msrb.mxu0 %v15605_v40  ;;  %v15400_v40 = vld [vmem:[%s26644_s18 + $0x200] sm:$0xf]  ;;  %10761 = vmatpush.bf16.msrb.mxu2 %v16213_v30  ;;  %v17666_v30 = vld [vmem:[%s26644_s18 + $0x6b8] sm:$0xf0] }
 0xc2b   : > { %v15401_v11 = vor.u32 %v17516_v63, %v15400_v40  ;;  %10789 = vmatmul.bf16.vlgmr.msrb.gmra.mxu3 %v24381_v1  ;;  %v15376_v1 = vld [vmem:[%s26644_s18 + $0x1d0] sm:$0xf]  ;;  %v15364_v63 = vld [vmem:[%s26644_s18 + $0x1b8] sm:$0xf] }
 0xc2c   : > { %10795 = vmatpush.bf16.msrb.mxu1 %v15413_v9  ;;  %10833 = vmatpush.bf16.msra.mxu3 %v15713_v58  ;;  %v17549_v9 = vld [vmem:[%s26644_s18 + $0x310] sm:$0xf0]  ;;  %v15377_v45 = vor.u32 %v17510_v57, %v15376_v1  ;;  %v16000_v40 = vld [vmem:[%s26644_s18 + $0x6b0] sm:$0xf]  ;;  %v15677_v58 = vor.u32 %v17585_v50, %v15676_v13  ;;  %v10569_v15 = vpop.f32.mrf.mxu0  ;;  %v15340_v57 = vld [vmem:[%s26644_s18 + $0x188] sm:$0xf] }
 0xc2d   : > { %v15533_v61 = vor.u32 %v17549_v9, %v15532_v59  ;;  %v25668_v44 = vadd.f32 %v10569_v15, %v25515_v35  ;;  %v16001_v38 = vor.u32 %v17666_v30, %v16000_v40  ;;  %v17663_v35 = vld [vmem:[%s26644_s18 + $0x6a0] sm:$0xf0]  ;;  %v15640_v50 = vld [vmem:[%s26644_s18 + $0x3e0] sm:$0xf]  ;;  %v15460_v9 = vld [vmem:[%s26644_s18 + $0x278] sm:$0xf] }
 0xc2e   : > { %10822 = vmatpush.bf16.msrb.mxu0 %v15593_v2  ;;  %v15701_v2 = vor.u32 %v17591_v60, %v15700_v24  ;;  %10762 = vmatpush.bf16.msrb.mxu2 %v16201_v25  ;;  %v15664_v24 = vld [vmem:[%s26644_s18 + $0x410] sm:$0xf]  ;;  %v17582_v60 = vld [vmem:[%s26644_s18 + $0x418] sm:$0xf0]  ;;  %v15365_v25 = vor.u32 %v17507_v0, %v15364_v63  ;;  %v15964_v30 = vld [vmem:[%s26644_s18 + $0x668] sm:$0xf] }
 0xc2f   : > { %v15665_v62 = vor.u32 %v17582_v60, %v15664_v24  ;;  %v15796_v15 = vld [vmem:[%s26644_s18 + $0x518] sm:$0xf]  ;;  %v15448_v24 = vld [vmem:[%s26644_s18 + $0x260] sm:$0xf]  ;;  %v15628_v60 = vld [vmem:[%s26644_s18 + $0x3c8] sm:$0xf] }
 0xc30   : > { %10796 = vmatpush.bf16.msrb.mxu1 %v15401_v11  ;;  %10834 = vmatpush.bf16.msra.mxu3 %v15701_v2  ;;  %v17537_v11 = vld [vmem:[%s26644_s18 + $0x2b0] sm:$0xf0]  ;;  %v15988_v2 = vld [vmem:[%s26644_s18 + $0x698] sm:$0xf] }
 0xc31   : > { %10763 = vmatmul.bf16.vlgmr.msrb.gmra.mxu2 %v25213_v33  ;;  %v15989_v32 = vor.u32 %v17663_v35, %v15988_v2  ;;  %v17690_v2 = vld [vmem:[%s26644_s18 + $0x778] sm:$0xf0]  ;;  %v15952_v35 = vld [vmem:[%s26644_s18 + $0x650] sm:$0xf] }
 0xc32   : > { %10823 = vmatpush.bf16.msrb.mxu0 %v15581_v7  ;;  %10807 = vmatpush.bf16.msra.mxu2 %v15521_v48  ;;  %v15509_v7 = vor.u32 %v17543_v47, %v15508_v49  ;;  %v17504_v48 = vld [vmem:[%s26644_s18 + $0x1a8] sm:$0xf0]  ;;  %v15652_v49 = vld [vmem:[%s26644_s18 + $0x3f8] sm:$0xf]  ;;  %v15472_v47 = vld [vmem:[%s26644_s18 + $0x290] sm:$0xf] }
 0xc33   : > { %v15353_v26 = vor.u32 %v17504_v48, %v15352_v19  ;;  %v15653_v1 = vor.u32 %v17579_v8, %v15652_v49  ;;  %v15473_v13 = vor.u32 %v17534_v12, %v15472_v47  ;;  %v17612_v47 = vld [vmem:[%s26644_s18 + $0x508] sm:$0xf0]  ;;  %v15436_v12 = vld [vmem:[%s26644_s18 + $0x248] sm:$0xf] }
 0xc34   : > { %10797 = vmatpush.bf16.msrb.mxu1 %v15389_v34  ;;  %10835 = vmatpush.bf16.msra.mxu3 %v15689_v17  ;;  %v15976_v34 = vld [vmem:[%s26644_s18 + $0x680] sm:$0xf]  ;;  %v17660_v17 = vld [vmem:[%s26644_s18 + $0x688] sm:$0xf0] }
 0xc35   : > { %v15977_v59 = vor.u32 %v17660_v17, %v15976_v34  ;;  %v15904_v17 = vld [vmem:[%s26644_s18 + $0x5f0] sm:$0xf] }
 0xc36   : > { %10824 = vmatpush.bf16.msrb.mxu0 %v15569_v52  ;;  %10808 = vmatpush.bf16.msra.mxu2 %v15509_v7  ;;  %v15497_v52 = vor.u32 %v17540_v55, %v15496_v21  ;;  %v17501_v7 = vld [vmem:[%s26644_s18 + $0x190] sm:$0xf0]  ;;  %v10571_v21 = vpop.f32.mrf.mxu0  ;;  %v17576_v55 = vld [vmem:[%s26644_s18 + $0x3e8] sm:$0xf0] }
 0xc37   : > { %v15341_v40 = vor.u32 %v17501_v7, %v15340_v57  ;;  %v15641_v0 = vor.u32 %v17576_v55, %v15640_v50  ;;  %v17687_v57 = vld [vmem:[%s26644_s18 + $0x760] sm:$0xf0]  ;;  %v17642_v7 = vld [vmem:[%s26644_s18 + $0x5f8] sm:$0xf0]  ;;  %v15772_v50 = vld [vmem:[%s26644_s18 + $0x4e8] sm:$0xf] }
 0xc38   : > { %10798 = vmatpush.bf16.msrb.mxu1 %v15377_v45  ;;  %10836 = vmatpush.bf16.msra.mxu3 %v15677_v58  ;;  %v17531_v45 = vld [vmem:[%s26644_s18 + $0x280] sm:$0xf0]  ;;  %v17657_v58 = vld [vmem:[%s26644_s18 + $0x670] sm:$0xf0] }
 0xc39   : > { %v17609_v55 = vld [vmem:[%s26644_s18 + $0x4f0] sm:$0xf0] }
 0xc3a   : > { %10825 = vmatpush.bf16.msrb.mxu0 %v15557_v22  ;;  %10809 = vmatpush.bf16.msra.mxu2 %v15497_v52  ;;  %v15485_v22 = vor.u32 %v17537_v11, %v15484_v20  ;;  %v17615_v52 = vld [vmem:[%s26644_s18 + $0x520] sm:$0xf0]  ;;  %v15965_v20 = vor.u32 %v17657_v58, %v15964_v30  ;;  %v17528_v11 = vld [vmem:[%s26644_s18 + $0x268] sm:$0xf0] }
 0xc3b   : > { %v15797_v19 = vor.u32 %v17615_v52, %v15796_v15  ;;  %v15449_v8 = vor.u32 %v17528_v11, %v15448_v24  ;;  %v17684_v30 = vld [vmem:[%s26644_s18 + $0x748] sm:$0xf0]  ;;  %v17639_v58 = vld [vmem:[%s26644_s18 + $0x5e0] sm:$0xf0]  ;;  %v15773_v15 = vor.u32 %v17609_v55, %v15772_v50  ;;  %v17606_v24 = vld [vmem:[%s26644_s18 + $0x4d8] sm:$0xf0] }
 0xc3c   : > { %10799 = vmatpush.bf16.msrb.mxu1 %v15365_v25  ;;  %10837 = vmatpush.bf16.msra.mxu3 %v15665_v62  ;;  %v16096_v25 = vld [vmem:[%s26644_s18 + $0x770] sm:$0xf]  ;;  %v17654_v62 = vld [vmem:[%s26644_s18 + $0x658] sm:$0xf0]  ;;  %v16060_v11 = vld [vmem:[%s26644_s18 + $0x728] sm:$0xf] }
 0xc3d   : > { %v15953_v34 = vor.u32 %v17654_v62, %v15952_v35  ;;  %v15916_v35 = vld [vmem:[%s26644_s18 + $0x608] sm:$0xf]  ;;  %v17645_v62 = vld [vmem:[%s26644_s18 + $0x610] sm:$0xf0]  ;;  %v17630_v50 = vld [vmem:[%s26644_s18 + $0x598] sm:$0xf0] }
 0xc3e   : > { %10826 = vmatpush.bf16.msrb.mxu0 %v15545_v42  ;;  %v15808_v42 = vld [vmem:[%s26644_s18 + $0x530] sm:$0xf]  ;;  %10810 = vmatpush.bf16.msra.mxu2 %v15485_v22  ;;  %v15784_v22 = vld [vmem:[%s26644_s18 + $0x500] sm:$0xf] }
 0xc3f   : > { %v15785_v21 = vor.u32 %v17612_v47, %v15784_v22  ;;  %v15748_v22 = vld [vmem:[%s26644_s18 + $0x4b8] sm:$0xf]  ;;  %v15917_v47 = vor.u32 %v17645_v62, %v15916_v35  ;;  %v17624_v35 = vld [vmem:[%s26644_s18 + $0x568] sm:$0xf0] }
 0xc40   : > { %10800 = vmatpush.bf16.msrb.mxu1 %v15353_v26  ;;  %10838 = vmatpush.bf16.msra.mxu3 %v15653_v1  ;;  %v17525_v26 = vld [vmem:[%s26644_s18 + $0x250] sm:$0xf0]  ;;  %v16084_v1 = vld [vmem:[%s26644_s18 + $0x758] sm:$0xf] }
 0xc42   : > { %10827 = vmatpush.bf16.msrb.mxu0 %v15533_v61  ;;  %10811 = vmatpush.bf16.msra.mxu2 %v15473_v13  ;;  %v15461_v61 = vor.u32 %v17531_v45, %v15460_v9  ;;  %v25770_v49 = vpop.f32.mrf.mxu0  ;;  %v15437_v13 = vor.u32 %v17525_v26, %v15436_v12  ;;  %v15892_v45 = vld [vmem:[%s26644_s18 + $0x5d8] sm:$0xf]  ;;  %v17678_v12 = vld [vmem:[%s26644_s18 + $0x718] sm:$0xf0]  ;;  %v15868_v26 = vld [vmem:[%s26644_s18 + $0x5a8] sm:$0xf] }
 0xc44   : > { %10801 = vmatpush.bf16.msrb.mxu1 %v15341_v40  ;;  %10839 = vmatpush.bf16.msra.mxu3 %v15641_v0  ;;  %v16072_v40 = vld [vmem:[%s26644_s18 + $0x740] sm:$0xf]  ;;  %v17648_v0 = vld [vmem:[%s26644_s18 + $0x628] sm:$0xf0] }
 0xc45   : > { %10828 = vmatmul.bf16.vlgmr.msrb.gmra.mxu0 %v24595_v37  ;;  %v17618_v37 = vld [vmem:[%s26644_s18 + $0x538] sm:$0xf0] }
 0xc46   : > { %10872 = vmatpush.bf16.msra.mxu0 %v16001_v38  ;;  %v15809_v63 = vor.u32 %v17618_v37, %v15808_v42  ;;  %v17573_v38 = vld [vmem:[%s26644_s18 + $0x3d0] sm:$0xf0]  ;;  %10812 = vmatpush.bf16.msra.mxu2 %v15461_v61  ;;  %v17651_v42 = vld [vmem:[%s26644_s18 + $0x640] sm:$0xf0]  ;;  %v16085_v37 = vor.u32 %v17687_v57, %v16084_v1  ;;  %v16073_v61 = vor.u32 %v17684_v30, %v16072_v40  ;;  %v15736_v57 = vld [vmem:[%s26644_s18 + $0x4a0] sm:$0xf] }
 0xc47   : > { %v15629_v48 = vor.u32 %v17573_v38, %v15628_v60  ;;  %10802 = vmatmul.bf16.vlgmr.msrb.gmra.mxu1 %v24383_v54  ;;  %v15940_v54 = vld [vmem:[%s26644_s18 + $0x638] sm:$0xf]  ;;  %v15893_v60 = vor.u32 %v17639_v58, %v15892_v45  ;;  %v15724_v45 = vld [vmem:[%s26644_s18 + $0x488] sm:$0xf]  ;;  %v17597_v40 = vld [vmem:[%s26644_s18 + $0x490] sm:$0xf0] }
 0xc48   : > { %10846 = vmatpush.bf16.msra.mxu1 %v15809_v63  ;;  %v15941_v9 = vor.u32 %v17651_v42, %v15940_v54  ;;  %v15928_v63 = vld [vmem:[%s26644_s18 + $0x620] sm:$0xf]  ;;  %v16036_v42 = vld [vmem:[%s26644_s18 + $0x6f8] sm:$0xf]  ;;  %v16192_v30 = vld [vmem:[%s26644_s18 + $0x830] sm:$0xf] }
 0xc49   : > { %10840 = vmatpush.bf16.msra.mxu3 %v15629_v48  ;;  %v15929_v38 = vor.u32 %v17648_v0, %v15928_v63  ;;  %v16024_v58 = vld [vmem:[%s26644_s18 + $0x6e0] sm:$0xf]  ;;  %v17672_v63 = vld [vmem:[%s26644_s18 + $0x6e8] sm:$0xf0]  ;;  %v15844_v0 = vld [vmem:[%s26644_s18 + $0x578] sm:$0xf] }
 0xc4a   : > { %10873 = vmatpush.bf16.msra.mxu0 %v15989_v32  ;;  %v16097_v32 = vor.u32 %v17690_v2, %v16096_v25  ;;  %10813 = vmatpush.bf16.msra.mxu2 %v15449_v8  ;;  %v10623_v52 = vpop.f32.mrf.mxu0  ;;  %v17681_v25 = vld [vmem:[%s26644_s18 + $0x730] sm:$0xf0]  ;;  %v17636_v2 = vld [vmem:[%s26644_s18 + $0x5c8] sm:$0xf0]  ;;  %v17603_v8 = vld [vmem:[%s26644_s18 + $0x4c0] sm:$0xf0] }
 0xc4b   : > { %v16061_v48 = vor.u32 %v17681_v25, %v16060_v11  ;;  %v15725_v52 = vor.u32 %v17597_v40, %v15724_v45  ;;  %v17669_v11 = vld [vmem:[%s26644_s18 + $0x6d0] sm:$0xf0] }
 0xc4c   : > { %10847 = vmatpush.bf16.msra.mxu1 %v15797_v19  ;;  %10841 = vmatmul.bf16.vlgmr.msra.gmra.mxu3 %v24597_v56  ;;  %v15760_v56 = vld [vmem:[%s26644_s18 + $0x4d0] sm:$0xf] }
 0xc4d   : > { %10885 = vmatpush.bf16.msrb.mxu3 %v16097_v32  ;;  %v15761_v19 = vor.u32 %v17606_v24, %v15760_v56  ;;  %v16025_v56 = vor.u32 %v17672_v63, %v16024_v58  ;;  %v16180_v24 = vld [vmem:[%s26644_s18 + $0x818] sm:$0xf]  ;;  %v16264_v58 = vld [vmem:[%s26644_s18 + $0x8c0] sm:$0xf] }
 0xc4e   : > { %10874 = vmatpush.bf16.msra.mxu0 %v15977_v59  ;;  %v15905_v59 = vor.u32 %v17642_v7, %v15904_v17  ;;  %10814 = vmatpush.bf16.msra.mxu2 %v15437_v13  ;;  %v15749_v17 = vor.u32 %v17603_v8, %v15748_v22  ;;  %v17600_v7 = vld [vmem:[%s26644_s18 + $0x4a8] sm:$0xf0]  ;;  %v10582_v13 = vpop.f32.mrf.mxu3 }
 0xc4f   : > { %v25887_v55 = vadd.f32 %v10582_v13, %v25668_v44  ;;  %v25969_v13 = vld [vmem:[%s26788_s26] sm:$0xff] }
 0xc50   : > { %10848 = vmatpush.bf16.msra.mxu1 %v15785_v21  ;;  %v17675_v21 = vld [vmem:[%s26644_s18 + $0x700] sm:$0xf0] }
 0xc51   : > { %10886 = vmatpush.bf16.msrb.mxu3 %v16085_v37  ;;  %10815 = vmatmul.bf16.vlgmr.msra.gmra.mxu2 %v24391_v3  ;;  %v16048_v3 = vld [vmem:[%s26644_s18 + $0x710] sm:$0xf] }
 0xc52   : > { %10875 = vmatpush.bf16.msra.mxu0 %v15965_v20  ;;  %10859 = vmatpush.bf16.msrb.mxu2 %v15905_v59  ;;  %v15880_v20 = vld [vmem:[%s26644_s18 + $0x5c0] sm:$0xf]  ;;  %v16049_v1 = vor.u32 %v17678_v12, %v16048_v3  ;;  %v15856_v37 = vld [vmem:[%s26644_s18 + $0x590] sm:$0xf]  ;;  %v15737_v59 = vor.u32 %v17600_v7, %v15736_v57  ;;  %v17708_v3 = vld [vmem:[%s26644_s18 + $0x808] sm:$0xf0] }
 0xc53   : > { %v15881_v32 = vor.u32 %v17636_v2, %v15880_v20  ;;  %v15857_v44 = vor.u32 %v17630_v50, %v15856_v37  ;;  %v16012_v20 = vld [vmem:[%s26644_s18 + $0x6c8] sm:$0xf]  ;;  %v15832_v2 = vld [vmem:[%s26644_s18 + $0x560] sm:$0xf]  ;;  %v17735_v50 = vld [vmem:[%s26644_s18 + $0x8e0] sm:$0xf0] }
 0xc54   : > { %10849 = vmatpush.bf16.msra.mxu1 %v15773_v15  ;;  %v17627_v15 = vld [vmem:[%s26644_s18 + $0x580] sm:$0xf0]  ;;  %v15820_v12 = vld [vmem:[%s26644_s18 + $0x548] sm:$0xf] }
 0xc55   : > { %10887 = vmatpush.bf16.msrb.mxu3 %v16073_v61  ;;  %v16156_v7 = vld [vmem:[%s26644_s18 + $0x7e8] sm:$0xf] }
 0xc56   : > { %10876 = vmatpush.bf16.msra.mxu0 %v15953_v34  ;;  %10860 = vmatpush.bf16.msrb.mxu2 %v15893_v60  ;;  %v17633_v34 = vld [vmem:[%s26644_s18 + $0x5b0] sm:$0xf0]  ;;  %v15845_v60 = vor.u32 %v17627_v15, %v15844_v0  ;;  %v10584_v25 = vpop.f32.mrf.mxu3  ;;  %v16132_v15 = vld [vmem:[%s26644_s18 + $0x7b8] sm:$0xf] }
 0xc57   : > { %v15869_v54 = vor.u32 %v17633_v34, %v15868_v26  ;;  %v17621_v26 = vld [vmem:[%s26644_s18 + $0x550] sm:$0xf0]  ;;  %v16288_v34 = vld [vmem:[%s26644_s18 + $0x8f0] sm:$0xf] }
 0xc58   : > { %10850 = vmatpush.bf16.msra.mxu1 %v15761_v19  ;;  %v16013_v19 = vor.u32 %v17669_v11, %v16012_v20  ;;  %v15821_v57 = vor.u32 %v17621_v26, %v15820_v12  ;;  %v16120_v20 = vld [vmem:[%s26644_s18 + $0x7a0] sm:$0xf]  ;;  %v17696_v11 = vld [vmem:[%s26644_s18 + $0x7a8] sm:$0xf0]  ;;  %v17723_v12 = vld [vmem:[%s26644_s18 + $0x880] sm:$0xf0] }
 0xc59   : > { %10888 = vmatpush.bf16.msrb.mxu3 %v16061_v48  ;;  %v25935_v48 = vld [vmem:[%s26645_s19] sm:$0x7] }
 0xc5a   : > { %10877 = vmatpush.bf16.msra.mxu0 %v15941_v9  ;;  %10861 = vmatpush.bf16.msrb.mxu2 %v15881_v32  ;;  %v16037_v9 = vor.u32 %v17675_v21, %v16036_v42  ;;  %v8915_v22 = vperm.slane %v25935_v48, 1  ;;  %v15833_v32 = vor.u32 %v17624_v35, %v15832_v2  ;;  %v16240_v2 = vld [vmem:[%s26644_s18 + $0x890] sm:$0xf]  ;;  %v17726_v35 = vld [vmem:[%s26644_s18 + $0x898] sm:$0xf0] }
 0xc5c   : > { %10851 = vmatpush.bf16.msra.mxu1 %v15749_v17  ;;  %v17738_v17 = vld [vmem:[%s26644_s18 + $0x8f8] sm:$0xf0] }
 0xc5d   : > { %10889 = vmatpush.bf16.msrb.mxu3 %v16049_v1  ;;  %v16289_v21 = vor.u32 %v17738_v17, %v16288_v34 }
 0xc5e   : > { %10878 = vmatpush.bf16.msra.mxu0 %v15929_v38  ;;  %10862 = vmatpush.bf16.msrb.mxu2 %v15869_v54  ;;  %v17711_v38 = vld [vmem:[%s26644_s18 + $0x820] sm:$0xf0]  ;;  %v17705_v54 = vld [vmem:[%s26644_s18 + $0x7f0] sm:$0xf0]  ;;  %v10634_v42 = vpop.f32.mrf.mxu3 }
 0xc5f   : > { %v16181_v62 = vor.u32 %v17711_v38, %v16180_v24  ;;  %v16157_v45 = vor.u32 %v17705_v54, %v16156_v7  ;;  %v16216_v54 = vld [vmem:[%s26644_s18 + $0x860] sm:$0xf] }
 0xc60   : > { %10852 = vmatpush.bf16.msra.mxu1 %v15737_v59  ;;  %v1797_v59 = vperm.slane %v25969_v13, 0 }
 0xc61   : > { %10890 = vmatpush.bf16.msrb.mxu3 %v16037_v9  ;;  %v10595_v9 = vpop.f32.mrf.mxu1 }
 0xc62   : > { %10879 = vmatpush.bf16.msra.mxu0 %v15917_v47  ;;  %10863 = vmatpush.bf16.msrb.mxu2 %v15857_v44  ;;  %v25938_v8 = vpop.f32.mrf.mxu0  ;;  %v16168_v47 = vld [vmem:[%s26644_s18 + $0x800] sm:$0xf]  ;;  %v10596_v40 = vadd.f32 %v10595_v9, %v25887_v55  ;;  %v17702_v44 = vld [vmem:[%s26644_s18 + $0x7d8] sm:$0xf0]  ;;  %v17732_v55 = vld [vmem:[%s26644_s18 + $0x8c8] sm:$0xf0]  ;;  %v25993_v63 = vadd.f32 %v19939_v10, %v1797_v59 }
 0xc63   : > { %v16169_v1 = vor.u32 %v17708_v3, %v16168_v47  ;;  %v16252_v10 = vld [vmem:[%s26644_s18 + $0x8a8] sm:$0xf]  ;;  %v16241_v47 = vor.u32 %v17726_v35, %v16240_v2  ;;  %v16228_v3 = vld [vmem:[%s26644_s18 + $0x878] sm:$0xf]  ;;  %v17717_v9 = vld [vmem:[%s26644_s18 + $0x850] sm:$0xf0] }
 0xc64   : > { %10853 = vmatpush.bf16.msra.mxu1 %v15725_v52  ;;  %v17699_v52 = vld [vmem:[%s26644_s18 + $0x7c0] sm:$0xf0]  ;;  %v12236_v24 = vmul.f32 -1.442695, %v25993_v63  ;;  %v16229_v7 = vor.u32 %v17723_v12, %v16228_v3 }
 0xc65   : > { %10880 = vmatmul.bf16.vlgmr.msra.gmra.mxu0 %v24874_v41  ;;  %v17714_v41 = vld [vmem:[%s26644_s18 + $0x838] sm:$0xf0]  ;;  %10891 = vmatpush.bf16.msrb.mxu3 %v16025_v56  ;;  %v16265_v56 = vor.u32 %v17732_v55, %v16264_v58  ;;  %v16133_v38 = vor.u32 %v17699_v52, %v16132_v15  ;;  %v17745_v58 = vld [vmem:[%s26648_s22 + $0x30] sm:$0xff] }
 0xc66   : > { %v16193_v61 = vor.u32 %v17714_v41, %v16192_v30  ;;  %10864 = vmatpush.bf16.msrb.mxu2 %v15845_v60  ;;  %18078 = vpow2.f32 %v12236_v24 }
 0xc67   : > { %10854 = vmatmul.bf16.vlgmr.msra.gmra.mxu1 %v24614_v16  ;;  %v10622_v16 = vadd.f32 %v25770_v49, %v8915_v22  ;;  %v16276_v49 = vld [vmem:[%s26644_s18 + $0x8d8] sm:$0xf]  ;;  %v17693_v22 = vld [vmem:[%s26644_s18 + $0x790] sm:$0xf0] }
 0xc68   : > { %10898 = vmatpush.bf16.msrb.mxu1 %v16193_v61  ;;  %v16277_v41 = vor.u32 %v17735_v50, %v16276_v49  ;;  %v10636_v61 = vpop.f32.mrf.mxu3 }
 0xc69   : > { %10892 = vmatpush.bf16.msrb.mxu3 %v16013_v19  ;;  %v10635_v37 = vadd.f32 %v10634_v42, %v10622_v16  ;;  %v10597_v60 = vpop.f32.mrf.mxu1  ;;  %v16108_v19 = vld [vmem:[%s26644_s18 + $0x788] sm:$0xf]  ;;  %v17720_v42 = vld [vmem:[%s26644_s18 + $0x868] sm:$0xf0] }
 0xc6a   : > { %10865 = vmatpush.bf16.msrb.mxu2 %v15833_v32  ;;  %v10675_v30 = vpop.f32.mrf.mxu0  ;;  %v16109_v17 = vor.u32 %v17693_v22, %v16108_v19  ;;  %v16217_v59 = vor.u32 %v17720_v42, %v16216_v54  ;;  %v17741_v19 = vld [vmem:[%s26648_s22 + $0x10] sm:$0xff]  ;;  %v17739_v42 = vld [vmem:[%s26648_s22] sm:$0xff] }
 0xc6c   : > { %10899 = vmatpush.bf16.msrb.mxu1 %v16181_v62  ;;  %10893 = vmatmul.bf16.vlgmr.msrb.gmra.mxu3 %v25037_v39  ;;  %v16144_v39 = vld [vmem:[%s26644_s18 + $0x7d0] sm:$0xf]  ;;  %v16121_v62 = vor.u32 %v17696_v11, %v16120_v20  ;;  %v10608_v26 = vpop.f32.mrf.mxu2 }
 0xc6d   : > { %v16145_v0 = vor.u32 %v17702_v44, %v16144_v39  ;;  %v17746_v39 = vld [vmem:[%s26648_s22 + $0x38] sm:$0xff]  ;;  %v1801_v44 = vperm.slane %v25969_v13, 4 }
 0xc6e   : > { %10866 = vmatpush.bf16.msrb.mxu2 %v15821_v57  ;;  %v18079_v57 = vpop.eup %18078 }
 0xc6f   : > { %v26056_v15 = vadd.f32 %v19947_v31, %v1801_v44  ;;  %v17743_v31 = vld [vmem:[%s26648_s22 + $0x20] sm:$0xff] }
 0xc70   : > { %10900 = vmatpush.bf16.msrb.mxu1 %v16169_v1  ;;  %v10686_v32 = vpop.f32.mrf.mxu3  ;;  %v26033_v1 = vadd.f32 %v10608_v26, %v10596_v40 }
 0xc71   : > { %10867 = vmatmul.bf16.vlgmr.msrb.gmra.mxu2 %v24675_v4  ;;  %v17729_v4 = vld [vmem:[%s26644_s18 + $0x8b0] sm:$0xf0]  ;;  %v10647_v34 = vpop.f32.mrf.mxu1 }
 0xc72   : > { %10911 = vmatpush.bf16.msra.mxu2 %v16289_v21  ;;  %v16253_v25 = vor.u32 %v17729_v4, %v16252_v10  ;;  %v10648_v16 = vadd.f32 %v10647_v34, %v10635_v37  ;;  %v1980_v21 = vadd.f32 1.0, %v18079_v57  ;;  %v16204_v37 = vld [vmem:[%s26644_s18 + $0x848] sm:$0xf]  ;;  %v12240_v4 = vmul.f32 -1.442695, %v26056_v15 }
 0xc73   : > { %v16205_v30 = vor.u32 %v17717_v9, %v16204_v37  ;;  %v17744_v10 = vld [vmem:[%s26648_s22 + $0x28] sm:$0xff] }
 0xc74   : > { %10901 = vmatpush.bf16.msrb.mxu1 %v16157_v45  ;;  %v10610_v45 = vpop.f32.mrf.mxu2  ;;  %18080 = vrcp.f32 %v1980_v21  ;;  %vm1995_vm12 = vweird.f32 %v1980_v21  ;;  %v1999_v22 = vand.u32 2147483647, %v1980_v21  ;;  %v17740_v57 = vld [vmem:[%s26648_s22 + $0x8] sm:$0xff] }
 0xc75   : > { %18082 = vpow2.f32 %v12240_v4  ;;  %v17774_v4 = vld [vmem:[%s26648_s22 + $0x118] sm:$0xff] }
 0xc76   : > { %10912 = vmatpush.bf16.msra.mxu2 %v16277_v41  ;;  %vm2000_vm5 = vcmp.eq.f32.partialorder %v1999_v22, 8.507059e+37 }
 0xc78   : > { %10902 = vmatpush.bf16.msrb.mxu1 %v16145_v0  ;;  %v10688_v50 = vpop.f32.mrf.mxu3 }
 0xc79   : > { %v10649_v40 = vpop.f32.mrf.mxu1 }
 0xc7a   : > { %10913 = vmatpush.bf16.msra.mxu2 %v16265_v56  ;;  %v18081_v41 = vpop.eup %18080 }
 0xc7b   : > { %v1991_v61 = vmul.f32 %v18081_v41, %v1980_v21  ;;  %vm1996_vm3 = vweird.f32 %v18081_v41  ;;  %v18083_v35 = vpop.eup %18082 }
 0xc7c   : > { %10903 = vmatpush.bf16.msrb.mxu1 %v16133_v38  ;;  %vm1997_vm10 = vmor %vm1995_vm12, %vm1996_vm3  ;;  %v1984_v12 = vadd.f32 1.0, %v18083_v35 }
 0xc7d   : > { %v10660_v55 = vpop.f32.mrf.mxu2  ;;  %v1992_v60 = vsub.f32 1.0, %v1991_v61 }
 0xc7e   : > { %10914 = vmatpush.bf16.msra.mxu2 %v16253_v25  ;;  %v10661_v52 = vadd.f32 %v10660_v55, %v10648_v16  ;;  %v17742_v25 = vld [vmem:[%s26648_s22 + $0x18] sm:$0xff]  ;;  %18084 = vrcp.f32 %v1984_v12  ;;  %vm2055_vm7 = vweird.f32 %v1984_v12 }
 0xc7f   : > { %v1993_v11 = vmul.f32 %v18081_v41, %v1992_v60 }
 0xc80   : > { %10904 = vmatpush.bf16.msrb.mxu1 %v16121_v62  ;;  %v10674_v56 = vadd.f32 %v25938_v8, %v10661_v52  ;;  %v2001_v62 = vand.u32 2147483648, %v1980_v21  ;;  %v17775_v52 = vld [vmem:[%s26648_s22 + $0x120] sm:$0xff] }
 0xc81   : > { %v10699_v0 = vpop.f32.mrf.mxu1  ;;  %v1994_v2 = vadd.f32 %v18081_v41, %v1993_v11 }
 0xc82   : > { %10915 = vmatpush.bf16.msra.mxu2 %v16241_v47  ;;  %v10725_v49 = vpop.f32.mrf.mxu0  ;;  %v10687_v24 = vadd.f32 %v10686_v32, %v10674_v56  ;;  %v2002_v26 = vor.u32 1.1754944e-38, %v2001_v62 }
 0xc83   : > { %v1998_v3 = vsel %vm1997_vm10, %v18081_v41, %v1994_v2  ;;  %v17776_v41 = vld [vmem:[%s26648_s22 + $0x128] sm:$0xff] }
 0xc84   : > { %10905 = vmatpush.bf16.msrb.mxu1 %v16109_v17  ;;  %v10700_v38 = vadd.f32 %v10699_v0, %v10687_v24  ;;  %v18085_v45 = vpop.eup %18084  ;;  %v8916_v0 = vperm.slane %v25935_v48, 2  ;;  %v2061_v48 = vand.u32 2147483648, %v1984_v12 }
 0xc85   : > { %v10662_v20 = vpop.f32.mrf.mxu2  ;;  %vm2056_vm15 = vweird.f32 %v18085_v45 }
 0xc86   : > { %10916 = vmatpush.bf16.msra.mxu2 %v16229_v7  ;;  %v2003_v7 = vsel %vm2000_vm5, %v2002_v26, %v1998_v3  ;;  %v2059_v20 = vand.u32 2147483647, %v1984_v12  ;;  %vm2057_vm8 = vmor %vm2055_vm7, %vm2056_vm15  ;;  %v2062_v2 = vor.u32 1.1754944e-38, %v2061_v48 }
 0xc87   : > { %10906 = vmatmul.bf16.vlgmr.msrb.gmra.mxu1 %v25146_v43  ;;  %v2140_v21 = vmul.f32 %v2003_v7, %v25993_v63 }
 0xc88   : > { %vm2060_vm11 = vcmp.eq.f32.partialorder %v2059_v20, 8.507059e+37 }
 0xc89   : > { %v10986_v40 = vpack.c.bf16 %v2140_v21, %v2140_v21 }
 0xc8a   : > { %10917 = vmatpush.bf16.msra.mxu2 %v16217_v59  ;;  %v10727_v43 = vpop.f32.mrf.mxu0  ;;  %v18123_v59 = vld [vmem:[%s26788_s26 + $0x8] sm:$0x3] }
 0xc8b   : > { %v1805_v37 = vperm.slane %v18123_v59, 0  ;;  %v2051_v43 = vmul.f32 %v18085_v45, %v1984_v12  ;;  %v17810_v12 = vld [vmem:[%s26648_s22 + $0x238] sm:$0xff] }
 0xc8c   : > { %v17806_v59 = vld [vmem:[%s26648_s22 + $0x218] sm:$0xff] }
 0xc8d   : > { %v2052_v55 = vsub.f32 1.0, %v2051_v43 }
 0xc8e   : > { %10918 = vmatpush.bf16.msra.mxu2 %v16205_v30  ;;  %v10738_v8 = vpop.f32.mrf.mxu3  ;;  %v17777_v30 = vld [vmem:[%s26648_s22 + $0x130] sm:$0xff] }
 0xc8f   : > { %v2053_v61 = vmul.f32 %v18085_v45, %v2052_v55 }
 0xc91   : > { %10919 = vmatmul.bf16.vlgmr.msra.gmra.mxu2 %v25213_v33  ;;  %v10701_v33 = vpop.f32.mrf.mxu1  ;;  %v2054_v60 = vadd.f32 %v18085_v45, %v2053_v61  ;;  %v17803_v61 = vld [vmem:[%s26648_s22 + $0x200] sm:$0xff] }
 0xc92   : > { %11870 = vmatpush.bf16.msrb.mxu2 %v17746_v39  ;;  %v26090_v39 = vadd.f32 %v20281_v23, %v1805_v37 }
 0xc94   : > { %v10712_v32 = vpop.f32.mrf.mxu2 }
 0xc95   : > { %v10713_v47 = vadd.f32 %v10712_v32, %v10700_v38  ;;  %v17771_v32 = vld [vmem:[%s26648_s22 + $0x100] sm:$0xff] }
 0xc96   : > { %11871 = vmatpush.bf16.msrb.mxu2 %v17745_v58  ;;  %v10740_v16 = vpop.f32.mrf.mxu3  ;;  %v12244_v58 = vmul.f32 -1.442695, %v26090_v39 }
 0xc97   : > { %v10726_v34 = vadd.f32 %v10725_v49, %v10713_v47  ;;  %v17778_v49 = vld [vmem:[%s26648_s22 + $0x138] sm:$0xff]  ;;  %v17809_v16 = vld [vmem:[%s26648_s22 + $0x230] sm:$0xff] }
 0xc98   : > { %18086 = vpow2.f32 %v12244_v58 }
 0xc99   : > { %v10739_v54 = vadd.f32 %v10738_v8, %v10726_v34  ;;  %v2058_v8 = vsel %vm2057_vm8, %v18085_v45, %v2054_v60 }
 0xc9a   : > { %11872 = vmatpush.bf16.msrb.mxu2 %v17744_v10  ;;  %v2063_v22 = vsel %vm2060_vm11, %v2062_v2, %v2058_v8 }
 0xc9b   : > { %v2144_v47 = vmul.f32 %v2063_v22, %v26056_v15  ;;  %v17808_v15 = vld [vmem:[%s26648_s22 + $0x228] sm:$0xff] }
 0xc9c   : > { %v10714_v50 = vpop.f32.mrf.mxu2 }
 0xc9e   : > { %11873 = vmatpush.bf16.msrb.mxu2 %v17743_v31  ;;  %v18087_v38 = vpop.eup %18086  ;;  %v17773_v31 = vld [vmem:[%s26648_s22 + $0x110] sm:$0xff] }
 0xca2   : > { %11874 = vmatpush.bf16.msrb.mxu2 %v17742_v25  ;;  %v10777_v17 = vpop.f32.mrf.mxu0  ;;  %v1988_v25 = vadd.f32 1.0, %v18087_v38 }
 0xca3   : > { %v10778_v56 = vadd.f32 %v10777_v17, %v8916_v0  ;;  %v10990_v17 = vpack.c.bf16 %v2144_v47, %v2144_v47 }
 0xca4   : > { %v10751_v63 = vpop.f32.mrf.mxu1  ;;  %18088 = vrcp.f32 %v1988_v25  ;;  %vm2115_vm4 = vweird.f32 %v1988_v25 }
 0xca5   : > { %v10752_v44 = vadd.f32 %v10751_v63, %v10739_v54 }
 0xca6   : > { %11875 = vmatpush.bf16.msrb.mxu2 %v17741_v19  ;;  %v17772_v19 = vld [vmem:[%s26648_s22 + $0x108] sm:$0xff] }
 0xcaa   : > { %11876 = vmatpush.bf16.msrb.mxu2 %v17740_v57  ;;  %v10779_v9 = vpop.f32.mrf.mxu0  ;;  %v18089_v34 = vpop.eup %18088 }
 0xcab   : > { %v2111_v7 = vmul.f32 %v18089_v34, %v1988_v25  ;;  %vm2116_vm6 = vweird.f32 %v18089_v34  ;;  %v2121_v9 = vand.u32 2147483648, %v1988_v25 }
 0xcac   : > { %v10753_v23 = vpop.f32.mrf.mxu1  ;;  %vm2117_vm13 = vmor %vm2115_vm4, %vm2116_vm6 }
 0xcad   : > { %v2112_v54 = vsub.f32 1.0, %v2111_v7 }
 0xcae   : > { %11877 = vmatpush.bf16.msrb.mxu2 %v17739_v42  ;;  %v10790_v10 = vpop.f32.mrf.mxu3  ;;  %v17807_v42 = vld [vmem:[%s26648_s22 + $0x220] sm:$0xff] }
 0xcaf   : > { %v10791_v24 = vadd.f32 %v10790_v10, %v10778_v56  ;;  %v2113_v50 = vmul.f32 %v18089_v34, %v2112_v54 }
 0xcb1   : > { %11878 = vmatmul.bf16.vlgmr.msrb.gmra.mxu2 %v10986_v40  ;;  %v2114_v37 = vadd.f32 %v18089_v34, %v2113_v50  ;;  %v17805_v40 = vld [vmem:[%s26648_s22 + $0x210] sm:$0xff]  ;;  %v17842_v50 = vld [vmem:[%s26649_s23 + $0xb8] sm:$0xff] }
 0xcb2   : > { %11922 = vmatpush.bf16.msra.mxu2 %v17778_v49  ;;  %11377 = vmatpush.bf16.msra.mxu1 %v17842_v50  ;;  %v17758_v50 = vld [vmem:[%s26648_s22 + $0x98] sm:$0xff] }
 0xcb3   : > { %v2118_v43 = vsel %vm2117_vm13, %v18089_v34, %v2114_v37  ;;  %v17841_v37 = vld [vmem:[%s26649_s23 + $0xb0] sm:$0xff] }
 0xcb4   : > { %v10764_v33 = vpop.f32.mrf.mxu2 }
 0xcb5   : > { %v26106_v11 = vadd.f32 %v10764_v33, %v10752_v44 }
 0xcb6   : > { %11923 = vmatpush.bf16.msra.mxu2 %v17777_v30  ;;  %v10792_v62 = vpop.f32.mrf.mxu3  ;;  %v2119_v30 = vand.u32 2147483647, %v1988_v25  ;;  %11378 = vmatpush.bf16.msra.mxu1 %v17841_v37 }
 0xcb8   : > { %vm2120_vm1 = vcmp.eq.f32.partialorder %v2119_v30, 8.507059e+37  ;;  %v17823_v30 = vld [vmem:[%s26649_s23 + $0x20] sm:$0xff] }
 0xcba   : > { %11924 = vmatpush.bf16.msra.mxu2 %v17776_v41  ;;  %v2122_v41 = vor.u32 1.1754944e-38, %v2121_v9  ;;  %v17824_v9 = vld [vmem:[%s26649_s23 + $0x28] sm:$0xff] }
 0xcbc   : > { %v10766_v3 = vpop.f32.mrf.mxu2  ;;  %v2123_v23 = vsel %vm2120_vm1, %v2122_v41, %v2118_v43  ;;  %v17822_v43 = vld [vmem:[%s26649_s23 + $0x18] sm:$0xff] }
 0xcbd   : > { %v2148_v56 = vmul.f32 %v2123_v23, %v26090_v39  ;;  %v10925_v39 = vadd.f32 %v26106_v11, %v22258_v46  ;;  %v17830_v41 = vld [vmem:[%s26649_s23 + $0x58] sm:$0xff] }
 0xcbe   : > { %11925 = vmatpush.bf16.msra.mxu2 %v17775_v52  ;;  %v17804_v52 = vld [vmem:[%s26648_s22 + $0x208] sm:$0xff] }
 0xcc2   : > { %11926 = vmatpush.bf16.msra.mxu2 %v17774_v4  ;;  %v10829_v35 = vpop.f32.mrf.mxu0 }
 0xcc4   : > { %v10803_v57 = vpop.f32.mrf.mxu1 }
 0xcc5   : > { %v10804_v45 = vadd.f32 %v10803_v57, %v10791_v24  ;;  %v10994_v24 = vpack.c.bf16 %v2148_v56, %v2148_v56  ;;  %v17820_v56 = vld [vmem:[%s26649_s23 + $0x8] sm:$0xff] }
 0xcc6   : > { %11927 = vmatpush.bf16.msra.mxu2 %v17773_v31 }
 0xcca   : > { %11928 = vmatpush.bf16.msra.mxu2 %v17772_v19  ;;  %v10831_v26 = vpop.f32.mrf.mxu0 }
 0xccb   : > { %v10931_v26 = vsel %vm10929_vm14, %v10925_v39, 0.0 }
 0xccc   : > { %v10805_v21 = vpop.f32.mrf.mxu1 }
 0xccd   : > { %v17834_v21 = vld [vmem:[%s26649_s23 + $0x78] sm:$0xff] }
 0xcce   : > { %11929 = vmatpush.bf16.msra.mxu2 %v17771_v32  ;;  %v10924_v32 = vadd.f32 %v26033_v1, %v22260_v27  ;;  %11364 = vmatpush.bf16.msra.mxu3 %v17834_v21 }
 0xccf   : > { %v10842_v49 = vpop.f32.mrf.mxu3 }
 0xcd1   : > { %11930 = vmatmul.bf16.vlgmr.msra.gmra.mxu2 %v10990_v17  ;;  %v10930_v17 = vsel %vm10929_vm14, %v10924_v32, 0.0 }
 0xcd2   : > { %11974 = vmatpush.bf16.msrb.mxu2 %v17810_v12 }
 0xcd4   : > { %v10816_v63 = vpop.f32.mrf.mxu2 }
 0xcd5   : > { %v10817_v44 = vadd.f32 %v10816_v63, %v10804_v45  ;;  %v17832_v45 = vld [vmem:[%s26649_s23 + $0x68] sm:$0xff]  ;;  %v17831_v63 = vld [vmem:[%s26649_s23 + $0x60] sm:$0xff] }
 0xcd6   : > { %11975 = vmatpush.bf16.msrb.mxu2 %v17809_v16  ;;  %v10932_v16 = vadd.f32 %v10931_v26, %v10930_v17  ;;  %v17769_v26 = vld [vmem:[%s26648_s22 + $0xf0] sm:$0xff]  ;;  %v17760_v17 = vld [vmem:[%s26648_s22 + $0xa8] sm:$0xff] }
 0xcd7   : > { %v10830_v58 = vadd.f32 %v10829_v35, %v10817_v44  ;;  %v10844_v0 = vpop.f32.mrf.mxu3  ;;  %v17839_v44 = vld [vmem:[%s26649_s23 + $0xa0] sm:$0xff] }
 0xcd8   : > { %v17829_v0 = vld [vmem:[%s26649_s23 + $0x50] sm:$0xff] }
 0xcd9   : > { %v10843_v25 = vadd.f32 %v10842_v49, %v10830_v58  ;;  %v17825_v49 = vld [vmem:[%s26649_s23 + $0x30] sm:$0xff]  ;;  %v17838_v58 = vld [vmem:[%s26649_s23 + $0x98] sm:$0xff] }
 0xcda   : > { %11976 = vmatpush.bf16.msrb.mxu2 %v17808_v15 }
 0xcdc   : > { %v10818_v10 = vpop.f32.mrf.mxu2 }
 0xcdd   : > { %v17828_v10 = vld [vmem:[%s26649_s23 + $0x48] sm:$0xff] }
 0xcde   : > { %11977 = vmatpush.bf16.msrb.mxu2 %v17807_v42 }
 0xce2   : > { %11978 = vmatpush.bf16.msrb.mxu2 %v17806_v59  ;;  %v10881_v55 = vpop.f32.mrf.mxu0  ;;  %v17833_v59 = vld [vmem:[%s26649_s23 + $0x70] sm:$0xff] }
 0xce3   : > { %11365 = vmatpush.bf16.msra.mxu3 %v17833_v59 }
 0xce4   : > { %v10855_v60 = vpop.f32.mrf.mxu1 }
 0xce5   : > { %v10856_v2 = vadd.f32 %v10855_v60, %v10843_v25 }
 0xce6   : > { %11979 = vmatpush.bf16.msrb.mxu2 %v17805_v40  ;;  %v17840_v40 = vld [vmem:[%s26649_s23 + $0xa8] sm:$0xff] }
 0xce7   : > { %11366 = vmatpush.bf16.msra.mxu3 %v17832_v45  ;;  %11379 = vmatpush.bf16.msra.mxu1 %v17840_v40  ;;  %v17757_v45 = vld [vmem:[%s26648_s22 + $0x90] sm:$0xff] }
 0xcea   : > { %11980 = vmatpush.bf16.msrb.mxu2 %v17804_v52  ;;  %v10883_v4 = vpop.f32.mrf.mxu0  ;;  %v17837_v52 = vld [vmem:[%s26649_s23 + $0x90] sm:$0xff] }
 0xceb   : > { %11367 = vmatpush.bf16.msra.mxu3 %v17831_v63  ;;  %11380 = vmatpush.bf16.msra.mxu1 %v17839_v44  ;;  %v17756_v63 = vld [vmem:[%s26648_s22 + $0x88] sm:$0xff] }
 0xcec   : > { %v10857_v38 = vpop.f32.mrf.mxu1  ;;  %v17764_v44 = vld [vmem:[%s26648_s22 + $0xc8] sm:$0xff] }
 0xced   : > { %v17836_v38 = vld [vmem:[%s26649_s23 + $0x88] sm:$0xff] }
 0xcee   : > { %11981 = vmatpush.bf16.msrb.mxu2 %v17803_v61 }
 0xcef   : > { %v10894_v48 = vpop.f32.mrf.mxu3  ;;  %11368 = vmatpush.bf16.msra.mxu3 %v17830_v41  ;;  %11381 = vmatpush.bf16.msra.mxu1 %v17838_v58  ;;  %v1803_v41 = vperm.slane %v25969_v13, 6  ;;  %v17755_v58 = vld [vmem:[%s26648_s22 + $0x80] sm:$0xff] }
 0xcf1   : > { %11982 = vmatmul.bf16.vlgmr.msrb.gmra.mxu2 %v10994_v24 }
 0xcf3   : > { %11369 = vmatpush.bf16.msra.mxu3 %v17829_v0  ;;  %11382 = vmatpush.bf16.msra.mxu1 %v17837_v52  ;;  %v1804_v52 = vperm.slane %v25969_v13, 7 }
 0xcf4   : > { %v10868_v31 = vpop.f32.mrf.mxu2 }
 0xcf5   : > { %v10869_v35 = vadd.f32 %v10868_v31, %v10856_v2 }
 0xcf7   : > { %v10896_v20 = vpop.f32.mrf.mxu3  ;;  %v10882_v19 = vadd.f32 %v10881_v55, %v10869_v35  ;;  %v17821_v55 = vld [vmem:[%s26649_s23 + $0x10] sm:$0xff]  ;;  %11370 = vmatpush.bf16.msra.mxu3 %v17828_v10  ;;  %11383 = vmatpush.bf16.msra.mxu1 %v17836_v38  ;;  %v1802_v10 = vperm.slane %v25969_v13, 5 }
 0xcf9   : > { %v10895_v22 = vadd.f32 %v10894_v48, %v10882_v19  ;;  %v17827_v19 = vld [vmem:[%s26649_s23 + $0x40] sm:$0xff] }
 0xcfb   : > { %11371 = vmatpush.bf16.msra.mxu3 %v17827_v19 }
 0xcfc   : > { %v10870_v33 = vpop.f32.mrf.mxu2 }
 0xd04   : > { %v10907_v8 = vpop.f32.mrf.mxu1 }
 0xd05   : > { %v10908_v47 = vadd.f32 %v10907_v8, %v10895_v22  ;;  %v17754_v22 = vld [vmem:[%s26648_s22 + $0x78] sm:$0xff] }
 0xd0c   : > { %v10909_v62 = vpop.f32.mrf.mxu1 }
 0xd0d   : > { %v17819_v62 = vld [vmem:[%s26649_s23] sm:$0xff] }
 0xd14   : > { %v10920_v3 = vpop.f32.mrf.mxu2 }
 0xd15   : > { %v10921_v12 = vadd.f32 %v10920_v3, %v10908_v47  ;;  %v17770_v47 = vld [vmem:[%s26648_s22 + $0xf8] sm:$0xff]  ;;  %v17753_v3 = vld [vmem:[%s26648_s22 + $0x70] sm:$0xff] }
 0xd17   : > { %v10926_v34 = vadd.f32 %v10921_v12, %v22265_v18  ;;  %v17826_v18 = vld [vmem:[%s26649_s23 + $0x38] sm:$0xff]  ;;  %v17761_v12 = vld [vmem:[%s26648_s22 + $0xb0] sm:$0xff] }
 0xd18   : > { %11351 = vmatpush.bf16.msrb.mxu0 %v17826_v18  ;;  %v17750_v18 = vld [vmem:[%s26648_s22 + $0x58] sm:$0xff] }
 0xd19   : > { %v10933_v57 = vsel %vm10929_vm14, %v10926_v34, 0.0 }
 0xd1a   : > { %v10934_v7 = vadd.f32 %v10933_v57, %v10932_v16  ;;  %v17768_v16 = vld [vmem:[%s26648_s22 + $0xe8] sm:$0xff]  ;;  %v17751_v57 = vld [vmem:[%s26648_s22 + $0x60] sm:$0xff] }
 0xd1c   : > { %v10922_v15 = vpop.f32.mrf.mxu2  ;;  %10935 = vadd.xlane.f32.xlu0 %v10934_v7  ;;  %11352 = vmatpush.bf16.msrb.mxu0 %v17825_v49  ;;  %v1800_v7 = vperm.slane %v25969_v13, 3  ;;  %v17766_v49 = vld [vmem:[%s26648_s22 + $0xd8] sm:$0xff] }
 0xd1d   : > { %v17759_v15 = vld [vmem:[%s26648_s22 + $0xa0] sm:$0xff] }
 0xd1e   : > { %v26285_v21 = vadd.f32 %v19903_v36, %v1800_v7  ;;  %v17749_v36 = vld [vmem:[%s26648_s22 + $0x50] sm:$0xff] }
 0xd20   : > { %11353 = vmatpush.bf16.msrb.mxu0 %v17824_v9  ;;  %v12239_v9 = vmul.f32 -1.442695, %v26285_v21 }
 0xd22   : > { %18090 = vpow2.f32 %v12239_v9 }
 0xd24   : > { %11354 = vmatpush.bf16.msrb.mxu0 %v17823_v30  ;;  %v17748_v30 = vld [vmem:[%s26648_s22 + $0x48] sm:$0xff] }
 0xd28   : > { %11355 = vmatpush.bf16.msrb.mxu0 %v17822_v43  ;;  %v17747_v43 = vld [vmem:[%s26648_s22 + $0x40] sm:$0xff]  ;;  %v18091_v0 = vpop.eup %18090 }
 0xd2c   : > { %11356 = vmatpush.bf16.msrb.mxu0 %v17821_v55  ;;  %v17763_v55 = vld [vmem:[%s26648_s22 + $0xc0] sm:$0xff] }
 0xd30   : > { %11357 = vmatpush.bf16.msrb.mxu0 %v17820_v56 }
 0xd34   : > { %v26148_v46 = vpop.f32.mrf.mxu2  ;;  %11358 = vmatpush.bf16.msrb.mxu0 %v17819_v62 }
 0xd38   : > { %11883 = vmatpush.bf16.msra.mxu0 %v17754_v22 }
 0xd3c   : > { %v11881_v11 = vpop.f32.mrf.mxu2  ;;  %11884 = vmatpush.bf16.msra.mxu0 %v17753_v3 }
 0xd3d   : > { %v17767_v11 = vld [vmem:[%s26648_s22 + $0xe0] sm:$0xff] }
 0xd54   : > { %v26150_v27 = vpop.f32.mrf.mxu2 }
 0xd5c   : > { %v11933_v1 = vpop.f32.mrf.mxu2 }
 0xd5d   : > { %v1798_v1 = vperm.slane %v25969_v13, 1 }
 0xd5f   : > { %v26294_v59 = vadd.f32 %v20025_v5, %v1798_v1  ;;  %v17765_v5 = vld [vmem:[%s26648_s22 + $0xd0] sm:$0xff] }
 0xd74   : > { %v26152_v54 = vpop.f32.mrf.mxu2 }
 0xd7c   : > { %v11985_v42 = vpop.f32.mrf.mxu2 }
 0xd7d   : > { %v1799_v42 = vperm.slane %v25969_v13, 2 }
 0xd7f   : > { %v26297_v37 = vadd.f32 %v20089_v29, %v1799_v42  ;;  %v12237_v29 = vmul.f32 -1.442695, %v26294_v59 }
 0xd81   : > { %v12238_v40 = vmul.f32 -1.442695, %v26297_v37  ;;  %18092 = vpow2.f32 %v12237_v29 }
 0xd83   : > { %18094 = vpow2.f32 %v12238_v40 }
 0xd8f   : > { %v10936_v23 = vpop.xlane.xlu0 %10935 }
 0xd90   : > { %v10937_v61 = vmul.f32 %v10936_v23, %v20490_v53  ;;  %v18093_v23 = vpop.eup %18092 }
 0xd91   : > { %v18095_v56 = vpop.eup %18094 }
 0xd92   : > { %v26215_v4 = vsub.f32 %v10924_v32, %v10937_v61  ;;  %v26217_v24 = vsub.f32 %v10925_v39, %v10937_v61  ;;  %v26219_v60 = vsub.f32 %v10926_v34, %v10937_v61  ;;  %v17835_v39 = vld [vmem:[%s26649_s23 + $0x80] sm:$0xff]  ;;  %v17762_v32 = vld [vmem:[%s26648_s22 + $0xb8] sm:$0xff]  ;;  %v17752_v34 = vld [vmem:[%s26648_s22 + $0x68] sm:$0xff] }
 0xd93   : > { %11384 = vmatpush.bf16.msra.mxu1 %v17835_v39  ;;  %11896 = vmatpush.bf16.msrb.mxu3 %v17762_v32 }
 0xd94   : > { %v10941_v48 = vmul.f32 %v26215_v4, %v26215_v4  ;;  %v10942_v31 = vmul.f32 %v26217_v24, %v26217_v24  ;;  %v10943_v20 = vmul.f32 %v26219_v60, %v26219_v60  ;;  %11885 = vmatpush.bf16.msra.mxu0 %v17752_v34  ;;  %v10927_v34 = vld [vmem:[%s26646_s20] sm:$0x7] }
 0xd96   : > { %v10944_v33 = vsel %vm10929_vm14, %v10941_v48, 0.0  ;;  %v10945_v8 = vsel %vm10929_vm14, %v10942_v31, 0.0  ;;  %v10947_v2 = vsel %vm10929_vm14, %v10943_v20, 0.0  ;;  %v26333_v48 = vadd.f32 1.0, %v18091_v0 }
 0xd97   : > { %v10946_v25 = vadd.f32 %v10945_v8, %v10944_v33  ;;  %11909 = vmatpush.bf16.msrb.mxu1 %v17770_v47  ;;  %11897 = vmatpush.bf16.msrb.mxu3 %v17761_v12  ;;  %v26336_v31 = vadd.f32 %v19996_v28, %v1803_v41  ;;  %v26338_v20 = vadd.f32 1.0, %v18093_v23  ;;  %v26341_v33 = vadd.f32 %v20027_v51, %v1804_v52 }
 0xd98   : > { %11886 = vmatpush.bf16.msra.mxu0 %v17751_v57  ;;  %vm2040_vm12 = vweird.f32 %v26333_v48 }
 0xd99   : > { %v10948_v35 = vadd.f32 %v10947_v2, %v10946_v25  ;;  %v26343_v25 = vadd.f32 1.0, %v18095_v56  ;;  %v26346_v2 = vadd.f32 %v20192_v14, %v1802_v10  ;;  %v12243_v28 = vmul.f32 -1.442695, %v26341_v33 }
 0xd9a   : > { %vm2010_vm7 = vweird.f32 %v26338_v20 }
 0xd9b   : > { %10949 = vadd.xlane.f32.xlu1 %v10948_v35  ;;  %11910 = vmatpush.bf16.msrb.mxu1 %v17769_v26  ;;  %v12241_v51 = vmul.f32 -1.442695, %v26346_v2  ;;  %vm2025_vm11 = vweird.f32 %v26343_v25 }
 0xd9c   : > { %11898 = vmatpush.bf16.msrb.mxu3 %v17760_v17  ;;  %11887 = vmatpush.bf16.msra.mxu0 %v17750_v18 }
 0xd9f   : > { %11911 = vmatpush.bf16.msrb.mxu1 %v17768_v16 }
 0xda0   : > { %11899 = vmatpush.bf16.msrb.mxu3 %v17759_v15  ;;  %11888 = vmatpush.bf16.msra.mxu0 %v17749_v36  ;;  %v10928_v15 = vld [vmem:[%s26647_s21] sm:$0x7]  ;;  %v10969_v36 = vperm.slane %v10927_v34, 2 }
 0xda1   : > { %v10978_v29 = vperm.slane %v10928_v15, 1 }
 0xda3   : > { %11912 = vmatpush.bf16.msrb.mxu1 %v17767_v11 }
 0xda4   : > { %11900 = vmatpush.bf16.msrb.mxu3 %v17758_v50  ;;  %11889 = vmatpush.bf16.msra.mxu0 %v17748_v30  ;;  %v10967_v50 = vperm.slane %v10927_v34, 0 }
 0xda7   : > { %11913 = vmatpush.bf16.msrb.mxu1 %v17766_v49  ;;  %v10968_v49 = vperm.slane %v10927_v34, 1  ;;  %v2014_v34 = vand.u32 2147483647, %v26338_v20 }
 0xda8   : > { %11901 = vmatpush.bf16.msrb.mxu3 %v17757_v45  ;;  %11890 = vmatpush.bf16.msra.mxu0 %v17747_v43 }
 0xda9   : > { %vm2015_vm4 = vcmp.eq.f32.partialorder %v2014_v34, 8.507059e+37  ;;  %v17797_v34 = vld [vmem:[%s26648_s22 + $0x1d0] sm:$0xff] }
 0xdab   : > { %11914 = vmatpush.bf16.msrb.mxu1 %v17765_v5  ;;  %v10977_v5 = vperm.slane %v10928_v15, 0 }
 0xdac   : > { %11902 = vmatpush.bf16.msrb.mxu3 %v17756_v63 }
 0xdaf   : > { %11915 = vmatpush.bf16.msrb.mxu1 %v17764_v44  ;;  %v10979_v44 = vperm.slane %v10928_v15, 2  ;;  %v2044_v15 = vand.u32 2147483647, %v26333_v48 }
 0xdb0   : > { %11903 = vmatpush.bf16.msrb.mxu3 %v17755_v58 }
 0xdb1   : > { %vm2045_vm1 = vcmp.eq.f32.partialorder %v2044_v15, 8.507059e+37 }
 0xdb3   : > { %11916 = vmatpush.bf16.msrb.mxu1 %v17763_v55 }
 0xe0e   : > { %v10950_v61 = vpop.xlane.xlu1 %10949 }
 0xe0f   : > { %v10951_v38 = vmul.f32 %v10950_v61, %v20490_v53  ;;  %v12242_v53 = vmul.f32 -1.442695, %v26336_v31 }
 0xe11   : > { %v10952_v8 = vadd.f32 1e-06, %v10951_v38  ;;  %v17794_v38 = vld [vmem:[%s26648_s22 + $0x1b8] sm:$0xff] }
 0xe13   : > { %18096 = vrsqrt.f32 %v10952_v8  ;;  %vm10959_vm0 = vweird.f32 %v10952_v8 }
 0xe14   : > { %18098 = vrcp.f32 %v26333_v48 }
 0xe15   : > { %18100 = vrcp.f32 %v26338_v20 }
 0xe16   : > { %18102 = vrcp.f32 %v26343_v25 }
 0xe17   : > { %18104 = vpow2.f32 %v12242_v53 }
 0xe18   : > { %18106 = vpow2.f32 %v12243_v28 }
 0xe19   : > { %v18097_v13 = vpop.eup %18096  ;;  %18108 = vpow2.f32 %v12241_v51 }
 0xe1a   : > { %v26354_v35 = vpop.eup %18098  ;;  %v10954_v14 = vmul.f32 %v18097_v13, %v10952_v8  ;;  %vm10960_vm2 = vweird.f32 %v18097_v13  ;;  %v17802_v8 = vld [vmem:[%s26648_s22 + $0x1f8] sm:$0xff] }
 0xe1b   : > { %v26356_v62 = vpop.eup %18100  ;;  %v2036_v22 = vmul.f32 %v26354_v35, %v26333_v48  ;;  %vm10961_vm9 = vmor %vm10959_vm0, %vm10960_vm2  ;;  %vm2041_vm3 = vweird.f32 %v26354_v35 }
 0xe1c   : > { %v26358_v19 = vpop.eup %18102  ;;  %v10955_v39 = vmul.f32 %v18097_v13, %v10954_v14  ;;  %v2006_v47 = vmul.f32 %v26356_v62, %v26338_v20  ;;  %vm2011_vm10 = vweird.f32 %v26356_v62  ;;  %vm26411_vm15 = vmor %vm2040_vm12, %vm2041_vm3 }
 0xe1d   : > { %v18105_v32 = vpop.eup %18104  ;;  %v2021_v26 = vmul.f32 %v26358_v19, %v26343_v25  ;;  %v2037_v57 = vsub.f32 1.0, %v2036_v22  ;;  %vm2026_vm5 = vweird.f32 %v26358_v19  ;;  %vm26424_vm8 = vmor %vm2010_vm7, %vm2011_vm10 }
 0xe1e   : > { %v10956_v3 = vmul.f32 0.5, %v10955_v39  ;;  %v18107_v12 = vpop.eup %18106  ;;  %v26369_v7 = vadd.f32 1.0, %v18105_v32  ;;  %v2007_v11 = vsub.f32 1.0, %v2006_v47  ;;  %v2046_v32 = vand.u32 2147483648, %v26333_v48  ;;  %vm26440_vm6 = vmor %vm2025_vm11, %vm2026_vm5 }
 0xe1f   : > { %v18109_v16 = vpop.eup %18108  ;;  %v26374_v1 = vadd.f32 1.0, %v18107_v12  ;;  %v2022_v18 = vsub.f32 1.0, %v2021_v26  ;;  %v2038_v55 = vmul.f32 %v26354_v35, %v2037_v57  ;;  %v2016_v47 = vand.u32 2147483648, %v26338_v20  ;;  %v17785_v12 = vld [vmem:[%s26648_s22 + $0x170] sm:$0xff] }
 0xe20   : > { %v10957_v17 = vsub.f32 1.5, %v10956_v3  ;;  %v26376_v9 = vadd.f32 1.0, %v18109_v16  ;;  %18110 = vrcp.f32 %v26369_v7  ;;  %v2008_v0 = vmul.f32 %v26356_v62, %v2007_v11  ;;  %v17793_v16 = vld [vmem:[%s26648_s22 + $0x1b0] sm:$0xff] }
 0xe21   : > { %18112 = vrcp.f32 %v26374_v1  ;;  %v2039_v51 = vadd.f32 %v26354_v35, %v2038_v55  ;;  %v2031_v3 = vand.u32 2147483648, %v26343_v25  ;;  %v17801_v57 = vld [vmem:[%s26648_s22 + $0x1f0] sm:$0xff]  ;;  %vm2085_vm2 = vweird.f32 %v26369_v7 }
 0xe22   : > { %v10958_v42 = vmul.f32 %v18097_v13, %v10957_v17  ;;  %18114 = vrcp.f32 %v26376_v9  ;;  %v2029_v17 = vand.u32 2147483647, %v26343_v25  ;;  %vm2070_vm12 = vweird.f32 %v26376_v9  ;;  %v17789_v26 = vld [vmem:[%s26648_s22 + $0x190] sm:$0xff] }
 0xe23   : > { %v2043_v25 = vsel %vm26411_vm15, %v26354_v35, %v2039_v51  ;;  %v17784_v35 = vld [vmem:[%s26648_s22 + $0x168] sm:$0xff]  ;;  %vm2100_vm10 = vweird.f32 %v26374_v1 }
 0xe24   : > { %v10962_v45 = vsel %vm10961_vm9, %v18097_v13, %v10958_v42  ;;  %v2009_v13 = vadd.f32 %v26356_v62, %v2008_v0  ;;  %vm2030_vm13 = vcmp.eq.f32.partialorder %v2029_v17, 8.507059e+37  ;;  %v17791_v0 = vld [vmem:[%s26648_s22 + $0x1a0] sm:$0xff]  ;;  %v2089_v17 = vand.u32 2147483647, %v26369_v7 }
 0xe25   : > { %v10963_v40 = vmul.f32 %v10962_v45, %v26215_v4  ;;  %v10964_v30 = vmul.f32 %v10962_v45, %v26217_v24  ;;  %v10965_v63 = vmul.f32 %v10962_v45, %v26219_v60  ;;  %v2023_v4 = vmul.f32 %v26358_v19, %v2022_v18  ;;  %v17786_v60 = vld [vmem:[%s26648_s22 + $0x178] sm:$0xff]  ;;  %v17800_v45 = vld [vmem:[%s26648_s22 + $0x1e8] sm:$0xff] }
 0xe26   : > { %v26397_v53 = vpop.eup %18110  ;;  %v2013_v11 = vsel %vm26424_vm8, %v26356_v62, %v2009_v13  ;;  %v2047_v62 = vor.u32 1.1754944e-38, %v2046_v32  ;;  %v2076_v13 = vand.u32 2147483648, %v26376_v9  ;;  %vm2090_vm8 = vcmp.eq.f32.partialorder %v2089_v17, 8.507059e+37 }
 0xe27   : > { %v10973_v43 = vmul.f32 %v10967_v50, %v10963_v40  ;;  %v10974_v41 = vmul.f32 %v10968_v49, %v10964_v30  ;;  %v10975_v58 = vmul.f32 %v10969_v36, %v10965_v63  ;;  %v26401_v28 = vpop.eup %18112  ;;  %v2024_v14 = vadd.f32 %v26358_v19, %v2023_v4  ;;  %v17799_v4 = vld [vmem:[%s26648_s22 + $0x1e0] sm:$0xff] }
 0xe28   : > { %v26407_v39 = vpop.eup %18114  ;;  %v2081_v18 = vmul.f32 %v26397_v53, %v26369_v7  ;;  %v2017_v50 = vor.u32 1.1754944e-38, %v2016_v47  ;;  %v2096_v49 = vmul.f32 %v26401_v28, %v26374_v1  ;;  %v2032_v36 = vor.u32 1.1754944e-38, %v2031_v3 }
 0xe29   : > { %v10983_v52 = vadd.f32 %v10977_v5, %v10973_v43  ;;  %v10984_v24 = vadd.f32 %v10978_v29, %v10974_v41  ;;  %v10985_v23 = vadd.f32 %v10979_v44, %v10975_v58  ;;  %v2028_v42 = vsel %vm26440_vm6, %v26358_v19, %v2024_v14  ;;  %v17792_v19 = vld [vmem:[%s26648_s22 + $0x1a8] sm:$0xff]  ;;  %v17783_v41 = vld [vmem:[%s26648_s22 + $0x160] sm:$0xff]  ;;  %v17781_v14 = vld [vmem:[%s26648_s22 + $0x150] sm:$0xff] }
 0xe2a   : > { %v2066_v48 = vmul.f32 %v26407_v39, %v26376_v9  ;;  %v2018_v5 = vsel %vm2015_vm4, %v2017_v50, %v2013_v11  ;;  %v2033_v29 = vsel %vm2030_vm13, %v2032_v36, %v2028_v42  ;;  %v2048_v40 = vsel %vm2045_vm1, %v2047_v62, %v2043_v25  ;;  %v17780_v11 = vld [vmem:[%s26648_s22 + $0x148] sm:$0xff]  ;;  %v17795_v62 = vld [vmem:[%s26648_s22 + $0x1c0] sm:$0xff] }
 0xe2b   : > { %v11156_v61 = vpack.c.bf16 %v10983_v52, %v10983_v52  ;;  %v11157_v56 = vpack.c.bf16 %v10984_v24, %v10984_v24  ;;  %v11158_v10 = vpack.c.bf16 %v10985_v23, %v10985_v23  ;;  %v12245_v30 = vmul.f32 -1.442695, %v20075_v6 }
 0xe2c   : > { %v2067_v63 = vsub.f32 1.0, %v2066_v48  ;;  %v2082_v44 = vsub.f32 1.0, %v2081_v18  ;;  %v2097_v43 = vsub.f32 1.0, %v2096_v49  ;;  %v2141_v58 = vmul.f32 %v2018_v5, %v26294_v59  ;;  %v17779_v49 = vld [vmem:[%s26648_s22 + $0x140] sm:$0xff]  ;;  %v17818_v5 = vld [vmem:[%s26648_s22 + $0x278] sm:$0xff] }
 0xe2d   : > { %11359 = vmatmul.bf16.vlgmr.msrb.gmra.mxu0 %v11156_v61  ;;  %11372 = vmatmul.bf16.vlgmr.msra.gmra.mxu3 %v11157_v56  ;;  %v2142_v55 = vmul.f32 %v2033_v29, %v26297_v37  ;;  %v2143_v52 = vmul.f32 %v2048_v40, %v26285_v21  ;;  %18116 = vpow2.f32 %v12245_v30  ;;  %v17782_v37 = vld [vmem:[%s26648_s22 + $0x158] sm:$0xff]  ;;  %vm2086_vm14 = vweird.f32 %v26397_v53 }
 0xe2e   : > { %11385 = vmatmul.bf16.vlgmr.msra.gmra.mxu1 %v11158_v10  ;;  %11935 = vmatpush.bf16.msrb.mxu0 %v17786_v60  ;;  %v2068_v24 = vmul.f32 %v26407_v39, %v2067_v63  ;;  %v2083_v23 = vmul.f32 %v26397_v53, %v2082_v44  ;;  %v2098_v59 = vmul.f32 %v26401_v28, %v2097_v43  ;;  %v17790_v21 = vld [vmem:[%s26648_s22 + $0x198] sm:$0xff]  ;;  %vm2071_vm0 = vweird.f32 %v26407_v39  ;;  %vm26504_vm3 = vmor %vm2085_vm2, %vm2086_vm14  ;;  %v17817_v63 = vld [vmem:[%s26648_s22 + $0x270] sm:$0xff] }
 0xe2f   : > { %11948 = vmatpush.bf16.msra.mxu3 %v17794_v38  ;;  %11961 = vmatpush.bf16.msra.mxu1 %v17802_v8  ;;  %v10987_v60 = vpack.c.bf16 %v2141_v58, %v2141_v58  ;;  %v10988_v61 = vpack.c.bf16 %v2142_v55, %v2142_v55  ;;  %v17798_v56 = vld [vmem:[%s26648_s22 + $0x1d8] sm:$0xff]  ;;  %v10989_v10 = vpack.c.bf16 %v2143_v52, %v2143_v52  ;;  %vm2101_vm9 = vweird.f32 %v26401_v28  ;;  %vm26523_vm5 = vmor %vm2070_vm12, %vm2071_vm0  ;;  %v17815_v43 = vld [vmem:[%s26648_s22 + $0x260] sm:$0xff] }
 0xe30   : > { %v2069_v38 = vadd.f32 %v26407_v39, %v2068_v24  ;;  %v2084_v8 = vadd.f32 %v26397_v53, %v2083_v23  ;;  %v2099_v51 = vadd.f32 %v26401_v28, %v2098_v59  ;;  %v2091_v47 = vand.u32 2147483648, %v26369_v7  ;;  %vm26529_vm15 = vmor %vm2100_vm10, %vm2101_vm9  ;;  %v17814_v58 = vld [vmem:[%s26648_s22 + $0x258] sm:$0xff]  ;;  %v17812_v59 = vld [vmem:[%s26648_s22 + $0x248] sm:$0xff] }
 0xe31   : > { %v2106_v3 = vand.u32 2147483648, %v26374_v1  ;;  %v2077_v25 = vor.u32 1.1754944e-38, %v2076_v13 }
 0xe32   : > { %11936 = vmatpush.bf16.msrb.mxu0 %v17785_v12  ;;  %v2074_v12 = vand.u32 2147483647, %v26376_v9  ;;  %v2073_v7 = vsel %vm26523_vm5, %v26407_v39, %v2069_v38  ;;  %v2103_v15 = vsel %vm26529_vm15, %v26401_v28, %v2099_v51  ;;  %v2092_v42 = vor.u32 1.1754944e-38, %v2091_v47  ;;  %v17796_v28 = vld [vmem:[%s26648_s22 + $0x1c8] sm:$0xff] }
 0xe33   : > { %11949 = vmatpush.bf16.msra.mxu3 %v17793_v16  ;;  %11962 = vmatpush.bf16.msra.mxu1 %v17801_v57  ;;  %v18117_v22 = vpop.eup %18116  ;;  %v2104_v16 = vand.u32 2147483647, %v26374_v1  ;;  %v2088_v1 = vsel %vm26504_vm3, %v26397_v53, %v2084_v8  ;;  %v2107_v48 = vor.u32 1.1754944e-38, %v2106_v3  ;;  %v17788_v53 = vld [vmem:[%s26648_s22 + $0x188] sm:$0xff] }
 0xe34   : > { %v1989_v20 = vadd.f32 1.0, %v18117_v22  ;;  %vm2075_vm7 = vcmp.eq.f32.partialorder %v2074_v12, 8.507059e+37  ;;  %v2093_v18 = vsel %vm2090_vm8, %v2092_v42, %v2088_v1 }
 0xe35   : > { %vm2105_vm11 = vcmp.eq.f32.partialorder %v2104_v16, 8.507059e+37  ;;  %v2078_v39 = vsel %vm2075_vm7, %v2077_v25, %v2073_v7 }
 0xe36   : > { %11937 = vmatpush.bf16.msrb.mxu0 %v17784_v35  ;;  %v2108_v50 = vsel %vm2105_vm11, %v2107_v48, %v2103_v15  ;;  %18118 = vrcp.f32 %v1989_v20  ;;  %v2145_v36 = vmul.f32 %v2078_v39, %v26346_v2  ;;  %v17787_v35 = vld [vmem:[%s26648_s22 + $0x180] sm:$0xff]  ;;  %vm2130_vm4 = vweird.f32 %v1989_v20 }
 0xe37   : > { %11950 = vmatpush.bf16.msra.mxu3 %v17792_v19  ;;  %11963 = vmatpush.bf16.msra.mxu1 %v17800_v45  ;;  %v2146_v19 = vmul.f32 %v2093_v18, %v26336_v31  ;;  %v2147_v45 = vmul.f32 %v2108_v50, %v26341_v33  ;;  %v17816_v33 = vld [vmem:[%s26648_s22 + $0x268] sm:$0xff]  ;;  %v2134_v52 = vand.u32 2147483647, %v1989_v20  ;;  %v12000_v39 = vld [vmem:[%s26806_s30] sm:$0x1] }
 0xe38   : > { %v10991_v2 = vpack.c.bf16 %v2145_v36, %v2145_v36 }
 0xe39   : > { %v10992_v40 = vpack.c.bf16 %v2146_v19, %v2146_v19  ;;  %v10993_v30 = vpack.c.bf16 %v2147_v45, %v2147_v45  ;;  %vm2135_vm1 = vcmp.eq.f32.partialorder %v2134_v52, 8.507059e+37 }
 0xe3a   : > { %11938 = vmatpush.bf16.msrb.mxu0 %v17783_v41 }
 0xe3b   : > { %11951 = vmatpush.bf16.msra.mxu3 %v17791_v0  ;;  %11964 = vmatpush.bf16.msra.mxu1 %v17799_v4  ;;  %v2136_v0 = vand.u32 2147483648, %v1989_v20  ;;  %v17813_v4 = vld [vmem:[%s26648_s22 + $0x250] sm:$0xff] }
 0xe3c   : > { %v18119_v29 = vpop.eup %18118 }
 0xe3d   : > { %11891 = vmatmul.bf16.vlgmr.msra.gmra.mxu0 %v10987_v60  ;;  %11904 = vmatmul.bf16.vlgmr.msrb.gmra.mxu3 %v10988_v61  ;;  %v2126_v31 = vmul.f32 %v18119_v29, %v1989_v20  ;;  %vm2131_vm6 = vweird.f32 %v18119_v29  ;;  %v2137_v23 = vor.u32 1.1754944e-38, %v2136_v0  ;;  %v17811_v60 = vld [vmem:[%s26648_s22 + $0x240] sm:$0xff] }
 0xe3e   : > { %11917 = vmatmul.bf16.vlgmr.msrb.gmra.mxu1 %v10989_v10  ;;  %11939 = vmatpush.bf16.msrb.mxu0 %v17782_v37  ;;  %vm2132_vm13 = vmor %vm2130_vm4, %vm2131_vm6 }
 0xe3f   : > { %11952 = vmatpush.bf16.msra.mxu3 %v17790_v21  ;;  %11965 = vmatpush.bf16.msra.mxu1 %v17798_v56  ;;  %v2127_v44 = vsub.f32 1.0, %v2126_v31 }
 0xe41   : > { %v2128_v41 = vmul.f32 %v18119_v29, %v2127_v44 }
 0xe42   : > { %11940 = vmatpush.bf16.msrb.mxu0 %v17781_v14 }
 0xe43   : > { %11953 = vmatpush.bf16.msra.mxu3 %v17789_v26  ;;  %11966 = vmatpush.bf16.msra.mxu1 %v17797_v34  ;;  %v2129_v55 = vadd.f32 %v18119_v29, %v2128_v41 }
 0xe45   : > { %v2133_v24 = vsel %vm2132_vm13, %v18119_v29, %v2129_v55 }
 0xe46   : > { %11941 = vmatpush.bf16.msrb.mxu0 %v17780_v11  ;;  %v2138_v37 = vsel %vm2135_vm1, %v2137_v23, %v2133_v24 }
 0xe47   : > { %11954 = vmatpush.bf16.msra.mxu3 %v17788_v53  ;;  %11967 = vmatpush.bf16.msra.mxu1 %v17796_v28  ;;  %v2149_v61 = vmul.f32 %v2138_v37, %v20075_v6 }
 0xe49   : > { %v10995_v21 = vpack.c.bf16 %v2149_v61, %v2149_v61 }
 0xe4a   : > { %11942 = vmatpush.bf16.msrb.mxu0 %v17779_v49 }
 0xe4b   : > { %11955 = vmatpush.bf16.msra.mxu3 %v17787_v35  ;;  %11968 = vmatpush.bf16.msra.mxu1 %v17795_v62 }
 0xe4d   : > { %11943 = vmatmul.bf16.vlgmr.msrb.gmra.mxu0 %v10991_v2 }
 0xe4e   : > { %11987 = vmatpush.bf16.msra.mxu0 %v17818_v5  ;;  %11956 = vmatmul.bf16.vlgmr.msra.gmra.mxu3 %v10992_v40 }
 0xe4f   : > { %11969 = vmatmul.bf16.vlgmr.msra.gmra.mxu1 %v10993_v30 }
 0xe52   : > { %11988 = vmatpush.bf16.msra.mxu0 %v17817_v63 }
 0xe56   : > { %11989 = vmatpush.bf16.msra.mxu0 %v17816_v33 }
 0xe5a   : > { %11990 = vmatpush.bf16.msra.mxu0 %v17815_v43 }
 0xe5e   : > { %11991 = vmatpush.bf16.msra.mxu0 %v17814_v58 }
 0xe62   : > { %11992 = vmatpush.bf16.msra.mxu0 %v17813_v4 }
 0xe66   : > { %11993 = vmatpush.bf16.msra.mxu0 %v17812_v59 }
 0xe6a   : > { %11994 = vmatpush.bf16.msra.mxu0 %v17811_v60 }
 0xe6d   : > { %11995 = vmatmul.bf16.vlgmr.msra.gmra.mxu0 %v10995_v21 }
 0xeaa   : > { %v11360_v56 = vpop.f32.mrf.mxu0 }
 0xeab   : > { %v11386_v10 = vpop.f32.mrf.mxu1 }
 0xeb0   : > { %v11373_v38 = vpop.f32.mrf.mxu3 }
 0xeb1   : > { %v11374_v12 = vadd.f32 %v11373_v38, %v11360_v56 }
 0xeb2   : > { %v11362_v8 = vpop.f32.mrf.mxu0 }
 0xeb3   : > { %v11388_v51 = vpop.f32.mrf.mxu1  ;;  %v11387_v6 = vadd.f32 %v11386_v10, %v11374_v12 }
 0xeb5   : > { %v11880_v16 = vadd.f32 %v26148_v46, %v11387_v6 }
 0xeb8   : > { %v11375_v13 = vpop.f32.mrf.mxu3 }
 0xeba   : > { %v11892_v14 = vpop.f32.mrf.mxu0 }
 0xebb   : > { %v11918_v22 = vpop.f32.mrf.mxu1  ;;  %v11893_v9 = vadd.f32 %v11892_v14, %v11880_v16 }
 0xec0   : > { %v11905_v32 = vpop.f32.mrf.mxu3 }
 0xec1   : > { %v11906_v1 = vadd.f32 %v11905_v32, %v11893_v9 }
 0xec2   : > { %v11894_v47 = vpop.f32.mrf.mxu0 }
 0xec3   : > { %v11920_v3 = vpop.f32.mrf.mxu1  ;;  %v11919_v20 = vadd.f32 %v11918_v22, %v11906_v1 }
 0xec5   : > { %v11932_v11 = vadd.f32 %v26150_v27, %v11919_v20 }
 0xec8   : > { %v11907_v26 = vpop.f32.mrf.mxu3 }
 0xeca   : > { %v11944_v34 = vpop.f32.mrf.mxu0 }
 0xecb   : > { %v11945_v42 = vadd.f32 %v11944_v34, %v11932_v11 }
 0xecc   : > { %v11970_v17 = vpop.f32.mrf.mxu1 }
 0xed1   : > { %v11957_v57 = vpop.f32.mrf.mxu3 }
 0xed2   : > { %v11946_v7 = vpop.f32.mrf.mxu0  ;;  %v11958_v48 = vadd.f32 %v11957_v57, %v11945_v42 }
 0xed4   : > { %v11972_v15 = vpop.f32.mrf.mxu1  ;;  %v11971_v53 = vadd.f32 %v11970_v17, %v11958_v48 }
 0xed6   : > { %v11984_v28 = vadd.f32 %v26152_v54, %v11971_v53 }
 0xed9   : > { %v11959_v25 = vpop.f32.mrf.mxu3 }
 0xeea   : > { %v11996_v46 = vpop.f32.mrf.mxu0 }
 0xeeb   : > { %v11997_v27 = vadd.f32 %v11996_v46, %v11984_v28 }
 0xeed   : > { %v12001_v18 = vadd.f32 %v12000_v39, %v11997_v27 }
 0xeef   : > { %12002 = vst [vmem:[%s771_s8] sm:$0x1] %v12001_v18 }
 0xef0   : > { %18151 = shalt.err (!%p18148_p3)
}
 0xef1   : > { %17846 = dma.vmem_to_hbm [thread:$0]  (%p18360_p5), %s12015_s3, 16, %s12017_s27, %s12004_s24  }
 0xef2   : > { %v11998_v54 = vpop.f32.mrf.mxu0 }
 0xef3 PF: > { %s26807_s29 = sld [smem:[#allocation7_spill]] }
 0xef4   : > { %s26808_s0 = sld [smem:[#allocation5_spill]] }
 0xef9   : > { %p17852_p4 = scmp.ge.s32.totalorder %s26807_s29, 2 }
 0xefa   : > { %s12028_s10 = sand.u32 1, %s26808_s0  }
 0xefb   : > { %p17849_p7 = pnand %p17852_p4, %p18364_p6  ;;  %s12029_s4 = scalar_lea.sflag [#allocation3], %s12028_s10 }
 0xefd   : > { %p17850_p8 = pneg %p17849_p7 }
 0xeff   : > { %18169 = dma.done.wait (%p17850_p8), %s12029_s4, 16  }
 0xf00   : > { %18171 = vsyncadd (%p17850_p8), %s12029_s4, 4294967280  ;;  %s26810_s30 = sld [smem:[#allocation8_spill]]  ;;  %s26813_s29 = smov %s18178_s2 }
 0xf01   : > { %s26811_s9 = sld [smem:[#allocation6_spill]] }
 0xf02   : > { %s26812_s6 = sld [smem:[#allocation9_spill]] }
 0xf06   : > { %p35_p9 = scmp.ge.s32.totalorder %s26810_s30, 4  }
 0xf07   : > { %s26814_s2 = smov %s26811_s9 }
 0xf08   :  { %37 = sbr.rel (!%p35_p9) target bundleno = 16 (0x10), region = 158 }
 0xf0d   :  { %12034 = vsyncpa [#allocation3], 1 }
 0xf0e   :  { %12036 = vsyncpa [#allocation3 + $0x1], 1 }

</bundles_post_ra>
